<compile_context>
chip_gen: v6e
topology: v6e:2x2x1
jax: 0.10.0
libtpu: 0.0.40
codegen_flags: <defaults>
</compile_context>

<pallas_src>
import functools

import jax
import jax.numpy as jnp
import numpy as np
from jax import lax
from jax.experimental import pallas as pl
from jax.experimental.pallas import tpu as pltpu


# ---------------------------------------------------------------------------
# Small helpers
# ---------------------------------------------------------------------------
def _round_up(x, m):
    return ((x + m - 1) // m) * m


def _pick_row_block(H, W, target_m=256):
    """Largest divisor of H with rb*W <= max(target_m, W): MXU M dim ~256, rb | H."""
    best = 1
    for rb in range(1, H + 1):
        if H % rb == 0 and rb * W <= max(target_m, W):
            best = rb
    return best


# ---------------------------------------------------------------------------
# In-kernel helpers
# ---------------------------------------------------------------------------
def _zero_border(ref):
    """Zero only the 1-pixel conv-padding frame (interior is fully overwritten)."""
    Hp, Wp, C = ref.shape
    zrow = jnp.zeros((1, Wp, C), ref.dtype)
    ref[0:1, :, :] = zrow
    ref[Hp - 1:Hp, :, :] = zrow
    zcol = jnp.zeros((Hp, 1, C), ref.dtype)
    ref[:, 0:1, :] = zcol
    ref[:, Wp - 1:Wp, :] = zcol


def _conv3x3_block(src_ref, w_ref, bias, h0, rb, W):
    """One row block of a 3x3 conv (+bias+ReLU) as 9 per-tap MXU matmuls.

    src_ref: (H+2, W+2, C) padded bf16 scratch
    w_ref:   (9*C, Cout_pad) bf16 packed weights (tap-major, matching lane order)
    bias:    (1, Cout_pad) f32
    Returns (rb*W, Cout_pad) f32.  Each tap is one contiguous slice of the scratch
    (no lane-axis concat); accumulation stays in f32.
    """
    C = src_ref.shape[2]
    acc = None
    for dh in range(3):
        for dw in range(3):
            blk = src_ref[pl.ds(h0 + dh, rb), dw:dw + W, :].reshape(rb * W, C)
            t = dh * 3 + dw
            part = jnp.dot(blk, w_ref[t * C:(t + 1) * C, :],
                           preferred_element_type=jnp.float32)
            acc = part if acc is None else acc + part
    return jnp.maximum(acc + bias, 0.0)


def _decoder_block_kernel(x_ref, skip_ref, w1_ref, b1_ref, w2_ref, b2_ref,
                          o_ref, inpad_ref, ypad_ref, *, upsample_h, rb):
    """Fused (H-upsample) + pad + virtual concat + conv1+BN+ReLU + conv2+BN+ReLU."""
    H, W, _ = skip_ref.shape
    Cin_pad = x_ref.shape[-1]
    Ctot_pad = inpad_ref.shape[-1]
    Cout_pad = ypad_ref.shape[-1]

    # Conv padding: zero only the 1-pixel frame each step (megacore-safe, cheap).
    _zero_border(inpad_ref)
    _zero_border(ypad_ref)

    # Stage x and skip into ONE padded bf16 scratch.  The channel concat is never
    # materialized in HBM; w1's K-row order matches this lane order.
    if upsample_h:
        # Nearest x2 along H done in-kernel: each half-height source row is
        # duplicated into two scratch rows (leading-axis broadcast, no relayout).
        Hh = x_ref.shape[0]
        xv = x_ref[...]
        xv = jnp.broadcast_to(xv[:, None], (Hh, 2, W, Cin_pad)).reshape(H, W, Cin_pad)
    else:
        xv = x_ref[...]
    inpad_ref[1:H + 1, 1:W + 1, 0:Cin_pad] = xv
    inpad_ref[1:H + 1, 1:W + 1, Cin_pad:Ctot_pad] = skip_ref[...]

    b1 = b1_ref[...]                       # (1, Cout_pad) f32, hoisted out of the loops
    b2 = b2_ref[...]

    # conv1 (+folded BN) + ReLU; attention1 (attention_type=None) is Identity.
    # The intermediate stays at Cout_pad lanes in VMEM (lane-dense store, no HBM trip).
    def conv1_body(i, carry):
        h0 = pl.multiple_of(i * rb, rb)
        act = _conv3x3_block(inpad_ref, w1_ref, b1, h0, rb, W)
        ypad_ref[pl.ds(h0 + 1, rb), 1:W + 1, :] = (
            act.astype(ypad_ref.dtype).reshape(rb, W, Cout_pad))
        return carry

    lax.fori_loop(0, H // rb, conv1_body, 0)

    # conv2 (+folded BN) + ReLU; attention2 is Identity.  Lane-dense output store.
    def conv2_body(i, carry):
        h0 = pl.multiple_of(i * rb, rb)
        act = _conv3x3_block(ypad_ref, w2_ref, b2, h0, rb, W)
        m0 = pl.multiple_of(i * (rb * W), rb * W)
        o_ref[pl.ds(m0, rb * W), :] = act.astype(o_ref.dtype)
        return carry

    lax.fori_loop(0, H // rb, conv2_body, 0)


# ---------------------------------------------------------------------------
# Wrapper: NCHW <-> NHWC glue, channel padding, weight packing, pallas_call
# ---------------------------------------------------------------------------
def decoder_block_forward(x_nchw, skip_nchw, params, interpolate=True):
    """DecoderBlock forward.  x/skip are NCHW (PyTorch convention), float32."""
    (w1, b1), (w2, b2) = params            # folded (BN absorbed) HWIO weights, f32
    if skip_nchw is None:
        # TODO(synk): skip=None path (conv on x alone) is not wired into the fused kernel.
        raise NotImplementedError("fused kernel expects a skip connection")

    N, Cin, H0, W0 = x_nchw.shape
    _, Cskip, H, W = skip_nchw.shape
    Cout = w1.shape[-1]
    assert w1.shape == (3, 3, Cin + Cskip, Cout) and w2.shape == (3, 3, Cout, Cout)
    if interpolate:
        assert (H, W) == (2 * H0, 2 * W0), "skip must match upsampled x"
        assert H % 2 == 0
    else:
        assert (H, W) == (H0, W0), "skip must match x"

    # Pad channels to 128-lane multiples: all kernel accesses lane aligned/dense,
    # full MXU K/N, free for real decoder channel counts (>=128 multiples).
    # TODO(synk): consider rounding Cout_pad to 256 when it reduces waste (v6e/v7x MXU N).
    Cin_pad = _round_up(Cin, 128)
    Cskip_pad = _round_up(Cskip, 128)
    Cout_pad = _round_up(Cout, 128)
    Ctot_pad = Cin_pad + Cskip_pad

    # NHWC bf16 activations.  Only the W-axis half of the nearest x2 upsample is done
    # here; the H-axis duplication happens inside the kernel (halves x's HBM read).
    x = jnp.transpose(x_nchw, (0, 2, 3, 1))
    if interpolate:
        x = jnp.repeat(x, 2, axis=2)                      # W-axis repeat only
    x = jnp.pad(x, ((0, 0), (0, 0), (0, 0), (0, Cin_pad - Cin))).astype(jnp.bfloat16)
    skip = jnp.transpose(skip_nchw, (0, 2, 3, 1))
    skip = jnp.pad(skip, ((0, 0), (0, 0), (0, 0),
                          (0, Cskip_pad - Cskip))).astype(jnp.bfloat16)
    x_rows = H // 2 if interpolate else H

    # Weight packing: pad the x / skip channel blocks separately so the K-row order
    # matches the combined-scratch lane order; pad Cout to Cout_pad (zero cols + zero
    # bias -> padded output lanes stay exactly 0 through both ReLUs).
    w1x = jnp.pad(w1[:, :, :Cin, :],
                  ((0, 0), (0, 0), (0, Cin_pad - Cin), (0, Cout_pad - Cout)))
    w1s = jnp.pad(w1[:, :, Cin:, :],
                  ((0, 0), (0, 0), (0, Cskip_pad - Cskip), (0, Cout_pad - Cout)))
    w1m = jnp.concatenate([w1x, w1s], axis=2).reshape(
        9 * Ctot_pad, Cout_pad).astype(jnp.bfloat16)
    w2m = jnp.pad(w2, ((0, 0), (0, 0), (0, Cout_pad - Cout),
                       (0, Cout_pad - Cout))).reshape(
        9 * Cout_pad, Cout_pad).astype(jnp.bfloat16)
    b1m = jnp.pad(b1, (0, Cout_pad - Cout)).reshape(1, Cout_pad).astype(jnp.float32)
    b2m = jnp.pad(b2, (0, Cout_pad - Cout)).reshape(1, Cout_pad).astype(jnp.float32)

    rb = _pick_row_block(H, W)             # MXU M = rb*W near 256; rb divides H.

    # Explicit VMEM budget from the actual footprint (the default scoped limit is
    # 16/32 MiB, well below what real decoder shapes need).
    block_bytes = (
        2 * x_rows * W * Cin_pad * 2          # x, double buffered, bf16
        + 2 * H * W * Cskip_pad * 2           # skip
        + 2 * 9 * Ctot_pad * Cout_pad * 2     # w1
        + 2 * 9 * Cout_pad * Cout_pad * 2     # w2
        + 4 * Cout_pad * 4                    # b1, b2
        + 2 * H * W * Cout_pad * 4)           # output block, f32
    scratch_bytes = (H + 2) * (W + 2) * (Ctot_pad + Cout_pad) * 2
    vmem_limit = int(min(100 * 2 ** 20,
                         max(8 * 2 ** 20, 1.5 * (block_bytes + scratch_bytes))))

    kernel = functools.partial(_decoder_block_kernel,
                               upsample_h=bool(interpolate), rb=rb)

    out_padded = pl.pallas_call(
        kernel,
        out_shape=jax.ShapeDtypeStruct((N, H * W, Cout_pad), jnp.float32),
        grid_spec=pltpu.PrefetchScalarGridSpec(
            num_scalar_prefetch=0,
            grid=(N,),
            in_specs=[
                pl.BlockSpec((None, x_rows, W, Cin_pad), lambda n: (n, 0, 0, 0)),
                pl.BlockSpec((None, H, W, Cskip_pad), lambda n: (n, 0, 0, 0)),
                pl.BlockSpec((9 * Ctot_pad, Cout_pad), lambda n: (0, 0)),   # w1 (folded)
                pl.BlockSpec((1, Cout_pad), lambda n: (0, 0)),              # b1 (folded)
                pl.BlockSpec((9 * Cout_pad, Cout_pad), lambda n: (0, 0)),   # w2 (folded)
                pl.BlockSpec((1, Cout_pad), lambda n: (0, 0)),              # b2 (folded)
            ],
            out_specs=pl.BlockSpec((None, H * W, Cout_pad), lambda n: (n, 0, 0)),
            scratch_shapes=[
                pltpu.VMEM((H + 2, W + 2, Ctot_pad), jnp.bfloat16),   # padded x || skip
                pltpu.VMEM((H + 2, W + 2, Cout_pad), jnp.bfloat16),   # padded conv1 out
            ],
        ),
        compiler_params=pltpu.CompilerParams(
            dimension_semantics=("parallel",),
            vmem_limit_bytes=vmem_limit),
    )(x, skip, w1m, b1m, w2m, b2m)

    out = out_padded[:, :, :Cout].reshape(N, H, W, Cout)   # drop lane padding
    return jnp.transpose(out, (0, 3, 1, 2))                # NHWC -> NCHW


# ---------------------------------------------------------------------------
# Parameter setup (deterministic) + BN folding (inference)
# ---------------------------------------------------------------------------
def make_conv_bn_params(key, cin, cout, eps=1e-5):
    kw, kg, kb, km, kv = jax.random.split(key, 5)
    w = jax.random.normal(kw, (3, 3, cin, cout), jnp.float32) * 0.1   # HWIO
    gamma = 1.0 + 0.1 * jax.random.normal(kg, (cout,), jnp.float32)
    beta = 0.1 * jax.random.normal(kb, (cout,), jnp.float32)
    mean = 0.05 * jax.random.normal(km, (cout,), jnp.float32)
    var = 1.0 + 0.1 * jax.random.uniform(kv, (cout,), jnp.float32)
    scale = gamma / jnp.sqrt(var + eps)
    w_folded = w * scale[None, None, None, :]
    b_folded = beta - mean * scale
    return w_folded, b_folded


# ---------------------------------------------------------------------------
# Pure-XLA reference (for correctness check)
# ---------------------------------------------------------------------------
def _ref_conv3x3_bn_relu(x_nhwc, w_hwio, bias):
    y = jax.lax.conv_general_dilated(
        x_nhwc, w_hwio, window_strides=(1, 1), padding="SAME",
        dimension_numbers=("NHWC", "HWIO", "NHWC"),
        preferred_element_type=jnp.float32)
    return jnp.maximum(y + bias[None, None, None, :], 0.0)


def _ref_forward(x_nchw, skip_nchw, params, interpolate=True,
                 compute_dtype=jnp.float32):
    """Reference DecoderBlock.  compute_dtype=bfloat16 mirrors the kernel's MXU
    input precision (accumulation stays f32) for a tight comparison."""
    (w1, b1), (w2, b2) = params
    x = jnp.transpose(x_nchw, (0, 2, 3, 1))
    if interpolate:
        x = jnp.repeat(jnp.repeat(x, 2, axis=1), 2, axis=2)
    if skip_nchw is not None:
        skip = jnp.transpose(skip_nchw, (0, 2, 3, 1))
        x = jnp.concatenate([x, skip], axis=-1)
    x = x.astype(compute_dtype)
    y = _ref_conv3x3_bn_relu(x, w1.astype(compute_dtype), b1)
    y = _ref_conv3x3_bn_relu(y.astype(compute_dtype), w2.astype(compute_dtype), b2)
    return jnp.transpose(y, (0, 3, 1, 2))


if __name__ == "__main__":
    # Small shapes: batch=2, in_channels=4, skip_channels=4, out_channels=8,
    # decoder input 8x8 -> upsample to 16x16, skip is 16x16.
    N, CIN, CSKIP, COUT = 2, 4, 4, 8
    H0, W0 = 8, 8

    key = jax.random.PRNGKey(0)
    kx, ks, kp1, kp2 = jax.random.split(key, 4)
    x = jax.random.normal(kx, (N, CIN, H0, W0), jnp.float32)              # NCHW
    skip = jax.random.normal(ks, (N, CSKIP, 2 * H0, 2 * W0), jnp.float32)

    params = (
        make_conv_bn_params(kp1, CIN + CSKIP, COUT),   # conv1 (+BN folded)
        make_conv_bn_params(kp2, COUT, COUT),          # conv2 (+BN folded)
    )

    out = jax.block_until_ready(
        decoder_block_forward(x, skip, params, interpolate=True))
    assert out.shape == (N, COUT, 2 * H0, 2 * W0), out.shape

    # Tight check vs a reference that mirrors the kernel's precision
    # (bf16 matmul operands, f32 accumulation).
    ref_bf16 = _ref_forward(x, skip, params, True, compute_dtype=jnp.bfloat16)
    np.testing.assert_allclose(np.asarray(out), np.asarray(ref_bf16),
                               rtol=2e-2, atol=2e-2)

    # Loose sanity bound vs the pure-f32 module semantics.
    ref_f32 = _ref_forward(x, skip, params, True, compute_dtype=jnp.float32)
    max_err = float(jnp.max(jnp.abs(out - ref_f32)))
    assert max_err < 0.1, f"f32 deviation too large: {max_err}"

    print("KERNEL_OK")
</pallas_src>

<mosaic_0001>
module attributes {stable_mosaic.version = 11 : i64} {
  func.func @_decoder_block_kernel(%arg0: i32, %arg1: memref<1x8x16x128xbf16, #tpu.memory_space<vmem>>, %arg2: memref<1x16x16x128xbf16, #tpu.memory_space<vmem>>, %arg3: memref<2304x128xbf16, #tpu.memory_space<vmem>>, %arg4: memref<1x128xf32, #tpu.memory_space<vmem>>, %arg5: memref<1152x128xbf16, #tpu.memory_space<vmem>>, %arg6: memref<1x128xf32, #tpu.memory_space<vmem>>, %arg7: memref<1x256x128xf32, #tpu.memory_space<vmem>>, %arg8: memref<18x18x256xbf16, #tpu.memory_space<vmem>>, %arg9: memref<18x18x128xbf16, #tpu.memory_space<vmem>>) attributes {dimension_semantics = [#tpu.dimension_semantics<parallel>], iteration_bounds = array<i64: 2>, scalar_prefetch = 0 : i64, scratch_operands = 2 : i64, tpu.core_type = #tpu.core_type<tc>, window_params = [{transform_indices = @transform_0, window_bounds = array<i64: 1, 8, 16, 128>}, {transform_indices = @transform_1, window_bounds = array<i64: 1, 16, 16, 128>}, {pipeline_mode = #tpu.pipeline_mode<synchronous>, transform_indices = @transform_2, window_bounds = array<i64: 2304, 128>}, {pipeline_mode = #tpu.pipeline_mode<synchronous>, transform_indices = @transform_3, window_bounds = array<i64: 1, 128>}, {pipeline_mode = #tpu.pipeline_mode<synchronous>, transform_indices = @transform_4, window_bounds = array<i64: 1152, 128>}, {pipeline_mode = #tpu.pipeline_mode<synchronous>, transform_indices = @transform_5, window_bounds = array<i64: 1, 128>}, {transform_indices = @transform_6, window_bounds = array<i64: 1, 256, 128>}]} {
    %cst = arith.constant 0.000000e+00 : bf16
    %0 = vector.broadcast %cst : bf16 to vector<1x18x256xbf16>
    %c0 = arith.constant 0 : index
    %c0_0 = arith.constant 0 : index
    %c0_1 = arith.constant 0 : index
    %1 = vector.load %arg8[%c0, %c0_0, %c0_1] : memref<18x18x256xbf16, #tpu.memory_space<vmem>>, vector<1x18x256xbf16>
    tpu.vector_store %arg8[%c0, %c0_0, %c0_1], %0 {strides = array<i32>} : memref<18x18x256xbf16, #tpu.memory_space<vmem>>, vector<1x18x256xbf16>,
    %c17 = arith.constant 17 : index
    %c0_2 = arith.constant 0 : index
    %c0_3 = arith.constant 0 : index
    %2 = vector.load %arg8[%c17, %c0_2, %c0_3] : memref<18x18x256xbf16, #tpu.memory_space<vmem>>, vector<1x18x256xbf16>
    tpu.vector_store %arg8[%c17, %c0_2, %c0_3], %0 {strides = array<i32>} : memref<18x18x256xbf16, #tpu.memory_space<vmem>>, vector<1x18x256xbf16>,
    %cst_4 = arith.constant 0.000000e+00 : bf16
    %3 = vector.broadcast %cst_4 : bf16 to vector<18x1x256xbf16>
    %c0_5 = arith.constant 0 : index
    %c0_6 = arith.constant 0 : index
    %c0_7 = arith.constant 0 : index
    %4 = vector.load %arg8[%c0_5, %c0_6, %c0_7] : memref<18x18x256xbf16, #tpu.memory_space<vmem>>, vector<18x1x256xbf16>
    tpu.vector_store %arg8[%c0_5, %c0_6, %c0_7], %3 {strides = array<i32>} : memref<18x18x256xbf16, #tpu.memory_space<vmem>>, vector<18x1x256xbf16>,
    %c0_8 = arith.constant 0 : index
    %c17_9 = arith.constant 17 : index
    %c0_10 = arith.constant 0 : index
    %5 = vector.load %arg8[%c0_8, %c17_9, %c0_10] : memref<18x18x256xbf16, #tpu.memory_space<vmem>>, vector<18x1x256xbf16>
    tpu.vector_store %arg8[%c0_8, %c17_9, %c0_10], %3 {strides = array<i32>} : memref<18x18x256xbf16, #tpu.memory_space<vmem>>, vector<18x1x256xbf16>,
    %cst_11 = arith.constant 0.000000e+00 : bf16
    %6 = vector.broadcast %cst_11 : bf16 to vector<1x18x128xbf16>
    %c0_12 = arith.constant 0 : index
    %c0_13 = arith.constant 0 : index
    %c0_14 = arith.constant 0 : index
    %7 = vector.load %arg9[%c0_12, %c0_13, %c0_14] : memref<18x18x128xbf16, #tpu.memory_space<vmem>>, vector<1x18x128xbf16>
    tpu.vector_store %arg9[%c0_12, %c0_13, %c0_14], %6 {strides = array<i32>} : memref<18x18x128xbf16, #tpu.memory_space<vmem>>, vector<1x18x128xbf16>,
    %c17_15 = arith.constant 17 : index
    %c0_16 = arith.constant 0 : index
    %c0_17 = arith.constant 0 : index
    %8 = vector.load %arg9[%c17_15, %c0_16, %c0_17] : memref<18x18x128xbf16, #tpu.memory_space<vmem>>, vector<1x18x128xbf16>
    tpu.vector_store %arg9[%c17_15, %c0_16, %c0_17], %6 {strides = array<i32>} : memref<18x18x128xbf16, #tpu.memory_space<vmem>>, vector<1x18x128xbf16>,
    %cst_18 = arith.constant 0.000000e+00 : bf16
    %9 = vector.broadcast %cst_18 : bf16 to vector<18x1x128xbf16>
    %c0_19 = arith.constant 0 : index
    %c0_20 = arith.constant 0 : index
    %c0_21 = arith.constant 0 : index
    %10 = vector.load %arg9[%c0_19, %c0_20, %c0_21] : memref<18x18x128xbf16, #tpu.memory_space<vmem>>, vector<18x1x128xbf16>
    tpu.vector_store %arg9[%c0_19, %c0_20, %c0_21], %9 {strides = array<i32>} : memref<18x18x128xbf16, #tpu.memory_space<vmem>>, vector<18x1x128xbf16>,
    %c0_22 = arith.constant 0 : index
    %c17_23 = arith.constant 17 : index
    %c0_24 = arith.constant 0 : index
    %11 = vector.load %arg9[%c0_22, %c17_23, %c0_24] : memref<18x18x128xbf16, #tpu.memory_space<vmem>>, vector<18x1x128xbf16>
    tpu.vector_store %arg9[%c0_22, %c17_23, %c0_24], %9 {strides = array<i32>} : memref<18x18x128xbf16, #tpu.memory_space<vmem>>, vector<18x1x128xbf16>,
    %c0_25 = arith.constant 0 : index
    %c0_26 = arith.constant 0 : index
    %c0_27 = arith.constant 0 : index
    %c0_28 = arith.constant 0 : index
    %12 = vector.load %arg1[%c0_25, %c0_26, %c0_27, %c0_28] : memref<1x8x16x128xbf16, #tpu.memory_space<vmem>>, vector<1x8x16x128xbf16>
    %13 = vector.shape_cast %12 : vector<1x8x16x128xbf16> to vector<8x16x128xbf16>
    %14 = vector.shape_cast %13 : vector<8x16x128xbf16> to vector<8x1x16x128xbf16>
    %15 = vector.shape_cast %14 : vector<8x1x16x128xbf16> to vector<8x1x16x128xbf16>
    %16 = vector.broadcast %15 : vector<8x1x16x128xbf16> to vector<8x2x16x128xbf16>
    %17 = vector.shape_cast %16 : vector<8x2x16x128xbf16> to vector<16x16x128xbf16>
    %c1 = arith.constant 1 : index
    %c1_29 = arith.constant 1 : index
    %c0_30 = arith.constant 0 : index
    %18 = vector.load %arg8[%c1, %c1_29, %c0_30] : memref<18x18x256xbf16, #tpu.memory_space<vmem>>, vector<16x16x128xbf16>
    tpu.vector_store %arg8[%c1, %c1_29, %c0_30], %17 {strides = array<i32>} : memref<18x18x256xbf16, #tpu.memory_space<vmem>>, vector<16x16x128xbf16>,
    %c0_31 = arith.constant 0 : index
    %c0_32 = arith.constant 0 : index
    %c0_33 = arith.constant 0 : index
    %c0_34 = arith.constant 0 : index
    %19 = vector.load %arg2[%c0_31, %c0_32, %c0_33, %c0_34] : memref<1x16x16x128xbf16, #tpu.memory_space<vmem>>, vector<1x16x16x128xbf16>
    %20 = vector.shape_cast %19 : vector<1x16x16x128xbf16> to vector<16x16x128xbf16>
    %c1_35 = arith.constant 1 : index
    %c1_36 = arith.constant 1 : index
    %c128 = arith.constant 128 : index
    %21 = vector.load %arg8[%c1_35, %c1_36, %c128] : memref<18x18x256xbf16, #tpu.memory_space<vmem>>, vector<16x16x128xbf16>
    tpu.vector_store %arg8[%c1_35, %c1_36, %c128], %20 {strides = array<i32>} : memref<18x18x256xbf16, #tpu.memory_space<vmem>>, vector<16x16x128xbf16>,
    %c0_37 = arith.constant 0 : index
    %c0_38 = arith.constant 0 : index
    %22 = vector.load %arg4[%c0_37, %c0_38] : memref<1x128xf32, #tpu.memory_space<vmem>>, vector<1x128xf32>
    %c0_39 = arith.constant 0 : index
    %c0_40 = arith.constant 0 : index
    %23 = vector.load %arg6[%c0_39, %c0_40] : memref<1x128xf32, #tpu.memory_space<vmem>>, vector<1x128xf32>
    %c0_i32 = arith.constant 0 : i32
    %c16_i32 = arith.constant 16 : i32
    %24 = arith.muli %c0_i32, %c16_i32 : i32
    %25 = tpu.assume_multiple %24, 16 : i32
    %c0_i32_41 = arith.constant 0 : i32
    %26 = arith.addi %25, %c0_i32_41 : i32
    %27 = arith.index_cast %26 : i32 to index
    %c0_42 = arith.constant 0 : index
    %c0_43 = arith.constant 0 : index
    %28 = vector.load %arg8[%27, %c0_42, %c0_43] : memref<18x18x256xbf16, #tpu.memory_space<vmem>>, vector<16x16x256xbf16>
    %29 = vector.shape_cast %28 : vector<16x16x256xbf16> to vector<256x256xbf16>
    %c0_44 = arith.constant 0 : index
    %c0_45 = arith.constant 0 : index
    %30 = vector.load %arg3[%c0_44, %c0_45] : memref<2304x128xbf16, #tpu.memory_space<vmem>>, vector<256x128xbf16>
    %cst_46 = arith.constant dense<0.000000e+00> : vector<256x128xf32>
    %31 = tpu.matmul %29, %30, %cst_46 {dimension_numbers = #tpu.dot_dimension_numbers<[1], [0], [0], [1], [0, 0, 1, 1], [], []>} : vector<256x256xbf16>, vector<256x128xbf16>, vector<256x128xf32> -> vector<256x128xf32>
    %c0_i32_47 = arith.constant 0 : i32
    %32 = arith.addi %25, %c0_i32_47 : i32
    %33 = arith.index_cast %32 : i32 to index
    %c1_48 = arith.constant 1 : index
    %c0_49 = arith.constant 0 : index
    %34 = vector.load %arg8[%33, %c1_48, %c0_49] : memref<18x18x256xbf16, #tpu.memory_space<vmem>>, vector<16x16x256xbf16>
    %35 = vector.shape_cast %34 : vector<16x16x256xbf16> to vector<256x256xbf16>
    %c256 = arith.constant 256 : index
    %c0_50 = arith.constant 0 : index
    %36 = vector.load %arg3[%c256, %c0_50] : memref<2304x128xbf16, #tpu.memory_space<vmem>>, vector<256x128xbf16>
    %cst_51 = arith.constant dense<0.000000e+00> : vector<256x128xf32>
    %37 = tpu.matmul %35, %36, %cst_51 {dimension_numbers = #tpu.dot_dimension_numbers<[1], [0], [0], [1], [0, 0, 1, 1], [], []>} : vector<256x256xbf16>, vector<256x128xbf16>, vector<256x128xf32> -> vector<256x128xf32>
    %38 = arith.addf %31, %37 : vector<256x128xf32>
    %c0_i32_52 = arith.constant 0 : i32
    %39 = arith.addi %25, %c0_i32_52 : i32
    %40 = arith.index_cast %39 : i32 to index
    %c2 = arith.constant 2 : index
    %c0_53 = arith.constant 0 : index
    %41 = vector.load %arg8[%40, %c2, %c0_53] : memref<18x18x256xbf16, #tpu.memory_space<vmem>>, vector<16x16x256xbf16>
    %42 = vector.shape_cast %41 : vector<16x16x256xbf16> to vector<256x256xbf16>
    %c512 = arith.constant 512 : index
    %c0_54 = arith.constant 0 : index
    %43 = vector.load %arg3[%c512, %c0_54] : memref<2304x128xbf16, #tpu.memory_space<vmem>>, vector<256x128xbf16>
    %cst_55 = arith.constant dense<0.000000e+00> : vector<256x128xf32>
    %44 = tpu.matmul %42, %43, %cst_55 {dimension_numbers = #tpu.dot_dimension_numbers<[1], [0], [0], [1], [0, 0, 1, 1], [], []>} : vector<256x256xbf16>, vector<256x128xbf16>, vector<256x128xf32> -> vector<256x128xf32>
    %45 = arith.addf %38, %44 : vector<256x128xf32>
    %c1_i32 = arith.constant 1 : i32
    %46 = arith.addi %25, %c1_i32 : i32
    %47 = arith.index_cast %46 : i32 to index
    %c0_56 = arith.constant 0 : index
    %c0_57 = arith.constant 0 : index
    %48 = vector.load %arg8[%47, %c0_56, %c0_57] : memref<18x18x256xbf16, #tpu.memory_space<vmem>>, vector<16x16x256xbf16>
    %49 = vector.shape_cast %48 : vector<16x16x256xbf16> to vector<256x256xbf16>
    %c768 = arith.constant 768 : index
    %c0_58 = arith.constant 0 : index
    %50 = vector.load %arg3[%c768, %c0_58] : memref<2304x128xbf16, #tpu.memory_space<vmem>>, vector<256x128xbf16>
    %cst_59 = arith.constant dense<0.000000e+00> : vector<256x128xf32>
    %51 = tpu.matmul %49, %50, %cst_59 {dimension_numbers = #tpu.dot_dimension_numbers<[1], [0], [0], [1], [0, 0, 1, 1], [], []>} : vector<256x256xbf16>, vector<256x128xbf16>, vector<256x128xf32> -> vector<256x128xf32>
    %52 = arith.addf %45, %51 : vector<256x128xf32>
    %c1_i32_60 = arith.constant 1 : i32
    %53 = arith.addi %25, %c1_i32_60 : i32
    %54 = arith.index_cast %53 : i32 to index
    %c1_61 = arith.constant 1 : index
    %c0_62 = arith.constant 0 : index
    %55 = vector.load %arg8[%54, %c1_61, %c0_62] : memref<18x18x256xbf16, #tpu.memory_space<vmem>>, vector<16x16x256xbf16>
    %56 = vector.shape_cast %55 : vector<16x16x256xbf16> to vector<256x256xbf16>
    %c1024 = arith.constant 1024 : index
    %c0_63 = arith.constant 0 : index
    %57 = vector.load %arg3[%c1024, %c0_63] : memref<2304x128xbf16, #tpu.memory_space<vmem>>, vector<256x128xbf16>
    %cst_64 = arith.constant dense<0.000000e+00> : vector<256x128xf32>
    %58 = tpu.matmul %56, %57, %cst_64 {dimension_numbers = #tpu.dot_dimension_numbers<[1], [0], [0], [1], [0, 0, 1, 1], [], []>} : vector<256x256xbf16>, vector<256x128xbf16>, vector<256x128xf32> -> vector<256x128xf32>
    %59 = arith.addf %52, %58 : vector<256x128xf32>
    %c1_i32_65 = arith.constant 1 : i32
    %60 = arith.addi %25, %c1_i32_65 : i32
    %61 = arith.index_cast %60 : i32 to index
    %c2_66 = arith.constant 2 : index
    %c0_67 = arith.constant 0 : index
    %62 = vector.load %arg8[%61, %c2_66, %c0_67] : memref<18x18x256xbf16, #tpu.memory_space<vmem>>, vector<16x16x256xbf16>
    %63 = vector.shape_cast %62 : vector<16x16x256xbf16> to vector<256x256xbf16>
    %c1280 = arith.constant 1280 : index
    %c0_68 = arith.constant 0 : index
    %64 = vector.load %arg3[%c1280, %c0_68] : memref<2304x128xbf16, #tpu.memory_space<vmem>>, vector<256x128xbf16>
    %cst_69 = arith.constant dense<0.000000e+00> : vector<256x128xf32>
    %65 = tpu.matmul %63, %64, %cst_69 {dimension_numbers = #tpu.dot_dimension_numbers<[1], [0], [0], [1], [0, 0, 1, 1], [], []>} : vector<256x256xbf16>, vector<256x128xbf16>, vector<256x128xf32> -> vector<256x128xf32>
    %66 = arith.addf %59, %65 : vector<256x128xf32>
    %c2_i32 = arith.constant 2 : i32
    %67 = arith.addi %25, %c2_i32 : i32
    %68 = arith.index_cast %67 : i32 to index
    %c0_70 = arith.constant 0 : index
    %c0_71 = arith.constant 0 : index
    %69 = vector.load %arg8[%68, %c0_70, %c0_71] : memref<18x18x256xbf16, #tpu.memory_space<vmem>>, vector<16x16x256xbf16>
    %70 = vector.shape_cast %69 : vector<16x16x256xbf16> to vector<256x256xbf16>
    %c1536 = arith.constant 1536 : index
    %c0_72 = arith.constant 0 : index
    %71 = vector.load %arg3[%c1536, %c0_72] : memref<2304x128xbf16, #tpu.memory_space<vmem>>, vector<256x128xbf16>
    %cst_73 = arith.constant dense<0.000000e+00> : vector<256x128xf32>
    %72 = tpu.matmul %70, %71, %cst_73 {dimension_numbers = #tpu.dot_dimension_numbers<[1], [0], [0], [1], [0, 0, 1, 1], [], []>} : vector<256x256xbf16>, vector<256x128xbf16>, vector<256x128xf32> -> vector<256x128xf32>
    %73 = arith.addf %66, %72 : vector<256x128xf32>
    %c2_i32_74 = arith.constant 2 : i32
    %74 = arith.addi %25, %c2_i32_74 : i32
    %75 = arith.index_cast %74 : i32 to index
    %c1_75 = arith.constant 1 : index
    %c0_76 = arith.constant 0 : index
    %76 = vector.load %arg8[%75, %c1_75, %c0_76] : memref<18x18x256xbf16, #tpu.memory_space<vmem>>, vector<16x16x256xbf16>
    %77 = vector.shape_cast %76 : vector<16x16x256xbf16> to vector<256x256xbf16>
    %c1792 = arith.constant 1792 : index
    %c0_77 = arith.constant 0 : index
    %78 = vector.load %arg3[%c1792, %c0_77] : memref<2304x128xbf16, #tpu.memory_space<vmem>>, vector<256x128xbf16>
    %cst_78 = arith.constant dense<0.000000e+00> : vector<256x128xf32>
    %79 = tpu.matmul %77, %78, %cst_78 {dimension_numbers = #tpu.dot_dimension_numbers<[1], [0], [0], [1], [0, 0, 1, 1], [], []>} : vector<256x256xbf16>, vector<256x128xbf16>, vector<256x128xf32> -> vector<256x128xf32>
    %80 = arith.addf %73, %79 : vector<256x128xf32>
    %c2_i32_79 = arith.constant 2 : i32
    %81 = arith.addi %25, %c2_i32_79 : i32
    %82 = arith.index_cast %81 : i32 to index
    %c2_80 = arith.constant 2 : index
    %c0_81 = arith.constant 0 : index
    %83 = vector.load %arg8[%82, %c2_80, %c0_81] : memref<18x18x256xbf16, #tpu.memory_space<vmem>>, vector<16x16x256xbf16>
    %84 = vector.shape_cast %83 : vector<16x16x256xbf16> to vector<256x256xbf16>
    %c2048 = arith.constant 2048 : index
    %c0_82 = arith.constant 0 : index
    %85 = vector.load %arg3[%c2048, %c0_82] : memref<2304x128xbf16, #tpu.memory_space<vmem>>, vector<256x128xbf16>
    %cst_83 = arith.constant dense<0.000000e+00> : vector<256x128xf32>
    %86 = tpu.matmul %84, %85, %cst_83 {dimension_numbers = #tpu.dot_dimension_numbers<[1], [0], [0], [1], [0, 0, 1, 1], [], []>} : vector<256x256xbf16>, vector<256x128xbf16>, vector<256x128xf32> -> vector<256x128xf32>
    %87 = arith.addf %80, %86 : vector<256x128xf32>
    %88 = vector.broadcast %22 : vector<1x128xf32> to vector<256x128xf32>
    %89 = arith.addf %87, %88 : vector<256x128xf32>
    %cst_84 = arith.constant 0.000000e+00 : f32
    %90 = vector.broadcast %cst_84 : f32 to vector<256x128xf32>
    %91 = arith.maximumf %89, %90 : vector<256x128xf32>
    %92 = arith.truncf %91 : vector<256x128xf32> to vector<256x128xbf16>
    %93 = vector.shape_cast %92 : vector<256x128xbf16> to vector<16x16x128xbf16>
    %c1_i32_85 = arith.constant 1 : i32
    %94 = arith.addi %25, %c1_i32_85 : i32
    %95 = arith.index_cast %94 : i32 to index
    %c1_86 = arith.constant 1 : index
    %c0_87 = arith.constant 0 : index
    %96 = vector.load %arg9[%95, %c1_86, %c0_87] : memref<18x18x128xbf16, #tpu.memory_space<vmem>>, vector<16x16x128xbf16>
    tpu.vector_store %arg9[%95, %c1_86, %c0_87], %93 {strides = array<i32>} : memref<18x18x128xbf16, #tpu.memory_space<vmem>>, vector<16x16x128xbf16>,
    %c1_i32_88 = arith.constant 1 : i32
    %c0_i32_89 = arith.constant 0 : i32
    %c16_i32_90 = arith.constant 16 : i32
    %97 = arith.muli %c0_i32_89, %c16_i32_90 : i32
    %98 = tpu.assume_multiple %97, 16 : i32
    %c0_i32_91 = arith.constant 0 : i32
    %99 = arith.addi %98, %c0_i32_91 : i32
    %100 = arith.index_cast %99 : i32 to index
    %c0_92 = arith.constant 0 : index
    %c0_93 = arith.constant 0 : index
    %101 = vector.load %arg9[%100, %c0_92, %c0_93] : memref<18x18x128xbf16, #tpu.memory_space<vmem>>, vector<16x16x128xbf16>
    %102 = vector.shape_cast %101 : vector<16x16x128xbf16> to vector<256x128xbf16>
    %c0_94 = arith.constant 0 : index
    %c0_95 = arith.constant 0 : index
    %103 = vector.load %arg5[%c0_94, %c0_95] : memref<1152x128xbf16, #tpu.memory_space<vmem>>, vector<128x128xbf16>
    %cst_96 = arith.constant dense<0.000000e+00> : vector<256x128xf32>
    %104 = tpu.matmul %102, %103, %cst_96 {dimension_numbers = #tpu.dot_dimension_numbers<[1], [0], [0], [1], [0, 0, 1, 1], [], []>} : vector<256x128xbf16>, vector<128x128xbf16>, vector<256x128xf32> -> vector<256x128xf32>
    %c0_i32_97 = arith.constant 0 : i32
    %105 = arith.addi %98, %c0_i32_97 : i32
    %106 = arith.index_cast %105 : i32 to index
    %c1_98 = arith.constant 1 : index
    %c0_99 = arith.constant 0 : index
    %107 = vector.load %arg9[%106, %c1_98, %c0_99] : memref<18x18x128xbf16, #tpu.memory_space<vmem>>, vector<16x16x128xbf16>
    %108 = vector.shape_cast %107 : vector<16x16x128xbf16> to vector<256x128xbf16>
    %c128_100 = arith.constant 128 : index
    %c0_101 = arith.constant 0 : index
    %109 = vector.load %arg5[%c128_100, %c0_101] : memref<1152x128xbf16, #tpu.memory_space<vmem>>, vector<128x128xbf16>
    %cst_102 = arith.constant dense<0.000000e+00> : vector<256x128xf32>
    %110 = tpu.matmul %108, %109, %cst_102 {dimension_numbers = #tpu.dot_dimension_numbers<[1], [0], [0], [1], [0, 0, 1, 1], [], []>} : vector<256x128xbf16>, vector<128x128xbf16>, vector<256x128xf32> -> vector<256x128xf32>
    %111 = arith.addf %104, %110 : vector<256x128xf32>
    %c0_i32_103 = arith.constant 0 : i32
    %112 = arith.addi %98, %c0_i32_103 : i32
    %113 = arith.index_cast %112 : i32 to index
    %c2_104 = arith.constant 2 : index
    %c0_105 = arith.constant 0 : index
    %114 = vector.load %arg9[%113, %c2_104, %c0_105] : memref<18x18x128xbf16, #tpu.memory_space<vmem>>, vector<16x16x128xbf16>
    %115 = vector.shape_cast %114 : vector<16x16x128xbf16> to vector<256x128xbf16>
    %c256_106 = arith.constant 256 : index
    %c0_107 = arith.constant 0 : index
    %116 = vector.load %arg5[%c256_106, %c0_107] : memref<1152x128xbf16, #tpu.memory_space<vmem>>, vector<128x128xbf16>
    %cst_108 = arith.constant dense<0.000000e+00> : vector<256x128xf32>
    %117 = tpu.matmul %115, %116, %cst_108 {dimension_numbers = #tpu.dot_dimension_numbers<[1], [0], [0], [1], [0, 0, 1, 1], [], []>} : vector<256x128xbf16>, vector<128x128xbf16>, vector<256x128xf32> -> vector<256x128xf32>
    %118 = arith.addf %111, %117 : vector<256x128xf32>
    %c1_i32_109 = arith.constant 1 : i32
    %119 = arith.addi %98, %c1_i32_109 : i32
    %120 = arith.index_cast %119 : i32 to index
    %c0_110 = arith.constant 0 : index
    %c0_111 = arith.constant 0 : index
    %121 = vector.load %arg9[%120, %c0_110, %c0_111] : memref<18x18x128xbf16, #tpu.memory_space<vmem>>, vector<16x16x128xbf16>
    %122 = vector.shape_cast %121 : vector<16x16x128xbf16> to vector<256x128xbf16>
    %c384 = arith.constant 384 : index
    %c0_112 = arith.constant 0 : index
    %123 = vector.load %arg5[%c384, %c0_112] : memref<1152x128xbf16, #tpu.memory_space<vmem>>, vector<128x128xbf16>
    %cst_113 = arith.constant dense<0.000000e+00> : vector<256x128xf32>
    %124 = tpu.matmul %122, %123, %cst_113 {dimension_numbers = #tpu.dot_dimension_numbers<[1], [0], [0], [1], [0, 0, 1, 1], [], []>} : vector<256x128xbf16>, vector<128x128xbf16>, vector<256x128xf32> -> vector<256x128xf32>
    %125 = arith.addf %118, %124 : vector<256x128xf32>
    %c1_i32_114 = arith.constant 1 : i32
    %126 = arith.addi %98, %c1_i32_114 : i32
    %127 = arith.index_cast %126 : i32 to index
    %c1_115 = arith.constant 1 : index
    %c0_116 = arith.constant 0 : index
    %128 = vector.load %arg9[%127, %c1_115, %c0_116] : memref<18x18x128xbf16, #tpu.memory_space<vmem>>, vector<16x16x128xbf16>
    %129 = vector.shape_cast %128 : vector<16x16x128xbf16> to vector<256x128xbf16>
    %c512_117 = arith.constant 512 : index
    %c0_118 = arith.constant 0 : index
    %130 = vector.load %arg5[%c512_117, %c0_118] : memref<1152x128xbf16, #tpu.memory_space<vmem>>, vector<128x128xbf16>
    %cst_119 = arith.constant dense<0.000000e+00> : vector<256x128xf32>
    %131 = tpu.matmul %129, %130, %cst_119 {dimension_numbers = #tpu.dot_dimension_numbers<[1], [0], [0], [1], [0, 0, 1, 1], [], []>} : vector<256x128xbf16>, vector<128x128xbf16>, vector<256x128xf32> -> vector<256x128xf32>
    %132 = arith.addf %125, %131 : vector<256x128xf32>
    %c1_i32_120 = arith.constant 1 : i32
    %133 = arith.addi %98, %c1_i32_120 : i32
    %134 = arith.index_cast %133 : i32 to index
    %c2_121 = arith.constant 2 : index
    %c0_122 = arith.constant 0 : index
    %135 = vector.load %arg9[%134, %c2_121, %c0_122] : memref<18x18x128xbf16, #tpu.memory_space<vmem>>, vector<16x16x128xbf16>
    %136 = vector.shape_cast %135 : vector<16x16x128xbf16> to vector<256x128xbf16>
    %c640 = arith.constant 640 : index
    %c0_123 = arith.constant 0 : index
    %137 = vector.load %arg5[%c640, %c0_123] : memref<1152x128xbf16, #tpu.memory_space<vmem>>, vector<128x128xbf16>
    %cst_124 = arith.constant dense<0.000000e+00> : vector<256x128xf32>
    %138 = tpu.matmul %136, %137, %cst_124 {dimension_numbers = #tpu.dot_dimension_numbers<[1], [0], [0], [1], [0, 0, 1, 1], [], []>} : vector<256x128xbf16>, vector<128x128xbf16>, vector<256x128xf32> -> vector<256x128xf32>
    %139 = arith.addf %132, %138 : vector<256x128xf32>
    %c2_i32_125 = arith.constant 2 : i32
    %140 = arith.addi %98, %c2_i32_125 : i32
    %141 = arith.index_cast %140 : i32 to index
    %c0_126 = arith.constant 0 : index
    %c0_127 = arith.constant 0 : index
    %142 = vector.load %arg9[%141, %c0_126, %c0_127] : memref<18x18x128xbf16, #tpu.memory_space<vmem>>, vector<16x16x128xbf16>
    %143 = vector.shape_cast %142 : vector<16x16x128xbf16> to vector<256x128xbf16>
    %c768_128 = arith.constant 768 : index
    %c0_129 = arith.constant 0 : index
    %144 = vector.load %arg5[%c768_128, %c0_129] : memref<1152x128xbf16, #tpu.memory_space<vmem>>, vector<128x128xbf16>
    %cst_130 = arith.constant dense<0.000000e+00> : vector<256x128xf32>
    %145 = tpu.matmul %143, %144, %cst_130 {dimension_numbers = #tpu.dot_dimension_numbers<[1], [0], [0], [1], [0, 0, 1, 1], [], []>} : vector<256x128xbf16>, vector<128x128xbf16>, vector<256x128xf32> -> vector<256x128xf32>
    %146 = arith.addf %139, %145 : vector<256x128xf32>
    %c2_i32_131 = arith.constant 2 : i32
    %147 = arith.addi %98, %c2_i32_131 : i32
    %148 = arith.index_cast %147 : i32 to index
    %c1_132 = arith.constant 1 : index
    %c0_133 = arith.constant 0 : index
    %149 = vector.load %arg9[%148, %c1_132, %c0_133] : memref<18x18x128xbf16, #tpu.memory_space<vmem>>, vector<16x16x128xbf16>
    %150 = vector.shape_cast %149 : vector<16x16x128xbf16> to vector<256x128xbf16>
    %c896 = arith.constant 896 : index
    %c0_134 = arith.constant 0 : index
    %151 = vector.load %arg5[%c896, %c0_134] : memref<1152x128xbf16, #tpu.memory_space<vmem>>, vector<128x128xbf16>
    %cst_135 = arith.constant dense<0.000000e+00> : vector<256x128xf32>
    %152 = tpu.matmul %150, %151, %cst_135 {dimension_numbers = #tpu.dot_dimension_numbers<[1], [0], [0], [1], [0, 0, 1, 1], [], []>} : vector<256x128xbf16>, vector<128x128xbf16>, vector<256x128xf32> -> vector<256x128xf32>
    %153 = arith.addf %146, %152 : vector<256x128xf32>
    %c2_i32_136 = arith.constant 2 : i32
    %154 = arith.addi %98, %c2_i32_136 : i32
    %155 = arith.index_cast %154 : i32 to index
    %c2_137 = arith.constant 2 : index
    %c0_138 = arith.constant 0 : index
    %156 = vector.load %arg9[%155, %c2_137, %c0_138] : memref<18x18x128xbf16, #tpu.memory_space<vmem>>, vector<16x16x128xbf16>
    %157 = vector.shape_cast %156 : vector<16x16x128xbf16> to vector<256x128xbf16>
    %c1024_139 = arith.constant 1024 : index
    %c0_140 = arith.constant 0 : index
    %158 = vector.load %arg5[%c1024_139, %c0_140] : memref<1152x128xbf16, #tpu.memory_space<vmem>>, vector<128x128xbf16>
    %cst_141 = arith.constant dense<0.000000e+00> : vector<256x128xf32>
    %159 = tpu.matmul %157, %158, %cst_141 {dimension_numbers = #tpu.dot_dimension_numbers<[1], [0], [0], [1], [0, 0, 1, 1], [], []>} : vector<256x128xbf16>, vector<128x128xbf16>, vector<256x128xf32> -> vector<256x128xf32>
    %160 = arith.addf %153, %159 : vector<256x128xf32>
    %161 = vector.broadcast %23 : vector<1x128xf32> to vector<256x128xf32>
    %162 = arith.addf %160, %161 : vector<256x128xf32>
    %cst_142 = arith.constant 0.000000e+00 : f32
    %163 = vector.broadcast %cst_142 : f32 to vector<256x128xf32>
    %164 = arith.maximumf %162, %163 : vector<256x128xf32>
    %c256_i32 = arith.constant 256 : i32
    %165 = arith.muli %c0_i32_89, %c256_i32 : i32
    %166 = tpu.assume_multiple %165, 256 : i32
    %c0_143 = arith.constant 0 : index
    %167 = arith.index_cast %166 : i32 to index
    %c0_144 = arith.constant 0 : index
    %168 = vector.load %arg7[%c0_143, %167, %c0_144] : memref<1x256x128xf32, #tpu.memory_space<vmem>>, vector<1x256x128xf32>
    %169 = vector.shape_cast %168 : vector<1x256x128xf32> to vector<256x128xf32>
    %170 = vector.shape_cast %164 : vector<256x128xf32> to vector<1x256x128xf32>
    tpu.vector_store %arg7[%c0_143, %167, %c0_144], %170 {strides = array<i32>} : memref<1x256x128xf32, #tpu.memory_space<vmem>>, vector<1x256x128xf32>,
    %c1_i32_145 = arith.constant 1 : i32
    return
  }
  func.func @transform_0(%arg0: i32) -> (i32, i32, i32, i32) {
    %c0_i32 = arith.constant 0 : i32
    %c0_i32_0 = arith.constant 0 : i32
    %c0_i32_1 = arith.constant 0 : i32
    %c0_i32_2 = arith.constant 0 : i32
    return %arg0, %c0_i32, %c0_i32_0, %c0_i32_1 : i32, i32, i32, i32
  }
  func.func @transform_1(%arg0: i32) -> (i32, i32, i32, i32) {
    %c0_i32 = arith.constant 0 : i32
    %c0_i32_0 = arith.constant 0 : i32
    %c0_i32_1 = arith.constant 0 : i32
    %c0_i32_2 = arith.constant 0 : i32
    return %arg0, %c0_i32, %c0_i32_0, %c0_i32_1 : i32, i32, i32, i32
  }
  func.func @transform_2(%arg0: i32) -> (i32, i32) {
    %c0_i32 = arith.constant 0 : i32
    %c0_i32_0 = arith.constant 0 : i32
    %c0_i32_1 = arith.constant 0 : i32
    return %c0_i32, %c0_i32_0 : i32, i32
  }
  func.func @transform_3(%arg0: i32) -> (i32, i32) {
    %c0_i32 = arith.constant 0 : i32
    %c0_i32_0 = arith.constant 0 : i32
    %c0_i32_1 = arith.constant 0 : i32
    return %c0_i32, %c0_i32_0 : i32, i32
  }
  func.func @transform_4(%arg0: i32) -> (i32, i32) {
    %c0_i32 = arith.constant 0 : i32
    %c0_i32_0 = arith.constant 0 : i32
    %c0_i32_1 = arith.constant 0 : i32
    return %c0_i32, %c0_i32_0 : i32, i32
  }
  func.func @transform_5(%arg0: i32) -> (i32, i32) {
    %c0_i32 = arith.constant 0 : i32
    %c0_i32_0 = arith.constant 0 : i32
    %c0_i32_1 = arith.constant 0 : i32
    return %c0_i32, %c0_i32_0 : i32, i32
  }
  func.func @transform_6(%arg0: i32) -> (i32, i32, i32) {
    %c0_i32 = arith.constant 0 : i32
    %c0_i32_0 = arith.constant 0 : i32
    %c0_i32_1 = arith.constant 0 : i32
    return %arg0, %c0_i32, %c0_i32_0 : i32, i32, i32
  }
}

</mosaic_0001>

<bundles_post_ra>
// kernel: tpu_custom_call.1
= control target key start
LH: loop header
LB: loop body
LE: loop exit
PB: predicated region body
PF: predicated region fallthrough
CT: control target
= control target key end

     0   :  { %s21896_s0 = inlined_call_operand.hbm [shape: bf16[2,8,16,128], index: 0, kind: input, shape index: {}]   ;;  %s21897_s1 = inlined_call_operand.hbm [shape: bf16[2,16,16,128], index: 1, kind: input, shape index: {}]   ;;  %s21898_s2 = inlined_call_operand.hbm [shape: bf16[2304,128], index: 2, kind: input, shape index: {}]   ;;  %s21899_s3 = inlined_call_operand.vmem [shape: f32[1,128], index: 3, kind: input, shape index: {}]   ;;  %s21900_s4 = inlined_call_operand.hbm [shape: bf16[1152,128], index: 4, kind: input, shape index: {}]   ;;  %s21901_s5 = inlined_call_operand.vmem [shape: f32[1,128], index: 5, kind: input, shape index: {}]   ;;  %s21902_s6 = inlined_call_operand.hbm [shape: f32[2,256,128], index: 6, kind: output, shape index: {}]  }
   0x1   :  { %21950 = sst [smem:[#allocation96_spill]] %s21896_s0 }
   0x2   :  { %21951 = sst [smem:[#allocation97_spill]] %s21898_s2 }
   0x3   :  { %21952 = sst [smem:[#allocation98_spill]] %s21900_s4 }
   0x4   :  { %11 = vsyncpa [#allocation5], 0 }
   0x5   :  { %13 = vsyncpa [#allocation5 + $0x1], 0 }
   0x6   :  { %14 = vsyncpa [#allocation8], 0 }
   0x7   :  { %16 = vsyncpa [#allocation8 + $0x1], 0 }
   0x8   :  { %17 = vsyncpa [#allocation11], 0 }
   0x9   :  { %18 = vsyncpa [#allocation6], 0 }
   0xa   :  { %20 = vsyncpa [#allocation6 + $0x1], 0  ;;  %s16223_s21 = smov 0   ;;  %s16225_s22 = smov 0  }
   0xb   :  { %s16227_s23 = smov 0   ;;  %s16229_s24 = smov 0  }
   0xc LB: > { %s16244_s25 = sadd.s32 4294967295, %s16176_s24   ;;  %s12938_s26 = sadd.s32 4294967294, %s16176_s24   ;;  %s16176_s24 = sphi %s16229_s24, %s22512_s24   ;;  %s16172_s23 = sphi %s16227_s23, %s22511_s23   ;;  %s16168_s22 = sphi %s16225_s22, %s22510_s22   ;;  %s16164_s21 = sphi %s16223_s21, %s22509_s21  }
   0xd   : > { %p46_p0 = scmp.ne.s32.totalorder %s16168_s22, %s16164_s21  ;;  %p21907_p1 = scmp.eq.s32.totalorder %s16244_s25, 0 }
   0xe   : > { %p180_p2 = scmp.eq.s32.totalorder %s16244_s25, 1  ;;  %p186_p3 = scmp.eq.s32.totalorder %s12938_s26, 1 }
   0xf   : > { %p16253_p4 = por %p21907_p1, %p46_p0  ;;  %p12939_p5 = scmp.ge.s32.totalorder %s16176_s24, 1 }
  0x10   : > { %p16258_p6 = por %p186_p3, %p46_p0  ;;  %p193_p7 = scmp.lt.s32.totalorder %s16176_s24, 3 }
  0x11   : > { %s21953_s27 = scalar_select %p16253_p4, 1, 0 }
  0x12   : > { %s21954_s28 = scalar_select %p16258_p6, 1, 0 }
  0x13   : > { %p16263_p8 = pnand %p12939_p5, %p193_p7  ;;  %s16178_s30 = smov [#allocation9]  }
  0x14   : > { %s205_s7 = sshll.u32 %s16178_s30, 4  ;;  %s16179_s9 = smov [#allocation10]   ;;  %s206_s7 = int_to_ptr.vmem [resolvable:$true] %s205_s7 }
  0x15   : > { %p15459_p9 = pneg %p16263_p8  ;;  %s221_s10 = sshll.u32 %s16179_s9, 4  ;;  %s222_s10 = int_to_ptr.vmem [resolvable:$true] %s221_s10 }
  0x16   : > { %s16003_s11 = scalar_lea.vmem %s206_s7, 18432  ;;  %p16011_p5 = scmp.lt.s32.totalorder %s206_s7, %s206_s7 }
  0x17   : > { %p16272_p11 = pnand %p15459_p9, %p21907_p1  ;;  %p16004_p13 = scmp.ne.s32.totalorder %s206_s7, %s16003_s11 }
  0x18   : > { %p16012_p7 = scmp.lt.s32.totalorder %s16003_s11, %s16003_s11 }
  0x19   : > { %p15994_p12 = pneg %p16272_p11 }
  0x1a   : > { %p16013_p10 = por %p16012_p7, %p16011_p5 }
  0x1b   : > { %p16006_p0 = pnand %p16004_p13, %p15994_p12 }
  0x1d   : > { %p16007_p3 = pneg %p16006_p0 }
  0x1f   : > { %p16014_p9 = pnand %p16013_p10, %p16007_p3 }
  0x21   : > { %16017 = shalt.err (!%p16014_p9)
}
  0x22   : > { %s21903_s12 = smov 64   ;;  %s21905_s13 = smov 4  }
  0x23   : > { %s21957_s2 = sld [smem:[#allocation97_spill]]  ;;  %s16029_s16 = scalar_lea.vmem %s222_s10, 9216 }
  0x24   : > { %p16030_p13 = scmp.ne.s32.totalorder %s222_s10, %s16029_s16  ;;  %p16037_p10 = scmp.lt.s32.totalorder %s222_s10, %s222_s10 }
  0x25   : > { %p16038_p3 = scmp.lt.s32.totalorder %s16029_s16, %s16029_s16 }
  0x26   : > { %p16032_p0 = pnand %p16030_p13, %p15994_p12 }
  0x27   : > { %p16039_p7 = por %p16038_p3, %p16037_p10 }
  0x28   : > { %p16033_p5 = pneg %p16032_p0 }
  0x29   : > { %15462 = dma.hbm_to_vmem [thread:$0]  (!%p16272_p11), %s21957_s2, 18432, %s206_s7, [#allocation8], %s21903_s12, %s21903_s12, %s21905_s13  }
  0x2a   : > { %p16040_p9 = pnand %p16039_p7, %p16033_p5 }
  0x2c   : > { %16043 = shalt.err (!%p16040_p9)
}
  0x2d   : > { %s21958_s4 = sld [smem:[#allocation98_spill]]  ;;  %s16301_s19 = sadd.s32 1, %s16176_s24  }
  0x2e   : > { %s33_s20 = sadd.s32 1, %s16172_s23  ;;  %s30_s26 = ssub.s32 %s16176_s24, %s16301_s19 }
  0x2f   : > { %p40_p12 = scmp.ne.s32.totalorder %s16172_s23, %s16168_s22  ;;  %p31_p13 = scmp.eq.s32.totalorder %s30_s26, 0 }
  0x30   : > { %p41_p0 = scmp.eq.s32.totalorder %s16176_s24, 0  ;;  %p15479_p10 = scmp.lt.s32.totalorder %s16176_s24, 2 }
  0x31   : > { %p16311_p5 = por %p180_p2, %p40_p12  ;;  %s16320_s8 = sand.u32 1, %s16172_s23  }
  0x32   : > { %s16317_s7 = scalar_select %p31_p13, %s16172_s23, %s33_s20  }
  0x33   : > { %15465 = dma.hbm_to_vmem [thread:$0]  (!%p16272_p11), %s21958_s4, 9216, %s222_s10, [#allocation11], %s21903_s12, %s21903_s12, %s21905_s13  }
  0x34   : > { %s21959_s30 = scalar_select %p16311_p5, 1, 0 }
  0x35   : > { %21960 = sst [smem:[#allocation18_spill]] %s16317_s7  ;;  %p42_p3 = por %p41_p0, %p40_p12 }
  0x36   : > { %s12943_s9 = sshll.u32 %s16320_s8, 6  ;;  %s13738_s10 = sshll.u32 %s16176_s24, 10 }
  0x37   : > { %s21961_s0 = sld [smem:[#allocation96_spill]]  ;;  %s242_s16 = scalar_lea.vmem [#allocation4], %s12943_s9 }
  0x38   : > { %s249_s17 = sshll.u32 %s242_s16, 4  ;;  %p16331_p2 = pnand %p15479_p10, %p42_p3  ;;  %s16329_s17 = int_to_ptr.vmem [resolvable:$true] %s249_s17 }
  0x39   : > { %s239_s12 = scalar_lea.sflag [#allocation5], %s16320_s8 }
  0x3a   : > { %p16046_p7 = pneg %p16331_p2 }
  0x3d   : > { %s16327_s15 = scalar_lea.hbm %s21961_s0, %s13738_s10  ;;  %s16049_s11 = scalar_lea.hbm %s21961_s0, 2048 }
  0x3e   : > { %s16044_s13 = scalar_lea.hbm %s16327_s15, 1024  ;;  %p16050_p13 = scmp.lt.s32.totalorder %s16327_s15, %s21961_s0 }
  0x3f   : > { %p16045_p11 = scmp.ne.s32.totalorder %s16327_s15, %s16044_s13  ;;  %p16051_p0 = scmp.lt.s32.totalorder %s16049_s11, %s16044_s13 }
  0x41   : > { %p16047_p9 = pnand %p16046_p7, %p16045_p11  ;;  %p16052_p10 = por %p16051_p0, %p16050_p13 }
  0x43   : > { %p16048_p12 = pneg %p16047_p9 }
  0x45   : > { %p16053_p3 = pnand %p16052_p10, %p16048_p12 }
  0x47   : > { %16056 = shalt.err (!%p16053_p3)
}
  0x48   : > { %s16057_s20 = scalar_lea.vmem %s16329_s17, 1024  ;;  %s16182_s9 = smov [#allocation4]  }
  0x49   : > { %p16058_p1 = scmp.ne.s32.totalorder %s16329_s17, %s16057_s20  ;;  %s16062_s10 = sshll.u32 %s16182_s9, 4  ;;  %s16063_s10 = int_to_ptr.vmem [resolvable:$false] %s16062_s10 }
  0x4a   : > { %s16064_s26 = scalar_lea.vmem %s16063_s10, 2048  ;;  %p16065_p6 = scmp.lt.s32.totalorder %s16329_s17, %s16063_s10 }
  0x4b   : > { %p16060_p11 = pnand %p16058_p1, %p16046_p7  ;;  %p16066_p5 = scmp.lt.s32.totalorder %s16064_s26, %s16057_s20 }
  0x4d   : > { %p16061_p9 = pneg %p16060_p11  ;;  %p16067_p4 = por %p16066_p5, %p16065_p6 }
  0x4f   : > { %p16068_p13 = pnand %p16067_p4, %p16061_p9 }
  0x51   : > { %16071 = shalt.err (!%p16068_p13)
}
  0x52   : > { %s21963_s13 = smov 4   ;;  %s21964_s11 = smov 64  }
  0x53   : > { %15469 = dma.hbm_to_vmem [thread:$0]  (!%p16331_p2), %s16327_s15, 1024, %s16329_s17, %s239_s12, %s21964_s11, %s21964_s11, %s21963_s13  }
  0x54   : > { %s13739_s14 = sshll.u32 %s16176_s24, 11  ;;  %s21965_s9 = sshll.u32 %s16320_s8, 7 }
  0x55   : > { %s16371_s26 = scalar_lea.hbm %s21897_s1, %s13739_s14  ;;  %s263_s10 = scalar_lea.vmem [#allocation7], %s21965_s9 }
  0x56   : > { %s270_s0 = sshll.u32 %s263_s10, 4  ;;  %s21966_s2 = sand.u32 1, %s16176_s24   ;;  %s16375_s0 = int_to_ptr.vmem [resolvable:$true] %s270_s0 }
  0x57   : > { %s260_s4 = scalar_lea.sflag [#allocation8], %s21966_s2  ;;  %s16072_s7 = scalar_lea.hbm %s16371_s26, 2048 }
  0x58   : > { %p16073_p1 = scmp.ne.s32.totalorder %s16371_s26, %s16072_s7  ;;  %s16077_s17 = scalar_lea.hbm %s21897_s1, 4096 }
  0x59   : > { %p16078_p5 = scmp.lt.s32.totalorder %s16371_s26, %s21897_s1  ;;  %p16079_p12 = scmp.lt.s32.totalorder %s16077_s17, %s16072_s7 }
  0x5a   : > { %p16075_p4 = pnand %p16073_p1, %p16046_p7 }
  0x5b   : > { %p16080_p0 = por %p16079_p12, %p16078_p5 }
  0x5c   : > { %p16076_p6 = pneg %p16075_p4 }
  0x5e   : > { %p16081_p10 = pnand %p16080_p0, %p16076_p6 }
  0x60   : > { %16084 = shalt.err (!%p16081_p10)
}
  0x61   : > { %s16085_s2 = scalar_lea.vmem %s16375_s0, 2048  ;;  %s16183_s16 = smov [#allocation7]  }
  0x62   : > { %p16086_p3 = scmp.ne.s32.totalorder %s16375_s0, %s16085_s2  ;;  %s16090_s20 = sshll.u32 %s16183_s16, 4  ;;  %s16091_s20 = int_to_ptr.vmem [resolvable:$false] %s16090_s20 }
  0x63   : > { %s16092_s9 = scalar_lea.vmem %s16091_s20, 4096  ;;  %p16093_p13 = scmp.lt.s32.totalorder %s16375_s0, %s16091_s20 }
  0x64   : > { %p16088_p11 = pnand %p16086_p3, %p16046_p7  ;;  %p16094_p1 = scmp.lt.s32.totalorder %s16092_s9, %s16085_s2 }
  0x66   : > { %p16089_p9 = pneg %p16088_p11  ;;  %p16095_p4 = por %p16094_p1, %p16093_p13 }
  0x68   : > { %p16096_p5 = pnand %p16095_p4, %p16089_p9 }
  0x6a   : > { %16099 = shalt.err (!%p16096_p5)
}
  0x6b   : > { %15472 = dma.hbm_to_vmem [thread:$0]  (!%p16331_p2), %s16371_s26, 2048, %s16375_s0, %s260_s4, %s21964_s11, %s21964_s11, %s21963_s13  }
  0x6c   : > { %282 = sbr.rel (%p16263_p8) target bundleno = 1620 (0x654), region = 44 }
  0x71   : > { %s16407_s7 = sand.u32 1, %s16168_s22   ;;  %p21967_p7 = scmp.ne.s32.totalorder %s21953_s27, 0 }
  0x72   : > { %s12950_s10 = sshll.u32 %s16407_s7, 6  ;;  %s285_s12 = scalar_lea.sflag [#allocation5], %s16407_s7 }
  0x73   : > { %s16411_s15 = scalar_lea.vmem [#allocation4], %s12950_s10 }
  0x74   : > { %16143 = dma.done.wait (%p21967_p7), %s285_s12, 1024  }
  0x75   : > { %16145 = vsyncadd (%p21967_p7), %s285_s12, 4294966272  ;;  %s293_s0 = sand.u32 1, %s16244_s25   ;;  %s12951_s4 = sshll.u32 %s16407_s7, 7 }
  0x76   : > { %s294_s29 = scalar_lea.sflag [#allocation8], %s293_s0  ;;  %s16419_s18 = scalar_lea.vmem [#allocation7], %s12951_s4 }
  0x77   : > { %16147 = dma.done.wait (%p21967_p7), %s294_s29, 2048  }
  0x78   : > { %16149 = vsyncadd (%p21967_p7), %s294_s29, 4294965248  ;;  %p21968_p8 = scmp.eq.s32.totalorder %s16244_s25, 0 }
  0x7a   : > { %16151 = dma.done.wait (%p21968_p8), [#allocation8], 18432   ;;  %p21969_p2 = pmov %p21968_p8 }
  0x7c   : > { %16153 = vsyncadd (%p21969_p2), [#allocation8], 4294948864  ;;  %p21970_p6 = pmov %p21969_p2 }
  0x7d   : > { %p21971_p12 = pmov %p21969_p2 }
  0x7e   : > { %16155 = dma.done.wait (%p21970_p6), [#allocation11], 9216  }
  0x7f   : > { %16157 = vsyncadd (%p21971_p12), [#allocation11], 4294958080  ;;  %v16184_v0 = vmov 0   ;;  %vm348_vm0 = vsmask.f32 256  ;;  %v15522_v1 = vld [vmem:[#allocation9 + $0xf8] sm:$0xff]  }
  0x80   : > { %340 = vst [vmem:[#allocation2] sm:$0xff] %v16184_v0  ;;  %341 = vst [vmem:[#allocation2 + $0x8] sm:$0xff] %v16184_v0  ;;  %vm351_vm1 = vsmask.f32 4352  ;;  %v15523_v2 = vld [vmem:[#allocation9 + $0xb8] sm:$0xff]   ;;  %13773 = vmatprep.subr.bf16.mxu0 %v15522_v1  ;;  %15429 = vmatprep.subr.bf16.mxu1 %v15522_v1  ;;  %v15524_v3 = vld [vmem:[#allocation9 + $0xf0] sm:$0xff]  }
  0x81   : > { %342 = vst [vmem:[#allocation2 + $0x10] sm:$0x11] %v16184_v0  ;;  %344 = vst [vmem:[#allocation2 + $0x198] sm:$0xff] %v16184_v0  ;;  %vm347_vm2 = vcmask 1040384   ;;  %13774 = vmatpush3.bf16.msra.mxu0 %v15523_v2  ;;  %15437 = vmatpush3.bf16.msra.mxu1 %v15523_v2  ;;  %v15525_v4 = vld [vmem:[#allocation9 + $0xb0] sm:$0xff]   ;;  %vm350_vm3 = vcmask 1044484  }
  0x82   : > { %346 = vst [vmem:[#allocation2 + $0x1a8] sm:$0x11] %v16184_v0  ;;  %467 = vst [vmem:[#allocation3] sm:$0xf] %v16184_v0  ;;  %13775 = vmatprep.subr.bf16.mxu0 %v15524_v3  ;;  %15430 = vmatprep.subr.bf16.mxu1 %v15524_v3  ;;  %v15526_v5 = vld [vmem:[#allocation9 + $0xe8] sm:$0xff]   ;;  %v21972_v6 = vmov 0 }
  0x83   : > { %468 = vst [vmem:[#allocation3 + $0x4] sm:$0xf] %v16184_v0  ;;  %469 = vst [vmem:[#allocation3 + $0x8] sm:$0x1] %v16184_v0  ;;  %vm408_vm5 = vsmask.f32 7938 }
  0x84   : > { %471 = vst [vmem:[#allocation3 + $0xcc] sm:$0xf] %v16184_v0  ;;  %472 = vst [vmem:[#allocation3 + $0xd0] sm:$0xf] %v16184_v0  ;;  %vm410_vm7 = vsmask.f32 7954 }
  0x85   : > { %473 = vst [vmem:[#allocation3 + $0xd4] sm:$0x1] %v16184_v0  ;;  %vm16435_vm4 = vmand %vm347_vm2, %vm348_vm0  ;;  %13776 = vmatpush3.bf16.msra.mxu0 %v15525_v4  ;;  %15438 = vmatpush3.bf16.msra.mxu1 %v15525_v4  ;;  %v15527_v8 = vld [vmem:[#allocation9 + $0xa8] sm:$0xff]   ;;  %v15528_v9 = vld [vmem:[#allocation9 + $0xe0] sm:$0xff]   ;;  %v21977_v10 = vmov 0  ;;  %v21980_v13 = vmov 0 }
  0x86   : > { %v21973_v6 = vsel %vm16435_vm4, 4294967295, %v21972_v6  ;;  %vm16441_vm6 = vmand %vm350_vm3, %vm351_vm1  ;;  %13777 = vmatprep.subr.bf16.mxu0 %v15526_v5  ;;  %15431 = vmatprep.subr.bf16.mxu1 %v15526_v5  ;;  %v15529_v11 = vld [vmem:[#allocation9 + $0xa0] sm:$0xff]   ;;  %v15530_v12 = vld [vmem:[#allocation9 + $0xd8] sm:$0xff]   ;;  %vm598_vm11 = vsmask.f32 4368  ;;  %v21983_v14 = vmov 0 }
  0x87   : > { %21974 = vst [vmem:[#allocation19_spill] sm:$0xff] %v21973_v6  ;;  %vm16447_vm8 = vmand %vm347_vm2, %vm408_vm5  ;;  %v16466_v15 = vrot.slane %v16184_v0, 5  ;;  %v1443_v16 = vrot.slane %v16184_v0, 4  ;;  %v15531_v17 = vld [vmem:[#allocation9 + $0x98] sm:$0xff]   ;;  %v15532_v18 = vld [vmem:[#allocation9 + $0xd0] sm:$0xff]   ;;  %vm761_vm13 = vcmask 1043456  }
  0x88   : > { %v21978_v10 = vsel %vm16447_vm8, 4294967295, %v21977_v10  ;;  %vm411_vm9 = vmand %vm350_vm3, %vm410_vm7  ;;  %v354_v19 = vld [vmem:[#allocation2] sm:$0x11]  ;;  %v413_v20 = vld [vmem:[#allocation2 + $0x10] sm:$0x11]  ;;  %v21986_v44 = vmov 0 }
  0x89   : > { %21979 = vst [vmem:[#allocation20_spill] sm:$0xff] %v21978_v10  ;;  %13778 = vmatpush3.bf16.msra.mxu0 %v15527_v8  ;;  %15439 = vmatpush3.bf16.msra.mxu1 %v15527_v8  ;;  %vm16456_vm10 = vmor %vm16441_vm6, %vm16435_vm4  ;;  %v15533_v21 = vld [vmem:[#allocation9 + $0x90] sm:$0xff]   ;;  %vm1424_vm14 = vsmask.f32 3328  ;;  %vm1425_vm15 = vsmask.f32 7440  ;;  %v1444_v26 = vor.u32 %v1443_v16, %v16466_v15 }
  0x8a   : > { %13779 = vmatprep.subr.bf16.mxu0 %v15528_v9  ;;  %15432 = vmatprep.subr.bf16.mxu1 %v15528_v9  ;;  %v21981_v13 = vsel %vm16456_vm10, 4294967295, %v21980_v13  ;;  %vm16462_vm12 = vmor %vm411_vm9, %vm16447_vm8  ;;  %v355_v22 = vsel %vm16456_vm10, 0, %v354_v19  ;;  %v390_v24 = vld [vmem:[#allocation2 + $0x120] sm:$0x11]  ;;  %v449_v25 = vld [vmem:[#allocation2 + $0x130] sm:$0x11] }
  0x8b   : > { %21982 = vst [vmem:[#allocation21_spill] sm:$0xff] %v21981_v13  ;;  %v21984_v14 = vsel %vm16462_vm12, 4294967295, %v21983_v14  ;;  %v414_v23 = vsel %vm16462_vm12, 0, %v413_v20  ;;  %356 = vst [vmem:[#allocation2] sm:$0x11] %v355_v22  ;;  %v391_v27 = vsel %vm16456_vm10, 0, %v390_v24 }
  0x8c   : > { %21985 = vst [vmem:[#allocation22_spill] sm:$0xff] %v21984_v14  ;;  %415 = vst [vmem:[#allocation2 + $0x10] sm:$0x11] %v414_v23  ;;  %v450_v28 = vsel %vm16462_vm12, 0, %v449_v25  ;;  %v592_v29 = vld [vmem:[%s16411_s15 + $0x28] sm:$0xf] }
  0x8d   : > { %13780 = vmatpush3.bf16.msra.mxu0 %v15529_v11  ;;  %15440 = vmatpush3.bf16.msra.mxu1 %v15529_v11  ;;  %v593_v30 = vld [vmem:[%s16411_s15 + $0x2c] sm:$0xf]  ;;  %392 = vst [vmem:[#allocation2 + $0x120] sm:$0x11] %v391_v27  ;;  %451 = vst [vmem:[#allocation2 + $0x130] sm:$0x11] %v450_v28 }
  0x8e   : > { %13781 = vmatprep.subr.bf16.mxu0 %v15530_v12  ;;  %15433 = vmatprep.subr.bf16.mxu1 %v15530_v12  ;;  %v686_v31 = vshrl.u32 %v592_v29, 16  ;;  %v689_v32 = vshll.u32 %v592_v29, 16  ;;  %v694_v33 = vshrl.u32 %v593_v30, 16  ;;  %v697_v34 = vshll.u32 %v593_v30, 16  ;;  %v897_v35 = vld [vmem:[%s16419_s18 + $0x58] sm:$0xf]  ;;  %vm16485_vm1 = vmor %vm348_vm0, %vm598_vm11 }
  0x8f   : > { %v15534_v36 = vld [vmem:[#allocation9 + $0xc8] sm:$0xff]   ;;  %v898_v37 = vld [vmem:[%s16419_s18 + $0x5c] sm:$0xf]  ;;  %v1095_v38 = vshrl.u32 %v897_v35, 16  ;;  %v1098_v41 = vshll.u32 %v897_v35, 16  ;;  %v1445_v43 = vrot.slane %v1444_v26, 4  ;;  %vm16494_vm2 = vmand %vm761_vm13, %vm408_vm5 }
  0x90   : > { %v688_v39 = vrot.slane %v686_v31, 7  ;;  %v16481_v40 = vrot.slane %v694_v33, 7  ;;  %v1103_v42 = vshrl.u32 %v898_v37, 16  ;;  %v21987_v44 = vsel %vm16485_vm1, 4294967295, %v21986_v44  ;;  %v15535_v46 = vld [vmem:[#allocation9 + $0x88] sm:$0xff]   ;;  %v15536_v47 = vld [vmem:[#allocation9 + $0xc0] sm:$0xff]   ;;  %vm16510_vm0 = vmor %vm1424_vm14, %vm1425_vm15 }
  0x91   : > { %13782 = vmatpush3.bf16.msra.mxu0 %v15531_v17  ;;  %15441 = vmatpush3.bf16.msra.mxu1 %v15531_v17  ;;  %21988 = vst [vmem:[#allocation23_spill] sm:$0xff] %v21987_v44  ;;  %v1097_v45 = vrot.slane %v1095_v38, 7  ;;  %v1106_v51 = vshll.u32 %v898_v37, 16  ;;  %v21989_v52 = vmov 0  ;;  %v15537_v60 = vld [vmem:[#allocation9 + $0x80] sm:$0xff]   ;;  %v15538_v7 = vld [vmem:[#allocation9 + $0x78] sm:$0xff]  }
  0x92   : > { %13783 = vmatprep.subr.bf16.mxu0 %v15532_v18  ;;  %15434 = vmatprep.subr.bf16.mxu1 %v15532_v18  ;;  %v16489_v48 = vor.u32 %v689_v32, %v688_v39  ;;  %v692_v49 = vrot.slane %v688_v39, 4  ;;  %v699_v50 = vor.u32 %v697_v34, %v16481_v40  ;;  %v21990_v52 = vsel %vm16494_vm2, 4294967295, %v21989_v52  ;;  %v16499_v55 = vld [vmem:[#allocation2] sm:$0xff]  ;;  %v357_v23 = vld [vmem:[#allocation2 + $0x18] sm:$0x11]  ;;  %s12954_s14 = sshll.u32 %s16407_s7, 8 }
  0x93   : > { %21991 = vst [vmem:[#allocation24_spill] sm:$0xff] %v21990_v52  ;;  %v701_v53 = vrot.slane %v16481_v40, 4  ;;  %v1105_v54 = vrot.slane %v1103_v42, 7  ;;  %v1408_v56 = vld [vmem:[#allocation2 + $0x10] sm:$0x11]  ;;  %v1100_v58 = vor.u32 %v1098_v41, %v1097_v45  ;;  %v1101_v59 = vrot.slane %v1097_v45, 4 }
  0x94   : > { %v700_v57 = vsel %vm16485_vm1, %v692_v49, %v699_v50  ;;  %v1428_v61 = vshrl.u32 %v16499_v55, 16  ;;  %v1431_v62 = vshll.u32 %v16499_v55, 16  ;;  %v1447_v63 = vshll.u32 %v1408_v56, 16  ;;  %v840_v0 = vld [vmem:[#allocation2 + $0x120] sm:$0xf]  ;;  %s21664_s2 = scalar_lea.vmem [#allocation12], %s12954_s14 }
  0x95   : > { %13784 = vmatpush3.bf16.msra.mxu0 %v15533_v21  ;;  %15442 = vmatpush3.bf16.msra.mxu1 %v15533_v21  ;;  %836 = vst [vmem:[#allocation2 + $0x110] sm:$0xf] %v700_v57  ;;  %843 = vst [vmem:[#allocation2 + $0x128] sm:$0xf] %v700_v57  ;;  %v841_v1 = vsel %vm16494_vm2, %v16489_v48, %v840_v0  ;;  %v844_v2 = vld [vmem:[#allocation2 + $0x130] sm:$0x1]  ;;  %v1108_v3 = vor.u32 %v1106_v51, %v1105_v54 }
  0x96   : > { %13785 = vmatprep.subr.bf16.mxu0 %v15534_v36  ;;  %15435 = vmatprep.subr.bf16.mxu1 %v15534_v36  ;;  %v1110_v4 = vrot.slane %v1105_v54, 4  ;;  %v1304_v5 = vld [vmem:[#allocation2 + $0x124] sm:$0xf]  ;;  %v21992_v8 = vmov 0  ;;  %v1430_v9 = vrot.slane %v1428_v61, 4  ;;  %v1433_v11 = vrot.slane %v1431_v62, 5 }
  0x97   : > { %v21993_v8 = vsel %vm16510_vm0, 4294967295, %v21992_v8  ;;  %v1449_v12 = vrot.slane %v1447_v63, 5  ;;  %842 = vst [vmem:[#allocation2 + $0x120] sm:$0xf] %v841_v1  ;;  %v845_v16 = vsel %vm16435_vm4, %v701_v53, %v844_v2  ;;  %v1308_v17 = vld [vmem:[#allocation2 + $0x134] sm:$0x1]  ;;  %v1109_v19 = vsel %vm16485_vm1, %v1101_v59, %v1108_v3 }
  0x98   : > { %21994 = vst [vmem:[#allocation25_spill] sm:$0xff] %v21993_v8  ;;  %v15539_v18 = vld [vmem:[#allocation9 + $0x178] sm:$0xff]   ;;  %846 = vst [vmem:[#allocation2 + $0x130] sm:$0x1] %v845_v16  ;;  %v1305_v20 = vsel %vm16494_vm2, %v1100_v58, %v1304_v5  ;;  %v1309_v21 = vsel %vm16435_vm4, %v1110_v4, %v1308_v17  ;;  %v1434_v22 = vor.u32 %v1433_v11, %v1430_v9  ;;  %v358_v25 = vsel %vm16456_vm10, 0, %v357_v23  ;;  %s13772_s16 = sshll.u32 %s16244_s25, 12 }
  0x99   : > { %13786 = vmatpush3.bf16.msra.mxu0 %v15535_v46  ;;  %15443 = vmatpush3.bf16.msra.mxu1 %v15535_v46  ;;  %1306 = vst [vmem:[#allocation2 + $0x124] sm:$0xf] %v1305_v20  ;;  %1307 = vst [vmem:[#allocation2 + $0x12c] sm:$0xf] %v1109_v19  ;;  %v1450_v24 = vsel %vm16510_vm0, %v1445_v43, %v1449_v12  ;;  %v416_v26 = vld [vmem:[#allocation2 + $0x28] sm:$0x11]  ;;  %s21849_s12 = scalar_lea.hbm %s21902_s6, %s13772_s16 }
  0x9a   : > { %13787 = vmatprep.subr.bf16.mxu0 %v15536_v47  ;;  %15436 = vmatprep.subr.bf16.mxu1 %v15536_v47  ;;  %1310 = vst [vmem:[#allocation2 + $0x134] sm:$0x1] %v1309_v21  ;;  %v582_v27 = vld [vmem:[%s16411_s15] sm:$0xf]  ;;  %v1435_v28 = vrot.slane %v1434_v22, 4  ;;  %v417_v29 = vsel %vm16462_vm12, 0, %v416_v26 }
  0x9b   : > { %359 = vst [vmem:[#allocation2 + $0x18] sm:$0x11] %v358_v25  ;;  %v583_v30 = vld [vmem:[%s16411_s15 + $0x4] sm:$0xf]  ;;  %v601_v31 = vshrl.u32 %v582_v27, 16  ;;  %v604_v32 = vshll.u32 %v582_v27, 16 }
  0x9c   : > { %418 = vst [vmem:[#allocation2 + $0x28] sm:$0x11] %v417_v29  ;;  %v609_v33 = vshrl.u32 %v583_v30, 16  ;;  %v612_v34 = vshll.u32 %v583_v30, 16  ;;  %v875_v35 = vld [vmem:[%s16419_s18] sm:$0xf]  ;;  %v1440_v37 = vsel %vm16510_vm0, %v1435_v28, %v16466_v15 }
  0x9d   : > { %13788 = vmatpush3.bf16.msra.mxu0 %v15537_v60  ;;  %15444 = vmatpush3.bf16.msra.mxu1 %v15537_v60  ;;  %v876_v36 = vld [vmem:[%s16419_s18 + $0x4] sm:$0xf]  ;;  %v603_v38 = vrot.slane %v601_v31, 7  ;;  %v908_v39 = vshrl.u32 %v875_v35, 16  ;;  %v911_v41 = vshll.u32 %v875_v35, 16  ;;  %v12955_v42 = vcombine.low %v1440_v37, %v1450_v24  ;;  %v15541_v45 = vld [vmem:[#allocation9 + $0x138] sm:$0xff]  }
  0x9e   : > { %13885 = vmatprep.subr.bf16.mxu1 %v15538_v7  ;;  %13997 = vmatprep.subr.bf16.mxu0 %v15539_v18  ;;  %v12956_v43 = vcombine.high %v1440_v37, %v1450_v24  ;;  %v16537_v46 = vrot.slane %v609_v33, 7  ;;  %v916_v47 = vshrl.u32 %v876_v36, 16  ;;  %v919_v51 = vshll.u32 %v876_v36, 16  ;;  %v393_v1 = vld [vmem:[#allocation2 + $0x138] sm:$0x11]  ;;  %s12819_s20 = sshll.u32 %s21664_s2, 4  ;;  %s21851_s20 = int_to_ptr.vmem [resolvable:$true] %s12819_s20 }
  0x9f   : > { %v607_v49 = vrot.slane %v603_v38, 4  ;;  %v910_v50 = vrot.slane %v908_v39, 7  ;;  %v16539_v58 = vor.u32 %v604_v32, %v603_v38  ;;  %v452_v2 = vld [vmem:[#allocation2 + $0x148] sm:$0x11]  ;;  %v594_v3 = vld [vmem:[%s16411_s15 + $0x30] sm:$0xf] }
  0xa0   : > { %2099 = vmatprep.mubr.bf16.mxu0 %v12956_v43  ;;  %v1368_v54 = vld [vmem:[#allocation2 + $0x120] sm:$0xff]  ;;  %v1369_v56 = vld [vmem:[#allocation2 + $0x128] sm:$0xff]  ;;  %v614_v15 = vor.u32 %v612_v34, %v16537_v46  ;;  %v616_v59 = vrot.slane %v16537_v46, 4  ;;  %v918_v60 = vrot.slane %v916_v47, 7  ;;  %v595_v20 = vld [vmem:[%s16411_s15 + $0x34] sm:$0xf] }
  0xa1   : > { %v1420_v57 = vld [vmem:[#allocation2 + $0x130] sm:$0x11]  ;;  %v1716_v61 = vshrl.u32 %v1368_v54, 16  ;;  %v1719_v62 = vshll.u32 %v1368_v54, 16  ;;  %v1725_v63 = vshll.u32 %v1369_v56, 16  ;;  %v1729_v0 = vshrl.u32 %v1369_v56, 16  ;;  %2100 = vmatmul.mubr.bf16.vlgmr.msra.gmra.mxu0 %v12955_v42 }
  0xa2   : > { %v1735_v4 = vshll.u32 %v1420_v57, 16  ;;  %13998 = vmatpush3.bf16.msra.mxu0 %v15541_v45  ;;  %v615_v5 = vsel %vm16485_vm1, %v607_v49, %v614_v15  ;;  %v763_v7 = vld [vmem:[#allocation2 + $0x18] sm:$0xf]  ;;  %v913_v9 = vor.u32 %v911_v41, %v910_v50  ;;  %v1227_v11 = vld [vmem:[#allocation2 + $0x1c] sm:$0xf]  ;;  %v914_v24 = vrot.slane %v910_v50, 4 }
  0xa3   : > { %v1718_v12 = vrot.slane %v1716_v61, 4  ;;  %v1721_v16 = vrot.slane %v1719_v62, 5  ;;  %v1727_v17 = vrot.slane %v1725_v63, 5  ;;  %v1731_v18 = vrot.slane %v1729_v0, 4  ;;  %766 = vst [vmem:[#allocation2 + $0x20] sm:$0xf] %v615_v5 }
  0xa4   : > { %v767_v19 = vld [vmem:[#allocation2 + $0x28] sm:$0x1]  ;;  %773 = vst [vmem:[#allocation2 + $0x38] sm:$0xf] %v615_v5  ;;  %v1737_v21 = vrot.slane %v1735_v4, 5  ;;  %v764_v22 = vsel %vm16494_vm2, %v16539_v58, %v763_v7  ;;  %v921_v29 = vor.u32 %v919_v51, %v918_v60  ;;  %v923_v30 = vrot.slane %v918_v60, 4 }
  0xa5   : > { %v768_v23 = vsel %vm16435_vm4, %v616_v59, %v767_v19  ;;  %v1231_v25 = vld [vmem:[#allocation2 + $0x2c] sm:$0x1]  ;;  %v899_v26 = vld [vmem:[%s16419_s18 + $0x60] sm:$0xf]  ;;  %v1722_v27 = vor.u32 %v1721_v16, %v1718_v12  ;;  %v1732_v28 = vor.u32 %v1731_v18, %v1727_v17  ;;  %765 = vst [vmem:[#allocation2 + $0x18] sm:$0xf] %v764_v22  ;;  %v1228_v32 = vsel %vm16494_vm2, %v913_v9, %v1227_v11 }
  0xa6   : > { %769 = vst [vmem:[#allocation2 + $0x28] sm:$0x1] %v768_v23  ;;  %v15547_v31 = vld [vmem:[#allocation9 + $0x170] sm:$0xff]   ;;  %v394_v33 = vsel %vm16456_vm10, 0, %v393_v1  ;;  %v453_v34 = vsel %vm16462_vm12, 0, %v452_v2  ;;  %v703_v35 = vshrl.u32 %v594_v3, 16  ;;  %v922_v39 = vsel %vm16485_vm1, %v914_v24, %v921_v29 }
  0xa7   : > { %v16562_v36 = vld [vmem:[%s16419_s18 + $0x64] sm:$0xf]  ;;  %v1723_v37 = vrot.slane %v1722_v27, 4  ;;  %v1733_v38 = vrot.slane %v1732_v28, 4  ;;  %1229 = vst [vmem:[#allocation2 + $0x1c] sm:$0xf] %v1228_v32  ;;  %v1232_v41 = vsel %vm16435_vm4, %v923_v30, %v1231_v25  ;;  %13999 = vmatprep.subr.bf16.mxu0 %v15547_v31 }
  0xa8   : > { %395 = vst [vmem:[#allocation2 + $0x138] sm:$0x11] %v394_v33  ;;  %454 = vst [vmem:[#allocation2 + $0x148] sm:$0x11] %v453_v34  ;;  %v15540_v42 = vld [vmem:[#allocation9 + $0x38] sm:$0xff]   ;;  %v705_v43 = vrot.slane %v703_v35, 7 }
  0xa9   : > { %1230 = vst [vmem:[#allocation2 + $0x24] sm:$0xf] %v922_v39  ;;  %1233 = vst [vmem:[#allocation2 + $0x2c] sm:$0x1] %v1232_v41  ;;  %v706_v45 = vshll.u32 %v594_v3, 16  ;;  %v711_v47 = vshrl.u32 %v595_v20, 16  ;;  %v1728_v49 = vsel %vm16510_vm0, %v1723_v37, %v1727_v17  ;;  %v1738_v50 = vsel %vm16510_vm0, %v1733_v38, %v1737_v21 }
  0xaa   : > { %v15542_v51 = vld [vmem:[#allocation9 + $0x70] sm:$0xff]   ;;  %v714_v54 = vshll.u32 %v595_v20, 16  ;;  %v1112_v56 = vshrl.u32 %v899_v26, 16  ;;  %v12979_v57 = vcombine.low %v1728_v49, %v1738_v50  ;;  %v12980_v15 = vcombine.high %v1728_v49, %v1738_v50  ;;  %v360_v19 = vld [vmem:[#allocation2 + $0x30] sm:$0x11]  ;;  %s16100_s25 = scalar_lea.vmem %s21851_s20, 4096 }
  0xab   : > { %v16572_v60 = vor.u32 %v706_v45, %v705_v43  ;;  %v1115_v61 = vshll.u32 %v899_v26, 16  ;;  %v15549_v62 = vld [vmem:[#allocation9 + $0x130] sm:$0xff]   ;;  %v709_v63 = vrot.slane %v705_v43, 4  ;;  %v16574_v0 = vrot.slane %v711_v47, 7  ;;  %v15544_v26 = vld [vmem:[#allocation9 + $0x68] sm:$0xff]   ;;  %p16101_p0 = scmp.ne.s32.totalorder %s21851_s20, %s16100_s25  ;;  %p22505_p10 = scmp.ne.s32.totalorder %s21959_s30, 0 }
  0xac   : > { %v1114_v1 = vrot.slane %v1112_v56, 7  ;;  %v1120_v2 = vshrl.u32 %v16562_v36, 16  ;;  %2195 = vmatprep.mubr.bf16.mxu1 %v12980_v15  ;;  %14000 = vmatpush3.bf16.msra.mxu0 %v15549_v62  ;;  %v15543_v3 = vld [vmem:[#allocation9 + $0x30] sm:$0xff]   ;;  %v1123_v9 = vshll.u32 %v16562_v36, 16  ;;  %v419_v27 = vld [vmem:[#allocation2 + $0x40] sm:$0x11] }
  0xad   : > { %2196 = vmatmul.mubr.bf16.vlgmr.msra.gmra.mxu1 %v12979_v57  ;;  %v716_v4 = vor.u32 %v714_v54, %v16574_v0  ;;  %v718_v5 = vrot.slane %v16574_v0, 4  ;;  %v16592_v28 = vld [vmem:[%s16419_s18 + $0x8] sm:$0xf]  ;;  %v878_v34 = vld [vmem:[%s16419_s18 + $0xc] sm:$0xf]  ;;  %v15546_v56 = vld [vmem:[#allocation9 + $0x60] sm:$0xff]   ;;  %p16102_p3 = pnand %p16101_p0, %p22505_p10 }
  0xae   : > { %v1118_v7 = vrot.slane %v1114_v1, 4  ;;  %13886 = vmatpush3.bf16.msra.mxu1 %v15540_v42  ;;  %v16580_v11 = vld [vmem:[#allocation2 + $0x18] sm:$0xff]  ;;  %v1117_v17 = vor.u32 %v1115_v61, %v1114_v1  ;;  %v1122_v18 = vrot.slane %v1120_v2, 7  ;;  %v15545_v47 = vld [vmem:[#allocation9 + $0x28] sm:$0xff]   ;;  %v361_v57 = vsel %vm16456_vm10, 0, %v360_v19  ;;  %s16185_s0 = smov [#allocation12]  }
  0xaf   : > { %v847_v12 = vld [vmem:[#allocation2 + $0x138] sm:$0xf]  ;;  %v851_v16 = vld [vmem:[#allocation2 + $0x148] sm:$0x1]  ;;  %13887 = vmatprep.subr.bf16.mxu1 %v15542_v51  ;;  %v1452_v22 = vshrl.u32 %v16580_v11, 16  ;;  %v1455_v23 = vshll.u32 %v16580_v11, 16  ;;  %v717_v24 = vsel %vm16485_vm1, %v709_v63, %v716_v4  ;;  %p16103_p11 = pneg %p16102_p3 }
  0xb0   : > { %v16582_v20 = vld [vmem:[#allocation2 + $0x20] sm:$0xff]  ;;  %v1409_v21 = vld [vmem:[#allocation2 + $0x28] sm:$0x11]  ;;  %v848_v25 = vsel %vm16494_vm2, %v16572_v60, %v847_v12  ;;  %850 = vst [vmem:[#allocation2 + $0x140] sm:$0xf] %v717_v24  ;;  %v852_v32 = vsel %vm16435_vm4, %v718_v5, %v851_v16  ;;  %v1125_v37 = vor.u32 %v1123_v9, %v1122_v18  ;;  %v1127_v38 = vrot.slane %v1122_v18, 4 }
  0xb1   : > { %v1461_v29 = vshll.u32 %v16582_v20, 16  ;;  %v1465_v30 = vshrl.u32 %v16582_v20, 16  ;;  %v1471_v31 = vshll.u32 %v1409_v21, 16  ;;  %849 = vst [vmem:[#allocation2 + $0x138] sm:$0xf] %v848_v25  ;;  %v1454_v35 = vrot.slane %v1452_v22, 4 }
  0xb2   : > { %v1311_v33 = vld [vmem:[#allocation2 + $0x13c] sm:$0xf]  ;;  %857 = vst [vmem:[#allocation2 + $0x158] sm:$0xf] %v717_v24  ;;  %v1457_v36 = vrot.slane %v1455_v23, 5  ;;  %13888 = vmatpush3.bf16.msra.mxu1 %v15543_v3  ;;  %v1126_v51 = vsel %vm16485_vm1, %v1118_v7, %v1125_v37  ;;  %v15548_v63 = vld [vmem:[#allocation9 + $0x20] sm:$0xff]  }
  0xb3   : > { %853 = vst [vmem:[#allocation2 + $0x148] sm:$0x1] %v852_v32  ;;  %v1315_v39 = vld [vmem:[#allocation2 + $0x14c] sm:$0x1]  ;;  %v1463_v41 = vrot.slane %v1461_v29, 5  ;;  %v1467_v42 = vrot.slane %v1465_v30, 4  ;;  %v1312_v45 = vsel %vm16494_vm2, %v1117_v17, %v1311_v33  ;;  %13889 = vmatprep.subr.bf16.mxu1 %v15544_v26 }
  0xb4   : > { %v1473_v43 = vrot.slane %v1471_v31, 5  ;;  %v396_v49 = vld [vmem:[#allocation2 + $0x150] sm:$0x11]  ;;  %v1458_v50 = vor.u32 %v1457_v36, %v1454_v35  ;;  %1313 = vst [vmem:[#allocation2 + $0x13c] sm:$0xf] %v1312_v45  ;;  %v1316_v54 = vsel %vm16435_vm4, %v1127_v38, %v1315_v39  ;;  %v420_v1 = vsel %vm16462_vm12, 0, %v419_v27 }
  0xb5   : > { %v455_v15 = vld [vmem:[#allocation2 + $0x160] sm:$0x11]  ;;  %v16610_v61 = vld [vmem:[%s16419_s18 + $0x68] sm:$0xf]  ;;  %v1468_v62 = vor.u32 %v1467_v42, %v1463_v41  ;;  %1314 = vst [vmem:[#allocation2 + $0x144] sm:$0xf] %v1126_v51 }
  0xb6   : > { %1317 = vst [vmem:[#allocation2 + $0x14c] sm:$0x1] %v1316_v54  ;;  %362 = vst [vmem:[#allocation2 + $0x30] sm:$0x11] %v361_v57  ;;  %v925_v2 = vshrl.u32 %v16592_v28, 16  ;;  %v928_v3 = vshll.u32 %v16592_v28, 16  ;;  %13890 = vmatpush3.bf16.msra.mxu1 %v15545_v47 }
  0xb7   : > { %v902_v4 = vld [vmem:[%s16419_s18 + $0x6c] sm:$0xf]  ;;  %v1459_v9 = vrot.slane %v1458_v50, 4  ;;  %421 = vst [vmem:[#allocation2 + $0x40] sm:$0x11] %v420_v1  ;;  %v933_v12 = vshrl.u32 %v878_v34, 16  ;;  %13891 = vmatprep.subr.bf16.mxu1 %v15546_v56 }
  0xb8   : > { %v15555_v7 = vld [vmem:[#allocation9 + $0x168] sm:$0xff]   ;;  %v936_v16 = vshll.u32 %v878_v34, 16  ;;  %v397_v17 = vsel %vm16456_vm10, 0, %v396_v49  ;;  %v1469_v18 = vrot.slane %v1468_v62, 4  ;;  %v927_v19 = vrot.slane %v925_v2, 7  ;;  %v15550_v26 = vld [vmem:[#allocation9 + $0x58] sm:$0xff]  }
  0xb9   : > { %398 = vst [vmem:[#allocation2 + $0x150] sm:$0x11] %v397_v17  ;;  %v456_v21 = vsel %vm16462_vm12, 0, %v455_v15  ;;  %v1129_v22 = vshrl.u32 %v16610_v61, 16  ;;  %14001 = vmatprep.subr.bf16.mxu0 %v15555_v7  ;;  %v1464_v23 = vsel %vm16510_vm0, %v1459_v9, %v1463_v41  ;;  %v935_v24 = vrot.slane %v933_v12, 7  ;;  %v15551_v30 = vld [vmem:[#allocation9 + $0x18] sm:$0xff]  }
  0xba   : > { %457 = vst [vmem:[#allocation2 + $0x160] sm:$0x11] %v456_v21  ;;  %v1137_v25 = vshrl.u32 %v902_v4, 16  ;;  %v1474_v27 = vsel %vm16510_vm0, %v1469_v18, %v1473_v43  ;;  %v931_v28 = vrot.slane %v927_v19, 4  ;;  %v1132_v34 = vshll.u32 %v16610_v61, 16  ;;  %v15552_v35 = vld [vmem:[#allocation9 + $0x50] sm:$0xff]   ;;  %13892 = vmatpush3.bf16.msra.mxu1 %v15548_v63 }
  0xbb   : > { %v1131_v29 = vrot.slane %v1129_v22, 7  ;;  %v12958_v31 = vcombine.high %v1464_v23, %v1474_v27  ;;  %v12957_v32 = vcombine.low %v1464_v23, %v1474_v27  ;;  %v938_v33 = vor.u32 %v936_v16, %v935_v24  ;;  %v15557_v36 = vld [vmem:[#allocation9 + $0x128] sm:$0xff]   ;;  %v1370_v37 = vld [vmem:[#allocation2 + $0x138] sm:$0xff]  ;;  %13893 = vmatprep.subr.bf16.mxu1 %v15550_v26  ;;  %v15560_v21 = vld [vmem:[#allocation9 + $0x160] sm:$0xff]   ;;  %s16104_s4 = sshll.u32 %s16185_s0, 4  ;;  %s16105_s4 = int_to_ptr.vmem [resolvable:$false] %s16104_s4 }
  0xbc   : > { %v930_v38 = vor.u32 %v928_v3, %v927_v19  ;;  %v940_v39 = vrot.slane %v935_v24, 4  ;;  %v16627_v41 = vrot.slane %v1137_v25, 7  ;;  %v1140_v42 = vshll.u32 %v902_v4, 16  ;;  %v1371_v45 = vld [vmem:[#allocation2 + $0x140] sm:$0xff]  ;;  %v15553_v62 = vld [vmem:[#allocation9 + $0x10] sm:$0xff]   ;;  %v15554_v9 = vld [vmem:[#allocation9 + $0x48] sm:$0xff]   ;;  %14002 = vmatpush3.bf16.msra.mxu0 %v15557_v36  ;;  %p16107_p9 = scmp.lt.s32.totalorder %s21851_s20, %s16105_s4 }
  0xbd   : > { %2107 = vmatprep.mubr.bf16.mxu0 %v12958_v31  ;;  %v1421_v43 = vld [vmem:[#allocation2 + $0x148] sm:$0x11]  ;;  %v1740_v47 = vshrl.u32 %v1370_v37, 16  ;;  %v1743_v49 = vshll.u32 %v1370_v37, 16  ;;  %v939_v50 = vsel %vm16485_vm1, %v931_v28, %v938_v33  ;;  %v1135_v51 = vrot.slane %v1131_v29, 4  ;;  %14003 = vmatprep.subr.bf16.mxu0 %v15560_v21  ;;  %s16106_s29 = scalar_lea.vmem %s16105_s4, 8192 }
  0xbe   : > { %v1749_v54 = vshll.u32 %v1371_v45, 16  ;;  %v1753_v56 = vshrl.u32 %v1371_v45, 16  ;;  %v1759_v57 = vshll.u32 %v1421_v43, 16  ;;  %2108 = vmatmul.mubr.bf16.gmra.mxu0 %v12957_v32  ;;  %v770_v15 = vld [vmem:[#allocation2 + $0x30] sm:$0xf]  ;;  %v1142_v61 = vor.u32 %v1140_v42, %v16627_v41  ;;  %13894 = vmatpush3.bf16.msra.mxu1 %v15551_v30  ;;  %v15561_v33 = vld [vmem:[#allocation9 + $0x120] sm:$0xff]   ;;  %p16108_p13 = scmp.lt.s32.totalorder %s16106_s29, %s16100_s25 }
  0xbf   : > { %1237 = vst [vmem:[#allocation2 + $0x3c] sm:$0xf] %v939_v50  ;;  %v1742_v63 = vrot.slane %v1740_v47, 4  ;;  %v1745_v1 = vrot.slane %v1743_v49, 5  ;;  %v771_v2 = vsel %vm16494_vm2, %v16539_v58, %v770_v15  ;;  %v774_v3 = vld [vmem:[#allocation2 + $0x40] sm:$0x1]  ;;  %v1134_v7 = vor.u32 %v1132_v34, %v1131_v29  ;;  %13895 = vmatprep.subr.bf16.mxu1 %v15552_v35 }
  0xc0   : > { %v1234_v4 = vld [vmem:[#allocation2 + $0x34] sm:$0xf]  ;;  %v1751_v12 = vrot.slane %v1749_v54, 5  ;;  %v1755_v16 = vrot.slane %v1753_v56, 4  ;;  %v1761_v17 = vrot.slane %v1759_v57, 5  ;;  %v775_v18 = vsel %vm16435_vm4, %v616_v59, %v774_v3  ;;  %v15558_v36 = vld [vmem:[#allocation9 + $0x40] sm:$0xff]   ;;  %14004 = vmatpush3.bf16.msra.mxu0 %v15561_v33  ;;  %p16109_p1 = por %p16108_p13, %p16107_p9 }
  0xc1   : > { %772 = vst [vmem:[#allocation2 + $0x30] sm:$0xf] %v771_v2  ;;  %v1238_v19 = vld [vmem:[#allocation2 + $0x44] sm:$0x1]  ;;  %v1746_v22 = vor.u32 %v1745_v1, %v1742_v63  ;;  %776 = vst [vmem:[#allocation2 + $0x40] sm:$0x1] %v775_v18  ;;  %v1235_v58 = vsel %vm16494_vm2, %v930_v38, %v1234_v4  ;;  %v1143_v26 = vsel %vm16485_vm1, %v1135_v51, %v1142_v61 }
  0xc2   : > { %v1239_v23 = vsel %vm16435_vm4, %v940_v39, %v1238_v19  ;;  %v854_v24 = vld [vmem:[#allocation2 + $0x150] sm:$0xf]  ;;  %v858_v25 = vld [vmem:[#allocation2 + $0x160] sm:$0x1]  ;;  %v1318_v46 = vld [vmem:[#allocation2 + $0x154] sm:$0xf]  ;;  %v1756_v27 = vor.u32 %v1755_v16, %v1751_v12  ;;  %13896 = vmatpush3.bf16.msra.mxu1 %v15553_v62  ;;  %p16110_p4 = pnand %p16109_p1, %p16103_p11 }
  0xc3   : > { %1236 = vst [vmem:[#allocation2 + $0x34] sm:$0xf] %v1235_v58  ;;  %1240 = vst [vmem:[#allocation2 + $0x44] sm:$0x1] %v1239_v23  ;;  %v855_v59 = vsel %vm16494_vm2, %v16572_v60, %v854_v24  ;;  %v859_v28 = vsel %vm16435_vm4, %v718_v5, %v858_v25  ;;  %v1144_v29 = vrot.slane %v16627_v41, 4  ;;  %v15556_v32 = vld [vmem:[#allocation9 + $0x8] sm:$0xff]   ;;  %v1319_v60 = vsel %vm16494_vm2, %v1134_v7, %v1318_v46 }
  0xc4   : > { %1321 = vst [vmem:[#allocation2 + $0x15c] sm:$0xf] %v1143_v26  ;;  %v1322_v30 = vld [vmem:[#allocation2 + $0x164] sm:$0x1]  ;;  %v363_v31 = vld [vmem:[#allocation2 + $0x48] sm:$0x11]  ;;  %13897 = vmatprep.subr.bf16.mxu1 %v15554_v9 }
  0xc5   : > { %v1747_v34 = vrot.slane %v1746_v22, 4  ;;  %856 = vst [vmem:[#allocation2 + $0x150] sm:$0xf] %v855_v59  ;;  %860 = vst [vmem:[#allocation2 + $0x160] sm:$0x1] %v859_v28  ;;  %v364_v0 = vsel %vm16456_vm10, 0, %v363_v31  ;;  %v1323_v38 = vsel %vm16435_vm4, %v1144_v29, %v1322_v30 }
  0xc6   : > { %v422_v35 = vld [vmem:[#allocation2 + $0x58] sm:$0x11]  ;;  %v584_v5 = vld [vmem:[%s16411_s15 + $0x8] sm:$0xf]  ;;  %v1757_v37 = vrot.slane %v1756_v27, 4  ;;  %v15566_v45 = vld [vmem:[#allocation9 + $0x158] sm:$0xff]   ;;  %13898 = vmatpush3.bf16.msra.mxu1 %v15556_v32 }
  0xc7   : > { %1320 = vst [vmem:[#allocation2 + $0x154] sm:$0xf] %v1319_v60  ;;  %365 = vst [vmem:[#allocation2 + $0x48] sm:$0x11] %v364_v0  ;;  %v423_v39 = vsel %vm16462_vm12, 0, %v422_v35  ;;  %v618_v42 = vshrl.u32 %v584_v5, 16  ;;  %v1752_v43 = vsel %vm16510_vm0, %v1747_v34, %v1751_v12  ;;  %14005 = vmatprep.subr.bf16.mxu0 %v15566_v45  ;;  %13899 = vmatprep.subr.bf16.mxu1 %v15558_v36 }
  0xc8   : > { %v585_v41 = vld [vmem:[%s16411_s15 + $0xc] sm:$0xf]  ;;  %v16665_v47 = vld [vmem:[#allocation2 + $0x38] sm:$0xff]  ;;  %1324 = vst [vmem:[#allocation2 + $0x164] sm:$0x1] %v1323_v38  ;;  %v621_v49 = vshll.u32 %v584_v5, 16  ;;  %v1762_v56 = vsel %vm16510_vm0, %v1757_v37, %v1761_v17 }
  0xc9   : > { %424 = vst [vmem:[#allocation2 + $0x58] sm:$0x11] %v423_v39  ;;  %v626_v50 = vshrl.u32 %v585_v41, 16  ;;  %v629_v51 = vshll.u32 %v585_v41, 16  ;;  %v16668_v54 = vld [vmem:[%s16419_s18 + $0x10] sm:$0xf]  ;;  %v12982_v63 = vcombine.high %v1752_v43, %v1762_v56  ;;  %v12981_v1 = vcombine.low %v1752_v43, %v1762_v56 }
  0xca   : > { %v1485_v57 = vshll.u32 %v16665_v47, 16  ;;  %v1489_v15 = vshrl.u32 %v16665_v47, 16  ;;  %v620_v61 = vrot.slane %v618_v42, 7  ;;  %v15567_v62 = vld [vmem:[#allocation9 + $0x118] sm:$0xff]   ;;  %v942_v3 = vshrl.u32 %v16668_v54, 16  ;;  %v15559_v12 = vld [vmem:[#allocation9] sm:$0xff]  }
  0xcb   : > { %v16674_v2 = vrot.slane %v626_v50, 7  ;;  %14006 = vmatpush3.bf16.msra.mxu0 %v15567_v62  ;;  %v15570_v16 = vld [vmem:[#allocation9 + $0x150] sm:$0xff]   ;;  %2203 = vmatprep.mubr.bf16.mxu1 %v12982_v63  ;;  %v16679_v17 = vld [vmem:[#allocation2 + $0x30] sm:$0xff]  ;;  %v1410_v18 = vld [vmem:[#allocation2 + $0x40] sm:$0x11]  ;;  %v945_v32 = vshll.u32 %v16668_v54, 16 }
  0xcc   : > { %v16677_v4 = vrot.slane %v1485_v57, 5  ;;  %v1491_v7 = vrot.slane %v1489_v15, 4  ;;  %v624_v9 = vrot.slane %v620_v61, 4  ;;  %v1373_v19 = vld [vmem:[#allocation2 + $0x158] sm:$0xff]  ;;  %v16681_v21 = vor.u32 %v621_v49, %v620_v61  ;;  %2204 = vmatmul.mubr.bf16.gmra.mxu1 %v12981_v1  ;;  %14007 = vmatprep.subr.bf16.mxu0 %v15570_v16  ;;  %v399_v50 = vld [vmem:[#allocation2 + $0x168] sm:$0x11] }
  0xcd   : > { %v631_v22 = vor.u32 %v629_v51, %v16674_v2  ;;  %v633_v58 = vrot.slane %v16674_v2, 4  ;;  %v16685_v23 = vrot.slane %v942_v3, 7  ;;  %v1476_v24 = vshrl.u32 %v16679_v17, 16  ;;  %v15571_v27 = vld [vmem:[#allocation9 + $0x110] sm:$0xff]   ;;  %13900 = vmatpush3.bf16.msra.mxu1 %v15559_v12  ;;  %v15576_v54 = vld [vmem:[#allocation9 + $0x148] sm:$0xff]  }
  0xce   : > { %v1479_v25 = vshll.u32 %v16679_v17, 16  ;;  %v1492_v26 = vor.u32 %v1491_v7, %v16677_v4  ;;  %v1495_v46 = vshll.u32 %v1410_v18, 16  ;;  %v1372_v59 = vld [vmem:[#allocation2 + $0x150] sm:$0xff]  ;;  %v1773_v28 = vshll.u32 %v1373_v19, 16  ;;  %v777_v31 = vld [vmem:[#allocation2 + $0x48] sm:$0xf] }
  0xcf   : > { %v1777_v29 = vshrl.u32 %v1373_v19, 16  ;;  %v632_v30 = vsel %vm16485_vm1, %v624_v9, %v631_v22  ;;  %v1478_v33 = vrot.slane %v1476_v24, 4  ;;  %v1422_v35 = vld [vmem:[#allocation2 + $0x160] sm:$0x11]  ;;  %v16694_v5 = vld [vmem:[%s16419_s18 + $0x14] sm:$0xf]  ;;  %14008 = vmatpush3.bf16.msra.mxu0 %v15571_v27  ;;  %v778_v49 = vsel %vm16494_vm2, %v16681_v21, %v777_v31 }
  0xd0   : > { %v1481_v34 = vrot.slane %v1479_v25, 5  ;;  %v1493_v60 = vrot.slane %v1492_v26, 4  ;;  %v1497_v0 = vrot.slane %v1495_v46, 5  ;;  %780 = vst [vmem:[#allocation2 + $0x50] sm:$0xf] %v632_v30  ;;  %v1764_v36 = vshrl.u32 %v1372_v59, 16  ;;  %14009 = vmatprep.subr.bf16.mxu0 %v15576_v54 }
  0xd1   : > { %787 = vst [vmem:[#allocation2 + $0x68] sm:$0xf] %v632_v30  ;;  %v1767_v37 = vshll.u32 %v1372_v59, 16  ;;  %v1775_v38 = vrot.slane %v1773_v28, 5  ;;  %v1779_v39 = vrot.slane %v1777_v29, 4  ;;  %v1783_v43 = vshll.u32 %v1422_v35, 16 }
  0xd2   : > { %v781_v41 = vld [vmem:[#allocation2 + $0x58] sm:$0x1]  ;;  %v1482_v42 = vor.u32 %v1481_v34, %v1478_v33  ;;  %v1498_v45 = vsel %vm16510_vm0, %v1493_v60, %v1497_v0  ;;  %v1766_v56 = vrot.slane %v1764_v36, 4  ;;  %779 = vst [vmem:[#allocation2 + $0x48] sm:$0xf] %v778_v49  ;;  %v947_v9 = vor.u32 %v945_v32, %v16685_v23  ;;  %v15577_v18 = vld [vmem:[#allocation9 + $0x108] sm:$0xff]  }
  0xd3   : > { %v458_v51 = vld [vmem:[#allocation2 + $0x178] sm:$0x11]  ;;  %v1769_v57 = vrot.slane %v1767_v37, 5  ;;  %v1780_v15 = vor.u32 %v1779_v39, %v1775_v38  ;;  %v782_v61 = vsel %vm16435_vm4, %v633_v58, %v781_v41  ;;  %v1241_v62 = vld [vmem:[#allocation2 + $0x4c] sm:$0xf]  ;;  %v1785_v7 = vrot.slane %v1783_v43, 5  ;;  %14010 = vmatpush3.bf16.msra.mxu0 %v15577_v18 }
  0xd4   : > { %v16706_v63 = vld [vmem:[%s16411_s15 + $0x38] sm:$0xf]  ;;  %v16709_v1 = vld [vmem:[%s16411_s15 + $0x3c] sm:$0xf]  ;;  %v1483_v3 = vrot.slane %v1482_v42, 4  ;;  %v948_v12 = vrot.slane %v16685_v23, 4  ;;  %v1242_v27 = vsel %vm16494_vm2, %v947_v9, %v1241_v62 }
  0xd5   : > { %783 = vst [vmem:[#allocation2 + $0x58] sm:$0x1] %v782_v61  ;;  %v16714_v16 = vld [vmem:[%s16419_s18 + $0x70] sm:$0xf]  ;;  %v1770_v19 = vor.u32 %v1769_v57, %v1766_v56  ;;  %v1781_v22 = vrot.slane %v1780_v15, 4  ;;  %v950_v24 = vshrl.u32 %v16694_v5, 16 }
  0xd6   : > { %v953_v25 = vshll.u32 %v16694_v5, 16  ;;  %v15580_v26 = vld [vmem:[#allocation9 + $0x140] sm:$0xff]   ;;  %v1488_v46 = vsel %vm16510_vm0, %v1483_v3, %v16677_v4  ;;  %v400_v23 = vsel %vm16456_vm10, 0, %v399_v50  ;;  %v459_v59 = vsel %vm16462_vm12, 0, %v458_v51  ;;  %v16728_v28 = vld [vmem:[%s16419_s18 + $0x74] sm:$0xf] }
  0xd7   : > { %v12960_v29 = vcombine.high %v1488_v46, %v1498_v45  ;;  %v1771_v30 = vrot.slane %v1770_v19, 4  ;;  %v1786_v31 = vsel %vm16510_vm0, %v1781_v22, %v1785_v7  ;;  %v12959_v32 = vcombine.low %v1488_v46, %v1498_v45  ;;  %1243 = vst [vmem:[#allocation2 + $0x4c] sm:$0xf] %v1242_v27  ;;  %v1245_v4 = vld [vmem:[#allocation2 + $0x5c] sm:$0x1]  ;;  %14011 = vmatprep.subr.bf16.mxu0 %v15580_v26  ;;  %v15581_v33 = vld [vmem:[#allocation9 + $0x100] sm:$0xff]  }
  0xd8   : > { %401 = vst [vmem:[#allocation2 + $0x168] sm:$0x11] %v400_v23  ;;  %460 = vst [vmem:[#allocation2 + $0x178] sm:$0x11] %v459_v59  ;;  %v952_v34 = vrot.slane %v950_v24, 7  ;;  %v720_v60 = vshrl.u32 %v16706_v63, 16  ;;  %14012 = vmatpush3.bf16.msra.mxu0 %v15581_v33  ;;  %v13006_v27 = vcombine.high %v16580_v11, %v16582_v20 }
  0xd9   : > { %v723_v0 = vshll.u32 %v16706_v63, 16  ;;  %v728_v35 = vshrl.u32 %v16709_v1, 16  ;;  %2115 = vmatprep.mubr.bf16.mxu0 %v12960_v29  ;;  %v1776_v5 = vsel %vm16510_vm0, %v1771_v30, %v1775_v38  ;;  %v731_v36 = vshll.u32 %v16709_v1, 16  ;;  %v15584_v41 = vld [vmem:[#allocation9 + $0x1f8] sm:$0xff]   ;;  %v16750_v62 = vld [vmem:[#allocation2 + $0x8] sm:$0xff] }
  0xda   : > { %v1146_v37 = vshrl.u32 %v16714_v16, 16  ;;  %v1149_v39 = vshll.u32 %v16714_v16, 16  ;;  %v12984_v42 = vcombine.high %v1776_v5, %v1786_v31  ;;  %2116 = vmatmul.mubr.bf16.gmra.mxu0 %v12959_v32  ;;  %v12983_v45 = vcombine.low %v1776_v5, %v1786_v31  ;;  %14109 = vmatprep.subr.bf16.mxu1 %v15584_v41  ;;  %v366_v61 = vld [vmem:[#allocation2 + $0x60] sm:$0x11]  ;;  %v425_v16 = vld [vmem:[#allocation2 + $0x70] sm:$0x11] }
  0xdb   : > { %v955_v43 = vor.u32 %v953_v25, %v952_v34  ;;  %v957_v49 = vrot.slane %v952_v34, 4  ;;  %v722_v50 = vrot.slane %v720_v60, 7  ;;  %v16740_v51 = vrot.slane %v728_v35, 7  ;;  %v15588_v1 = vld [vmem:[#allocation9 + $0x278] sm:$0xff]  }
  0xdc   : > { %v16742_v54 = vrot.slane %v1146_v37, 7  ;;  %v1154_v56 = vshrl.u32 %v16728_v28, 16  ;;  %2211 = vmatprep.mubr.bf16.mxu1 %v12984_v42  ;;  %v1157_v15 = vshll.u32 %v16728_v28, 16  ;;  %v13004_v63 = vcombine.high %v16499_v55, %v16750_v62  ;;  %v881_v18 = vld [vmem:[%s16419_s18 + $0x18] sm:$0xf]  ;;  %14221 = vmatprep.subr.bf16.mxu0 %v15588_v1 }
  0xdd   : > { %v956_v38 = vsel %vm16485_vm1, %v948_v12, %v955_v43  ;;  %v1246_v57 = vsel %vm16435_vm4, %v957_v49, %v1245_v4  ;;  %2212 = vmatmul.mubr.bf16.gmra.mxu1 %v12983_v45  ;;  %v16754_v3 = vor.u32 %v723_v0, %v722_v50  ;;  %v726_v7 = vrot.slane %v722_v50, 4  ;;  %v882_v60 = vld [vmem:[%s16419_s18 + $0x1c] sm:$0xf]  ;;  %v369_v50 = vld [vmem:[#allocation2 + $0x78] sm:$0x11] }
  0xde   : > { %1244 = vst [vmem:[#allocation2 + $0x54] sm:$0xf] %v956_v38  ;;  %1247 = vst [vmem:[#allocation2 + $0x5c] sm:$0x1] %v1246_v57  ;;  %v733_v9 = vor.u32 %v731_v36, %v16740_v51  ;;  %v21910_v12 = vrot.slane %v16740_v51, 4  ;;  %v16759_v19 = vld [vmem:[#allocation2 + $0x48] sm:$0xff]  ;;  %v1151_v25 = vor.u32 %v1149_v39, %v16742_v54  ;;  %v13003_v46 = vcombine.low %v16499_v55, %v16750_v62 }
  0xdf   : > { %v861_v22 = vld [vmem:[#allocation2 + $0x168] sm:$0xf]  ;;  %v865_v24 = vld [vmem:[#allocation2 + $0x178] sm:$0x1]  ;;  %v1152_v26 = vrot.slane %v16742_v54, 4  ;;  %v1500_v23 = vshrl.u32 %v16759_v19, 16  ;;  %v13005_v54 = vcombine.low %v16580_v11, %v16582_v20 }
  0xe0   : > { %v1503_v59 = vshll.u32 %v16759_v19, 16  ;;  %v734_v28 = vsel %vm16485_vm1, %v726_v7, %v733_v9  ;;  %v862_v29 = vsel %vm16494_vm2, %v16754_v3, %v861_v22  ;;  %v1325_v30 = vld [vmem:[#allocation2 + $0x16c] sm:$0xf]  ;;  %v1329_v31 = vld [vmem:[#allocation2 + $0x17c] sm:$0x1]  ;;  %v866_v32 = vsel %vm16435_vm4, %v21910_v12, %v865_v24 }
  0xe1   : > { %863 = vst [vmem:[#allocation2 + $0x168] sm:$0xf] %v862_v29  ;;  %864 = vst [vmem:[#allocation2 + $0x170] sm:$0xf] %v734_v28  ;;  %v1156_v4 = vrot.slane %v1154_v56, 7  ;;  %v1326_v33 = vsel %vm16494_vm2, %v1151_v25, %v1325_v30  ;;  %v367_v34 = vsel %vm16456_vm10, 0, %v366_v61 }
  0xe2   : > { %871 = vst [vmem:[#allocation2 + $0x188] sm:$0xf] %v734_v28  ;;  %v1502_v0 = vrot.slane %v1500_v23, 4  ;;  %v1505_v35 = vrot.slane %v1503_v59, 5  ;;  %867 = vst [vmem:[#allocation2 + $0x178] sm:$0x1] %v866_v32 }
  0xe3   : > { %1327 = vst [vmem:[#allocation2 + $0x16c] sm:$0xf] %v1326_v33  ;;  %368 = vst [vmem:[#allocation2 + $0x60] sm:$0x11] %v367_v34  ;;  %v426_v5 = vsel %vm16462_vm12, 0, %v425_v16  ;;  %v959_v36 = vshrl.u32 %v881_v18, 16  ;;  %v1159_v37 = vor.u32 %v1157_v15, %v1156_v4 }
  0xe4   : > { %v1161_v39 = vrot.slane %v1156_v4, 4  ;;  %427 = vst [vmem:[#allocation2 + $0x70] sm:$0x11] %v426_v5  ;;  %v962_v41 = vshll.u32 %v881_v18, 16  ;;  %v967_v42 = vshrl.u32 %v882_v60, 16  ;;  %v1506_v45 = vor.u32 %v1505_v35, %v1502_v0 }
  0xe5   : > { %v961_v43 = vrot.slane %v959_v36, 7  ;;  %v970_v49 = vshll.u32 %v882_v60, 16  ;;  %v16787_v56 = vld [vmem:[#allocation2 + $0x50] sm:$0xff]  ;;  %v1411_v38 = vld [vmem:[#allocation2 + $0x58] sm:$0x11]  ;;  %v1160_v57 = vsel %vm16485_vm1, %v1152_v26, %v1159_v37  ;;  %v370_v1 = vsel %vm16456_vm10, 0, %v369_v50 }
  0xe6   : > { %v1330_v15 = vsel %vm16435_vm4, %v1161_v39, %v1329_v31  ;;  %v969_v61 = vrot.slane %v967_v42, 7  ;;  %v1507_v7 = vrot.slane %v1506_v45, 4  ;;  %v1509_v9 = vshll.u32 %v16787_v56, 16  ;;  %1328 = vst [vmem:[#allocation2 + $0x174] sm:$0xf] %v1160_v57 }
  0xe7   : > { %v1513_v16 = vshrl.u32 %v16787_v56, 16  ;;  %v1519_v18 = vshll.u32 %v1411_v38, 16  ;;  %1331 = vst [vmem:[#allocation2 + $0x17c] sm:$0x1] %v1330_v15  ;;  %371 = vst [vmem:[#allocation2 + $0x78] sm:$0x11] %v370_v1  ;;  %v964_v24 = vor.u32 %v962_v41, %v961_v43  ;;  %v13008_v35 = vcombine.high %v16679_v17, %v16665_v47 }
  0xe8   : > { %v428_v22 = vld [vmem:[#allocation2 + $0x88] sm:$0x11]  ;;  %v965_v25 = vrot.slane %v961_v43, 4  ;;  %v972_v26 = vor.u32 %v970_v49, %v969_v61  ;;  %v974_v23 = vrot.slane %v969_v61, 4  ;;  %v586_v59 = vld [vmem:[%s16411_s15 + $0x10] sm:$0xf]  ;;  %v13007_v5 = vcombine.low %v16679_v17, %v16665_v47 }
  0xe9   : > { %v1511_v28 = vrot.slane %v1509_v9, 5  ;;  %v1515_v29 = vrot.slane %v1513_v16, 4  ;;  %v1521_v30 = vrot.slane %v1519_v18, 5  ;;  %v429_v31 = vsel %vm16462_vm12, 0, %v428_v22  ;;  %v16801_v32 = vld [vmem:[%s16411_s15 + $0x14] sm:$0xf] }
  0xea   : > { %v1374_v4 = vld [vmem:[#allocation2 + $0x168] sm:$0xff]  ;;  %v784_v33 = vld [vmem:[#allocation2 + $0x60] sm:$0xf]  ;;  %v973_v34 = vsel %vm16485_vm1, %v965_v25, %v972_v26  ;;  %v1248_v60 = vld [vmem:[#allocation2 + $0x64] sm:$0xf]  ;;  %v635_v0 = vshrl.u32 %v586_v59, 16  ;;  %v13010_v16 = vcombine.high %v16759_v19, %v16787_v56 }
  0xeb   : > { %430 = vst [vmem:[#allocation2 + $0x88] sm:$0x11] %v429_v31  ;;  %v1512_v36 = vsel %vm16510_vm0, %v1507_v7, %v1511_v28  ;;  %v1516_v37 = vor.u32 %v1515_v29, %v1511_v28  ;;  %v1788_v39 = vshrl.u32 %v1374_v4, 16  ;;  %v1791_v41 = vshll.u32 %v1374_v4, 16  ;;  %v788_v42 = vld [vmem:[#allocation2 + $0x70] sm:$0x1] }
  0xec   : > { %1251 = vst [vmem:[#allocation2 + $0x6c] sm:$0xf] %v973_v34  ;;  %v1252_v45 = vld [vmem:[#allocation2 + $0x74] sm:$0x1]  ;;  %v785_v43 = vsel %vm16494_vm2, %v16681_v21, %v784_v33  ;;  %v789_v49 = vsel %vm16435_vm4, %v633_v58, %v788_v42  ;;  %v1249_v50 = vsel %vm16494_vm2, %v964_v24, %v1248_v60  ;;  %v637_v21 = vrot.slane %v635_v0, 7 }
  0xed   : > { %v1253_v38 = vsel %vm16435_vm4, %v974_v23, %v1252_v45  ;;  %v1517_v57 = vrot.slane %v1516_v37, 4  ;;  %v1790_v15 = vrot.slane %v1788_v39, 4  ;;  %v1793_v61 = vrot.slane %v1791_v41, 5  ;;  %786 = vst [vmem:[#allocation2 + $0x60] sm:$0xf] %v785_v43  ;;  %v1375_v1 = vld [vmem:[#allocation2 + $0x170] sm:$0xff] }
  0xee   : > { %790 = vst [vmem:[#allocation2 + $0x70] sm:$0x1] %v789_v49  ;;  %1250 = vst [vmem:[#allocation2 + $0x64] sm:$0xf] %v1249_v50  ;;  %v1423_v2 = vld [vmem:[#allocation2 + $0x178] sm:$0x11] }
  0xef   : > { %1254 = vst [vmem:[#allocation2 + $0x74] sm:$0x1] %v1253_v38  ;;  %v638_v7 = vshll.u32 %v586_v59, 16  ;;  %v643_v58 = vshrl.u32 %v16801_v32, 16  ;;  %v646_v9 = vshll.u32 %v16801_v32, 16  ;;  %v1522_v18 = vsel %vm16510_vm0, %v1517_v57, %v1521_v30 }
  0xf0   : > { %v1794_v22 = vor.u32 %v1793_v61, %v1790_v15  ;;  %v1797_v24 = vshll.u32 %v1375_v1, 16  ;;  %v1801_v25 = vshrl.u32 %v1375_v1, 16  ;;  %v791_v26 = vld [vmem:[#allocation2 + $0x78] sm:$0xf]  ;;  %v883_v23 = vld [vmem:[%s16419_s18 + $0x20] sm:$0xf]  ;;  %v12962_v28 = vcombine.high %v1512_v36, %v1522_v18 }
  0xf1   : > { %v1807_v29 = vshll.u32 %v1423_v2, 16  ;;  %v12961_v31 = vcombine.low %v1512_v36, %v1522_v18  ;;  %v16829_v4 = vor.u32 %v638_v7, %v637_v21  ;;  %v641_v32 = vrot.slane %v637_v21, 4  ;;  %v884_v15 = vld [vmem:[%s16419_s18 + $0x24] sm:$0xf] }
  0xf2   : > { %v1795_v59 = vrot.slane %v1794_v22, 4  ;;  %v1799_v33 = vrot.slane %v1797_v24, 5  ;;  %v1803_v34 = vrot.slane %v1801_v25, 4  ;;  %2123 = vmatprep.mubr.bf16.mxu0 %v12962_v28  ;;  %v16833_v30 = vrot.slane %v643_v58, 7  ;;  %v795_v39 = vld [vmem:[#allocation2 + $0x88] sm:$0x1] }
  0xf3   : > { %v1809_v60 = vrot.slane %v1807_v29, 5  ;;  %v16831_v0 = vld [vmem:[#allocation2 + $0x68] sm:$0xff]  ;;  %v792_v37 = vsel %vm16494_vm2, %v16829_v4, %v791_v26  ;;  %v976_v41 = vshrl.u32 %v883_v23, 16  ;;  %2124 = vmatmul.mubr.bf16.gmra.mxu0 %v12961_v31  ;;  %v979_v21 = vshll.u32 %v883_v23, 16  ;;  %v372_v25 = vld [vmem:[#allocation2 + $0x90] sm:$0x11] }
  0xf4   : > { %v1800_v36 = vsel %vm16510_vm0, %v1795_v59, %v1799_v33  ;;  %v1804_v42 = vor.u32 %v1803_v34, %v1799_v33  ;;  %v1533_v45 = vshll.u32 %v16831_v0, 16  ;;  %v1537_v43 = vshrl.u32 %v16831_v0, 16  ;;  %793 = vst [vmem:[#allocation2 + $0x78] sm:$0xf] %v792_v37  ;;  %v431_v26 = vld [vmem:[#allocation2 + $0xa0] sm:$0x11] }
  0xf5   : > { %v16842_v49 = vld [vmem:[#allocation2 + $0x60] sm:$0xff]  ;;  %v648_v38 = vor.u32 %v646_v9, %v16833_v30  ;;  %v650_v57 = vrot.slane %v16833_v30, 4  ;;  %v16847_v61 = vrot.slane %v976_v41, 7  ;;  %v1255_v59 = vld [vmem:[#allocation2 + $0x7c] sm:$0xf]  ;;  %vm2693_vm3 = vcmask 1042432  }
  0xf6   : > { %v1412_v50 = vld [vmem:[#allocation2 + $0x70] sm:$0x11]  ;;  %v1805_v1 = vrot.slane %v1804_v42, 4  ;;  %v1524_v2 = vshrl.u32 %v16842_v49, 16  ;;  %v1527_v7 = vshll.u32 %v16842_v49, 16  ;;  %v1535_v58 = vrot.slane %v1533_v45, 5 }
  0xf7   : > { %v1539_v18 = vrot.slane %v1537_v43, 4  ;;  %v1543_v22 = vshll.u32 %v1412_v50, 16  ;;  %v649_v24 = vsel %vm16485_vm1, %v641_v32, %v648_v38  ;;  %v796_v9 = vsel %vm16435_vm4, %v650_v57, %v795_v39  ;;  %v885_v33 = vld [vmem:[%s16419_s18 + $0x28] sm:$0xf]  ;;  %v886_v39 = vld [vmem:[%s16419_s18 + $0x2c] sm:$0xf] }
  0xf8   : > { %v1810_v23 = vsel %vm16510_vm0, %v1805_v1, %v1809_v60  ;;  %v1526_v28 = vrot.slane %v1524_v2, 4  ;;  %v1529_v29 = vrot.slane %v1527_v7, 5  ;;  %794 = vst [vmem:[#allocation2 + $0x80] sm:$0xf] %v649_v24  ;;  %797 = vst [vmem:[#allocation2 + $0x88] sm:$0x1] %v796_v9  ;;  %v981_v31 = vor.u32 %v979_v21, %v16847_v61 }
  0xf9   : > { %801 = vst [vmem:[#allocation2 + $0x98] sm:$0xf] %v649_v24  ;;  %v12986_v34 = vcombine.high %v1800_v36, %v1810_v23  ;;  %v12985_v32 = vcombine.low %v1800_v36, %v1810_v23  ;;  %v1540_v37 = vor.u32 %v1539_v18, %v1535_v58  ;;  %v1545_v41 = vrot.slane %v1543_v22, 5  ;;  %v375_v42 = vld [vmem:[#allocation2 + $0xa8] sm:$0x11] }
  0xfa   : > { %v1530_v45 = vor.u32 %v1529_v29, %v1526_v28  ;;  %v982_v43 = vrot.slane %v16847_v61, 4  ;;  %v984_v50 = vshrl.u32 %v884_v15, 16  ;;  %v987_v60 = vshll.u32 %v884_v15, 16  ;;  %v434_v38 = vld [vmem:[#allocation2 + $0xb8] sm:$0x11] }
  0xfb   : > { %2219 = vmatprep.mubr.bf16.mxu1 %v12986_v34  ;;  %v1541_v1 = vrot.slane %v1540_v37, 4  ;;  %v1256_v21 = vsel %vm16494_vm2, %v981_v31, %v1255_v59  ;;  %v1259_v2 = vld [vmem:[#allocation2 + $0x8c] sm:$0x1]  ;;  %v373_v7 = vsel %vm16456_vm10, 0, %v372_v25  ;;  %v432_v36 = vsel %vm16462_vm12, 0, %v431_v26 }
  0xfc   : > { %2220 = vmatmul.mubr.bf16.gmra.mxu1 %v12985_v32  ;;  %v1531_v18 = vrot.slane %v1530_v45, 4  ;;  %v986_v22 = vrot.slane %v984_v50, 7  ;;  %1257 = vst [vmem:[#allocation2 + $0x7c] sm:$0xf] %v1256_v21  ;;  %374 = vst [vmem:[#allocation2 + $0x90] sm:$0x11] %v373_v7 }
  0xfd   : > { %433 = vst [vmem:[#allocation2 + $0xa0] sm:$0x11] %v432_v36  ;;  %v993_v15 = vshrl.u32 %v885_v33, 16  ;;  %v996_v61 = vshll.u32 %v885_v33, 16  ;;  %v1546_v24 = vsel %vm16510_vm0, %v1541_v1, %v1545_v41  ;;  %2516 = vmatprep.mubr.bf16.mxu1 %v13004_v63  ;;  %v1001_v9 = vshrl.u32 %v886_v39, 16  ;;  %v15586_v21 = vld [vmem:[#allocation9 + $0x1b8] sm:$0xff]  }
  0xfe   : > { %v1004_v25 = vshll.u32 %v886_v39, 16  ;;  %v376_v26 = vsel %vm16456_vm10, 0, %v375_v42  ;;  %v1536_v23 = vsel %vm16510_vm0, %v1531_v18, %v1535_v58  ;;  %v989_v28 = vor.u32 %v987_v60, %v986_v22  ;;  %v588_v59 = vld [vmem:[%s16411_s15 + $0x18] sm:$0xf]  ;;  %v16882_v63 = vld [vmem:[%s16411_s15 + $0x1c] sm:$0xf] }
  0xff   : > { %v991_v29 = vrot.slane %v986_v22, 4  ;;  %v995_v31 = vrot.slane %v993_v15, 7  ;;  %377 = vst [vmem:[#allocation2 + $0xa8] sm:$0x11] %v376_v26  ;;  %v12964_v33 = vcombine.high %v1536_v23, %v1546_v24  ;;  %v12963_v34 = vcombine.low %v1536_v23, %v1546_v24  ;;  %v16885_v41 = vld [vmem:[%s16419_s18 + $0x30] sm:$0xf] }
 0x100   : > { %v1003_v32 = vrot.slane %v1001_v9, 7  ;;  %v435_v37 = vsel %vm16462_vm12, 0, %v434_v38  ;;  %v990_v39 = vsel %vm16485_vm1, %v982_v43, %v989_v28  ;;  %v652_v38 = vshrl.u32 %v588_v59, 16  ;;  %v15592_v7 = vld [vmem:[#allocation9 + $0x1f0] sm:$0xff]  }
 0x101   : > { %v1260_v58 = vsel %vm16435_vm4, %v991_v29, %v1259_v2  ;;  %v998_v42 = vor.u32 %v996_v61, %v995_v31  ;;  %v999_v45 = vrot.slane %v995_v31, 4  ;;  %436 = vst [vmem:[#allocation2 + $0xb8] sm:$0x11] %v435_v37  ;;  %2131 = vmatprep.mubr.bf16.mxu0 %v12964_v33  ;;  %1258 = vst [vmem:[#allocation2 + $0x84] sm:$0xf] %v990_v39  ;;  %v655_v1 = vshll.u32 %v588_v59, 16 }
 0x102   : > { %1261 = vst [vmem:[#allocation2 + $0x8c] sm:$0x1] %v1260_v58  ;;  %v1006_v50 = vor.u32 %v1004_v25, %v1003_v32  ;;  %v1008_v60 = vrot.slane %v1003_v32, 4  ;;  %2132 = vmatmul.mubr.bf16.gmra.mxu0 %v12963_v34  ;;  %v660_v36 = vshrl.u32 %v16882_v63, 16  ;;  %v663_v43 = vshll.u32 %v16882_v63, 16 }
 0x103   : > { %v16894_v18 = vld [vmem:[%s16419_s18 + $0x34] sm:$0xf]  ;;  %v1010_v2 = vshrl.u32 %v16885_v41, 16  ;;  %v1013_v22 = vshll.u32 %v16885_v41, 16  ;;  %v798_v61 = vld [vmem:[#allocation2 + $0x90] sm:$0xf]  ;;  %v13009_v26 = vcombine.low %v16759_v19, %v16787_v56  ;;  %v13012_v23 = vcombine.high %v16842_v49, %v16831_v0 }
 0x104   : > { %v16898_v15 = vld [vmem:[#allocation2 + $0x78] sm:$0xff]  ;;  %v802_v24 = vld [vmem:[#allocation2 + $0xa0] sm:$0x1]  ;;  %v1007_v9 = vsel %vm16485_vm1, %v999_v45, %v1006_v50  ;;  %v654_v25 = vrot.slane %v652_v38, 7  ;;  %2517 = vmatmul.mubr.bf16.vlgmr.msra.gmra.mxu1 %v13003_v46  ;;  %v799_v31 = vsel %vm16494_vm2, %v16829_v4, %v798_v61  ;;  %v1262_v33 = vld [vmem:[#allocation2 + $0x94] sm:$0xf] }
 0x105   : > { %v1548_v28 = vshrl.u32 %v16898_v15, 16  ;;  %v1551_v29 = vshll.u32 %v16898_v15, 16  ;;  %v803_v59 = vsel %vm16435_vm4, %v650_v57, %v802_v24  ;;  %1265 = vst [vmem:[#allocation2 + $0x9c] sm:$0xf] %v1007_v9  ;;  %v1266_v34 = vld [vmem:[#allocation2 + $0xa4] sm:$0x1]  ;;  %2524 = vmatprep.mubr.bf16.mxu1 %v13006_v27  ;;  %v1263_v55 = vsel %vm16494_vm2, %v998_v42, %v1262_v33  ;;  %14110 = vmatpush3.bf16.msra.mxu1 %v15586_v21 }
 0x106   : > { %800 = vst [vmem:[#allocation2 + $0x90] sm:$0xf] %v799_v31  ;;  %804 = vst [vmem:[#allocation2 + $0xa0] sm:$0x1] %v803_v59  ;;  %v1267_v62 = vsel %vm16435_vm4, %v1008_v60, %v1266_v34  ;;  %v16925_v46 = vor.u32 %v655_v1, %v654_v25  ;;  %v658_v4 = vrot.slane %v654_v25, 4  ;;  %v15594_v57 = vld [vmem:[#allocation9 + $0x1b0] sm:$0xff]   ;;  %14111 = vmatprep.subr.bf16.mxu1 %v15592_v7 }
 0x107   : > { %v805_v30 = vld [vmem:[#allocation2 + $0xa8] sm:$0xf]  ;;  %v1550_v32 = vrot.slane %v1548_v28, 4  ;;  %v1553_v37 = vrot.slane %v1551_v29, 5  ;;  %1264 = vst [vmem:[#allocation2 + $0x94] sm:$0xf] %v1263_v55  ;;  %v13011_v60 = vcombine.low %v16842_v49, %v16831_v0 }
 0x108   : > { %1268 = vst [vmem:[#allocation2 + $0xa4] sm:$0x1] %v1267_v62  ;;  %v16927_v63 = vrot.slane %v660_v36, 7  ;;  %v16929_v27 = vrot.slane %v1010_v2, 7  ;;  %v15600_v41 = vld [vmem:[#allocation9 + $0x1e8] sm:$0xff]   ;;  %v806_v39 = vsel %vm16494_vm2, %v16925_v46, %v805_v30  ;;  %v1018_v42 = vshrl.u32 %v16894_v18, 16 }
 0x109   : > { %v809_v58 = vld [vmem:[#allocation2 + $0xb8] sm:$0x1]  ;;  %v1021_v45 = vshll.u32 %v16894_v18, 16  ;;  %v1269_v50 = vld [vmem:[#allocation2 + $0xac] sm:$0xf]  ;;  %v15602_v38 = vld [vmem:[#allocation9 + $0x1a8] sm:$0xff]   ;;  %v1554_v36 = vor.u32 %v1553_v37, %v1550_v32  ;;  %14112 = vmatpush3.bf16.msra.mxu1 %v15594_v57 }
 0x10a   : > { %v16938_v1 = vld [vmem:[#allocation2 + $0x80] sm:$0xff]  ;;  %v1413_v21 = vld [vmem:[#allocation2 + $0x88] sm:$0x11]  ;;  %v665_v7 = vor.u32 %v663_v43, %v16927_v63  ;;  %v667_v2 = vrot.slane %v16927_v63, 4  ;;  %807 = vst [vmem:[#allocation2 + $0xa8] sm:$0xf] %v806_v39  ;;  %v1015_v61 = vor.u32 %v1013_v22, %v16929_v27  ;;  %14113 = vmatprep.subr.bf16.mxu1 %v15600_v41 }
 0x10b   : > { %v378_v24 = vld [vmem:[#allocation2 + $0xc0] sm:$0x11]  ;;  %v437_v9 = vld [vmem:[#allocation2 + $0xd0] sm:$0x11]  ;;  %v15608_v25 = vld [vmem:[#allocation9 + $0x1e0] sm:$0xff]   ;;  %v1557_v18 = vshll.u32 %v16938_v1, 16  ;;  %v13014_v56 = vcombine.high %v16898_v15, %v16938_v1  ;;  %v13013_v0 = vcombine.low %v16898_v15, %v16938_v1 }
 0x10c   : > { %v1561_v28 = vshrl.u32 %v16938_v1, 16  ;;  %v1567_v29 = vshll.u32 %v1413_v21, 16  ;;  %v1016_v31 = vrot.slane %v16929_v27, 4  ;;  %v1555_v59 = vrot.slane %v1554_v36, 4  ;;  %v16952_v30 = vld [vmem:[#allocation2 + $0x98] sm:$0xff]  ;;  %2525 = vmatmul.mubr.bf16.gmra.mxu1 %v13005_v54  ;;  %v15609_v54 = vld [vmem:[#allocation9 + $0x1a0] sm:$0xff]  }
 0x10d   : > { %v666_v43 = vsel %vm16485_vm1, %v658_v4, %v665_v7  ;;  %v810_v22 = vsel %vm16435_vm4, %v667_v2, %v809_v58  ;;  %v1020_v33 = vrot.slane %v1018_v42, 7  ;;  %v1559_v34 = vrot.slane %v1557_v18, 5  ;;  %v16957_v4 = vld [vmem:[%s16419_s18 + $0x38] sm:$0xf]  ;;  %v1273_v39 = vld [vmem:[#allocation2 + $0xbc] sm:$0x1]  ;;  %2532 = vmatprep.mubr.bf16.mxu1 %v13008_v35  ;;  %14114 = vmatpush3.bf16.msra.mxu1 %v15602_v38 }
 0x10e   : > { %v1563_v55 = vrot.slane %v1561_v28, 4  ;;  %v1569_v62 = vrot.slane %v1567_v29, 5  ;;  %808 = vst [vmem:[#allocation2 + $0xb0] sm:$0xf] %v666_v43  ;;  %811 = vst [vmem:[#allocation2 + $0xb8] sm:$0x1] %v810_v22  ;;  %v1270_v57 = vsel %vm16494_vm2, %v1015_v61, %v1269_v50  ;;  %14115 = vmatprep.subr.bf16.mxu1 %v15608_v25 }
 0x10f   : > { %815 = vst [vmem:[#allocation2 + $0xc8] sm:$0xf] %v666_v43  ;;  %v1581_v32 = vshll.u32 %v16952_v30, 16  ;;  %v1585_v37 = vshrl.u32 %v16952_v30, 16  ;;  %v1023_v27 = vor.u32 %v1021_v45, %v1020_v33  ;;  %v1025_v41 = vrot.slane %v1020_v33, 4  ;;  %v16969_v21 = vld [vmem:[#allocation2 + $0x90] sm:$0xff] }
 0x110   : > { %1271 = vst [vmem:[#allocation2 + $0xac] sm:$0xf] %v1270_v57  ;;  %v16965_v58 = vld [vmem:[%s16419_s18 + $0x3c] sm:$0xf]  ;;  %v1560_v42 = vsel %vm16510_vm0, %v1555_v59, %v1559_v34  ;;  %v1564_v50 = vor.u32 %v1563_v55, %v1559_v34  ;;  %v379_v11 = vsel %vm16456_vm10, 0, %v378_v24  ;;  %v438_v20 = vsel %vm16462_vm12, 0, %v437_v9 }
 0x111   : > { %v16971_v36 = vld [vmem:[#allocation2 + $0xa0] sm:$0x11]  ;;  %v1572_v45 = vshrl.u32 %v16969_v21, 16  ;;  %v1575_v7 = vshll.u32 %v16969_v21, 16  ;;  %v1583_v61 = vrot.slane %v1581_v32, 5  ;;  %v1587_v18 = vrot.slane %v1585_v37, 4  ;;  %14116 = vmatpush3.bf16.msra.mxu1 %v15609_v54 }
 0x112   : > { %380 = vst [vmem:[#allocation2 + $0xc0] sm:$0x11] %v379_v11  ;;  %439 = vst [vmem:[#allocation2 + $0xd0] sm:$0x11] %v438_v20  ;;  %v15612_v28 = vld [vmem:[#allocation9 + $0x1d8] sm:$0xff]   ;;  %v1565_v29 = vrot.slane %v1564_v50, 4  ;;  %v1024_v24 = vsel %vm16485_vm1, %v1016_v31, %v1023_v27  ;;  %v1274_v38 = vsel %vm16435_vm4, %v1025_v41, %v1273_v39 }
 0x113   : > { %v1591_v35 = vshll.u32 %v16971_v36, 16  ;;  %v381_v9 = vld [vmem:[#allocation2 + $0xd8] sm:$0x11]  ;;  %v1574_v59 = vrot.slane %v1572_v45, 4  ;;  %v1577_v43 = vrot.slane %v1575_v7, 5  ;;  %v1588_v22 = vor.u32 %v1587_v18, %v1583_v61  ;;  %14117 = vmatprep.subr.bf16.mxu1 %v15612_v28  ;;  %v15614_v41 = vld [vmem:[#allocation9 + $0x198] sm:$0xff]  }
 0x114   : > { %1272 = vst [vmem:[#allocation2 + $0xb4] sm:$0xf] %v1024_v24  ;;  %1275 = vst [vmem:[#allocation2 + $0xbc] sm:$0x1] %v1274_v38  ;;  %v1027_v33 = vshrl.u32 %v16957_v4, 16  ;;  %v1570_v25 = vsel %vm16510_vm0, %v1565_v29, %v1569_v62  ;;  %v1030_v55 = vshll.u32 %v16957_v4, 16  ;;  %2533 = vmatmul.mubr.bf16.gmra.mxu1 %v13007_v5 }
 0x115   : > { %v1593_v34 = vrot.slane %v1591_v35, 5  ;;  %v1035_v57 = vshrl.u32 %v16965_v58, 16  ;;  %v12966_v31 = vcombine.high %v1560_v42, %v1570_v25  ;;  %v12965_v32 = vcombine.low %v1560_v42, %v1570_v25  ;;  %v15616_v4 = vld [vmem:[#allocation9 + $0x1d0] sm:$0xff]   ;;  %v590_v18 = vld [vmem:[%s16411_s15 + $0x20] sm:$0xf]  ;;  %2540 = vmatprep.mubr.bf16.mxu1 %v13010_v16  ;;  %14118 = vmatpush3.bf16.msra.mxu1 %v15614_v41  ;;  %v15620_v63 = vld [vmem:[#allocation9 + $0x1c8] sm:$0xff]  }
 0x116   : > { %v1578_v37 = vor.u32 %v1577_v43, %v1574_v59  ;;  %v1589_v27 = vrot.slane %v1588_v22, 4  ;;  %v1029_v50 = vrot.slane %v1027_v33, 7  ;;  %v1038_v20 = vshll.u32 %v16965_v58, 16  ;;  %v440_v58 = vld [vmem:[#allocation2 + $0xe8] sm:$0x11]  ;;  %v15617_v28 = vld [vmem:[#allocation9 + $0x190] sm:$0xff]   ;;  %14119 = vmatprep.subr.bf16.mxu1 %v15616_v4 }
 0x117   : > { %v16992_v39 = vld [vmem:[#allocation2 + $0xa8] sm:$0xff]  ;;  %v1037_v11 = vrot.slane %v1035_v57, 7  ;;  %v382_v62 = vsel %vm16456_vm10, 0, %v381_v9  ;;  %2139 = vmatprep.mubr.bf16.mxu0 %v12966_v31  ;;  %v895_v49 = vld [vmem:[%s16419_s18 + $0x50] sm:$0xf]  ;;  %vm2694_vm5 = vcmask 1046532  }
 0x118   : > { %v1579_v45 = vrot.slane %v1578_v37, 4  ;;  %v16999_v42 = vsel %vm16510_vm0, %v1589_v27, %v1593_v34  ;;  %v1596_v54 = vshrl.u32 %v16992_v39, 16  ;;  %v1599_v7 = vshll.u32 %v16992_v39, 16  ;;  %383 = vst [vmem:[#allocation2 + $0xd8] sm:$0x11] %v382_v62  ;;  %2140 = vmatmul.mubr.bf16.gmra.mxu0 %v12965_v32  ;;  %vm17204_vm6 = vmor %vm2693_vm3, %vm2694_vm5 }
 0x119   : > { %v812_v29 = vld [vmem:[#allocation2 + $0xc0] sm:$0xf]  ;;  %v816_v35 = vld [vmem:[#allocation2 + $0xd0] sm:$0x1]  ;;  %v1032_v24 = vor.u32 %v1030_v55, %v1029_v50  ;;  %v1033_v38 = vrot.slane %v1029_v50, 4  ;;  %v1040_v9 = vor.u32 %v1038_v20, %v1037_v11  ;;  %v1042_v47 = vrot.slane %v1037_v11, 4  ;;  %14120 = vmatpush3.bf16.msra.mxu1 %v15617_v28 }
 0x11a   : > { %v1584_v17 = vsel %vm16510_vm0, %v1579_v45, %v1583_v61  ;;  %v1598_v5 = vrot.slane %v1596_v54, 4  ;;  %v1601_v59 = vrot.slane %v1599_v7, 5  ;;  %v813_v43 = vsel %vm16494_vm2, %v16925_v46, %v812_v29  ;;  %v1276_v22 = vld [vmem:[#allocation2 + $0xc4] sm:$0xf]  ;;  %v1280_v33 = vld [vmem:[#allocation2 + $0xd4] sm:$0x1]  ;;  %14121 = vmatprep.subr.bf16.mxu1 %v15620_v63 }
 0x11b   : > { %v12968_v16 = vcombine.high %v1584_v17, %v16999_v42  ;;  %v12967_v25 = vcombine.low %v1584_v17, %v16999_v42  ;;  %v17017_v34 = vld [vmem:[#allocation2 + $0xb0] sm:$0xff]  ;;  %v17019_v55 = vld [vmem:[#allocation2 + $0xb8] sm:$0x11]  ;;  %814 = vst [vmem:[#allocation2 + $0xc0] sm:$0xf] %v813_v43  ;;  %v817_v61 = vsel %vm16435_vm4, %v667_v2, %v816_v35  ;;  %v1041_v46 = vsel %vm16485_vm1, %v1033_v38, %v1040_v9 }
 0x11c   : > { %v591_v57 = vld [vmem:[%s16411_s15 + $0x24] sm:$0xf]  ;;  %v1602_v31 = vor.u32 %v1601_v59, %v1598_v5  ;;  %v1605_v32 = vshll.u32 %v17017_v34, 16  ;;  %v1609_v37 = vshrl.u32 %v17017_v34, 16  ;;  %v1615_v27 = vshll.u32 %v17019_v55, 16  ;;  %2541 = vmatmul.mubr.bf16.gmra.mxu1 %v13009_v26  ;;  %v15621_v43 = vld [vmem:[#allocation9 + $0x188] sm:$0xff]  }
 0x11d   : > { %818 = vst [vmem:[#allocation2 + $0xd0] sm:$0x1] %v817_v61  ;;  %1279 = vst [vmem:[#allocation2 + $0xcc] sm:$0xf] %v1041_v46  ;;  %v891_v41 = vld [vmem:[%s16419_s18 + $0x40] sm:$0xf]  ;;  %2147 = vmatprep.mubr.bf16.mxu0 %v12968_v16  ;;  %v1277_v2 = vsel %vm16494_vm2, %v1032_v24, %v1276_v22  ;;  %v1281_v50 = vsel %vm16435_vm4, %v1042_v47, %v1280_v33  ;;  %2548 = vmatprep.mubr.bf16.mxu1 %v13012_v23 }
 0x11e   : > { %v441_v11 = vsel %vm16462_vm12, 0, %v440_v58  ;;  %v669_v20 = vshrl.u32 %v590_v18, 16  ;;  %v17039_v62 = vld [vmem:[%s16419_s18 + $0x44] sm:$0xf]  ;;  %v1603_v4 = vrot.slane %v1602_v31, 4  ;;  %v1607_v45 = vrot.slane %v1605_v32, 5  ;;  %14122 = vmatpush3.bf16.msra.mxu1 %v15621_v43 }
 0x11f   : > { %v1611_v42 = vrot.slane %v1609_v37, 4  ;;  %v1617_v54 = vrot.slane %v1615_v27, 5  ;;  %1278 = vst [vmem:[#allocation2 + $0xc4] sm:$0xf] %v1277_v2  ;;  %1282 = vst [vmem:[#allocation2 + $0xd4] sm:$0x1] %v1281_v50 }
 0x120   : > { %442 = vst [vmem:[#allocation2 + $0xe8] sm:$0x11] %v441_v11  ;;  %v671_v7 = vrot.slane %v669_v20, 7  ;;  %v672_v29 = vshll.u32 %v590_v18, 16  ;;  %v677_v35 = vshrl.u32 %v591_v57, 16  ;;  %v680_v24 = vshll.u32 %v591_v57, 16  ;;  %2148 = vmatmul.mubr.bf16.gmra.mxu0 %v12967_v25 }
 0x121   : > { %v17043_v38 = vsel %vm16510_vm0, %v1603_v4, %v1607_v45  ;;  %v1612_v58 = vor.u32 %v1611_v42, %v1607_v45  ;;  %v819_v9 = vld [vmem:[#allocation2 + $0xd8] sm:$0xf]  ;;  %v1044_v47 = vshrl.u32 %v891_v41, 16  ;;  %v1047_v17 = vshll.u32 %v891_v41, 16  ;;  %v15622_v26 = vld [vmem:[#allocation9 + $0x1c0] sm:$0xff]   ;;  %s12806_s15 = scalar_lea.sflag [#allocation6], %s16407_s7 }
 0x122   : > { %v17051_v18 = vor.u32 %v672_v29, %v671_v7  ;;  %v675_v28 = vrot.slane %v671_v7, 4  ;;  %v17053_v5 = vrot.slane %v677_v35, 7  ;;  %v1052_v59 = vshrl.u32 %v17039_v62, 16  ;;  %v1283_v57 = vld [vmem:[#allocation2 + $0xdc] sm:$0xf]  ;;  %v15623_v31 = vld [vmem:[#allocation9 + $0x180] sm:$0xff]   ;;  %14123 = vmatprep.subr.bf16.mxu1 %v15622_v26 }
 0x123   : > { %v1613_v22 = vrot.slane %v1612_v58, 4  ;;  %v1046_v33 = vrot.slane %v1044_v47, 7  ;;  %v1055_v19 = vshll.u32 %v17039_v62, 16  ;;  %v384_v45 = vld [vmem:[#allocation2 + $0xf0] sm:$0x11]  ;;  %14124 = vmatpush3.bf16.msra.mxu1 %v15623_v31 }
 0x124   : > { %v17059_v16 = vld [vmem:[#allocation2 + $0xc8] sm:$0xff]  ;;  %v682_v23 = vor.u32 %v680_v24, %v17053_v5  ;;  %v684_v25 = vrot.slane %v17053_v5, 4  ;;  %v820_v61 = vsel %vm16494_vm2, %v17051_v18, %v819_v9  ;;  %v1054_v46 = vrot.slane %v1052_v59, 7  ;;  %v443_v42 = vld [vmem:[#allocation2 + $0x100] sm:$0x11]  ;;  %2549 = vmatmul.mubr.bf16.gmra.mxu1 %v13011_v60 }
 0x125   : > { %v1618_v32 = vsel %vm16510_vm0, %v1613_v22, %v1617_v54  ;;  %v1629_v37 = vshll.u32 %v17059_v16, 16  ;;  %v1633_v27 = vshrl.u32 %v17059_v16, 16  ;;  %821 = vst [vmem:[#allocation2 + $0xd8] sm:$0xf] %v820_v61  ;;  %v1049_v41 = vor.u32 %v1047_v17, %v1046_v33  ;;  %v387_v26 = vld [vmem:[#allocation2 + $0x108] sm:$0x11]  ;;  %2556 = vmatprep.mubr.bf16.mxu1 %v13014_v56 }
 0x126   : > { %v12970_v63 = vcombine.high %v17043_v38, %v1618_v32  ;;  %v12969_v2 = vcombine.low %v17043_v38, %v1618_v32  ;;  %v17072_v50 = vld [vmem:[#allocation2 + $0xc0] sm:$0xff]  ;;  %v17074_v11 = vld [vmem:[#allocation2 + $0xd0] sm:$0x11]  ;;  %v683_v20 = vsel %vm16485_vm1, %v675_v28, %v682_v23  ;;  %v1050_v4 = vrot.slane %v1046_v33, 4  ;;  %v446_v23 = vld [vmem:[#allocation2 + $0x118] sm:$0x11] }
 0x127   : > { %v823_v62 = vld [vmem:[#allocation2 + $0xe8] sm:$0x1]  ;;  %v1620_v54 = vshrl.u32 %v17072_v50, 16  ;;  %v1623_v7 = vshll.u32 %v17072_v50, 16  ;;  %v1631_v29 = vrot.slane %v1629_v37, 5  ;;  %v1635_v35 = vrot.slane %v1633_v27, 4 }
 0x128   : > { %822 = vst [vmem:[#allocation2 + $0xe0] sm:$0xf] %v683_v20  ;;  %v1287_v24 = vld [vmem:[#allocation2 + $0xec] sm:$0x1]  ;;  %829 = vst [vmem:[#allocation2 + $0xf8] sm:$0xf] %v683_v20  ;;  %2155 = vmatprep.mubr.bf16.mxu0 %v12970_v63  ;;  %v824_v9 = vsel %vm16435_vm4, %v684_v25, %v823_v62  ;;  %v1057_v47 = vor.u32 %v1055_v19, %v1054_v46  ;;  %v1284_v33 = vsel %vm16494_vm2, %v1049_v41, %v1283_v57 }
 0x129   : > { %v893_v38 = vld [vmem:[%s16419_s18 + $0x48] sm:$0xf]  ;;  %v1639_v58 = vshll.u32 %v17074_v11, 16  ;;  %v1059_v17 = vrot.slane %v1054_v46, 4  ;;  %v894_v28 = vld [vmem:[%s16419_s18 + $0x4c] sm:$0xf]  ;;  %v1636_v22 = vor.u32 %v1635_v35, %v1631_v29  ;;  %2156 = vmatmul.mubr.bf16.gmra.mxu0 %v12969_v2  ;;  %v13016_v2 = vcombine.high %v16969_v21, %v16952_v30 }
 0x12a   : > { %v1622_v59 = vrot.slane %v1620_v54, 4  ;;  %v1625_v43 = vrot.slane %v1623_v7, 5  ;;  %825 = vst [vmem:[#allocation2 + $0xe8] sm:$0x1] %v824_v9  ;;  %v1058_v61 = vsel %vm16485_vm1, %v1050_v4, %v1057_v47  ;;  %1285 = vst [vmem:[#allocation2 + $0xdc] sm:$0xf] %v1284_v33  ;;  %v13015_v20 = vcombine.low %v16969_v21, %v16952_v30 }
 0x12b   : > { %v1641_v19 = vrot.slane %v1639_v58, 5  ;;  %v1288_v46 = vsel %vm16435_vm4, %v1059_v17, %v1287_v24  ;;  %v17100_v60 = vld [vmem:[%s16419_s18 + $0x54] sm:$0xf]  ;;  %v1637_v57 = vrot.slane %v1636_v22, 4  ;;  %1286 = vst [vmem:[#allocation2 + $0xe4] sm:$0xf] %v1058_v61  ;;  %v13018_v61 = vcombine.high %v16992_v39, %v17017_v34 }
 0x12c   : > { %v1626_v31 = vor.u32 %v1625_v43, %v1622_v59  ;;  %1289 = vst [vmem:[#allocation2 + $0xec] sm:$0x1] %v1288_v46  ;;  %v385_v32 = vsel %vm16456_vm10, 0, %v384_v45  ;;  %v444_v37 = vsel %vm16462_vm12, 0, %v443_v42  ;;  %v1061_v27 = vshrl.u32 %v893_v38, 16  ;;  %2557 = vmatmul.mubr.bf16.gmra.mxu1 %v13013_v0 }
 0x12d   : > { %386 = vst [vmem:[#allocation2 + $0xf0] sm:$0x11] %v385_v32  ;;  %445 = vst [vmem:[#allocation2 + $0x100] sm:$0x11] %v444_v37  ;;  %v1064_v56 = vshll.u32 %v893_v38, 16  ;;  %v1069_v41 = vshrl.u32 %v894_v28, 16  ;;  %v1642_v1 = vsel %vm16510_vm0, %v1637_v57, %v1641_v19  ;;  %2564 = vmatprep.mubr.bf16.mxu1 %v13016_v2 }
 0x12e   : > { %v1072_v63 = vshll.u32 %v894_v28, 16  ;;  %v1627_v15 = vrot.slane %v1626_v31, 4  ;;  %v1063_v62 = vrot.slane %v1061_v27, 7  ;;  %v388_v45 = vsel %vm16456_vm10, 0, %v387_v26 }
 0x12f   : > { %v1071_v4 = vrot.slane %v1069_v41, 7  ;;  %v447_v42 = vsel %vm16462_vm12, 0, %v446_v23  ;;  %389 = vst [vmem:[#allocation2 + $0x108] sm:$0x11] %v388_v45  ;;  %v1078_v7 = vshrl.u32 %v895_v49, 16  ;;  %v1081_v35 = vshll.u32 %v895_v49, 16 }
 0x130   : > { %v1632_v54 = vsel %vm16510_vm0, %v1627_v15, %v1631_v29  ;;  %448 = vst [vmem:[#allocation2 + $0x118] sm:$0x11] %v447_v42  ;;  %v1086_v24 = vshrl.u32 %v17100_v60, 16  ;;  %v1066_v9 = vor.u32 %v1064_v56, %v1063_v62  ;;  %v1067_v47 = vrot.slane %v1063_v62, 4 }
 0x131   : > { %v12972_v38 = vcombine.high %v1632_v54, %v1642_v1  ;;  %v12971_v58 = vcombine.low %v1632_v54, %v1642_v1  ;;  %v17119_v17 = vld [vmem:[#allocation2 + $0xd8] sm:$0xff]  ;;  %v1074_v28 = vor.u32 %v1072_v63, %v1071_v4  ;;  %v1076_v59 = vrot.slane %v1071_v4, 4 }
 0x132   : > { %v1080_v43 = vrot.slane %v1078_v7, 7  ;;  %v1088_v22 = vrot.slane %v1086_v24, 7  ;;  %v17121_v33 = vld [vmem:[#allocation2 + $0xe0] sm:$0xff]  ;;  %v1644_v26 = vshrl.u32 %v17119_v17, 16  ;;  %v1647_v23 = vshll.u32 %v17119_v17, 16  ;;  %v17544_v13 = vld [vmem:[#allocation2 + $0xd8] sm:$0xff] }
 0x133   : > { %2163 = vmatprep.mubr.bf16.mxu0 %v12972_v38  ;;  %v17123_v29 = vld [vmem:[#allocation2 + $0xe8] sm:$0x11]  ;;  %v1089_v19 = vshll.u32 %v17100_v60, 16  ;;  %v1653_v46 = vshll.u32 %v17121_v33, 16  ;;  %v1657_v0 = vshrl.u32 %v17121_v33, 16  ;;  %v1075_v57 = vsel %vm16485_vm1, %v1067_v47, %v1074_v28 }
 0x134   : > { %2164 = vmatmul.mubr.bf16.gmra.mxu0 %v12971_v58  ;;  %v1663_v49 = vshll.u32 %v17123_v29, 16  ;;  %v826_v31 = vld [vmem:[#allocation2 + $0xf0] sm:$0xf]  ;;  %v1646_v32 = vrot.slane %v1644_v26, 4  ;;  %v1649_v37 = vrot.slane %v1647_v23, 5  ;;  %v1083_v41 = vor.u32 %v1081_v35, %v1080_v43  ;;  %2565 = vmatmul.mubr.bf16.gmra.mxu1 %v13015_v20 }
 0x135   : > { %v827_v60 = vsel %vm16494_vm2, %v17051_v18, %v826_v31  ;;  %v830_v27 = vld [vmem:[#allocation2 + $0x100] sm:$0x1]  ;;  %v1290_v56 = vld [vmem:[#allocation2 + $0xf4] sm:$0xf]  ;;  %1293 = vst [vmem:[#allocation2 + $0xfc] sm:$0xf] %v1075_v57  ;;  %v1091_v24 = vor.u32 %v1089_v19, %v1088_v22  ;;  %2572 = vmatprep.mubr.bf16.mxu1 %v13018_v61  ;;  %v13017_v19 = vcombine.low %v16992_v39, %v17017_v34 }
 0x136   : > { %v1655_v63 = vrot.slane %v1653_v46, 5  ;;  %v1659_v15 = vrot.slane %v1657_v0, 4  ;;  %v1665_v1 = vrot.slane %v1663_v49, 5  ;;  %828 = vst [vmem:[#allocation2 + $0xf0] sm:$0xf] %v827_v60  ;;  %v831_v2 = vsel %vm16435_vm4, %v684_v25, %v830_v27 }
 0x137   : > { %v1294_v62 = vld [vmem:[#allocation2 + $0x104] sm:$0x1]  ;;  %v1650_v4 = vor.u32 %v1649_v37, %v1646_v32  ;;  %832 = vst [vmem:[#allocation2 + $0x100] sm:$0x1] %v831_v2  ;;  %v1291_v45 = vsel %vm16494_vm2, %v1066_v9, %v1290_v56  ;;  %v833_v42 = vld [vmem:[#allocation2 + $0x108] sm:$0xf]  ;;  %v13020_v31 = vcombine.high %v17072_v50, %v17059_v16 }
 0x138   : > { %v1295_v18 = vsel %vm16435_vm4, %v1076_v59, %v1294_v62  ;;  %v837_v54 = vld [vmem:[#allocation2 + $0x118] sm:$0x1]  ;;  %v1084_v7 = vrot.slane %v1080_v43, 4  ;;  %v1660_v35 = vor.u32 %v1659_v15, %v1655_v63  ;;  %1292 = vst [vmem:[#allocation2 + $0xf4] sm:$0xf] %v1291_v45  ;;  %v834_v5 = vsel %vm16494_vm2, %v16489_v48, %v833_v42 }
 0x139   : > { %1296 = vst [vmem:[#allocation2 + $0x104] sm:$0x1] %v1295_v18  ;;  %v838_v25 = vsel %vm16435_vm4, %v701_v53, %v837_v54  ;;  %v1297_v38 = vld [vmem:[#allocation2 + $0x10c] sm:$0xf]  ;;  %v1301_v58 = vld [vmem:[#allocation2 + $0x11c] sm:$0x1] }
 0x13a   : > { %v1651_v9 = vrot.slane %v1650_v4, 4  ;;  %835 = vst [vmem:[#allocation2 + $0x108] sm:$0xf] %v834_v5  ;;  %839 = vst [vmem:[#allocation2 + $0x118] sm:$0x1] %v838_v25  ;;  %v1093_v47 = vrot.slane %v1088_v22, 4  ;;  %v1298_v28 = vsel %vm16494_vm2, %v1083_v41, %v1297_v38  ;;  %v1092_v40 = vsel %vm16485_vm1, %v1084_v7, %v1091_v24 }
 0x13b   : > { %v1661_v59 = vrot.slane %v1660_v35, 4  ;;  %1299 = vst [vmem:[#allocation2 + $0x10c] sm:$0xf] %v1298_v28  ;;  %1300 = vst [vmem:[#allocation2 + $0x114] sm:$0xf] %v1092_v40  ;;  %v15879_v24 = vld [vmem:[#allocation2 + $0x8] sm:$0xff]  ;;  %v13019_v28 = vcombine.low %v17072_v50, %v17059_v16 }
 0x13c   : > { %v1656_v48 = vsel %vm16510_vm0, %v1651_v9, %v1655_v63  ;;  %v1302_v53 = vsel %vm16435_vm4, %v1093_v47, %v1301_v58  ;;  %v17166_v22 = vld [vmem:[#allocation2 + $0xf8] sm:$0xff]  ;;  %2573 = vmatmul.mubr.bf16.gmra.mxu1 %v13017_v19  ;;  %v2645_v25 = vld [vmem:[#allocation2] sm:$0xee]  ;;  %v2698_v38 = vrot.slane %v15879_v24, 5 }
 0x13d   : > { %v1666_v43 = vsel %vm16510_vm0, %v1661_v59, %v1665_v1  ;;  %1303 = vst [vmem:[#allocation2 + $0x11c] sm:$0x1] %v1302_v53  ;;  %v1677_v26 = vshll.u32 %v17166_v22, 16  ;;  %v1681_v23 = vshrl.u32 %v17166_v22, 16  ;;  %2580 = vmatprep.mubr.bf16.mxu1 %v13020_v31 }
 0x13e   : > { %v12974_v21 = vcombine.high %v1656_v48, %v1666_v43  ;;  %v12973_v20 = vcombine.low %v1656_v48, %v1666_v43  ;;  %v13022_v48 = vcombine.high %v17119_v17, %v17121_v33  ;;  %v2700_v31 = vrot.slane %v2698_v38, 4 }
 0x13f   : > { %v17172_v46 = vld [vmem:[#allocation2 + $0xf0] sm:$0xff]  ;;  %v1679_v61 = vrot.slane %v1677_v26, 5  ;;  %v1683_v49 = vrot.slane %v1681_v23, 4 }
 0x140   : > { %2171 = vmatprep.mubr.bf16.mxu0 %v12974_v21  ;;  %v17174_v0 = vld [vmem:[#allocation2 + $0x100] sm:$0x11]  ;;  %v1668_v57 = vshrl.u32 %v17172_v46, 16  ;;  %v1671_v32 = vshll.u32 %v17172_v46, 16  ;;  %v15880_v23 = vld [vmem:[#allocation2 + $0x10] sm:$0x11] }
 0x141   : > { %2172 = vmatmul.mubr.bf16.gmra.mxu0 %v12973_v20  ;;  %v1687_v37 = vshll.u32 %v17174_v0, 16  ;;  %v1684_v60 = vor.u32 %v1683_v49, %v1679_v61  ;;  %v2701_v19 = vrot.slane %v15880_v23, 5  ;;  %v13051_v49 = vrot.slane %v2645_v25, 9 }
 0x142   : > { %v17181_v27 = vld [vmem:[#allocation2 + $0x108] sm:$0xff]  ;;  %v1670_v39 = vrot.slane %v1668_v57, 4  ;;  %v1673_v56 = vrot.slane %v1671_v32, 5  ;;  %v17183_v63 = vld [vmem:[#allocation2 + $0x110] sm:$0xff]  ;;  %v13023_v23 = vcombine.low %v17172_v46, %v17166_v22 }
 0x143   : > { %v1689_v41 = vrot.slane %v1687_v37, 5  ;;  %v1692_v15 = vshrl.u32 %v17181_v27, 16  ;;  %v1685_v1 = vrot.slane %v1684_v60, 4  ;;  %v1695_v62 = vshll.u32 %v17181_v27, 16  ;;  %v2646_v37 = vld [vmem:[#allocation2 + $0x18] sm:$0xee] }
 0x144   : > { %v17186_v2 = vld [vmem:[#allocation2 + $0x118] sm:$0x11]  ;;  %v1701_v4 = vshll.u32 %v17183_v63, 16  ;;  %v1705_v45 = vshrl.u32 %v17183_v63, 16  ;;  %v1674_v18 = vor.u32 %v1673_v56, %v1670_v39  ;;  %2581 = vmatmul.mubr.bf16.gmra.mxu1 %v13019_v28  ;;  %v15881_v60 = vld [vmem:[#allocation2 + $0x20] sm:$0xff]  ;;  %v17210_v56 = vsel %vm17204_vm6, %v13051_v49, %v2698_v38 }
 0x145   : > { %v1694_v42 = vrot.slane %v1692_v15, 4  ;;  %v1711_v54 = vshll.u32 %v17186_v2, 16  ;;  %v1697_v7 = vrot.slane %v1695_v62, 5  ;;  %v1690_v9 = vsel %vm16510_vm0, %v1685_v1, %v1689_v41  ;;  %2588 = vmatprep.mubr.bf16.mxu1 %v13022_v48  ;;  %v2647_v1 = vld [vmem:[#allocation2 + $0x30] sm:$0xee] }
 0x146   : > { %v1703_v35 = vrot.slane %v1701_v4, 5  ;;  %v1707_v5 = vrot.slane %v1705_v45, 4  ;;  %v1675_v58 = vrot.slane %v1674_v18, 4  ;;  %v2705_v39 = vrot.slane %v15881_v60, 5  ;;  %v2651_v45 = vld [vmem:[#allocation2 + $0x90] sm:$0xee] }
 0x147   : > { %v1713_v47 = vrot.slane %v1711_v54, 5  ;;  %v1698_v59 = vor.u32 %v1697_v7, %v1694_v42  ;;  %v17214_v41 = vsel %vm17204_vm6, %v2700_v31, %v2701_v19  ;;  %v13021_v15 = vcombine.low %v17119_v17, %v17121_v33  ;;  %v15882_v42 = vld [vmem:[#allocation2 + $0x28] sm:$0x11]  ;;  %v15883_v7 = vld [vmem:[#allocation2 + $0x38] sm:$0xff]  ;;  %v2652_v38 = vld [vmem:[#allocation2 + $0xa8] sm:$0xee] }
 0x148   : > { %v1708_v40 = vor.u32 %v1707_v5, %v1703_v35  ;;  %v1680_v53 = vsel %vm16510_vm0, %v1675_v58, %v1679_v61  ;;  %v21995_v61 = vmov 0  ;;  %v13052_v62 = vrot.slane %v2646_v37, 9  ;;  %v2654_v49 = vld [vmem:[#allocation2 + $0xd8] sm:$0xee] }
 0x149   : > { %v12976_v43 = vcombine.high %v1680_v53, %v1690_v9  ;;  %v12975_v21 = vcombine.low %v1680_v53, %v1690_v9  ;;  %v1699_v20 = vrot.slane %v1698_v59, 4  ;;  %v21996_v61 = vsel %vm17204_vm6, 4294967295, %v21995_v61  ;;  %v2653_v9 = vld [vmem:[#allocation2 + $0xc0] sm:$0xee]  ;;  %v15884_v59 = vld [vmem:[#allocation2 + $0x40] sm:$0x11] }
 0x14a   : > { %v1709_v26 = vrot.slane %v1708_v40, 4  ;;  %21997 = vst [vmem:[#allocation26_spill] sm:$0xff] %v21996_v61  ;;  %v13024_v4 = vcombine.high %v17172_v46, %v17166_v22  ;;  %v2708_v54 = vrot.slane %v15882_v42, 5  ;;  %v13068_v5 = vcombine.high %v17210_v56, %v17214_v41 }
 0x14b   : > { %2179 = vmatprep.mubr.bf16.mxu0 %v12976_v43  ;;  %v1704_v50 = vsel %vm16510_vm0, %v1699_v20, %v1703_v35  ;;  %v2712_v35 = vrot.slane %v15883_v7, 5  ;;  %v2707_v25 = vrot.slane %v2705_v39, 4  ;;  %v13053_v24 = vrot.slane %v2647_v1, 9  ;;  %v17230_v43 = vld [vmem:[#allocation2 + $0x50] sm:$0xff]  ;;  %v2656_v1 = vld [vmem:[#allocation2 + $0x108] sm:$0xee] }
 0x14c   : > { %v1714_v57 = vsel %vm16510_vm0, %v1709_v26, %v1713_v47  ;;  %2180 = vmatmul.mubr.bf16.gmra.mxu0 %v12975_v21  ;;  %2589 = vmatmul.mubr.bf16.gmra.mxu1 %v13021_v15  ;;  %v13057_v58 = vrot.slane %v2651_v45, 9  ;;  %v2740_v17 = vrot.slane %v16952_v30, 5  ;;  %v13067_v47 = vcombine.low %v17210_v56, %v17214_v41 }
 0x14d   : > { %v12978_v32 = vcombine.high %v1704_v50, %v1714_v57  ;;  %v12977_v18 = vcombine.low %v1704_v50, %v1714_v57  ;;  %v17227_v28 = vsel %vm17204_vm6, %v13052_v62, %v2705_v39  ;;  %2596 = vmatprep.mubr.bf16.mxu1 %v13024_v4  ;;  %v2715_v40 = vrot.slane %v15884_v59, 5  ;;  %v2655_v39 = vld [vmem:[#allocation2 + $0xf0] sm:$0xee]  ;;  %v15589_v62 = vld [vmem:[#allocation9 + $0x238] sm:$0xff]   ;;  %v15597_v59 = vld [vmem:[#allocation9 + $0x230] sm:$0xff]  }
 0x14e   : > { %v2743_v48 = vrot.slane %v16971_v36, 5  ;;  %v2714_v53 = vrot.slane %v2712_v35, 4  ;;  %v2719_v21 = vrot.slane %v17230_v43, 5  ;;  %v17235_v30 = vsel %vm17204_vm6, %v13057_v58, %v2740_v17 }
 0x14f   : > { %2187 = vmatprep.mubr.bf16.mxu0 %v12978_v32  ;;  %v2742_v20 = vrot.slane %v2740_v17, 4  ;;  %v17239_v26 = vsel %vm17204_vm6, %v2707_v25, %v2708_v54  ;;  %v13058_v36 = vrot.slane %v2652_v38, 9  ;;  %v2747_v19 = vrot.slane %v17017_v34, 5  ;;  %v15596_v54 = vld [vmem:[#allocation9 + $0x270] sm:$0xff]  }
 0x150   : > { %v13026_v31 = vcombine.high %v17181_v27, %v17183_v63  ;;  %v2750_v57 = vrot.slane %v17019_v55, 5  ;;  %v13059_v32 = vrot.slane %v2653_v9, 9  ;;  %v13070_v56 = vcombine.high %v17227_v28, %v17239_v26 }
 0x151   : > { %v17248_v50 = vsel %vm17204_vm6, %v2742_v20, %v2743_v48  ;;  %v17257_v34 = vsel %vm17204_vm6, %v13058_v36, %v2747_v19  ;;  %v2749_v60 = vrot.slane %v2747_v19, 4  ;;  %v17263_v41 = vsel %vm17204_vm6, %v13053_v24, %v2712_v35  ;;  %v15648_v24 = vld [vmem:[#allocation9 + $0x2f8] sm:$0xff]   ;;  %v15604_v20 = vld [vmem:[#allocation9 + $0x268] sm:$0xff]  }
 0x152   : > { %v13080_v37 = vcombine.high %v17235_v30, %v17248_v50  ;;  %v13079_v46 = vcombine.low %v17235_v30, %v17248_v50  ;;  %v2754_v55 = vrot.slane %v17059_v16, 5  ;;  %v2757_v15 = vrot.slane %v17074_v11, 5  ;;  %14333 = vmatprep.subr.bf16.mxu1 %v15648_v24  ;;  %v15886_v19 = vld [vmem:[#allocation2 + $0x120] sm:$0xff]  ;;  %v15615_v24 = vld [vmem:[#allocation9 + $0x220] sm:$0xff]  }
 0x153   : > { %v17269_v4 = vsel %vm17204_vm6, %v2749_v60, %v2750_v57  ;;  %v13060_v45 = vrot.slane %v2654_v49, 9  ;;  %v2764_v42 = vrot.slane %v17123_v29, 5  ;;  %v13061_v58 = vrot.slane %v2655_v39, 9  ;;  %v17313_v49 = vld [vmem:[#allocation2 + $0x128] sm:$0xff] }
 0x154   : > { %2188 = vmatmul.mubr.bf16.gmra.mxu0 %v12977_v18  ;;  %v2761_v18 = vrot.slane %v17121_v33, 5  ;;  %2597 = vmatmul.mubr.bf16.gmra.mxu1 %v13023_v23  ;;  %v13082_v7 = vcombine.high %v17257_v34, %v17269_v4  ;;  %v13081_v16 = vcombine.low %v17257_v34, %v17269_v4  ;;  %v17279_v11 = vsel %vm17204_vm6, %v13059_v32, %v2754_v55 }
 0x155   : > { %3096 = vmatprep.mubr.bf16.mxu0 %v13068_v5  ;;  %v2756_v35 = vrot.slane %v2754_v55, 4  ;;  %v17283_v5 = vsel %vm17204_vm6, %v2714_v53, %v2715_v40  ;;  %2604 = vmatprep.mubr.bf16.mxu1 %v13026_v31  ;;  %v13025_v33 = vcombine.low %v17181_v27, %v17183_v63  ;;  %v2768_v17 = vrot.slane %v17166_v22, 5  ;;  %v2648_v27 = vld [vmem:[#allocation2 + $0x48] sm:$0xee] }
 0x156   : > { %v17289_v29 = vsel %vm17204_vm6, %v13060_v45, %v2761_v18  ;;  %v2763_v25 = vrot.slane %v2761_v18, 4  ;;  %v2771_v9 = vrot.slane %v17174_v0, 5  ;;  %v13062_v53 = vrot.slane %v2656_v1, 9  ;;  %v15613_v1 = vld [vmem:[#allocation9 + $0x260] sm:$0xff]   ;;  %v15888_v45 = vld [vmem:[#allocation2 + $0x58] sm:$0x11] }
 0x157   : > { %v17293_v38 = vsel %vm17204_vm6, %v2756_v35, %v2757_v15  ;;  %v17311_v23 = vsel %vm17204_vm6, %v13061_v58, %v2768_v17  ;;  %v2770_v36 = vrot.slane %v2768_v17, 4  ;;  %v13028_v31 = vcombine.high %v15886_v19, %v17313_v49  ;;  %v15605_v15 = vld [vmem:[#allocation9 + $0x228] sm:$0xff]   ;;  %v15889_v17 = vld [vmem:[#allocation2 + $0x68] sm:$0xff] }
 0x158   : > { %v13084_v40 = vcombine.high %v17279_v11, %v17293_v38  ;;  %v13083_v48 = vcombine.low %v17279_v11, %v17293_v38  ;;  %v2775_v57 = vrot.slane %v17183_v63, 5  ;;  %v2778_v32 = vrot.slane %v17186_v2, 5 }
 0x159   : > { %v13069_v60 = vcombine.low %v17227_v28, %v17239_v26  ;;  %v13072_v39 = vcombine.high %v17263_v41, %v17283_v5  ;;  %v17324_v55 = vsel %vm17204_vm6, %v2770_v36, %v2771_v9  ;;  %v2721_v26 = vrot.slane %v2719_v21, 4 }
 0x15a   : > { %v13087_v63 = vcombine.low %v17311_v23, %v17324_v55  ;;  %v17332_v2 = vsel %vm17204_vm6, %v13062_v53, %v2775_v57  ;;  %v2777_v28 = vrot.slane %v2775_v57, 4  ;;  %v2722_v18 = vrot.slane %v15888_v45, 5  ;;  %v15890_v53 = vld [vmem:[#allocation2 + $0x138] sm:$0xff] }
 0x15b   : > { %v2726_v9 = vrot.slane %v15889_v17, 5  ;;  %v13071_v43 = vcombine.low %v17263_v41, %v17283_v5  ;;  %v15893_v5 = vld [vmem:[#allocation2 + $0x80] sm:$0xff]  ;;  %v2650_v45 = vld [vmem:[#allocation2 + $0x78] sm:$0xee] }
 0x15c   : > { %3097 = vmatmul.mubr.bf16.vlgmr.msra.gmra.mxu0 %v13067_v47  ;;  %v17303_v47 = vsel %vm17204_vm6, %v2763_v25, %v2764_v42  ;;  %2605 = vmatmul.mubr.bf16.gmra.mxu1 %v13025_v33  ;;  %v17338_v42 = vsel %vm17204_vm6, %v2777_v28, %v2778_v32  ;;  %v2649_v25 = vld [vmem:[#allocation2 + $0x60] sm:$0xee]  ;;  %v2723_v58 = vsel %vm17204_vm6, %v2721_v26, %v2722_v18  ;;  %v15632_v32 = vld [vmem:[#allocation9 + $0x250] sm:$0xff]   ;;  %v15638_v26 = vld [vmem:[#allocation9 + $0x248] sm:$0xff]  }
 0x15d   : > { %14222 = vmatpush3.bf16.msra.mxu0 %v15589_v62  ;;  %3104 = vmatprep.mubr.bf16.mxu0 %v13070_v56  ;;  %v13086_v22 = vcombine.high %v17289_v29, %v17303_v47  ;;  %v13085_v0 = vcombine.low %v17289_v29, %v17303_v47  ;;  %v13054_v56 = vrot.slane %v2648_v27, 9  ;;  %v13088_v62 = vcombine.high %v17311_v23, %v17324_v55  ;;  %v15626_v27 = vld [vmem:[#allocation9 + $0x258] sm:$0xff]   ;;  %v17361_v18 = vld [vmem:[#allocation2 + $0x158] sm:$0xff]  ;;  %v15899_v47 = vld [vmem:[#allocation2 + $0x130] sm:$0x11] }
 0x15e   : > { %14223 = vmatprep.subr.bf16.mxu0 %v15596_v54  ;;  %2612 = vmatprep.mubr.bf16.mxu1 %v13028_v31  ;;  %v13090_v54 = vcombine.high %v17332_v2, %v17338_v42  ;;  %v13089_v35 = vcombine.low %v17332_v2, %v17338_v42  ;;  %v13055_v57 = vrot.slane %v2649_v25, 9  ;;  %v15895_v25 = vld [vmem:[#allocation2 + $0x150] sm:$0xff] }
 0x15f   : > { %v2720_v33 = vsel %vm17204_vm6, %v13054_v56, %v2719_v21  ;;  %v15627_v21 = vld [vmem:[#allocation9 + $0x218] sm:$0xff]  }
 0x160   : > { %v13074_v31 = vcombine.high %v2720_v33, %v2723_v58  ;;  %v13073_v17 = vcombine.low %v2720_v33, %v2723_v58 }
 0x161   : > { %14224 = vmatpush3.bf16.msra.mxu0 %v15597_v59  ;;  %v13027_v59 = vcombine.low %v15886_v19, %v17313_v49  ;;  %v15633_v19 = vld [vmem:[#allocation9 + $0x210] sm:$0xff]  }
 0x162   : > { %14225 = vmatprep.subr.bf16.mxu0 %v15604_v20  ;;  %v17351_v20 = vld [vmem:[#allocation2 + $0x140] sm:$0xff] }
 0x163   : > { %v13030_v36 = vcombine.high %v15890_v53, %v17351_v20  ;;  %v13029_v28 = vcombine.low %v15890_v53, %v17351_v20  ;;  %v2789_v23 = vrot.slane %v17351_v20, 5  ;;  %v2796_v20 = vrot.slane %v17361_v18, 5 }
 0x164   : > { %3105 = vmatmul.mubr.bf16.gmra.mxu0 %v13069_v60  ;;  %v2728_v60 = vrot.slane %v2726_v9, 4  ;;  %2613 = vmatmul.mubr.bf16.gmra.mxu1 %v13027_v59  ;;  %v13789_v59 = vpop.f32.mrf.mxu0 }
 0x165   : > { %3112 = vmatprep.mubr.bf16.mxu0 %v13072_v39  ;;  %14226 = vmatpush3.bf16.msra.mxu0 %v15605_v15  ;;  %v15892_v39 = vld [vmem:[#allocation2 + $0x70] sm:$0x11]  ;;  %v2727_v15 = vsel %vm17204_vm6, %v13055_v57, %v2726_v9 }
 0x166   : > { %14227 = vmatprep.subr.bf16.mxu0 %v15613_v1  ;;  %v2729_v56 = vrot.slane %v15892_v39, 5  ;;  %2620 = vmatprep.mubr.bf16.mxu1 %v13030_v36  ;;  %v2733_v1 = vrot.slane %v15893_v5, 5  ;;  %v15639_v9 = vld [vmem:[#allocation9 + $0x208] sm:$0xff]   ;;  %v13056_v36 = vrot.slane %v2650_v45, 9  ;;  %v13790_v53 = vpop.f32.mrf.mxu0  ;;  %v13031_v39 = vcombine.low %v15895_v25, %v17361_v18 }
 0x167   : > { %v17371_v5 = vld [vmem:[#allocation2 + $0x170] sm:$0xff] }
 0x168   : > { %v2730_v41 = vsel %vm17204_vm6, %v2728_v60, %v2729_v56  ;;  %v15645_v60 = vld [vmem:[#allocation9 + $0x200] sm:$0xff]   ;;  %v2734_v33 = vsel %vm17204_vm6, %v13056_v36, %v2733_v1  ;;  %v15652_v56 = vld [vmem:[#allocation9 + $0x378] sm:$0xff]   ;;  %v17385_v36 = vld [vmem:[#allocation2 + $0x30] sm:$0xff] }
 0x169   : > { %14228 = vmatpush3.bf16.msra.mxu0 %v15615_v24  ;;  %v13032_v24 = vcombine.high %v15895_v25, %v17361_v18 }
 0x16a   : > { %14229 = vmatprep.subr.bf16.mxu0 %v15626_v27  ;;  %v13076_v27 = vcombine.high %v2727_v15, %v2730_v41 }
 0x16c   : > { %3113 = vmatmul.mubr.bf16.gmra.mxu0 %v13071_v43  ;;  %v2735_v43 = vrot.slane %v2733_v1, 4  ;;  %2621 = vmatmul.mubr.bf16.gmra.mxu1 %v13029_v28  ;;  %v17374_v1 = vld [vmem:[#allocation2 + $0x18] sm:$0xff] }
 0x16d   : > { %3120 = vmatprep.mubr.bf16.mxu0 %v13074_v31  ;;  %14230 = vmatpush3.bf16.msra.mxu0 %v15627_v21  ;;  %v15896_v31 = vld [vmem:[#allocation2 + $0x88] sm:$0x11] }
 0x16e   : > { %14231 = vmatprep.subr.bf16.mxu0 %v15632_v32  ;;  %v2736_v57 = vrot.slane %v15896_v31, 5  ;;  %v15644_v21 = vld [vmem:[#allocation9 + $0x240] sm:$0xff]   ;;  %2628 = vmatprep.mubr.bf16.mxu1 %v13032_v24  ;;  %v17364_v32 = vadd.f32 %v13790_v53, %v13789_v59  ;;  %v17376_v24 = vld [vmem:[#allocation2 + $0x20] sm:$0xff] }
 0x16f   : > { %v13115_v31 = vcombine.low %v17374_v1, %v17376_v24 }
 0x170   : > { %v2737_v58 = vsel %vm17204_vm6, %v2735_v43, %v2736_v57  ;;  %v17387_v43 = vld [vmem:[#allocation2 + $0x38] sm:$0xff] }
 0x171   : > { %14232 = vmatpush3.bf16.msra.mxu0 %v15633_v19  ;;  %v15897_v19 = vld [vmem:[#allocation2 + $0x168] sm:$0xff]  ;;  %v13078_v45 = vcombine.high %v2734_v33, %v2737_v58  ;;  %v13118_v57 = vcombine.high %v17385_v36, %v17387_v43  ;;  %v13117_v30 = vcombine.low %v17385_v36, %v17387_v43 }
 0x172   : > { %14233 = vmatprep.subr.bf16.mxu0 %v15638_v26  ;;  %v13034_v28 = vcombine.high %v15897_v19, %v17371_v5  ;;  %v13075_v26 = vcombine.low %v2727_v15, %v2730_v41  ;;  %v13033_v25 = vcombine.low %v15897_v19, %v17371_v5  ;;  %v13077_v41 = vcombine.low %v2734_v33, %v2737_v58  ;;  %v402_v33 = vld [vmem:[#allocation2 + $0x180] sm:$0x11]  ;;  %v17404_v19 = vld [vmem:[#allocation2 + $0x50] sm:$0xff] }
 0x173   : > { %v905_v58 = vld [vmem:[%s16419_s18 + $0x78] sm:$0xf] }
 0x174   : > { %3121 = vmatmul.mubr.bf16.gmra.mxu0 %v13073_v17  ;;  %2629 = vmatmul.mubr.bf16.gmra.mxu1 %v13031_v39  ;;  %v13861_v17 = vpop.f32.mrf.mxu1 }
 0x175   : > { %3128 = vmatprep.mubr.bf16.mxu0 %v13076_v27  ;;  %14234 = vmatpush3.bf16.msra.mxu0 %v15639_v9  ;;  %v13116_v27 = vcombine.high %v17374_v1, %v17376_v24  ;;  %v17383_v9 = vpop.f32.mrf.mxu0 }
 0x176   : > { %14235 = vmatprep.subr.bf16.mxu0 %v15644_v21  ;;  %2636 = vmatprep.mubr.bf16.mxu1 %v13034_v28  ;;  %v13862_v59 = vpop.f32.mrf.mxu1  ;;  %v15651_v21 = vld [vmem:[#allocation9 + $0x2b8] sm:$0xff]   ;;  %v15664_v28 = vld [vmem:[#allocation9 + $0x2e8] sm:$0xff]  }
 0x177   : > { %v17381_v15 = vadd.f32 %v13862_v59, %v13861_v17  ;;  %v17396_v53 = vpop.f32.mrf.mxu0  ;;  %v1166_v59 = vshll.u32 %v905_v58, 16 }
 0x179   : > { %14236 = vmatpush3.bf16.msra.mxu0 %v15645_v60  ;;  %21998 = vst [vmem:[#allocation27_spill] sm:$0xff] %v17381_v15  ;;  %v15656_v60 = vld [vmem:[#allocation9 + $0x2f0] sm:$0xff]  }
 0x17a   : > { %14445 = vmatprep.subr.bf16.mxu0 %v15652_v56  ;;  %v15659_v56 = vld [vmem:[#allocation9 + $0x2b0] sm:$0xff]  }
 0x17c   : > { %3129 = vmatmul.mubr.bf16.gmra.mxu0 %v13075_v26  ;;  %2637 = vmatmul.mubr.bf16.gmra.mxu1 %v13033_v25  ;;  %v403_v26 = vsel %vm16456_vm10, 0, %v402_v33  ;;  %v906_v25 = vld [vmem:[%s16419_s18 + $0x7c] sm:$0xf] }
 0x17d   : > { %3136 = vmatprep.mubr.bf16.mxu0 %v13078_v45  ;;  %3613 = vmatprep.mubr.bf16.mxu1 %v13116_v27  ;;  %v1163_v45 = vshrl.u32 %v905_v58, 16  ;;  %404 = vst [vmem:[#allocation2 + $0x180] sm:$0x11] %v403_v26  ;;  %v17424_v58 = vld [vmem:[#allocation2 + $0x68] sm:$0xff] }
 0x17e   : > { %v13795_v39 = vpop.f32.mrf.mxu0  ;;  %v3908_v61 = vshrl.u32 %v17424_v58, 16 }
 0x180   : > { %v13796_v17 = vpop.f32.mrf.mxu0 }
 0x181   : > { %v17414_v50 = vadd.f32 %v13796_v17, %v13795_v39  ;;  %v17422_v39 = vld [vmem:[#allocation2 + $0x60] sm:$0xff]  ;;  %v15673_v17 = vld [vmem:[#allocation9 + $0x2a0] sm:$0xff]  }
 0x184   : > { %3137 = vmatmul.mubr.bf16.gmra.mxu0 %v13077_v41  ;;  %3614 = vmatmul.mubr.bf16.vlgmr.msra.gmra.mxu1 %v13115_v31  ;;  %v17418_v41 = vpop.f32.mrf.mxu1  ;;  %v15667_v31 = vld [vmem:[#allocation9 + $0x2a8] sm:$0xff]  }
 0x185   : > { %3144 = vmatprep.mubr.bf16.mxu0 %v13080_v37  ;;  %3621 = vmatprep.mubr.bf16.mxu1 %v13118_v57  ;;  %v17402_v37 = vld [vmem:[#allocation2 + $0x48] sm:$0xff]  ;;  %21999 = vst [vmem:[#allocation28_spill] sm:$0xff] %v17418_v41  ;;  %v17592_v41 = vld [vmem:[#allocation2 + $0xf8] sm:$0xff] }
 0x186   : > { %14334 = vmatpush3.bf16.msra.mxu1 %v15651_v21  ;;  %v13120_v27 = vcombine.high %v17402_v37, %v17404_v19  ;;  %v15672_v57 = vld [vmem:[#allocation9 + $0x2e0] sm:$0xff]   ;;  %v1174_v21 = vshll.u32 %v906_v25, 16  ;;  %v13119_v34 = vcombine.low %v17402_v37, %v17404_v19 }
 0x187   : > { %14335 = vmatprep.subr.bf16.mxu1 %v15656_v60 }
 0x18a   : > { %14336 = vmatpush3.bf16.msra.mxu1 %v15659_v56  ;;  %v15676_v56 = vld [vmem:[#allocation9 + $0x2d8] sm:$0xff]  }
 0x18b   : > { %14337 = vmatprep.subr.bf16.mxu1 %v15664_v28  ;;  %v868_v28 = vld [vmem:[#allocation2 + $0x180] sm:$0xf] }
 0x18c   : > { %3145 = vmatmul.mubr.bf16.gmra.mxu0 %v13079_v46  ;;  %v1165_v46 = vrot.slane %v1163_v45, 7  ;;  %3622 = vmatmul.mubr.bf16.gmra.mxu1 %v13117_v30  ;;  %v17426_v45 = vpop.f32.mrf.mxu1  ;;  %v1332_v30 = vld [vmem:[#allocation2 + $0x184] sm:$0xf] }
 0x18d   : > { %3152 = vmatprep.mubr.bf16.mxu0 %v13082_v7  ;;  %v1171_v7 = vshrl.u32 %v906_v25, 16  ;;  %3629 = vmatprep.mubr.bf16.mxu1 %v13120_v27  ;;  %22000 = vst [vmem:[#allocation29_spill] sm:$0xff] %v17426_v45  ;;  %v17590_v45 = vld [vmem:[#allocation2 + $0xf0] sm:$0xff] }
 0x18e   : > { %v1168_v60 = vor.u32 %v1166_v59, %v1165_v46  ;;  %v1169_v33 = vrot.slane %v1165_v46, 4  ;;  %14338 = vmatpush3.bf16.msra.mxu1 %v15667_v31  ;;  %v869_v46 = vsel %vm16494_vm2, %v16754_v3, %v868_v28  ;;  %v13867_v27 = vpop.f32.mrf.mxu1  ;;  %v15680_v3 = vld [vmem:[#allocation9 + $0x2d0] sm:$0xff]  }
 0x18f   : > { %v17420_v26 = vrot.slane %v1171_v7, 7  ;;  %14339 = vmatprep.subr.bf16.mxu1 %v15672_v57  ;;  %870 = vst [vmem:[#allocation2 + $0x180] sm:$0xf] %v869_v46  ;;  %v17448_v7 = vpop.f32.mrf.mxu0  ;;  %v15685_v46 = vld [vmem:[#allocation9 + $0x288] sm:$0xff]  }
 0x190   : > { %v1333_v59 = vsel %vm16494_vm2, %v1168_v60, %v1332_v30  ;;  %v13868_v31 = vpop.f32.mrf.mxu1  ;;  %v15681_v60 = vld [vmem:[#allocation9 + $0x290] sm:$0xff]  }
 0x191   : > { %v1176_v25 = vor.u32 %v1174_v21, %v17420_v26  ;;  %1334 = vst [vmem:[#allocation2 + $0x184] sm:$0xf] %v1333_v59  ;;  %v17446_v57 = vadd.f32 %v13868_v31, %v13867_v27  ;;  %v17466_v38 = vpop.f32.mrf.mxu0 }
 0x192   : > { %14340 = vmatpush3.bf16.msra.mxu1 %v15673_v17  ;;  %v13870_v21 = vpop.f32.mrf.mxu1  ;;  %v17455_v17 = vld [vmem:[#allocation2 + $0x80] sm:$0xff] }
 0x193   : > { %v1177_v4 = vsel %vm16485_vm1, %v1169_v33, %v1176_v25  ;;  %14341 = vmatprep.subr.bf16.mxu1 %v15676_v56  ;;  %22001 = vst [vmem:[#allocation30_spill] sm:$0xff] %v17446_v57  ;;  %v17453_v33 = vld [vmem:[#allocation2 + $0x78] sm:$0xff]  ;;  %v15684_v56 = vld [vmem:[#allocation9 + $0x2c8] sm:$0xff]   ;;  %v13121_v25 = vcombine.low %v17422_v39, %v17424_v58 }
 0x194   : > { %3153 = vmatmul.mubr.bf16.gmra.mxu0 %v13081_v16  ;;  %v13122_v16 = vcombine.high %v17422_v39, %v17424_v58  ;;  %1335 = vst [vmem:[#allocation2 + $0x18c] sm:$0xf] %v1177_v4  ;;  %3630 = vmatmul.mubr.bf16.gmra.mxu1 %v13119_v34  ;;  %v13871_v28 = vpop.f32.mrf.mxu1  ;;  %v13124_v11 = vcombine.high %v17453_v33, %v17455_v17  ;;  %v17471_v34 = vld [vmem:[#allocation2 + $0x90] sm:$0xff]  ;;  %v17473_v4 = vld [vmem:[#allocation2 + $0x98] sm:$0xff] }
 0x195   : > { %3160 = vmatprep.mubr.bf16.mxu0 %v13084_v40  ;;  %v15678_v40 = vld [vmem:[#allocation9 + $0x298] sm:$0xff]   ;;  %v17462_v30 = vadd.f32 %v13871_v28, %v13870_v21  ;;  %v13126_v29 = vcombine.high %v17471_v34, %v17473_v4  ;;  %v13125_v55 = vcombine.low %v17471_v34, %v17473_v4 }
 0x196   : > { %3637 = vmatprep.mubr.bf16.mxu1 %v13122_v16  ;;  %14342 = vmatpush3.bf16.msra.mxu1 %v15678_v40  ;;  %v2782_v16 = vrot.slane %v17313_v49, 5  ;;  %v2657_v40 = vld [vmem:[#allocation2 + $0x120] sm:$0xee] }
 0x197   : > { %14343 = vmatprep.subr.bf16.mxu1 %v15680_v3  ;;  %22002 = vst [vmem:[#allocation31_spill] sm:$0xff] %v17462_v30  ;;  %v13123_v3 = vcombine.low %v17453_v33, %v17455_v17  ;;  %v3871_v30 = vshrl.u32 %v17402_v37, 16 }
 0x198   : > { %v2784_v28 = vrot.slane %v2782_v16, 4 }
 0x19a   : > { %14344 = vmatpush3.bf16.msra.mxu1 %v15681_v60  ;;  %v13801_v59 = vpop.f32.mrf.mxu0 }
 0x19b   : > { %14345 = vmatprep.subr.bf16.mxu1 %v15684_v56  ;;  %v13063_v56 = vrot.slane %v2657_v40, 9 }
 0x19c   : > { %3161 = vmatmul.mubr.bf16.gmra.mxu0 %v13083_v48  ;;  %v15686_v48 = vld [vmem:[#allocation9 + $0x2c0] sm:$0xff]   ;;  %3638 = vmatmul.mubr.bf16.gmra.mxu1 %v13121_v25  ;;  %v13802_v27 = vpop.f32.mrf.mxu0 }
 0x19d   : > { %3168 = vmatprep.mubr.bf16.mxu0 %v13086_v22  ;;  %3645 = vmatprep.mubr.bf16.mxu1 %v13124_v11  ;;  %v15687_v22 = vld [vmem:[#allocation9 + $0x280] sm:$0xff]   ;;  %v13873_v31 = vpop.f32.mrf.mxu1  ;;  %v17481_v21 = vadd.f32 %v13802_v27, %v13801_v59  ;;  %v2783_v59 = vsel %vm17204_vm6, %v13063_v56, %v2782_v16  ;;  %v2658_v27 = vld [vmem:[#allocation2 + $0x138] sm:$0xee]  ;;  %v2659_v16 = vld [vmem:[#allocation2 + $0x150] sm:$0xee] }
 0x19e   : > { %14346 = vmatpush3.bf16.msra.mxu1 %v15685_v46  ;;  %v17490_v25 = vld [vmem:[#allocation2 + $0xa8] sm:$0xff]  ;;  %v17492_v46 = vld [vmem:[#allocation2 + $0xb0] sm:$0xff] }
 0x19f   : > { %14347 = vmatprep.subr.bf16.mxu1 %v15686_v48  ;;  %v13874_v60 = vpop.f32.mrf.mxu1  ;;  %v17518_v56 = vld [vmem:[#allocation2 + $0x168] sm:$0xee]  ;;  %v13127_v42 = vcombine.low %v17490_v25, %v17492_v46 }
 0x1a0   : > { %v13066_v52 = vrot.slane %v17518_v56, 9 }
 0x1a1   : > { %v13876_v49 = vpop.f32.mrf.mxu1 }
 0x1a2   : > { %14348 = vmatpush3.bf16.msra.mxu1 %v15687_v22 }
 0x1a3   : > { %v13877_v11 = vpop.f32.mrf.mxu1 }
 0x1a4   : > { %3169 = vmatmul.mubr.bf16.gmra.mxu0 %v13085_v0  ;;  %v2785_v0 = vrot.slane %v15899_v47, 5  ;;  %3646 = vmatmul.mubr.bf16.gmra.mxu1 %v13123_v3  ;;  %v17497_v48 = vadd.f32 %v13877_v11, %v13876_v49  ;;  %v13064_v3 = vrot.slane %v2658_v27, 9  ;;  %v17508_v47 = vpop.f32.mrf.mxu0  ;;  %v3823_v49 = vshrl.u32 %v17374_v1, 16 }
 0x1a5   : > { %3176 = vmatprep.mubr.bf16.mxu0 %v13088_v62  ;;  %v17485_v62 = vadd.f32 %v13874_v60, %v13873_v31  ;;  %3653 = vmatprep.mubr.bf16.mxu1 %v13126_v29  ;;  %v15900_v31 = vld [vmem:[#allocation2 + $0x148] sm:$0x11]  ;;  %v3826_v11 = vshll.u32 %v17374_v1, 16  ;;  %v3836_v1 = vshrl.u32 %v17376_v24, 16 }
 0x1a6   : > { %22004 = vst [vmem:[#allocation33_spill] sm:$0xff] %v17497_v48  ;;  %v2786_v22 = vsel %vm17204_vm6, %v2784_v28, %v2785_v0  ;;  %v2792_v29 = vrot.slane %v15900_v31, 5  ;;  %v17514_v0 = vld [vmem:[#allocation2 + $0xc0] sm:$0xff]  ;;  %v17516_v60 = vld [vmem:[#allocation2 + $0xc8] sm:$0xff]  ;;  %v17526_v27 = vsel %vm17204_vm6, %v13064_v3, %v2789_v23  ;;  %v3825_v12 = vrot.slane %v3823_v49, 4 }
 0x1a7   : > { %22003 = vst [vmem:[#allocation32_spill] sm:$0xff] %v17485_v62  ;;  %v13092_v40 = vcombine.high %v2783_v59, %v2786_v22  ;;  %v17520_v28 = vld [vmem:[#allocation2 + $0x28] sm:$0x11]  ;;  %v13130_v18 = vcombine.high %v17514_v0, %v17516_v60  ;;  %v15901_v3 = vld [vmem:[#allocation2 + $0x160] sm:$0x11]  ;;  %v3828_v44 = vrot.slane %v3826_v11, 5 }
 0x1a8   : > { %22005 = vst [vmem:[#allocation34_spill] sm:$0xff] %v17520_v28  ;;  %v2799_v31 = vrot.slane %v15901_v3, 5  ;;  %v17546_v48 = vld [vmem:[#allocation2 + $0xe0] sm:$0xff]  ;;  %v3838_v3 = vrot.slane %v3836_v1, 4  ;;  %v22006_v1 = vrot.slane %v17371_v5, 5 }
 0x1a9   : > { %v13131_v14 = vcombine.low %v17544_v13, %v17546_v48 }
 0x1ac   : > { %3177 = vmatmul.mubr.bf16.gmra.mxu0 %v13087_v63  ;;  %v13128_v63 = vcombine.high %v17490_v25, %v17492_v46  ;;  %3654 = vmatmul.mubr.bf16.gmra.mxu1 %v13125_v55  ;;  %v3832_v55 = vshll.u32 %v17376_v24, 16  ;;  %v3842_v24 = vshll.u32 %v17520_v28, 16 }
 0x1ad   : > { %3184 = vmatprep.mubr.bf16.mxu0 %v13090_v54  ;;  %v2791_v54 = vrot.slane %v2789_v23, 4  ;;  %v2798_v23 = vrot.slane %v2796_v20, 4 }
 0x1ae   : > { %3661 = vmatprep.mubr.bf16.mxu1 %v13128_v63  ;;  %v13091_v63 = vcombine.low %v2783_v59, %v2786_v22  ;;  %v15902_v59 = vld [vmem:[#allocation2 + $0x178] sm:$0x11]  ;;  %v17571_v62 = vrot.slane %v3842_v24, 5 }
 0x1af   : > { %v17530_v2 = vsel %vm17204_vm6, %v2791_v54, %v2792_v29  ;;  %v2806_v22 = vrot.slane %v15902_v59, 5  ;;  %v3847_v29 = vshrl.u32 %v17385_v36, 16  ;;  %v17560_v11 = vsel %vm17204_vm6, %v2798_v23, %v2799_v31 }
 0x1b0   : > { %v13094_v54 = vcombine.high %v17526_v27, %v17530_v2  ;;  %v13093_v49 = vcombine.low %v17526_v27, %v17530_v2  ;;  %v3829_v27 = vor.u32 %v3828_v44, %v3825_v12  ;;  %v17568_v2 = vld [vmem:[#allocation2 + $0x40] sm:$0x11]  ;;  %v3856_v23 = vshll.u32 %v17387_v43, 16 }
 0x1b1   : > { %22007 = vst [vmem:[#allocation35_spill] sm:$0xff] %v17568_v2  ;;  %v3860_v31 = vshrl.u32 %v17387_v43, 16  ;;  %v3874_v44 = vshll.u32 %v17402_v37, 16  ;;  %v3880_v43 = vshll.u32 %v17404_v19, 16 }
 0x1b2   : > { %v3830_v15 = vrot.slane %v3829_v27, 4  ;;  %v3898_v27 = vshll.u32 %v17422_v39, 16 }
 0x1b4   : > { %3185 = vmatmul.mubr.bf16.gmra.mxu0 %v13089_v35  ;;  %v17534_v35 = vpop.f32.mrf.mxu0  ;;  %3662 = vmatmul.mubr.bf16.gmra.mxu1 %v13127_v42  ;;  %v13129_v42 = vcombine.low %v17514_v0, %v17516_v60 }
 0x1b5   : > { %3192 = vmatprep.mubr.bf16.mxu0 %v13092_v40  ;;  %v13065_v40 = vrot.slane %v2659_v16, 9  ;;  %3669 = vmatprep.mubr.bf16.mxu1 %v13130_v18  ;;  %v17549_v16 = vrot.slane %v3832_v55, 5  ;;  %v461_v55 = vld [vmem:[#allocation2 + $0x190] sm:$0x11] }
 0x1b6   : > { %v13807_v10 = vpop.f32.mrf.mxu0  ;;  %v462_v12 = vsel %vm16462_vm12, 0, %v461_v55  ;;  %v3866_v55 = vshll.u32 %v17568_v2, 16  ;;  %v3876_v2 = vrot.slane %v3874_v44, 5 }
 0x1b7   : > { %v17556_v56 = vsel %vm17204_vm6, %v13065_v40, %v2796_v20  ;;  %v3850_v20 = vshll.u32 %v17385_v36, 16  ;;  %v3839_v24 = vor.u32 %v3838_v3, %v17549_v16  ;;  %463 = vst [vmem:[#allocation2 + $0x190] sm:$0x11] %v462_v12  ;;  %v17603_v12 = vrot.slane %v3856_v23, 5 }
 0x1b8   : > { %v13808_v18 = vpop.f32.mrf.mxu0  ;;  %v13095_v3 = vcombine.low %v17556_v56, %v17560_v11 }
 0x1b9   : > { %v17566_v59 = vadd.f32 %v13808_v18, %v13807_v10  ;;  %v13132_v10 = vcombine.high %v17544_v13, %v17546_v48  ;;  %v17584_v18 = vrot.slane %v3847_v29, 4  ;;  %v3852_v37 = vrot.slane %v3850_v20, 5 }
 0x1ba   : > { %v13810_v40 = vpop.f32.mrf.mxu0  ;;  %v3862_v20 = vrot.slane %v3860_v31, 4  ;;  %v17621_v31 = vrot.slane %v3866_v55, 5  ;;  %v3785_v55 = vld [vmem:[#allocation2 + $0x70] sm:$0x11] }
 0x1bc   : > { %3193 = vmatmul.mubr.bf16.gmra.mxu0 %v13091_v63  ;;  %v2805_v63 = vrot.slane %v22006_v1, 4  ;;  %v13811_v36 = vpop.f32.mrf.mxu0  ;;  %v3884_v1 = vshrl.u32 %v17404_v19, 16  ;;  %v13879_v29 = vpop.f32.mrf.mxu1  ;;  %3670 = vmatmul.mubr.bf16.gmra.mxu1 %v13129_v42  ;;  %v17599_v19 = vld [vmem:[#allocation2 + $0x58] sm:$0x11] }
 0x1bd   : > { %3200 = vmatprep.mubr.bf16.mxu0 %v13094_v54  ;;  %v13096_v54 = vcombine.high %v17556_v56, %v17560_v11  ;;  %v17588_v57 = vadd.f32 %v13811_v36, %v13810_v40  ;;  %v3895_v40 = vshrl.u32 %v17422_v39, 16  ;;  %3677 = vmatprep.mubr.bf16.mxu1 %v13132_v10  ;;  %v3873_v36 = vrot.slane %v3871_v30, 4 }
 0x1be   : > { %v22009_v56 = vrot.slane %v17371_v5, 5  ;;  %v17613_v42 = vsel %vm17204_vm6, %v2805_v63, %v2806_v22  ;;  %v13880_v28 = vpop.f32.mrf.mxu1  ;;  %v17617_v39 = vrot.slane %v3880_v43, 5  ;;  %v3886_v23 = vrot.slane %v3884_v1, 4  ;;  %v17623_v5 = vld [vmem:[#allocation2 + $0x110] sm:$0xff] }
 0x1bf   : > { %22008 = vst [vmem:[#allocation36_spill] sm:$0xff] %v17588_v57  ;;  %v17615_v57 = vld [vmem:[#allocation2 + $0x108] sm:$0xff]  ;;  %v17619_v30 = vadd.f32 %v13880_v28, %v13879_v29  ;;  %v13134_v63 = vcombine.high %v17590_v45, %v17592_v41  ;;  %v3897_v44 = vrot.slane %v3895_v40, 4  ;;  %v3900_v43 = vrot.slane %v3898_v27, 5  ;;  %v872_v29 = vld [vmem:[#allocation2 + $0x190] sm:$0x1] }
 0x1c0   : > { %v17609_v11 = vsel %vm17204_vm6, %v13066_v52, %v22009_v56  ;;  %v1178_v52 = vrot.slane %v17420_v26, 4  ;;  %v13882_v10 = vpop.f32.mrf.mxu1  ;;  %v3863_v28 = vor.u32 %v3862_v20, %v17603_v12  ;;  %v3890_v1 = vshll.u32 %v17599_v19, 16 }
 0x1c1   : > { %22010 = vst [vmem:[#allocation37_spill] sm:$0xff] %v17619_v30  ;;  %v3887_v30 = vor.u32 %v3886_v23, %v17617_v39  ;;  %v3904_v22 = vshll.u32 %v17424_v58, 16  ;;  %v22011_v40 = vrot.slane %v16740_v51, 4  ;;  %v13136_v27 = vcombine.high %v17615_v57, %v17623_v5 }
 0x1c2   : > { %v13883_v56 = vpop.f32.mrf.mxu1  ;;  %v13813_v26 = vpop.f32.mrf.mxu0  ;;  %v17651_v51 = vsel %vm16510_vm0, %v3830_v15, %v17549_v16  ;;  %v3901_v23 = vor.u32 %v3900_v43, %v3897_v44  ;;  %v3922_v16 = vshll.u32 %v17453_v33, 16  ;;  %v3864_v43 = vrot.slane %v3863_v28, 4 }
 0x1c3   : > { %v17642_v19 = vadd.f32 %v13883_v56, %v13882_v10  ;;  %v3919_v10 = vshrl.u32 %v17453_v33, 16 }
 0x1c4   : > { %3201 = vmatmul.mubr.bf16.gmra.mxu0 %v13093_v49  ;;  %v3840_v49 = vrot.slane %v3839_v24, 4  ;;  %v3877_v24 = vor.u32 %v3876_v2, %v3873_v36  ;;  %v13098_v2 = vcombine.high %v17609_v11, %v17613_v42  ;;  %v13901_v58 = vpop.f32.mrf.mxu1  ;;  %3678 = vmatmul.mubr.bf16.gmra.mxu1 %v13131_v14  ;;  %v13814_v36 = vpop.f32.mrf.mxu0 }
 0x1c5   : > { %3208 = vmatprep.mubr.bf16.mxu0 %v13096_v54  ;;  %v3853_v54 = vor.u32 %v3852_v37, %v17584_v18  ;;  %v873_v18 = vsel %vm16435_vm4, %v22011_v40, %v872_v29  ;;  %v1336_v37 = vld [vmem:[#allocation2 + $0x194] sm:$0x1]  ;;  %22012 = vst [vmem:[#allocation38_spill] sm:$0xff] %v17642_v19  ;;  %v3914_v29 = vshll.u32 %v3785_v55, 16  ;;  %v17653_v40 = vld [vmem:[#allocation2 + $0x88] sm:$0x11]  ;;  %3685 = vmatprep.mubr.bf16.mxu1 %v13134_v63 }
 0x1c6   : > { %874 = vst [vmem:[#allocation2 + $0x190] sm:$0x1] %v873_v18  ;;  %v1337_v20 = vsel %vm16435_vm4, %v1178_v52, %v1336_v37  ;;  %v17659_v56 = vsel %vm16510_vm0, %v3840_v49, %v17571_v62  ;;  %v17661_v52 = vadd.f32 %v13814_v36, %v13813_v26  ;;  %v13902_v14 = vpop.f32.mrf.mxu1  ;;  %v13816_v44 = vpop.f32.mrf.mxu0  ;;  %v17664_v55 = vrot.slane %v3877_v24, 4 }
 0x1c7   : > { %1338 = vst [vmem:[#allocation2 + $0x194] sm:$0x1] %v1337_v20  ;;  %v3854_v15 = vrot.slane %v3853_v54, 4  ;;  %v17666_v18 = vrot.slane %v3887_v30, 4  ;;  %v17668_v37 = vrot.slane %v3890_v1, 5  ;;  %v13903_v20 = vadd.f32 %v13902_v14, %v13901_v58 }
 0x1c8   : > { %v17670_v62 = vrot.slane %v3904_v22, 5  ;;  %v17672_v49 = vrot.slane %v3908_v61, 4  ;;  %v3928_v63 = vshll.u32 %v17455_v17, 16  ;;  %v13904_v54 = vpop.f32.mrf.mxu1  ;;  %v13817_v33 = vpop.f32.mrf.mxu0  ;;  %v17677_v26 = vrot.slane %v3914_v29, 5 }
 0x1c9   : > { %v17679_v28 = vrot.slane %v3919_v10, 4  ;;  %v3932_v30 = vshrl.u32 %v17455_v17, 16  ;;  %v17683_v24 = vadd.f32 %v13903_v20, %v17364_v32  ;;  %v17685_v1 = vadd.f32 %v13817_v33, %v13816_v44  ;;  %v17698_v32 = vld [vmem:[#allocation2 + $0xa0] sm:$0x11] }
 0x1ca   : > { %v17687_v22 = vrot.slane %v3922_v16, 5  ;;  %v13097_v58 = vcombine.low %v17609_v11, %v17613_v42  ;;  %v13164_v36 = vcombine.high %v17651_v51, %v17659_v56  ;;  %v17696_v29 = vrot.slane %v3928_v63, 5  ;;  %v17707_v11 = vld [vmem:[#allocation2 + $0x128] sm:$0xff] }
 0x1cb   : > { %v3943_v10 = vshrl.u32 %v17471_v34, 16  ;;  %v3946_v16 = vshll.u32 %v17471_v34, 16  ;;  %v3952_v42 = vshll.u32 %v17473_v4, 16  ;;  %v3956_v44 = vshrl.u32 %v17473_v4, 16 }
 0x1cc   : > { %3209 = vmatmul.mubr.bf16.gmra.mxu0 %v13095_v3  ;;  %v17675_v3 = vrot.slane %v3901_v23, 4  ;;  %v13905_v23 = vpop.f32.mrf.mxu1  ;;  %v13135_v63 = vcombine.low %v17615_v57, %v17623_v5  ;;  %v17718_v34 = vsel %vm16510_vm0, %v3854_v15, %v17603_v12  ;;  %v3967_v4 = vshrl.u32 %v17490_v25, 16 }
 0x1cd   : > { %3216 = vmatprep.mubr.bf16.mxu0 %v13098_v2  ;;  %v13794_v2 = vadd.f32 %v17396_v53, %v17383_v9  ;;  %v13906_v17 = vadd.f32 %v13905_v23, %v13904_v54  ;;  %v22013_v9 = vcombine.low %v17590_v45, %v17592_v41  ;;  %v17705_v53 = vld [vmem:[#allocation2 + $0x120] sm:$0xff]  ;;  %v17723_v54 = vsel %vm16510_vm0, %v3864_v43, %v17621_v31 }
 0x1ce   : > { %v13907_v14 = vpop.f32.mrf.mxu1  ;;  %v13163_v23 = vcombine.low %v17651_v51, %v17659_v56  ;;  %v3948_v12 = vrot.slane %v3946_v16, 5  ;;  %v17729_v15 = vrot.slane %v3952_v42, 5  ;;  %v3958_v61 = vrot.slane %v3956_v44, 4  ;;  %v15653_v43 = vld [vmem:[#allocation9 + $0x338] sm:$0xff]  }
 0x1cf   : > { %3686 = vmatmul.mubr.bf16.gmra.mxu1 %v22013_v9  ;;  %v17711_v20 = vadd.f32 %v13906_v17, %v13794_v2  ;;  %v3970_v2 = vshll.u32 %v17490_v25, 16  ;;  %v3945_v17 = vrot.slane %v3943_v10, 4  ;;  %v3962_v31 = vshll.u32 %v17698_v32, 16  ;;  %v15660_v10 = vld [vmem:[#allocation9 + $0x370] sm:$0xff]  }
 0x1d0   : > { %3693 = vmatprep.mubr.bf16.mxu1 %v13136_v27  ;;  %v13908_v33 = vpop.f32.mrf.mxu1  ;;  %v13166_v6 = vcombine.high %v17718_v34, %v17723_v54  ;;  %v13138_v51 = vcombine.high %v17705_v53, %v17707_v11  ;;  %v3911_v56 = vor.u32 %v17672_v49, %v17670_v62  ;;  %v3969_v16 = vrot.slane %v3967_v4, 4  ;;  %v17748_v49 = vld [vmem:[#allocation2 + $0x138] sm:$0xff] }
 0x1d1   : > { %22014 = vst [vmem:[#allocation39_spill] sm:$0xff] %v17711_v20  ;;  %v13909_v27 = vadd.f32 %v13908_v33, %v13907_v14  ;;  %v3972_v14 = vrot.slane %v3970_v2, 5  ;;  %v3976_v32 = vshll.u32 %v17492_v46, 16  ;;  %v3980_v42 = vshrl.u32 %v17492_v46, 16 }
 0x1d2   : > { %v13910_v9 = vpop.f32.mrf.mxu1  ;;  %v13800_v44 = vadd.f32 %v17466_v38, %v17448_v7  ;;  %v3925_v33 = vor.u32 %v17687_v22, %v17679_v28  ;;  %v3949_v4 = vor.u32 %v3948_v12, %v3945_v17  ;;  %v3959_v2 = vor.u32 %v3958_v61, %v17729_v15 }
 0x1d3   : > { %v17735_v25 = vadd.f32 %v13909_v27, %v17414_v50  ;;  %v13165_v46 = vcombine.low %v17718_v34, %v17723_v54  ;;  %v17761_v38 = vsel %vm16510_vm0, %v17664_v55, %v17617_v39  ;;  %v13137_v28 = vcombine.low %v17705_v53, %v17707_v11  ;;  %v15661_v39 = vld [vmem:[#allocation9 + $0x330] sm:$0xff]  }
 0x1d4   : > { %3217 = vmatmul.mubr.bf16.gmra.mxu0 %v13097_v58  ;;  %v3934_v58 = vrot.slane %v3932_v30, 4  ;;  %v3794_v30 = vld [vmem:[#allocation2 + $0xb8] sm:$0x11]  ;;  %v17769_v22 = vsel %vm16510_vm0, %v17666_v18, %v17668_v37  ;;  %v3973_v34 = vor.u32 %v3972_v14, %v3969_v16  ;;  %v17771_v17 = vrot.slane %v3925_v33, 4  ;;  %v15669_v16 = vld [vmem:[#allocation9 + $0x328] sm:$0xff]  }
 0x1d5   : > { %4494 = vmatprep.mubr.bf16.mxu0 %v13164_v36  ;;  %22015 = vst [vmem:[#allocation40_spill] sm:$0xff] %v17735_v25  ;;  %v13911_v36 = vpop.f32.mrf.mxu1  ;;  %v17750_v25 = vld [vmem:[#allocation2 + $0x140] sm:$0xff]  ;;  %v3986_v54 = vshll.u32 %v3794_v30, 16  ;;  %v17781_v30 = vrot.slane %v3949_v4, 4  ;;  %v17792_v14 = vrot.slane %v3976_v32, 5  ;;  %v3991_v33 = vshrl.u32 %v17514_v0, 16 }
 0x1d6   : > { %v13912_v50 = vadd.f32 %v13911_v36, %v13910_v9  ;;  %v3935_v27 = vor.u32 %v3934_v58, %v17696_v29  ;;  %v13168_v32 = vcombine.high %v17761_v38, %v17769_v22 }
 0x1d7   : > { %v13913_v19 = vpop.f32.mrf.mxu1  ;;  %3694 = vmatmul.mubr.bf16.gmra.mxu1 %v13135_v63  ;;  %v3912_v63 = vrot.slane %v3911_v56, 4  ;;  %v15668_v56 = vld [vmem:[#allocation9 + $0x368] sm:$0xff]  }
 0x1d8   : > { %v13819_v20 = vpop.f32.mrf.mxu0  ;;  %v17755_v7 = vadd.f32 %v13912_v50, %v13800_v44  ;;  %3701 = vmatprep.mubr.bf16.mxu1 %v13138_v51  ;;  %v17773_v9 = vrot.slane %v3935_v27, 4  ;;  %v15696_v51 = vld [vmem:[#allocation9 + $0x3f8] sm:$0xff]   ;;  %v17796_v44 = vrot.slane %v3973_v34, 4  ;;  %v17798_v50 = vrot.slane %v3986_v54, 5  ;;  %v17810_v54 = vld [vmem:[#allocation2 + $0x150] sm:$0xff] }
 0x1d9   : > { %v13914_v61 = vpop.f32.mrf.mxu1  ;;  %14557 = vmatprep.subr.bf16.mxu1 %v15696_v51  ;;  %v13806_v27 = vadd.f32 %v17534_v35, %v17508_v47  ;;  %v15679_v47 = vld [vmem:[#allocation9 + $0x320] sm:$0xff]   ;;  %v17820_v35 = vsel %vm16510_vm0, %v17675_v3, %v17670_v62  ;;  %v4004_v51 = vshrl.u32 %v17516_v60, 16 }
 0x1da   : > { %v13820_v58 = vpop.f32.mrf.mxu0  ;;  %v13915_v55 = vadd.f32 %v13914_v61, %v13913_v19 }
 0x1db   : > { %v17779_v18 = vadd.f32 %v13820_v58, %v13819_v20  ;;  %v13916_v37 = vpop.f32.mrf.mxu1  ;;  %v17794_v20 = vrot.slane %v3980_v42, 4  ;;  %v17812_v58 = vld [vmem:[#allocation2 + $0x158] sm:$0xff] }
 0x1dc   : > { %4495 = vmatmul.mubr.bf16.vlgmr.msra.gmra.mxu0 %v13163_v23  ;;  %v22016_v23 = vshll.u32 %v17653_v40, 16  ;;  %v13822_v19 = vpop.f32.mrf.mxu0  ;;  %v17788_v36 = vadd.f32 %v13915_v55, %v17481_v21  ;;  %v13140_v40 = vcombine.high %v17748_v49, %v17750_v25  ;;  %v3994_v21 = vshll.u32 %v17514_v0, 16 }
 0x1dd   : > { %14446 = vmatpush3.bf16.msra.mxu0 %v15653_v43  ;;  %4502 = vmatprep.mubr.bf16.mxu0 %v13166_v6  ;;  %v17783_v6 = vrot.slane %v3959_v2, 4  ;;  %v17785_v43 = vrot.slane %v3962_v31, 5  ;;  %v15677_v31 = vld [vmem:[#allocation9 + $0x360] sm:$0xff]   ;;  %v17806_v2 = vld [vmem:[#allocation2 + $0xd0] sm:$0x11] }
 0x1de   : > { %v17777_v12 = vrot.slane %v22016_v23, 5  ;;  %14447 = vmatprep.subr.bf16.mxu0 %v15660_v10  ;;  %22017 = vst [vmem:[#allocation41_spill] sm:$0xff] %v17788_v36  ;;  %v13917_v10 = vpop.f32.mrf.mxu1  ;;  %v13823_v4 = vpop.f32.mrf.mxu0  ;;  %v4000_v23 = vshll.u32 %v17516_v60, 16  ;;  %v3996_v62 = vrot.slane %v3994_v21, 5  ;;  %v4018_v60 = vshll.u32 %v17544_v13, 16  ;;  %v17914_v36 = vld [vmem:[#allocation2 + $0x188] sm:$0xff] }
 0x1df   : > { %v13918_v42 = vadd.f32 %v13917_v10, %v13916_v37  ;;  %v17808_v61 = vadd.f32 %v13823_v4, %v13822_v19  ;;  %3702 = vmatmul.mubr.bf16.gmra.mxu1 %v13137_v28  ;;  %v13139_v28 = vcombine.low %v17748_v49, %v17750_v25  ;;  %v3993_v19 = vrot.slane %v3991_v33, 4  ;;  %v15688_v4 = vld [vmem:[#allocation9 + $0x358] sm:$0xff]  }
 0x1e0   : > { %v13919_v34 = vpop.f32.mrf.mxu1  ;;  %v13825_v0 = vpop.f32.mrf.mxu0  ;;  %3709 = vmatprep.mubr.bf16.mxu1 %v13140_v40  ;;  %v4010_v10 = vshll.u32 %v17806_v2, 16  ;;  %v4024_v33 = vshll.u32 %v17546_v48, 16  ;;  %v4028_v21 = vshrl.u32 %v17546_v48, 16  ;;  %v15690_v2 = vld [vmem:[#allocation9 + $0x350] sm:$0xff]  }
 0x1e1   : > { %14448 = vmatpush3.bf16.msra.mxu0 %v15661_v39  ;;  %v17814_v55 = vadd.f32 %v13918_v42, %v13806_v27  ;;  %v4015_v27 = vshrl.u32 %v17544_v13, 16  ;;  %v15689_v13 = vld [vmem:[#allocation9 + $0x318] sm:$0xff]  }
 0x1e2   : > { %14449 = vmatprep.subr.bf16.mxu0 %v15668_v56  ;;  %v13920_v39 = vpop.f32.mrf.mxu1  ;;  %v13826_v37 = vpop.f32.mrf.mxu0 }
 0x1e3   : > { %22018 = vst [vmem:[#allocation42_spill] sm:$0xff] %v17814_v55  ;;  %v13921_v56 = vadd.f32 %v13920_v39, %v13919_v34  ;;  %v17831_v3 = vadd.f32 %v13826_v37, %v13825_v0  ;;  %v3997_v39 = vor.u32 %v3996_v62, %v3993_v19  ;;  %v17849_v37 = vld [vmem:[#allocation2 + $0xe8] sm:$0x11] }
 0x1e4   : > { %4503 = vmatmul.mubr.bf16.gmra.mxu0 %v13165_v46  ;;  %v17829_v46 = vsel %vm16510_vm0, %v3912_v63, %v17677_v26  ;;  %v13922_v40 = vpop.f32.mrf.mxu1  ;;  %v13142_v26 = vcombine.high %v17810_v54, %v17812_v58  ;;  %v13167_v63 = vcombine.low %v17761_v38, %v17769_v22 }
 0x1e5   : > { %4510 = vmatprep.mubr.bf16.mxu0 %v13168_v32  ;;  %14450 = vmatpush3.bf16.msra.mxu0 %v15669_v16  ;;  %v13828_v32 = vpop.f32.mrf.mxu0  ;;  %v17837_v42 = vadd.f32 %v13921_v56, %v17566_v59  ;;  %v13170_v59 = vcombine.high %v17820_v35, %v17829_v46  ;;  %v17855_v56 = vld [vmem:[#allocation2 + $0x170] sm:$0xff] }
 0x1e6   : > { %14451 = vmatprep.subr.bf16.mxu0 %v15677_v31  ;;  %v13923_v16 = vpop.f32.mrf.mxu1  ;;  %v3983_v31 = vor.u32 %v17794_v20, %v17792_v14  ;;  %v17853_v20 = vld [vmem:[#allocation2 + $0x168] sm:$0xff] }
 0x1e7   : > { %22019 = vst [vmem:[#allocation43_spill] sm:$0xff] %v17837_v42  ;;  %v13829_v34 = vpop.f32.mrf.mxu0  ;;  %v13924_v0 = vadd.f32 %v13923_v16, %v13922_v40  ;;  %3710 = vmatmul.mubr.bf16.gmra.mxu1 %v13139_v28  ;;  %v22020_v42 = vld [vmem:[#allocation36_spill] sm:$0xff]  ;;  %v13141_v40 = vcombine.low %v17810_v54, %v17812_v58  ;;  %v17872_v28 = vsel %vm16510_vm0, %v17773_v9, %v17777_v12  ;;  %v17880_v16 = vrot.slane %v4010_v10, 5 }
 0x1e8   : > { %v17851_v38 = vadd.f32 %v13829_v34, %v13828_v32  ;;  %v13925_v22 = vpop.f32.mrf.mxu1  ;;  %3717 = vmatprep.mubr.bf16.mxu1 %v13142_v26  ;;  %v17874_v62 = vrot.slane %v3983_v31, 4  ;;  %v17878_v26 = vrot.slane %v3997_v39, 4  ;;  %v17884_v9 = vrot.slane %v4015_v27, 4  ;;  %v15692_v31 = vld [vmem:[#allocation9 + $0x348] sm:$0xff]   ;;  %v17900_v39 = vld [vmem:[#allocation2 + $0x20] sm:$0xff] }
 0x1e9   : > { %14452 = vmatpush3.bf16.msra.mxu0 %v15679_v47  ;;  %v13831_v48 = vpop.f32.mrf.mxu0  ;;  %v17858_v55 = vadd.f32 %v13924_v0, %v22020_v42  ;;  %v17866_v47 = vsel %vm16510_vm0, %v17771_v17, %v17696_v29  ;;  %v15691_v29 = vld [vmem:[#allocation9 + $0x310] sm:$0xff]   ;;  %v17886_v12 = vrot.slane %v4018_v60, 5  ;;  %v17894_v10 = vrot.slane %v4024_v33, 5 }
 0x1ea   : > { %14453 = vmatprep.subr.bf16.mxu0 %v15688_v4  ;;  %v13926_v19 = vpop.f32.mrf.mxu1  ;;  %v17876_v4 = vrot.slane %v4000_v23, 5  ;;  %v13169_v27 = vcombine.low %v17820_v35, %v17829_v46  ;;  %v17909_v46 = vld [vmem:[#allocation2 + $0x180] sm:$0xff] }
 0x1eb   : > { %22021 = vst [vmem:[#allocation36_spill] sm:$0xff] %v17858_v55  ;;  %v13832_v32 = vpop.f32.mrf.mxu0  ;;  %v13927_v42 = vadd.f32 %v13926_v19, %v13925_v22  ;;  %v4039_v22 = vshrl.u32 %v17590_v45, 16 }
 0x1ec   : > { %4511 = vmatmul.mubr.bf16.gmra.mxu0 %v13167_v63  ;;  %v4006_v63 = vrot.slane %v4004_v51, 4  ;;  %v17882_v17 = vadd.f32 %v13832_v32, %v13831_v48  ;;  %v13928_v34 = vpop.f32.mrf.mxu1  ;;  %v13144_v51 = vcombine.high %v17853_v20, %v17855_v56  ;;  %v15693_v48 = vld [vmem:[#allocation9 + $0x308] sm:$0xff]   ;;  %v13172_v32 = vcombine.high %v17866_v47, %v17872_v28 }
 0x1ed   : > { %4518 = vmatprep.mubr.bf16.mxu0 %v13170_v59  ;;  %14454 = vmatpush3.bf16.msra.mxu0 %v15689_v13  ;;  %v13834_v59 = vpop.f32.mrf.mxu0  ;;  %v17890_v0 = vadd.f32 %v13927_v42, %v17661_v52  ;;  %v17896_v13 = vrot.slane %v4028_v21, 4  ;;  %v15694_v52 = vld [vmem:[#allocation9 + $0x340] sm:$0xff]   ;;  %v4655_v42 = vld [vmem:[#allocation2 + $0x18] sm:$0xee] }
 0x1ee   : > { %14455 = vmatprep.subr.bf16.mxu0 %v15690_v2  ;;  %v13929_v60 = vpop.f32.mrf.mxu1  ;;  %v4007_v21 = vor.u32 %v4006_v63, %v17876_v4  ;;  %v4042_v63 = vshll.u32 %v17590_v45, 16  ;;  %v17931_v45 = vsel %vm16510_vm0, %v17783_v6, %v17785_v43  ;;  %v13146_v6 = vcombine.high %v17909_v46, %v17914_v36 }
 0x1ef   : > { %22022 = vst [vmem:[#allocation44_spill] sm:$0xff] %v17890_v0  ;;  %v13835_v19 = vpop.f32.mrf.mxu0  ;;  %v13930_v33 = vadd.f32 %v13929_v60, %v13928_v34  ;;  %3718 = vmatmul.mubr.bf16.gmra.mxu1 %v13141_v40  ;;  %v17921_v40 = vsel %vm16510_vm0, %v17781_v30, %v17729_v15  ;;  %v22023_v60 = vld [vmem:[#allocation34_spill] sm:$0xff]  ;;  %v4048_v30 = vshll.u32 %v17592_v41, 16 }
 0x1f0   : > { %v17907_v23 = vadd.f32 %v13835_v19, %v13834_v59  ;;  %v13931_v35 = vpop.f32.mrf.mxu1  ;;  %3725 = vmatprep.mubr.bf16.mxu1 %v13144_v51  ;;  %v17925_v34 = vrot.slane %v4007_v21, 4  ;;  %v4724_v15 = vrot.slane %v22023_v60, 5  ;;  %v13171_v19 = vcombine.low %v17866_v47, %v17872_v28 }
 0x1f1   : > { %14456 = vmatpush3.bf16.msra.mxu0 %v15691_v29  ;;  %v17912_v2 = vadd.f32 %v13930_v33, %v17685_v1  ;;  %v13143_v1 = vcombine.low %v17853_v20, %v17855_v56  ;;  %v22025_v21 = vrot.slane %v17900_v39, 5  ;;  %v4044_v60 = vrot.slane %v4042_v63, 5 }
 0x1f2   : > { %14457 = vmatprep.subr.bf16.mxu0 %v15692_v31  ;;  %v13932_v55 = vpop.f32.mrf.mxu1  ;;  %v15695_v31 = vld [vmem:[#allocation9 + $0x300] sm:$0xff]   ;;  %v13174_v47 = vcombine.high %v17921_v40, %v17931_v45 }
 0x1f3   : > { %v13933_v29 = vadd.f32 %v13932_v55, %v13931_v35  ;;  %v15700_v55 = vld [vmem:[#allocation9 + $0x478] sm:$0xff]   ;;  %v4041_v35 = vrot.slane %v4039_v22, 4  ;;  %v13173_v22 = vcombine.low %v17921_v40, %v17931_v45  ;;  %v22026_v40 = vmov %v22025_v21 }
 0x1f4   : > { %4519 = vmatmul.mubr.bf16.gmra.mxu0 %v13169_v27  ;;  %v13837_v0 = vpop.f32.mrf.mxu0  ;;  %v13934_v51 = vpop.f32.mrf.mxu1  ;;  %v13211_v27 = vrot.slane %v4655_v42, 9  ;;  %v4723_v42 = vrot.slane %v22025_v21, 4 }
 0x1f5   : > { %4526 = vmatprep.mubr.bf16.mxu0 %v13172_v32  ;;  %14458 = vmatpush3.bf16.msra.mxu0 %v15693_v48  ;;  %v17940_v32 = vadd.f32 %v13933_v29, %v17779_v18  ;;  %v4021_v18 = vor.u32 %v17886_v12, %v17884_v9  ;;  %v17953_v29 = vld [vmem:[#allocation2 + $0x100] sm:$0x11]  ;;  %v17966_v9 = vsel %vm16510_vm0, %v17796_v44, %v17792_v14  ;;  %v15904_v44 = vld [vmem:[#allocation2 + $0x38] sm:$0xff] }
 0x1f6   : > { %v13838_v59 = vpop.f32.mrf.mxu0  ;;  %14459 = vmatprep.subr.bf16.mxu0 %v15694_v52  ;;  %v13935_v33 = vpop.f32.mrf.mxu1  ;;  %v4052_v52 = vshrl.u32 %v17592_v41, 16  ;;  %v17972_v12 = vsel %vm16510_vm0, %v17874_v62, %v17798_v50  ;;  %v4045_v14 = vor.u32 %v4044_v60, %v4041_v35  ;;  %v4728_v45 = vrot.slane %v15904_v44, 5  ;;  %v22029_v35 = vld [vmem:[#allocation35_spill] sm:$0xff] }
 0x1f7   : > { %v17937_v48 = vadd.f32 %v13838_v59, %v13837_v0  ;;  %22024 = vst [vmem:[#allocation34_spill] sm:$0xff] %v17940_v32  ;;  %v13936_v28 = vadd.f32 %v13935_v33, %v13934_v51  ;;  %v4031_v0 = vor.u32 %v17896_v13, %v17894_v10  ;;  %v4656_v59 = vld [vmem:[#allocation2 + $0x30] sm:$0xee]  ;;  %3726 = vmatmul.mubr.bf16.gmra.mxu1 %v13143_v1  ;;  %v17984_v50 = vrot.slane %v4021_v18, 4 }
 0x1f8   : > { %v13840_v43 = vpop.f32.mrf.mxu0  ;;  %v13937_v63 = vpop.f32.mrf.mxu1  ;;  %3733 = vmatprep.mubr.bf16.mxu1 %v13146_v6  ;;  %v17994_v6 = vrot.slane %v4048_v30, 5  ;;  %v4730_v18 = vrot.slane %v4728_v45, 4  ;;  %v4063_v30 = vshrl.u32 %v17615_v57, 16 }
 0x1f9   : > { %14460 = vmatpush3.bf16.msra.mxu0 %v15695_v31  ;;  %v17960_v51 = vadd.f32 %v13936_v28, %v17808_v61  ;;  %v17978_v61 = vsel %vm17204_vm6, %v13211_v27, %v22026_v40  ;;  %v17982_v31 = vsel %vm17204_vm6, %v4723_v42, %v4724_v15  ;;  %v17986_v62 = vrot.slane %v4031_v0, 4 }
 0x1fa   : > { %v13841_v32 = vpop.f32.mrf.mxu0  ;;  %14669 = vmatprep.subr.bf16.mxu0 %v15700_v55  ;;  %v13938_v13 = vpop.f32.mrf.mxu1  ;;  %v13145_v27 = vcombine.low %v17909_v46, %v17914_v36  ;;  %v4058_v15 = vshll.u32 %v17953_v29, 16  ;;  %v13228_v21 = vcombine.high %v17978_v61, %v17982_v31  ;;  %v4054_v42 = vrot.slane %v4052_v52, 4 }
 0x1fb   : > { %v17957_v41 = vadd.f32 %v13841_v32, %v13840_v43  ;;  %v13939_v55 = vadd.f32 %v13938_v13, %v13937_v63  ;;  %v13212_v43 = vrot.slane %v4656_v59, 9  ;;  %v18003_v28 = vrot.slane %v4045_v14, 4 }
 0x1fc   : > { %4527 = vmatmul.mubr.bf16.gmra.mxu0 %v13171_v19  ;;  %v22028_v19 = vshll.u32 %v17849_v37, 16  ;;  %v13940_v32 = vpop.f32.mrf.mxu1  ;;  %v4731_v37 = vrot.slane %v22029_v35, 5  ;;  %v4066_v0 = vshll.u32 %v17615_v57, 16  ;;  %v13176_v59 = vcombine.high %v17966_v9, %v17972_v12 }
 0x1fd   : > { %4534 = vmatprep.mubr.bf16.mxu0 %v13174_v47  ;;  %v17998_v33 = vadd.f32 %v13939_v55, %v17831_v3  ;;  %v18014_v55 = vrot.slane %v4058_v15, 5  ;;  %v18018_v57 = vsel %vm17204_vm6, %v13212_v43, %v4728_v45  ;;  %v13227_v15 = vcombine.low %v17978_v61, %v17982_v31  ;;  %v4657_v43 = vld [vmem:[#allocation2 + $0x48] sm:$0xee]  ;;  %v15699_v31 = vld [vmem:[#allocation9 + $0x3b8] sm:$0xff]  }
 0x1fe   : > { %v17990_v39 = vrot.slane %v22028_v19, 5  ;;  %v13941_v47 = vpop.f32.mrf.mxu1  ;;  %v18022_v19 = vsel %vm17204_vm6, %v4730_v18, %v4731_v37  ;;  %v4055_v37 = vor.u32 %v4054_v42, %v17994_v6  ;;  %v18050_v61 = vrot.slane %v4066_v0, 5 }
 0x1ff   : > { %v13942_v3 = vadd.f32 %v13941_v47, %v13940_v32  ;;  %3734 = vmatmul.mubr.bf16.gmra.mxu1 %v13145_v27  ;;  %v15905_v32 = vld [vmem:[#allocation2 + $0x50] sm:$0xff]  ;;  %v13175_v42 = vcombine.low %v17966_v9, %v17972_v12 }
 0x200   : > { %v13943_v13 = vpop.f32.mrf.mxu1  ;;  %5119 = vmatprep.mubr.bf16.mxu1 %v13228_v21  ;;  %v4735_v27 = vrot.slane %v15905_v32, 5 }
 0x201   : > { %v13843_v60 = vpop.f32.mrf.mxu0  ;;  %v18012_v52 = vadd.f32 %v13942_v3, %v17851_v38  ;;  %v18028_v38 = vsel %vm16510_vm0, %v17878_v26, %v17876_v4  ;;  %v4072_v4 = vshll.u32 %v17623_v5, 16  ;;  %v4076_v26 = vshrl.u32 %v17623_v5, 16  ;;  %v15906_v5 = vld [vmem:[#allocation2 + $0x58] sm:$0x11] }
 0x202   : > { %v13944_v44 = vpop.f32.mrf.mxu1  ;;  %v4737_v3 = vrot.slane %v4735_v27, 4 }
 0x203   : > { %v13844_v63 = vpop.f32.mrf.mxu0  ;;  %v13945_v45 = vadd.f32 %v13944_v44, %v13943_v13  ;;  %v15704_v13 = vld [vmem:[#allocation9 + $0x3f0] sm:$0xff]   ;;  %v18058_v0 = vrot.slane %v4072_v4, 5  ;;  %v4078_v32 = vrot.slane %v4076_v26, 4  ;;  %v15712_v26 = vld [vmem:[#allocation9 + $0x3e8] sm:$0xff]  }
 0x204   : > { %v18009_v40 = vadd.f32 %v13844_v63, %v13843_v60  ;;  %4535 = vmatmul.mubr.bf16.gmra.mxu0 %v13173_v22  ;;  %v18034_v22 = vsel %vm16510_vm0, %v17925_v34, %v17880_v16  ;;  %v13946_v35 = vpop.f32.mrf.mxu1  ;;  %v18039_v60 = vrot.slane %v4063_v30, 4  ;;  %v13230_v34 = vcombine.high %v18018_v57, %v18022_v19  ;;  %v18054_v30 = vld [vmem:[#allocation2 + $0x118] sm:$0x11] }
 0x205   : > { %v13846_v14 = vpop.f32.mrf.mxu0  ;;  %4542 = vmatprep.mubr.bf16.mxu0 %v13176_v59  ;;  %v18046_v16 = vadd.f32 %v13945_v45, %v17882_v17  ;;  %v13213_v59 = vrot.slane %v4657_v43, 9  ;;  %v4738_v63 = vrot.slane %v15906_v5, 5  ;;  %v13178_v17 = vcombine.high %v18028_v38, %v18034_v22 }
 0x206   : > { %v13947_v18 = vpop.f32.mrf.mxu1  ;;  %v18069_v45 = vsel %vm16510_vm0, %v17984_v50, %v17894_v10  ;;  %v4056_v43 = vrot.slane %v4055_v37, 4  ;;  %v15907_v50 = vld [vmem:[#allocation2 + $0x68] sm:$0xff]  ;;  %v4090_v5 = vshll.u32 %v17705_v53, 16 }
 0x207   : > { %v13847_v21 = vpop.f32.mrf.mxu0  ;;  %5120 = vmatmul.mubr.bf16.vlgmr.msra.gmra.mxu1 %v13227_v15  ;;  %v18079_v4 = vsel %vm17204_vm6, %v13213_v59, %v4735_v27  ;;  %v18083_v10 = vsel %vm17204_vm6, %v4737_v3, %v4738_v63  ;;  %v4742_v37 = vrot.slane %v15907_v50, 5  ;;  %v4658_v27 = vld [vmem:[#allocation2 + $0x60] sm:$0xee]  ;;  %v4079_v59 = vor.u32 %v4078_v32, %v18058_v0  ;;  %v15720_v50 = vld [vmem:[#allocation9 + $0x3e0] sm:$0xff]  }
 0x208   : > { %v18043_v47 = vadd.f32 %v13847_v21, %v13846_v14  ;;  %v13948_v14 = vadd.f32 %v13947_v18, %v13946_v35  ;;  %v13949_v44 = vpop.f32.mrf.mxu1  ;;  %5127 = vmatprep.mubr.bf16.mxu1 %v13230_v34  ;;  %14558 = vmatpush3.bf16.msra.mxu1 %v15699_v31  ;;  %v15707_v21 = vld [vmem:[#allocation9 + $0x3b0] sm:$0xff]   ;;  %v18075_v35 = vsel %vm16510_vm0, %v17986_v62, %v17990_v39  ;;  %v4082_v39 = vshll.u32 %v18054_v30, 16 }
 0x209   : > { %14559 = vmatprep.subr.bf16.mxu1 %v15704_v13  ;;  %v13229_v31 = vcombine.low %v18018_v57, %v18022_v19  ;;  %v4069_v62 = vor.u32 %v18050_v61, %v18039_v60  ;;  %v4087_v3 = vshrl.u32 %v17705_v53, 16  ;;  %v4096_v63 = vshll.u32 %v17707_v11, 16  ;;  %v15715_v61 = vld [vmem:[#allocation9 + $0x3a8] sm:$0xff]  }
 0x20a   : > { %v18063_v12 = vadd.f32 %v13948_v14, %v17907_v23  ;;  %v13950_v23 = vpop.f32.mrf.mxu1  ;;  %v13232_v19 = vcombine.high %v18079_v4, %v18083_v10  ;;  %v4100_v60 = vshrl.u32 %v17707_v11, 16  ;;  %v13180_v14 = vcombine.high %v18069_v45, %v18075_v35 }
 0x20b   : > { %v13951_v34 = vadd.f32 %v13950_v23, %v13949_v44  ;;  %v13214_v53 = vrot.slane %v4658_v27, 9  ;;  %v4744_v32 = vrot.slane %v4742_v37, 4  ;;  %v15908_v23 = vld [vmem:[#allocation2 + $0x70] sm:$0x11]  ;;  %v18113_v11 = vsel %vm16510_vm0, %v4056_v43, %v18014_v55  ;;  %v15721_v43 = vld [vmem:[#allocation9 + $0x3a0] sm:$0xff]  }
 0x20c   : > { %v13849_v15 = vpop.f32.mrf.mxu0  ;;  %4543 = vmatmul.mubr.bf16.gmra.mxu0 %v13175_v42  ;;  %v13952_v18 = vpop.f32.mrf.mxu1  ;;  %14560 = vmatpush3.bf16.msra.mxu1 %v15707_v21  ;;  %v4070_v21 = vrot.slane %v4069_v62, 4  ;;  %v4080_v9 = vrot.slane %v4079_v59, 4  ;;  %v18124_v55 = vrot.slane %v4100_v60, 4 }
 0x20d   : > { %4550 = vmatprep.mubr.bf16.mxu0 %v13178_v17  ;;  %v18097_v57 = vadd.f32 %v13951_v34, %v17937_v48  ;;  %14561 = vmatprep.subr.bf16.mxu1 %v15712_v26  ;;  %v18108_v34 = vsel %vm16510_vm0, %v18003_v28, %v17994_v6  ;;  %v4089_v26 = vrot.slane %v4087_v3, 4  ;;  %v18120_v6 = vld [vmem:[#allocation2 + $0x130] sm:$0x11]  ;;  %v18122_v28 = vrot.slane %v4096_v63, 5  ;;  %v15909_v3 = vld [vmem:[#allocation2 + $0x80] sm:$0xff] }
 0x20e   : > { %v13850_v42 = vpop.f32.mrf.mxu0  ;;  %v13953_v44 = vpop.f32.mrf.mxu1  ;;  %v18131_v59 = vsel %vm17204_vm6, %v13214_v53, %v4742_v37  ;;  %v15724_v63 = vld [vmem:[#allocation9 + $0x3d8] sm:$0xff]   ;;  %v13231_v53 = vcombine.low %v18079_v4, %v18083_v10 }
 0x20f   : > { %v18094_v13 = vadd.f32 %v13850_v42, %v13849_v15  ;;  %22030 = vst [vmem:[#allocation35_spill] sm:$0xff] %v18097_v57  ;;  %v4745_v15 = vrot.slane %v15908_v23, 5  ;;  %v13954_v48 = vadd.f32 %v13953_v44, %v13952_v18  ;;  %5128 = vmatmul.mubr.bf16.gmra.mxu1 %v13229_v31  ;;  %v4084_v23 = vrot.slane %v4082_v39, 5 }
 0x210   : > { %v13852_v17 = vpop.f32.mrf.mxu0  ;;  %v13955_v27 = vpop.f32.mrf.mxu1  ;;  %v4092_v57 = vrot.slane %v4090_v5, 5  ;;  %5135 = vmatprep.mubr.bf16.mxu1 %v13232_v19  ;;  %14562 = vmatpush3.bf16.msra.mxu1 %v15715_v61  ;;  %v22031_v31 = vcombine.low %v18028_v38, %v18034_v22  ;;  %v4749_v5 = vrot.slane %v15909_v3, 5  ;;  %v13179_v19 = vcombine.low %v18069_v45, %v18075_v35  ;;  %v4659_v38 = vld [vmem:[#allocation2 + $0x78] sm:$0xee] }
 0x211   : > { %v18118_v44 = vadd.f32 %v13954_v48, %v17957_v41  ;;  %v18135_v41 = vsel %vm17204_vm6, %v4744_v32, %v4745_v15  ;;  %14563 = vmatprep.subr.bf16.mxu1 %v15720_v50  ;;  %v13182_v61 = vcombine.high %v18108_v34, %v18113_v11  ;;  %v4106_v35 = vshll.u32 %v18120_v6, 16  ;;  %v15726_v50 = vld [vmem:[#allocation9 + $0x398] sm:$0xff]  }
 0x212   : > { %v13853_v42 = vpop.f32.mrf.mxu0  ;;  %v13956_v39 = vpop.f32.mrf.mxu1  ;;  %v4093_v32 = vor.u32 %v4092_v57, %v4089_v26  ;;  %v13215_v4 = vrot.slane %v4659_v38, 9  ;;  %v4751_v10 = vrot.slane %v4749_v5, 4  ;;  %v15910_v57 = vld [vmem:[#allocation2 + $0x88] sm:$0x11]  ;;  %v4103_v26 = vor.u32 %v18124_v55, %v18122_v28 }
 0x213   : > { %v18115_v18 = vadd.f32 %v13853_v42, %v13852_v17  ;;  %v13957_v60 = vadd.f32 %v13956_v39, %v13955_v27  ;;  %v18144_v17 = vsel %vm16510_vm0, %v4070_v21, %v18058_v0  ;;  %v18158_v0 = vsel %vm16510_vm0, %v4080_v9, %v4084_v23  ;;  %v22033_v39 = vld [vmem:[#allocation29_spill] sm:$0xff] }
 0x214   : > { %v13855_v62 = vpop.f32.mrf.mxu0  ;;  %4551 = vmatmul.mubr.bf16.gmra.mxu0 %v22031_v31  ;;  %v13958_v37 = vpop.f32.mrf.mxu1  ;;  %14564 = vmatpush3.bf16.msra.mxu1 %v15721_v43  ;;  %v4752_v21 = vrot.slane %v15910_v57, 5  ;;  %v4114_v43 = vshll.u32 %v17748_v49, 16  ;;  %v22032_v31 = vld [vmem:[#allocation28_spill] sm:$0xff]  ;;  %v4120_v38 = vshll.u32 %v17750_v25, 16  ;;  %v13184_v23 = vcombine.high %v18144_v17, %v18158_v0 }
 0x215   : > { %4558 = vmatprep.mubr.bf16.mxu0 %v13180_v14  ;;  %v18151_v45 = vadd.f32 %v13957_v60, %v18009_v40  ;;  %v13234_v14 = vcombine.high %v18131_v59, %v18135_v41  ;;  %14565 = vmatprep.subr.bf16.mxu1 %v15724_v63  ;;  %v15728_v40 = vld [vmem:[#allocation9 + $0x3d0] sm:$0xff]   ;;  %v18166_v3 = vadd.f32 %v22033_v39, %v22032_v31  ;;  %v4094_v63 = vrot.slane %v4093_v32, 4  ;;  %v18179_v32 = vld [vmem:[#allocation2 + $0x148] sm:$0x11] }
 0x216   : > { %v13856_v22 = vpop.f32.mrf.mxu0  ;;  %v13959_v42 = vpop.f32.mrf.mxu1  ;;  %v4104_v39 = vrot.slane %v4103_v26, 4 }
 0x217   : > { %v18148_v15 = vadd.f32 %v13856_v22, %v13855_v62  ;;  %v13960_v27 = vadd.f32 %v13959_v42, %v13958_v37  ;;  %v4111_v62 = vshrl.u32 %v17748_v49, 16  ;;  %5136 = vmatmul.mubr.bf16.gmra.mxu1 %v13231_v53  ;;  %v4124_v37 = vshrl.u32 %v17750_v25, 16  ;;  %v15729_v42 = vld [vmem:[#allocation9 + $0x390] sm:$0xff]   ;;  %v15732_v25 = vld [vmem:[#allocation9 + $0x3c8] sm:$0xff]  }
 0x218   : > { %v13858_v48 = vpop.f32.mrf.mxu0  ;;  %v13961_v60 = vpop.f32.mrf.mxu1  ;;  %5143 = vmatprep.mubr.bf16.mxu1 %v13234_v14  ;;  %14566 = vmatpush3.bf16.msra.mxu1 %v15726_v50  ;;  %v4108_v53 = vrot.slane %v4106_v35, 5  ;;  %v4660_v35 = vld [vmem:[#allocation2 + $0x90] sm:$0xee] }
 0x219   : > { %v18174_v55 = vadd.f32 %v13960_v27, %v18043_v47  ;;  %v18187_v47 = vsel %vm17204_vm6, %v4751_v10, %v4752_v21  ;;  %v15911_v27 = vld [vmem:[#allocation2 + $0x98] sm:$0xff]  ;;  %14567 = vmatprep.subr.bf16.mxu1 %v15728_v40  ;;  %v13233_v10 = vcombine.low %v18131_v59, %v18135_v41  ;;  %v18198_v21 = vrot.slane %v4120_v38, 5  ;;  %v15734_v41 = vld [vmem:[#allocation9 + $0x3c0] sm:$0xff]  }
 0x21a   : > { %v13859_v9 = vpop.f32.mrf.mxu0  ;;  %v13962_v31 = vpop.f32.mrf.mxu1  ;;  %v4756_v14 = vrot.slane %v15911_v27, 5  ;;  %v4126_v26 = vrot.slane %v4124_v37, 4 }
 0x21b   : > { %v18171_v22 = vadd.f32 %v13859_v9, %v13858_v48  ;;  %22034 = vst [vmem:[#allocation28_spill] sm:$0xff] %v18174_v55  ;;  %v18183_v48 = vsel %vm17204_vm6, %v13215_v4, %v4749_v5  ;;  %v13963_v50 = vadd.f32 %v13962_v31, %v13961_v60  ;;  %v4116_v9 = vrot.slane %v4114_v43, 5  ;;  %v15733_v43 = vld [vmem:[#allocation9 + $0x388] sm:$0xff]   ;;  %v15912_v55 = vld [vmem:[#allocation2 + $0xa0] sm:$0x11] }
 0x21c   : > { %v14013_v57 = vpop.f32.mrf.mxu0  ;;  %4559 = vmatmul.mubr.bf16.gmra.mxu0 %v13179_v19  ;;  %v4113_v19 = vrot.slane %v4111_v62, 4  ;;  %v13964_v5 = vpop.f32.mrf.mxu1  ;;  %v18194_v4 = vsel %vm16510_vm0, %v4094_v63, %v18122_v28  ;;  %v13236_v62 = vcombine.high %v18183_v48, %v18187_v47  ;;  %14568 = vmatpush3.bf16.msra.mxu1 %v15729_v42  ;;  %v4130_v28 = vshll.u32 %v18179_v32, 16 }
 0x21d   : > { %4566 = vmatprep.mubr.bf16.mxu0 %v13182_v61  ;;  %v18201_v40 = vadd.f32 %v13963_v50, %v18094_v13  ;;  %v13216_v63 = vrot.slane %v4660_v35, 9  ;;  %v4758_v27 = vrot.slane %v4756_v14, 4  ;;  %v4759_v59 = vrot.slane %v15912_v55, 5  ;;  %14569 = vmatprep.subr.bf16.mxu1 %v15732_v25 }
 0x21e   : > { %v14014_v49 = vpop.f32.mrf.mxu0  ;;  %v13965_v31 = vpop.f32.mrf.mxu1  ;;  %v4117_v37 = vor.u32 %v4116_v9, %v4113_v19  ;;  %v4135_v50 = vshrl.u32 %v17810_v54, 16  ;;  %v4138_v35 = vshll.u32 %v17810_v54, 16  ;;  %v4144_v55 = vshll.u32 %v17812_v58, 16 }
 0x21f   : > { %v14015_v61 = vadd.f32 %v14014_v49, %v14013_v57  ;;  %22035 = vst [vmem:[#allocation29_spill] sm:$0xff] %v18201_v40  ;;  %v13966_v13 = vadd.f32 %v13965_v31, %v13964_v5  ;;  %v18211_v49 = vsel %vm16510_vm0, %v4104_v39, %v4108_v53  ;;  %5144 = vmatmul.mubr.bf16.gmra.mxu1 %v13233_v10  ;;  %v4148_v25 = vshrl.u32 %v17812_v58, 16  ;;  %v15735_v53 = vld [vmem:[#allocation9 + $0x380] sm:$0xff]  }
 0x220   : > { %v14016_v60 = vpop.f32.mrf.mxu0  ;;  %v13967_v57 = vpop.f32.mrf.mxu1  ;;  %v4127_v5 = vor.u32 %v4126_v26, %v18198_v21  ;;  %5151 = vmatprep.mubr.bf16.mxu1 %v13236_v62  ;;  %14570 = vmatpush3.bf16.msra.mxu1 %v15733_v43  ;;  %v22036_v19 = vcombine.low %v18108_v34, %v18113_v11  ;;  %v4132_v54 = vrot.slane %v4130_v28, 5  ;;  %v18226_v10 = vsel %vm17204_vm6, %v13216_v63, %v4756_v14  ;;  %v22037_v26 = vld [vmem:[#allocation39_spill] sm:$0xff] }
 0x221   : > { %v18207_v38 = vadd.f32 %v14015_v61, %v17683_v24  ;;  %v18218_v24 = vadd.f32 %v13966_v13, %v18115_v18  ;;  %v18230_v58 = vsel %vm17204_vm6, %v4758_v27, %v4759_v59  ;;  %v15913_v18 = vld [vmem:[#allocation2 + $0xb0] sm:$0xff]  ;;  %14571 = vmatprep.subr.bf16.mxu1 %v15734_v41  ;;  %v4118_v34 = vrot.slane %v4117_v37, 4  ;;  %v4661_v14 = vld [vmem:[#allocation2 + $0xa8] sm:$0xee] }
 0x222   : > { %v14017_v42 = vpop.f32.mrf.mxu0  ;;  %v13968_v9 = vpop.f32.mrf.mxu1  ;;  %v4763_v61 = vrot.slane %v15913_v18, 5  ;;  %v13235_v11 = vcombine.low %v18183_v48, %v18187_v47  ;;  %v4137_v63 = vrot.slane %v4135_v50, 4  ;;  %v4140_v27 = vrot.slane %v4138_v35, 5  ;;  %v15914_v50 = vld [vmem:[#allocation2 + $0xb8] sm:$0x11] }
 0x223   : > { %v14018_v40 = vadd.f32 %v14017_v42, %v14016_v60  ;;  %v13969_v43 = vadd.f32 %v13968_v9, %v13967_v57  ;;  %v18237_v60 = vld [vmem:[#allocation2 + $0x160] sm:$0x11]  ;;  %v18239_v59 = vrot.slane %v4144_v55, 5  ;;  %v4150_v13 = vrot.slane %v4148_v25, 4  ;;  %v22038_v55 = vld [vmem:[#allocation40_spill] sm:$0xff] }
 0x224   : > { %v14019_v39 = vpop.f32.mrf.mxu0  ;;  %4567 = vmatmul.mubr.bf16.gmra.mxu0 %v22036_v19  ;;  %v13970_v28 = vpop.f32.mrf.mxu1  ;;  %v13238_v37 = vcombine.high %v18226_v10, %v18230_v58  ;;  %14572 = vmatpush3.bf16.msra.mxu1 %v15735_v53  ;;  %v4154_v42 = vshll.u32 %v18237_v60, 16  ;;  %v13217_v57 = vrot.slane %v4661_v14, 9  ;;  %v4765_v19 = vrot.slane %v4763_v61, 4 }
 0x225   : > { %v18233_v62 = vadd.f32 %v14018_v40, %v22037_v26  ;;  %4574 = vmatprep.mubr.bf16.mxu0 %v13184_v23  ;;  %v18242_v40 = vadd.f32 %v13969_v43, %v18148_v15  ;;  %v4128_v23 = vrot.slane %v4127_v5, 4  ;;  %v4766_v35 = vrot.slane %v15914_v50, 5  ;;  %v22041_v50 = vld [vmem:[#allocation27_spill] sm:$0xff] }
 0x226   : > { %v14020_v31 = vpop.f32.mrf.mxu0  ;;  %v13971_v47 = vpop.f32.mrf.mxu1  ;;  %v13185_v15 = vcombine.low %v18194_v4, %v18211_v49  ;;  %v13186_v25 = vcombine.high %v18194_v4, %v18211_v49  ;;  %v18257_v53 = vsel %vm16510_vm0, %v4118_v34, %v18198_v21  ;;  %v4141_v26 = vor.u32 %v4140_v27, %v4137_v63 }
 0x227   : > { %v14021_v41 = vadd.f32 %v14020_v31, %v14019_v39  ;;  %v13972_v5 = vadd.f32 %v13971_v47, %v13970_v28  ;;  %5152 = vmatmul.mubr.bf16.gmra.mxu1 %v13235_v11  ;;  %v4151_v43 = vor.u32 %v4150_v13, %v18239_v59  ;;  %v4159_v14 = vshrl.u32 %v17853_v20, 16 }
 0x228   : > { %v14022_v48 = vpop.f32.mrf.mxu0  ;;  %v13973_v18 = vpop.f32.mrf.mxu1  ;;  %v18266_v4 = vsel %vm16510_vm0, %v4128_v23, %v4132_v54  ;;  %5159 = vmatprep.mubr.bf16.mxu1 %v13238_v37  ;;  %v4162_v49 = vshll.u32 %v17853_v20, 16  ;;  %v22040_v34 = vcombine.low %v18144_v17, %v18158_v0  ;;  %v4156_v28 = vrot.slane %v4154_v42, 5  ;;  %v15915_v54 = vld [vmem:[#allocation2 + $0xc8] sm:$0xff]  ;;  %v4662_v23 = vld [vmem:[#allocation2 + $0xc0] sm:$0xee] }
 0x229   : > { %v18248_v9 = vadd.f32 %v14021_v41, %v22038_v55  ;;  %v18262_v41 = vadd.f32 %v13972_v5, %v18171_v22  ;;  %v18274_v63 = vsel %vm17204_vm6, %v13217_v57, %v4763_v61  ;;  %v18278_v22 = vsel %vm17204_vm6, %v4765_v19, %v4766_v35 }
 0x22a   : > { %v14023_v39 = vpop.f32.mrf.mxu0  ;;  %v13974_v11 = vpop.f32.mrf.mxu1  ;;  %v4770_v27 = vrot.slane %v15915_v54, 5  ;;  %v4168_v17 = vshll.u32 %v17855_v56, 16  ;;  %v4172_v0 = vshrl.u32 %v17855_v56, 16  ;;  %v4142_v61 = vrot.slane %v4141_v26, 4  ;;  %v15916_v26 = vld [vmem:[#allocation2 + $0xd0] sm:$0x11] }
 0x22b   : > { %v14024_v31 = vadd.f32 %v14023_v39, %v14022_v48  ;;  %22039 = vst [vmem:[#allocation39_spill] sm:$0xff] %v18262_v41  ;;  %v13975_v20 = vadd.f32 %v13974_v11, %v13973_v18  ;;  %v4152_v47 = vrot.slane %v4151_v43, 4  ;;  %v13237_v42 = vcombine.low %v18226_v10, %v18230_v58  ;;  %v22049_v41 = vld [vmem:[#allocation31_spill] sm:$0xff] }
 0x22c   : > { %v14025_v21 = vpop.f32.mrf.mxu0  ;;  %4575 = vmatmul.mubr.bf16.gmra.mxu0 %v22040_v34  ;;  %v13976_v48 = vpop.f32.mrf.mxu1  ;;  %v4161_v57 = vrot.slane %v4159_v14, 4  ;;  %v13240_v55 = vcombine.high %v18274_v63, %v18278_v22  ;;  %v13188_v56 = vcombine.high %v18257_v53, %v18266_v4  ;;  %v13218_v39 = vrot.slane %v4662_v23, 9  ;;  %v18297_v14 = vld [vmem:[#allocation2 + $0x178] sm:$0x11] }
 0x22d   : > { %v18281_v13 = vadd.f32 %v14024_v31, %v17755_v7  ;;  %4582 = vmatprep.mubr.bf16.mxu0 %v13186_v25  ;;  %v18288_v35 = vadd.f32 %v13975_v20, %v22041_v50  ;;  %v4164_v7 = vrot.slane %v4162_v49, 5  ;;  %v4772_v18 = vrot.slane %v4770_v27, 4  ;;  %v22043_v31 = vld [vmem:[#allocation41_spill] sm:$0xff] }
 0x22e   : > { %v14026_v37 = vpop.f32.mrf.mxu0  ;;  %v13977_v5 = vpop.f32.mrf.mxu1  ;;  %v4773_v43 = vrot.slane %v15916_v26, 5  ;;  %v4174_v49 = vrot.slane %v4172_v0, 4  ;;  %v13187_v11 = vcombine.low %v18257_v53, %v18266_v4  ;;  %v18306_v54 = vsel %vm16510_vm0, %v4142_v61, %v18239_v59  ;;  %v4663_v50 = vld [vmem:[#allocation2 + $0xd8] sm:$0xee]  ;;  %v22046_v26 = vld [vmem:[#allocation30_spill] sm:$0xff] }
 0x22f   : > { %v14027_v19 = vadd.f32 %v14026_v37, %v14025_v21  ;;  %22042 = vst [vmem:[#allocation40_spill] sm:$0xff] %v18288_v35  ;;  %v13978_v58 = vadd.f32 %v13977_v5, %v13976_v48  ;;  %v18299_v21 = vrot.slane %v4168_v17, 5  ;;  %5160 = vmatmul.mubr.bf16.gmra.mxu1 %v13237_v42  ;;  %v18313_v17 = vsel %vm16510_vm0, %v4152_v47, %v4156_v28 }
 0x230   : > { %v14028_v25 = vpop.f32.mrf.mxu0  ;;  %v13979_v20 = vpop.f32.mrf.mxu1  ;;  %v4165_v0 = vor.u32 %v4164_v7, %v4161_v57  ;;  %5167 = vmatprep.mubr.bf16.mxu1 %v13240_v55  ;;  %v4178_v4 = vshll.u32 %v18297_v14, 16  ;;  %v18318_v59 = vsel %vm17204_vm6, %v13218_v39, %v4770_v27  ;;  %v18322_v61 = vsel %vm17204_vm6, %v4772_v18, %v4773_v43 }
 0x231   : > { %v18295_v10 = vadd.f32 %v14027_v19, %v22043_v31  ;;  %v18309_v37 = vadd.f32 %v13978_v58, %v18166_v3  ;;  %v15917_v3 = vld [vmem:[#allocation2 + $0xe0] sm:$0xff]  ;;  %v4183_v57 = vshrl.u32 %v17909_v46, 16  ;;  %v13239_v27 = vcombine.low %v18274_v63, %v18278_v22 }
 0x232   : > { %v14029_v34 = vpop.f32.mrf.mxu0  ;;  %v13980_v53 = vpop.f32.mrf.mxu1  ;;  %v4777_v42 = vrot.slane %v15917_v3, 5  ;;  %v22045_v19 = vld [vmem:[#allocation42_spill] sm:$0xff]  ;;  %v4192_v5 = vshll.u32 %v17914_v36, 16  ;;  %v4196_v39 = vshrl.u32 %v17914_v36, 16  ;;  %v13242_v31 = vcombine.high %v18318_v59, %v18322_v61 }
 0x233   : > { %v14030_v23 = vadd.f32 %v14029_v34, %v14028_v25  ;;  %22044 = vst [vmem:[#allocation27_spill] sm:$0xff] %v18309_v37  ;;  %v13981_v47 = vadd.f32 %v13980_v53, %v13979_v20  ;;  %v4186_v25 = vshll.u32 %v17909_v46, 16  ;;  %v4166_v34 = vrot.slane %v4165_v0, 4  ;;  %v15918_v46 = vld [vmem:[#allocation2 + $0xe8] sm:$0x11] }
 0x234   : > { %v14031_v48 = vpop.f32.mrf.mxu0  ;;  %4583 = vmatmul.mubr.bf16.gmra.mxu0 %v13185_v15  ;;  %v4175_v15 = vor.u32 %v4174_v49, %v18299_v21  ;;  %v13982_v55 = vpop.f32.mrf.mxu1  ;;  %v13219_v63 = vrot.slane %v4663_v50, 9  ;;  %v4779_v22 = vrot.slane %v4777_v42, 4  ;;  %v4780_v20 = vrot.slane %v15918_v46, 5  ;;  %v18347_v50 = vld [vmem:[#allocation2 + $0x190] sm:$0x11] }
 0x235   : > { %v18325_v28 = vadd.f32 %v14030_v23, %v22045_v19  ;;  %4590 = vmatprep.mubr.bf16.mxu0 %v13188_v56  ;;  %v13190_v56 = vcombine.high %v18306_v54, %v18313_v17  ;;  %v18337_v43 = vadd.f32 %v13981_v47, %v22046_v26  ;;  %v22048_v23 = vld [vmem:[#allocation43_spill] sm:$0xff]  ;;  %v4180_v3 = vrot.slane %v4178_v4, 5 }
 0x236   : > { %v14032_v7 = vpop.f32.mrf.mxu0  ;;  %v13983_v49 = vpop.f32.mrf.mxu1  ;;  %v4185_v47 = vrot.slane %v4183_v57, 4  ;;  %v4188_v26 = vrot.slane %v4186_v25, 5  ;;  %v4198_v37 = vrot.slane %v4196_v39, 4  ;;  %v18351_v4 = vsel %vm17204_vm6, %v13219_v63, %v4777_v42  ;;  %v15919_v57 = vld [vmem:[#allocation2 + $0xf8] sm:$0xff] }
 0x237   : > { %v14033_v18 = vadd.f32 %v14032_v7, %v14031_v48  ;;  %22047 = vst [vmem:[#allocation41_spill] sm:$0xff] %v18337_v43  ;;  %v13984_v36 = vadd.f32 %v13983_v49, %v13982_v55  ;;  %v4176_v48 = vrot.slane %v4175_v15, 4  ;;  %5168 = vmatmul.mubr.bf16.gmra.mxu1 %v13239_v27  ;;  %v4194_v43 = vrot.slane %v4192_v5, 5  ;;  %v22050_v27 = vld [vmem:[#allocation36_spill] sm:$0xff] }
 0x238   : > { %v14034_v58 = vpop.f32.mrf.mxu0  ;;  %v13985_v7 = vpop.f32.mrf.mxu1  ;;  %5175 = vmatprep.mubr.bf16.mxu1 %v13242_v31  ;;  %v18355_v15 = vsel %vm17204_vm6, %v4779_v22, %v4780_v20  ;;  %v4784_v55 = vrot.slane %v15919_v57, 5  ;;  %v4664_v5 = vld [vmem:[#allocation2 + $0xf0] sm:$0xee]  ;;  %v4202_v63 = vshll.u32 %v18347_v50, 16 }
 0x239   : > { %v18342_v53 = vadd.f32 %v14033_v18, %v22048_v23  ;;  %v18345_v0 = vadd.f32 %v13984_v36, %v22049_v41  ;;  %v18363_v41 = vsel %vm16510_vm0, %v4166_v34, %v18299_v21  ;;  %v4199_v49 = vor.u32 %v4198_v37, %v4194_v43  ;;  %v22051_v22 = vld [vmem:[#allocation32_spill] sm:$0xff] }
 0x23a   : > { %v14035_v19 = vpop.f32.mrf.mxu0  ;;  %v13986_v18 = vpop.f32.mrf.mxu1  ;;  %v13244_v21 = vcombine.high %v18351_v4, %v18355_v15  ;;  %v13189_v23 = vcombine.low %v18306_v54, %v18313_v17  ;;  %v4787_v37 = vrot.slane %v17953_v29, 5  ;;  %v22053_v54 = vld [vmem:[#allocation33_spill] sm:$0xff] }
 0x23b   : > { %v14036_v35 = vadd.f32 %v14035_v19, %v14034_v58  ;;  %v13987_v42 = vadd.f32 %v13986_v18, %v13985_v7  ;;  %v4189_v58 = vor.u32 %v4188_v26, %v4185_v47  ;;  %v22052_v19 = vld [vmem:[#allocation44_spill] sm:$0xff]  ;;  %v4204_v18 = vrot.slane %v4202_v63, 5 }
 0x23c   : > { %v14037_v46 = vpop.f32.mrf.mxu0  ;;  %4591 = vmatmul.mubr.bf16.gmra.mxu0 %v13187_v11  ;;  %v18367_v11 = vsel %vm16510_vm0, %v4176_v48, %v4180_v3  ;;  %v13988_v31 = vpop.f32.mrf.mxu1  ;;  %v13220_v48 = vrot.slane %v4664_v5, 9  ;;  %v4786_v3 = vrot.slane %v4784_v55, 4 }
 0x23d   : > { %v18358_v25 = vadd.f32 %v14036_v35, %v22050_v27  ;;  %4598 = vmatprep.mubr.bf16.mxu0 %v13190_v56  ;;  %v13241_v35 = vcombine.low %v18318_v59, %v18322_v61  ;;  %v18373_v20 = vadd.f32 %v13987_v42, %v22051_v22  ;;  %v13192_v59 = vcombine.high %v18363_v41, %v18367_v11 }
 0x23e   : > { %v14038_v39 = vpop.f32.mrf.mxu0  ;;  %v13989_v36 = vpop.f32.mrf.mxu1  ;;  %v4190_v26 = vrot.slane %v4189_v58, 4  ;;  %v18390_v5 = vsel %vm17204_vm6, %v13220_v48, %v4784_v55 }
 0x23f   : > { %v14039_v56 = vadd.f32 %v14038_v39, %v14037_v46  ;;  %v13990_v61 = vadd.f32 %v13989_v36, %v13988_v31  ;;  %v4200_v46 = vrot.slane %v4199_v49, 4  ;;  %5176 = vmatmul.mubr.bf16.gmra.mxu1 %v13241_v35  ;;  %v18394_v39 = vsel %vm17204_vm6, %v4786_v3, %v4787_v37  ;;  %v15920_v31 = vld [vmem:[#allocation2 + $0x110] sm:$0xff]  ;;  %v4665_v35 = vld [vmem:[#allocation2 + $0x108] sm:$0xee]  ;;  %v405_v37 = vld [vmem:[#allocation2 + $0x198] sm:$0x11] }
 0x240   : > { %v14040_v34 = vpop.f32.mrf.mxu0  ;;  %v13991_v57 = vpop.f32.mrf.mxu1  ;;  %5183 = vmatprep.mubr.bf16.mxu1 %v13244_v21  ;;  %v4791_v58 = vrot.slane %v15920_v31, 5  ;;  %v4195_v22 = vsel %vm16510_vm0, %v4190_v26, %v4194_v43  ;;  %v13191_v36 = vcombine.low %v18363_v41, %v18367_v11  ;;  %v13246_v3 = vcombine.high %v18390_v5, %v18394_v39 }
 0x241   : > { %v18381_v7 = vadd.f32 %v14039_v56, %v22052_v19  ;;  %v18386_v17 = vadd.f32 %v13990_v61, %v22053_v54  ;;  %v4205_v55 = vsel %vm16510_vm0, %v4200_v46, %v4204_v18  ;;  %v22057_v54 = vld [vmem:[#allocation38_spill] sm:$0xff] }
 0x242   : > { %v14041_v47 = vpop.f32.mrf.mxu0  ;;  %v13992_v29 = vpop.f32.mrf.mxu1  ;;  %v4793_v61 = vrot.slane %v4791_v58, 4  ;;  %v13194_v41 = vcombine.high %v4195_v22, %v4205_v55 }
 0x243   : > { %v14042_v27 = vadd.f32 %v14041_v47, %v14040_v34  ;;  %v13993_v63 = vadd.f32 %v13992_v29, %v13991_v57  ;;  %v13243_v34 = vcombine.low %v18351_v4, %v18355_v15  ;;  %v4794_v47 = vrot.slane %v18054_v30, 5  ;;  %v22056_v15 = vld [vmem:[#allocation34_spill] sm:$0xff] }
 0x244   : > { %v14043_v42 = vpop.f32.mrf.mxu0  ;;  %4599 = vmatmul.mubr.bf16.gmra.mxu0 %v13189_v23  ;;  %v13994_v21 = vpop.f32.mrf.mxu1  ;;  %v406_v4 = vsel %vm16456_vm10, 0, %v405_v37  ;;  %v18428_v37 = vld [vmem:[#allocation2 + $0x30] sm:$0xff] }
 0x245   : > { %v18397_v49 = vadd.f32 %v14042_v27, %v17912_v2  ;;  %4606 = vmatprep.mubr.bf16.mxu0 %v13192_v59  ;;  %v22054_v2 = vld [vmem:[#allocation37_spill] sm:$0xff]  ;;  %v13221_v59 = vrot.slane %v4665_v35, 9  ;;  %407 = vst [vmem:[#allocation2 + $0x198] sm:$0x11] %v406_v4  ;;  %v15921_v35 = vld [vmem:[#allocation2 + $0x128] sm:$0xff] }
 0x246   : > { %v14044_v56 = vpop.f32.mrf.mxu0  ;;  %v18408_v48 = vadd.f32 %v13993_v63, %v22054_v2  ;;  %v13995_v43 = vpop.f32.mrf.mxu1  ;;  %v4795_v63 = vsel %vm17204_vm6, %v4793_v61, %v4794_v47 }
 0x247   : > { %v14045_v23 = vadd.f32 %v14044_v56, %v14043_v42  ;;  %v13996_v11 = vadd.f32 %v13995_v43, %v13994_v21  ;;  %5184 = vmatmul.mubr.bf16.gmra.mxu1 %v13243_v34  ;;  %v4792_v31 = vsel %vm17204_vm6, %v13221_v59, %v4791_v58  ;;  %v4798_v56 = vrot.slane %v15921_v35, 5 }
 0x248   : > { %v14046_v19 = vpop.f32.mrf.mxu0  ;;  %v14125_v57 = vpop.f32.mrf.mxu1  ;;  %5191 = vmatprep.mubr.bf16.mxu1 %v13246_v3  ;;  %v18430_v3 = vld [vmem:[#allocation2 + $0x38] sm:$0xff]  ;;  %v13245_v58 = vcombine.low %v18390_v5, %v18394_v39  ;;  %v13248_v59 = vcombine.high %v4792_v31, %v4795_v63 }
 0x249   : > { %v18416_v46 = vadd.f32 %v14045_v23, %v22056_v15  ;;  %v18419_v42 = vadd.f32 %v13996_v11, %v22057_v54  ;;  %v4666_v23 = vld [vmem:[#allocation2 + $0x120] sm:$0xee]  ;;  %v4800_v4 = vrot.slane %v4798_v56, 4  ;;  %v4801_v15 = vrot.slane %v18120_v6, 5 }
 0x24a   : > { %v14047_v18 = vpop.f32.mrf.mxu0  ;;  %v14126_v30 = vpop.f32.mrf.mxu1  ;;  %v13222_v26 = vrot.slane %v4666_v23, 9  ;;  %v13276_v11 = vcombine.high %v18428_v37, %v18430_v3  ;;  %v18459_v23 = vld [vmem:[#allocation2 + $0x50] sm:$0xff] }
 0x24b   : > { %v14048_v27 = vadd.f32 %v14047_v18, %v14046_v19  ;;  %v14127_v34 = vadd.f32 %v14126_v30, %v14125_v57  ;;  %v4667_v30 = vld [vmem:[#allocation2 + $0x138] sm:$0xee] }
 0x24c   : > { %v14049_v29 = vpop.f32.mrf.mxu0  ;;  %4607 = vmatmul.mubr.bf16.gmra.mxu0 %v13191_v36  ;;  %v14128_v36 = vpop.f32.mrf.mxu1  ;;  %v18448_v6 = vsel %vm17204_vm6, %v13222_v26, %v4798_v56  ;;  %v13247_v56 = vcombine.low %v4792_v31, %v4795_v63  ;;  %v4808_v26 = vrot.slane %v18179_v32, 5  ;;  %v15701_v31 = vld [vmem:[#allocation9 + $0x438] sm:$0xff]  }
 0x24d   : > { %v18426_v21 = vadd.f32 %v14048_v27, %v17960_v51  ;;  %4614 = vmatprep.mubr.bf16.mxu0 %v13194_v41  ;;  %v18435_v43 = vadd.f32 %v14127_v34, %v18207_v38  ;;  %v13193_v51 = vcombine.low %v4195_v22, %v4205_v55  ;;  %v15922_v27 = vld [vmem:[#allocation2 + $0x140] sm:$0xff]  ;;  %v18457_v34 = vld [vmem:[#allocation2 + $0x48] sm:$0xff] }
 0x24e   : > { %v14050_v2 = vpop.f32.mrf.mxu0  ;;  %v14129_v47 = vpop.f32.mrf.mxu1  ;;  %v4805_v54 = vrot.slane %v15922_v27, 5 }
 0x24f   : > { %v14051_v19 = vadd.f32 %v14050_v2, %v14049_v29  ;;  %v14130_v18 = vadd.f32 %v14129_v47, %v14128_v36  ;;  %5192 = vmatmul.mubr.bf16.gmra.mxu1 %v13245_v58 }
 0x250   : > { %v14052_v61 = vpop.f32.mrf.mxu0  ;;  %v14131_v39 = vpop.f32.mrf.mxu1  ;;  %5199 = vmatprep.mubr.bf16.mxu1 %v13248_v59  ;;  %v4807_v47 = vrot.slane %v4805_v54, 4 }
 0x251   : > { %v18439_v41 = vadd.f32 %v14051_v19, %v17998_v33  ;;  %v18444_v57 = vadd.f32 %v14130_v18, %v18233_v62  ;;  %v18452_v33 = vsel %vm17204_vm6, %v4800_v4, %v4801_v15  ;;  %v15708_v18 = vld [vmem:[#allocation9 + $0x470] sm:$0xff]  }
 0x252   : > { %v14053_v5 = vpop.f32.mrf.mxu0  ;;  %v14132_v55 = vpop.f32.mrf.mxu1  ;;  %v13250_v19 = vcombine.high %v18448_v6, %v18452_v33 }
 0x253   : > { %v14054_v38 = vadd.f32 %v14053_v5, %v14052_v61  ;;  %v14133_v62 = vadd.f32 %v14132_v55, %v14131_v39  ;;  %v15923_v55 = vld [vmem:[#allocation2 + $0x158] sm:$0xff] }
 0x254   : > { %v14055_v22 = vpop.f32.mrf.mxu0  ;;  %4615 = vmatmul.mubr.bf16.gmra.mxu0 %v13193_v51  ;;  %v14134_v2 = vpop.f32.mrf.mxu1  ;;  %v13223_v51 = vrot.slane %v4667_v30, 9  ;;  %v4812_v27 = vrot.slane %v15923_v55, 5 }
 0x255   : > { %v18455_v29 = vadd.f32 %v14054_v38, %v18012_v52  ;;  %5636 = vmatprep.mubr.bf16.mxu0 %v13276_v11  ;;  %v18462_v58 = vadd.f32 %v14133_v62, %v18248_v9  ;;  %v13275_v52 = vcombine.low %v18428_v37, %v18430_v3  ;;  %v13278_v9 = vcombine.high %v18457_v34, %v18459_v23 }
 0x256   : > { %v14056_v35 = vpop.f32.mrf.mxu0  ;;  %v14135_v61 = vpop.f32.mrf.mxu1 }
 0x257   : > { %v14057_v36 = vadd.f32 %v14056_v35, %v14055_v22  ;;  %v14136_v63 = vadd.f32 %v14135_v61, %v14134_v2  ;;  %5200 = vmatmul.mubr.bf16.gmra.mxu1 %v13247_v56  ;;  %v18483_v22 = vsel %vm17204_vm6, %v4807_v47, %v4808_v26  ;;  %v4668_v35 = vld [vmem:[#allocation2 + $0x150] sm:$0xee]  ;;  %v18488_v56 = vld [vmem:[#allocation2 + $0x60] sm:$0xff]  ;;  %v13277_v47 = vcombine.low %v18457_v34, %v18459_v23 }
 0x258   : > { %v14058_v59 = vpop.f32.mrf.mxu0  ;;  %v14137_v11 = vpop.f32.mrf.mxu1  ;;  %5207 = vmatprep.mubr.bf16.mxu1 %v13250_v19  ;;  %v13249_v19 = vcombine.low %v18448_v6, %v18452_v33  ;;  %v15717_v33 = vld [vmem:[#allocation9 + $0x428] sm:$0xff]  }
 0x259   : > { %v18470_v4 = vadd.f32 %v14057_v36, %v18046_v16  ;;  %v18475_v39 = vadd.f32 %v14136_v63, %v18281_v13  ;;  %v18479_v16 = vsel %vm17204_vm6, %v13223_v51, %v4805_v54  ;;  %v15709_v13 = vld [vmem:[#allocation9 + $0x430] sm:$0xff]   ;;  %v18490_v36 = vld [vmem:[#allocation2 + $0x68] sm:$0xff]  ;;  %v4815_v63 = vrot.slane %v18237_v60, 5  ;;  %v18512_v60 = vld [vmem:[#allocation2 + $0x80] sm:$0xff] }
 0x25a   : > { %v14059_v15 = vpop.f32.mrf.mxu0  ;;  %v14138_v32 = vpop.f32.mrf.mxu1  ;;  %v13252_v61 = vcombine.high %v18479_v16, %v18483_v22  ;;  %v13280_v6 = vcombine.high %v18488_v56, %v18490_v36 }
 0x25b   : > { %v14060_v5 = vadd.f32 %v14059_v15, %v14058_v59  ;;  %22058 = vst [vmem:[#allocation42_spill] sm:$0xff] %v18475_v39  ;;  %v14139_v30 = vadd.f32 %v14138_v32, %v14137_v11  ;;  %v15716_v59 = vld [vmem:[#allocation9 + $0x468] sm:$0xff]   ;;  %v22060_v15 = vld [vmem:[#allocation35_spill] sm:$0xff]  ;;  %v5870_v39 = vshrl.u32 %v18457_v34, 16 }
 0x25c   : > { %v14061_v38 = vpop.f32.mrf.mxu0  ;;  %5637 = vmatmul.mubr.bf16.vlgmr.msra.gmra.mxu0 %v13275_v52  ;;  %v14140_v54 = vpop.f32.mrf.mxu1 }
 0x25d   : > { %v18486_v62 = vadd.f32 %v14060_v5, %v18063_v12  ;;  %14670 = vmatpush3.bf16.msra.mxu0 %v15701_v31  ;;  %5644 = vmatprep.mubr.bf16.mxu0 %v13278_v9  ;;  %v18495_v12 = vadd.f32 %v14139_v30, %v18295_v10  ;;  %v13224_v31 = vrot.slane %v4668_v35, 9  ;;  %v4814_v9 = vrot.slane %v4812_v27, 4  ;;  %v18510_v30 = vld [vmem:[#allocation2 + $0x78] sm:$0xff] }
 0x25e   : > { %v14062_v2 = vpop.f32.mrf.mxu0  ;;  %14671 = vmatprep.subr.bf16.mxu0 %v15708_v18  ;;  %v14141_v26 = vpop.f32.mrf.mxu1  ;;  %v5921_v1 = vshll.u32 %v18510_v30, 16 }
 0x25f   : > { %v14063_v52 = vadd.f32 %v14062_v2, %v14061_v38  ;;  %22059 = vst [vmem:[#allocation30_spill] sm:$0xff] %v18495_v12  ;;  %v14142_v10 = vadd.f32 %v14141_v26, %v14140_v54  ;;  %5208 = vmatmul.mubr.bf16.gmra.mxu1 %v13249_v19  ;;  %v15725_v38 = vld [vmem:[#allocation9 + $0x460] sm:$0xff]   ;;  %v18520_v54 = vsel %vm17204_vm6, %v4814_v9, %v4815_v63  ;;  %v15738_v63 = vld [vmem:[#allocation9 + $0x458] sm:$0xff]  }
 0x260   : > { %v14064_v51 = vpop.f32.mrf.mxu0  ;;  %v14143_v5 = vpop.f32.mrf.mxu1  ;;  %5215 = vmatprep.mubr.bf16.mxu1 %v13252_v61  ;;  %v4669_v19 = vld [vmem:[#allocation2 + $0x168] sm:$0xee]  ;;  %v13279_v26 = vcombine.low %v18488_v56, %v18490_v36  ;;  %v13251_v9 = vcombine.low %v18479_v16, %v18483_v22 }
 0x261   : > { %v18503_v11 = vadd.f32 %v14063_v52, %v22060_v15  ;;  %14672 = vmatpush3.bf16.msra.mxu0 %v15709_v13  ;;  %v18508_v55 = vadd.f32 %v14142_v10, %v18325_v28  ;;  %v18516_v13 = vsel %vm17204_vm6, %v13224_v31, %v4812_v27  ;;  %v15727_v61 = vld [vmem:[#allocation9 + $0x420] sm:$0xff]   ;;  %v13282_v27 = vcombine.high %v18510_v30, %v18512_v60 }
 0x262   : > { %v14065_v18 = vpop.f32.mrf.mxu0  ;;  %14673 = vmatprep.subr.bf16.mxu0 %v15716_v59  ;;  %v14144_v2 = vpop.f32.mrf.mxu1  ;;  %v15924_v59 = vld [vmem:[#allocation2 + $0x170] sm:$0xff]  ;;  %v13225_v10 = vrot.slane %v4669_v19, 9 }
 0x263   : > { %v14066_v32 = vadd.f32 %v14065_v18, %v14064_v51  ;;  %22061 = vst [vmem:[#allocation43_spill] sm:$0xff] %v18508_v55  ;;  %v4819_v28 = vrot.slane %v15924_v59, 5  ;;  %v14145_v51 = vadd.f32 %v14144_v2, %v14143_v5  ;;  %v5846_v2 = vshrl.u32 %v18428_v37, 16  ;;  %v22066_v55 = vld [vmem:[#allocation29_spill] sm:$0xff] }
 0x264   : > { %v14067_v35 = vpop.f32.mrf.mxu0  ;;  %5645 = vmatmul.mubr.bf16.gmra.mxu0 %v13277_v47  ;;  %v14146_v31 = vpop.f32.mrf.mxu1  ;;  %v5849_v59 = vshll.u32 %v18428_v37, 16 }
 0x265   : > { %v18523_v52 = vadd.f32 %v14066_v32, %v18118_v44  ;;  %5652 = vmatprep.mubr.bf16.mxu0 %v13280_v6  ;;  %14674 = vmatpush3.bf16.msra.mxu0 %v15717_v33  ;;  %v18532_v44 = vadd.f32 %v14145_v51, %v18342_v53  ;;  %v13254_v6 = vcombine.high %v18516_v13, %v18520_v54  ;;  %v4821_v5 = vrot.slane %v4819_v28, 4 }
 0x266   : > { %v14068_v47 = vpop.f32.mrf.mxu0  ;;  %14675 = vmatprep.subr.bf16.mxu0 %v15725_v38  ;;  %v14147_v18 = vpop.f32.mrf.mxu1  ;;  %v4822_v32 = vrot.slane %v18297_v14, 5  ;;  %v5855_v53 = vshll.u32 %v18430_v3, 16  ;;  %v5859_v38 = vshrl.u32 %v18430_v3, 16  ;;  %v18553_v3 = vld [vmem:[#allocation2 + $0x98] sm:$0xff] }
 0x267   : > { %v14069_v15 = vadd.f32 %v14068_v47, %v14067_v35  ;;  %22062 = vst [vmem:[#allocation31_spill] sm:$0xff] %v18532_v44  ;;  %v14148_v22 = vadd.f32 %v14147_v18, %v14146_v31  ;;  %v15739_v35 = vld [vmem:[#allocation9 + $0x418] sm:$0xff]   ;;  %5216 = vmatmul.mubr.bf16.gmra.mxu1 %v13251_v9  ;;  %v15744_v47 = vld [vmem:[#allocation9 + $0x450] sm:$0xff]  }
 0x268   : > { %v14070_v33 = vpop.f32.mrf.mxu0  ;;  %v14149_v51 = vpop.f32.mrf.mxu1  ;;  %5223 = vmatprep.mubr.bf16.mxu1 %v13254_v6  ;;  %v18557_v9 = vsel %vm17204_vm6, %v4821_v5, %v4822_v32  ;;  %v22064_v6 = vld [vmem:[#allocation28_spill] sm:$0xff]  ;;  %v13281_v5 = vcombine.low %v18510_v30, %v18512_v60 }
 0x269   : > { %v18540_v16 = vadd.f32 %v14069_v15, %v18151_v45  ;;  %14676 = vmatpush3.bf16.msra.mxu0 %v15727_v61  ;;  %v18545_v44 = vadd.f32 %v14148_v22, %v18358_v25  ;;  %v18549_v45 = vsel %vm17204_vm6, %v13225_v10, %v4819_v28  ;;  %v18551_v61 = vld [vmem:[#allocation2 + $0x90] sm:$0xff]  ;;  %v5848_v25 = vrot.slane %v5846_v2, 4  ;;  %v4670_v10 = vld [vmem:[#allocation2 + $0x180] sm:$0xee] }
 0x26a   : > { %v14071_v19 = vpop.f32.mrf.mxu0  ;;  %14677 = vmatprep.subr.bf16.mxu0 %v15738_v63  ;;  %v14150_v31 = vpop.f32.mrf.mxu1  ;;  %v15925_v63 = vld [vmem:[#allocation2 + $0x188] sm:$0xff]  ;;  %v5861_v22 = vrot.slane %v5859_v38, 4  ;;  %v13253_v2 = vcombine.low %v18516_v13, %v18520_v54  ;;  %v4829_v13 = vrot.slane %v18347_v50, 5  ;;  %v5879_v50 = vshll.u32 %v18459_v23, 16 }
 0x26b   : > { %v14072_v14 = vadd.f32 %v14071_v19, %v14070_v33  ;;  %22063 = vst [vmem:[#allocation36_spill] sm:$0xff] %v18545_v44  ;;  %v4826_v15 = vrot.slane %v15925_v63, 5  ;;  %v5851_v33 = vrot.slane %v5849_v59, 5  ;;  %v14151_v28 = vadd.f32 %v14150_v31, %v14149_v51  ;;  %v15745_v19 = vld [vmem:[#allocation9 + $0x410] sm:$0xff]   ;;  %v18568_v59 = vld [vmem:[#allocation2 + $0x40] sm:$0x11] }
 0x26c   : > { %v14073_v37 = vpop.f32.mrf.mxu0  ;;  %5653 = vmatmul.mubr.bf16.gmra.mxu0 %v13279_v26  ;;  %v18562_v26 = vrot.slane %v5855_v53, 5  ;;  %v14152_v32 = vpop.f32.mrf.mxu1  ;;  %v13284_v53 = vcombine.high %v18551_v61, %v18553_v3  ;;  %v13226_v63 = vrot.slane %v4670_v10, 9  ;;  %v5865_v12 = vshll.u32 %v18568_v59, 16 }
 0x26d   : > { %v18560_v18 = vadd.f32 %v14072_v14, %v22064_v6  ;;  %5660 = vmatprep.mubr.bf16.mxu0 %v13282_v27  ;;  %14678 = vmatpush3.bf16.msra.mxu0 %v15739_v35  ;;  %v15750_v14 = vld [vmem:[#allocation9 + $0x448] sm:$0xff]   ;;  %v18573_v38 = vadd.f32 %v14151_v28, %v18381_v7  ;;  %v13256_v35 = vcombine.high %v18549_v45, %v18557_v9  ;;  %v4828_v6 = vrot.slane %v4826_v15, 4 }
 0x26e   : > { %v14074_v44 = vpop.f32.mrf.mxu0  ;;  %14679 = vmatprep.subr.bf16.mxu0 %v15744_v47  ;;  %v14153_v31 = vpop.f32.mrf.mxu1  ;;  %v5852_v54 = vor.u32 %v5851_v33, %v5848_v25  ;;  %v15751_v7 = vld [vmem:[#allocation9 + $0x408] sm:$0xff]   ;;  %v5873_v10 = vshll.u32 %v18457_v34, 16  ;;  %v5883_v25 = vshrl.u32 %v18459_v23, 16  ;;  %v18594_v34 = vsel %vm17204_vm6, %v13226_v63, %v4826_v15 }
 0x26f   : > { %v14075_v27 = vadd.f32 %v14074_v44, %v14073_v37  ;;  %22065 = vst [vmem:[#allocation32_spill] sm:$0xff] %v18573_v38  ;;  %v14154_v44 = vadd.f32 %v14153_v31, %v14152_v32  ;;  %v5862_v37 = vor.u32 %v5861_v22, %v18562_v26  ;;  %5224 = vmatmul.mubr.bf16.gmra.mxu1 %v13253_v2  ;;  %v5872_v63 = vrot.slane %v5870_v39, 4 }
 0x270   : > { %v14076_v51 = vpop.f32.mrf.mxu0  ;;  %v14155_v38 = vpop.f32.mrf.mxu1  ;;  %5231 = vmatprep.mubr.bf16.mxu1 %v13256_v35  ;;  %v13255_v2 = vcombine.low %v18549_v45, %v18557_v9  ;;  %v18598_v23 = vsel %vm17204_vm6, %v4828_v6, %v4829_v13  ;;  %v18603_v45 = vld [vmem:[#allocation2 + $0xa8] sm:$0xff]  ;;  %v18605_v9 = vld [vmem:[#allocation2 + $0xb0] sm:$0xff]  ;;  %v18607_v6 = vrot.slane %v5879_v50, 5  ;;  %v5885_v13 = vrot.slane %v5883_v25, 4  ;;  %v18628_v25 = vld [vmem:[#allocation2 + $0xc0] sm:$0xff] }
 0x271   : > { %v18579_v47 = vadd.f32 %v14075_v27, %v22066_v55  ;;  %14680 = vmatpush3.bf16.msra.mxu0 %v15745_v19  ;;  %v15756_v55 = vld [vmem:[#allocation9 + $0x440] sm:$0xff]   ;;  %v18588_v22 = vadd.f32 %v14154_v44, %v18397_v49  ;;  %v5863_v35 = vrot.slane %v5862_v37, 4  ;;  %v5875_v44 = vrot.slane %v5873_v10, 5 }
 0x272   : > { %v14077_v28 = vpop.f32.mrf.mxu0  ;;  %14681 = vmatprep.subr.bf16.mxu0 %v15750_v14  ;;  %v14156_v32 = vpop.f32.mrf.mxu1  ;;  %v5853_v14 = vrot.slane %v5852_v54, 4  ;;  %v13283_v37 = vcombine.low %v18551_v61, %v18553_v3 }
 0x273   : > { %v14078_v33 = vadd.f32 %v14077_v28, %v14076_v51  ;;  %v14157_v49 = vadd.f32 %v14156_v32, %v14155_v38  ;;  %v15757_v51 = vld [vmem:[#allocation9 + $0x400] sm:$0xff]   ;;  %v18614_v38 = vld [vmem:[#allocation2 + $0x58] sm:$0x11]  ;;  %v13286_v28 = vcombine.high %v18603_v45, %v18605_v9  ;;  %v5886_v32 = vor.u32 %v5885_v13, %v18607_v6 }
 0x274   : > { %v14079_v19 = vpop.f32.mrf.mxu0  ;;  %5661 = vmatmul.mubr.bf16.gmra.mxu0 %v13281_v5  ;;  %v5867_v5 = vrot.slane %v5865_v12, 5  ;;  %v14158_v15 = vpop.f32.mrf.mxu1  ;;  %v13258_v12 = vcombine.high %v18594_v34, %v18598_v23  ;;  %22067 = vst [vmem:[#allocation44_spill] sm:$0xff] %v18614_v38 }
 0x275   : > { %v18601_v27 = vadd.f32 %v14078_v33, %v18218_v24  ;;  %5668 = vmatprep.mubr.bf16.mxu0 %v13284_v53  ;;  %14682 = vmatpush3.bf16.msra.mxu0 %v15751_v7  ;;  %v18610_v53 = vadd.f32 %v14157_v49, %v18416_v46  ;;  %v18626_v46 = vsel %vm16510_vm0, %v5853_v14, %v18562_v26  ;;  %v5889_v49 = vshll.u32 %v18614_v38, 16 }
 0x276   : > { %v14080_v31 = vpop.f32.mrf.mxu0  ;;  %14683 = vmatprep.subr.bf16.mxu0 %v15756_v55  ;;  %v14159_v7 = vpop.f32.mrf.mxu1  ;;  %v18630_v55 = vld [vmem:[#allocation2 + $0xc8] sm:$0xff]  ;;  %v5894_v14 = vshrl.u32 %v18488_v56, 16 }
 0x277   : > { %v14081_v24 = vadd.f32 %v14080_v31, %v14079_v19  ;;  %v14160_v10 = vadd.f32 %v14159_v7, %v14158_v15  ;;  %5232 = vmatmul.mubr.bf16.gmra.mxu1 %v13255_v2  ;;  %v5876_v19 = vor.u32 %v5875_v44, %v5872_v63  ;;  %v13285_v2 = vcombine.low %v18603_v45, %v18605_v9  ;;  %v22069_v44 = vld [vmem:[#allocation39_spill] sm:$0xff] }
 0x278   : > { %v14082_v54 = vpop.f32.mrf.mxu0  ;;  %v14161_v33 = vpop.f32.mrf.mxu1  ;;  %5239 = vmatprep.mubr.bf16.mxu1 %v13258_v12  ;;  %v5907_v63 = vshrl.u32 %v18490_v36, 16 }
 0x279   : > { %v18619_v39 = vadd.f32 %v14081_v24, %v18242_v40  ;;  %14684 = vmatpush3.bf16.msra.mxu0 %v15757_v51  ;;  %v18634_v40 = vsel %vm16510_vm0, %v5863_v35, %v5867_v5  ;;  %v18639_v26 = vadd.f32 %v14160_v10, %v18426_v21  ;;  %v5897_v51 = vshll.u32 %v18488_v56, 16 }
 0x27a   : > { %v14083_v50 = vpop.f32.mrf.mxu0  ;;  %v14162_v35 = vpop.f32.mrf.mxu1  ;;  %v5903_v5 = vshll.u32 %v18490_v36, 16  ;;  %v13288_v21 = vcombine.high %v18628_v25, %v18630_v55  ;;  %v13257_v56 = vcombine.low %v18594_v34, %v18598_v23  ;;  %v5877_v7 = vrot.slane %v5876_v19, 4  ;;  %v22072_v19 = vld [vmem:[#allocation40_spill] sm:$0xff] }
 0x27b   : > { %v14084_v31 = vadd.f32 %v14083_v50, %v14082_v54  ;;  %22068 = vst [vmem:[#allocation33_spill] sm:$0xff] %v18639_v26  ;;  %v14163_v24 = vadd.f32 %v14162_v35, %v14161_v33  ;;  %v5887_v10 = vrot.slane %v5886_v32, 4  ;;  %v5891_v50 = vrot.slane %v5889_v49, 5  ;;  %v18659_v33 = vld [vmem:[#allocation2 + $0x70] sm:$0x11] }
 0x27c   : > { %v14085_v15 = vpop.f32.mrf.mxu0  ;;  %5669 = vmatmul.mubr.bf16.gmra.mxu0 %v13283_v37  ;;  %v14164_v54 = vpop.f32.mrf.mxu1  ;;  %v13324_v37 = vcombine.high %v18626_v46, %v18634_v40  ;;  %22071 = vst [vmem:[#allocation21_spill] sm:$0xff] %v18659_v33  ;;  %v18661_v35 = vrot.slane %v5903_v5, 5  ;;  %v5909_v34 = vrot.slane %v5907_v63, 4  ;;  %v5918_v23 = vshrl.u32 %v18510_v30, 16 }
 0x27d   : > { %v18648_v13 = vadd.f32 %v14084_v31, %v22069_v44  ;;  %5676 = vmatprep.mubr.bf16.mxu0 %v13286_v28  ;;  %v18657_v31 = vadd.f32 %v14163_v24, %v18439_v41  ;;  %v5896_v28 = vrot.slane %v5894_v14, 4  ;;  %v5899_v44 = vrot.slane %v5897_v51, 5 }
 0x27e   : > { %v14086_v12 = vpop.f32.mrf.mxu0  ;;  %v14165_v26 = vpop.f32.mrf.mxu1  ;;  %v5927_v41 = vshll.u32 %v18512_v60, 16  ;;  %v5931_v14 = vshrl.u32 %v18512_v60, 16  ;;  %v18673_v5 = vsel %vm16510_vm0, %v5877_v7, %v18607_v6  ;;  %v18680_v30 = vsel %vm16510_vm0, %v5887_v10, %v5891_v50 }
 0x27f   : > { %v14087_v36 = vadd.f32 %v14086_v12, %v14085_v15  ;;  %22070 = vst [vmem:[#allocation37_spill] sm:$0xff] %v18657_v31  ;;  %v14166_v49 = vadd.f32 %v14165_v26, %v14164_v54  ;;  %5240 = vmatmul.mubr.bf16.gmra.mxu1 %v13257_v56  ;;  %v5913_v26 = vshll.u32 %v18659_v33, 16  ;;  %v18683_v12 = vld [vmem:[#allocation2 + $0xd8] sm:$0xff]  ;;  %v18685_v56 = vld [vmem:[#allocation2 + $0xe0] sm:$0xff]  ;;  %v5900_v6 = vor.u32 %v5899_v44, %v5896_v28  ;;  %v18697_v44 = vld [vmem:[#allocation2 + $0x88] sm:$0x11] }
 0x280   : > { %v14088_v38 = vpop.f32.mrf.mxu0  ;;  %v14167_v15 = vpop.f32.mrf.mxu1  ;;  %6517 = vmatprep.mubr.bf16.mxu1 %v13324_v37  ;;  %v5920_v7 = vrot.slane %v5918_v23, 4  ;;  %v18691_v50 = vrot.slane %v5927_v41, 5  ;;  %v13323_v28 = vcombine.low %v18626_v46, %v18634_v40  ;;  %v13326_v23 = vcombine.high %v18673_v5, %v18680_v30  ;;  %v464_v33 = vld [vmem:[#allocation2 + $0x1a8] sm:$0x11]  ;;  %v22076_v46 = vld [vmem:[#allocation41_spill] sm:$0xff] }
 0x281   : > { %v18666_v32 = vadd.f32 %v14087_v36, %v22072_v19  ;;  %v18676_v24 = vadd.f32 %v14166_v49, %v18455_v29  ;;  %v5923_v29 = vrot.slane %v5921_v1, 5  ;;  %v22074_v36 = vld [vmem:[#allocation27_spill] sm:$0xff]  ;;  %v5933_v19 = vrot.slane %v5931_v14, 4 }
 0x282   : > { %v14089_v51 = vpop.f32.mrf.mxu0  ;;  %v14168_v54 = vpop.f32.mrf.mxu1  ;;  %v13290_v1 = vcombine.high %v18683_v12, %v18685_v56  ;;  %v5945_v31 = vshll.u32 %v18551_v61, 16 }
 0x283   : > { %v14090_v63 = vadd.f32 %v14089_v51, %v14088_v38  ;;  %22073 = vst [vmem:[#allocation34_spill] sm:$0xff] %v18676_v24  ;;  %v5910_v38 = vor.u32 %v5909_v34, %v18661_v35  ;;  %v14169_v10 = vadd.f32 %v14168_v54, %v14167_v15  ;;  %v5901_v15 = vrot.slane %v5900_v6, 4 }
 0x284   : > { %v14091_v60 = vpop.f32.mrf.mxu0  ;;  %5677 = vmatmul.mubr.bf16.gmra.mxu0 %v13285_v2  ;;  %v13287_v2 = vcombine.low %v18628_v25, %v18630_v55  ;;  %v14170_v51 = vpop.f32.mrf.mxu1  ;;  %v5915_v54 = vrot.slane %v5913_v26, 5  ;;  %v5937_v24 = vshll.u32 %v18697_v44, 16  ;;  %v5951_v6 = vshll.u32 %v18553_v3, 16 }
 0x285   : > { %v18689_v37 = vadd.f32 %v14090_v63, %v22074_v36  ;;  %5684 = vmatprep.mubr.bf16.mxu0 %v13288_v21  ;;  %v18702_v21 = vadd.f32 %v14169_v10, %v18470_v4  ;;  %v5911_v63 = vrot.slane %v5910_v38, 4  ;;  %v5924_v36 = vor.u32 %v5923_v29, %v5920_v7 }
 0x286   : > { %v14092_v49 = vpop.f32.mrf.mxu0  ;;  %v14171_v14 = vpop.f32.mrf.mxu1  ;;  %v5955_v26 = vshrl.u32 %v18553_v3, 16 }
 0x287   : > { %v14093_v34 = vadd.f32 %v14092_v49, %v14091_v60  ;;  %22075 = vst [vmem:[#allocation38_spill] sm:$0xff] %v18702_v21  ;;  %v14172_v60 = vadd.f32 %v14171_v14, %v14170_v51  ;;  %v5934_v49 = vor.u32 %v5933_v19, %v18691_v50  ;;  %6518 = vmatmul.mubr.bf16.vlgmr.msra.gmra.mxu1 %v13323_v28  ;;  %v5942_v21 = vshrl.u32 %v18551_v61, 16 }
 0x288   : > { %v14094_v41 = vpop.f32.mrf.mxu0  ;;  %v14173_v10 = vpop.f32.mrf.mxu1  ;;  %6525 = vmatprep.mubr.bf16.mxu1 %v13326_v23  ;;  %v465_v19 = vsel %vm16462_vm12, 0, %v464_v33  ;;  %v13325_v28 = vcombine.low %v18673_v5, %v18680_v30  ;;  %v18725_v61 = vsel %vm16510_vm0, %v5901_v15, %v18661_v35  ;;  %v18729_v3 = vsel %vm16510_vm0, %v5911_v63, %v5915_v54  ;;  %v18734_v5 = vld [vmem:[#allocation2 + $0xf0] sm:$0xff]  ;;  %v18736_v30 = vld [vmem:[#allocation2 + $0xf8] sm:$0xff] }
 0x289   : > { %v18707_v40 = vadd.f32 %v14093_v34, %v22076_v46  ;;  %v18716_v7 = vadd.f32 %v14172_v60, %v18486_v62  ;;  %v5925_v62 = vrot.slane %v5924_v36, 4  ;;  %466 = vst [vmem:[#allocation2 + $0x1a8] sm:$0x11] %v465_v19  ;;  %v5944_v15 = vrot.slane %v5942_v21, 4 }
 0x28a   : > { %v14095_v4 = vpop.f32.mrf.mxu0  ;;  %v14174_v34 = vpop.f32.mrf.mxu1  ;;  %v5947_v46 = vrot.slane %v5945_v31, 5  ;;  %v18738_v60 = vrot.slane %v5951_v6, 5  ;;  %v5957_v63 = vrot.slane %v5955_v26, 4  ;;  %v13292_v31 = vcombine.high %v18734_v5, %v18736_v30  ;;  %v18759_v26 = vld [vmem:[#allocation2 + $0x108] sm:$0xff] }
 0x28b   : > { %v14096_v38 = vadd.f32 %v14095_v4, %v14094_v41  ;;  %v14175_v33 = vadd.f32 %v14174_v34, %v14173_v10  ;;  %v5939_v41 = vrot.slane %v5937_v24, 5 }
 0x28c   : > { %v14097_v51 = vpop.f32.mrf.mxu0  ;;  %5685 = vmatmul.mubr.bf16.gmra.mxu0 %v13287_v2  ;;  %v5935_v2 = vrot.slane %v5934_v49, 4  ;;  %v14176_v35 = vpop.f32.mrf.mxu1  ;;  %v13289_v49 = vcombine.low %v18683_v12, %v18685_v56  ;;  %v5948_v19 = vor.u32 %v5947_v46, %v5944_v15  ;;  %v5979_v15 = vshrl.u32 %v18605_v9, 16 }
 0x28d   : > { %v18732_v23 = vadd.f32 %v14096_v38, %v18345_v0  ;;  %5692 = vmatprep.mubr.bf16.mxu0 %v13290_v1  ;;  %v18741_v36 = vadd.f32 %v14175_v33, %v18503_v11  ;;  %v13328_v0 = vcombine.high %v18725_v61, %v18729_v3  ;;  %v18745_v1 = vld [vmem:[#allocation2 + $0xa0] sm:$0x11]  ;;  %v18757_v11 = vsel %vm16510_vm0, %v5925_v62, %v18691_v50  ;;  %v18761_v38 = vld [vmem:[#allocation2 + $0x110] sm:$0xff] }
 0x28e   : > { %v14098_v14 = vpop.f32.mrf.mxu0  ;;  %22078 = vst [vmem:[#allocation35_spill] sm:$0xff] %v18745_v1  ;;  %v14177_v4 = vpop.f32.mrf.mxu1  ;;  %v5961_v34 = vshll.u32 %v18745_v1, 16  ;;  %v5966_v62 = vshrl.u32 %v18603_v45, 16 }
 0x28f   : > { %v14099_v54 = vadd.f32 %v14098_v14, %v14097_v51  ;;  %v14178_v10 = vadd.f32 %v14177_v4, %v14176_v35  ;;  %6526 = vmatmul.mubr.bf16.gmra.mxu1 %v13325_v28  ;;  %v5958_v51 = vor.u32 %v5957_v63, %v18738_v60  ;;  %v5969_v14 = vshll.u32 %v18603_v45, 16 }
 0x290   : > { %v14100_v24 = vpop.f32.mrf.mxu0  ;;  %v14179_v29 = vpop.f32.mrf.mxu1  ;;  %6533 = vmatprep.mubr.bf16.mxu1 %v13328_v0  ;;  %v13291_v28 = vcombine.low %v18734_v5, %v18736_v30  ;;  %v13327_v45 = vcombine.low %v18725_v61, %v18729_v3  ;;  %v5990_v61 = vshrl.u32 %v18628_v25, 16  ;;  %v5993_v3 = vshll.u32 %v18628_v25, 16 }
 0x291   : > { %v18750_v21 = vadd.f32 %v14099_v54, %v18373_v20  ;;  %v18765_v20 = vsel %vm16510_vm0, %v5935_v2, %v5939_v41  ;;  %v18770_v50 = vadd.f32 %v14178_v10, %v18523_v52  ;;  %v5975_v41 = vshll.u32 %v18605_v9, 16 }
 0x292   : > { %v14101_v6 = vpop.f32.mrf.mxu0  ;;  %v14180_v2 = vpop.f32.mrf.mxu1  ;;  %v13294_v52 = vcombine.high %v18759_v26, %v18761_v38  ;;  %v5959_v4 = vrot.slane %v5958_v51, 4  ;;  %v5963_v10 = vrot.slane %v5961_v34, 5  ;;  %v18797_v51 = vld [vmem:[#allocation2 + $0xb8] sm:$0x11]  ;;  %v6003_v34 = vshrl.u32 %v18630_v55, 16 }
 0x293   : > { %v14102_v33 = vadd.f32 %v14101_v6, %v14100_v24  ;;  %22079 = vst [vmem:[#allocation28_spill] sm:$0xff] %v18770_v50  ;;  %v14181_v63 = vadd.f32 %v14180_v2, %v14179_v29  ;;  %v13330_v24 = vcombine.high %v18757_v11, %v18765_v20  ;;  %v5971_v6 = vrot.slane %v5969_v14, 5  ;;  %22080 = vst [vmem:[#allocation29_spill] sm:$0xff] %v18797_v51 }
 0x294   : > { %v14103_v35 = vpop.f32.mrf.mxu0  ;;  %5693 = vmatmul.mubr.bf16.gmra.mxu0 %v13289_v49  ;;  %v14182_v0 = vpop.f32.mrf.mxu1  ;;  %v5949_v49 = vrot.slane %v5948_v19, 4  ;;  %v18790_v29 = vrot.slane %v5975_v41, 5  ;;  %v5981_v2 = vrot.slane %v5979_v15, 4 }
 0x295   : > { %v18779_v46 = vadd.f32 %v14102_v33, %v18386_v17  ;;  %5700 = vmatprep.mubr.bf16.mxu0 %v13292_v31  ;;  %v18788_v17 = vadd.f32 %v14181_v63, %v18540_v16  ;;  %v5968_v31 = vrot.slane %v5966_v62, 4  ;;  %v5999_v16 = vshll.u32 %v18630_v55, 16  ;;  %v18813_v55 = vld [vmem:[#allocation2 + $0x120] sm:$0xff]  ;;  %v18815_v63 = vld [vmem:[#allocation2 + $0x128] sm:$0xff] }
 0x296   : > { %v14104_v54 = vpop.f32.mrf.mxu0  ;;  %v14183_v1 = vpop.f32.mrf.mxu1 }
 0x297   : > { %v14105_v9 = vadd.f32 %v14104_v54, %v14103_v35  ;;  %v14184_v19 = vadd.f32 %v14183_v1, %v14182_v0  ;;  %6534 = vmatmul.mubr.bf16.gmra.mxu1 %v13327_v45  ;;  %v18804_v35 = vsel %vm16510_vm0, %v5949_v49, %v18738_v60  ;;  %v5972_v1 = vor.u32 %v5971_v6, %v5968_v31 }
 0x298   : > { %v14106_v33 = vpop.f32.mrf.mxu0  ;;  %v14185_v14 = vpop.f32.mrf.mxu1  ;;  %6541 = vmatprep.mubr.bf16.mxu1 %v13330_v24  ;;  %v5982_v60 = vor.u32 %v5981_v2, %v18790_v29  ;;  %v5985_v54 = vshll.u32 %v18797_v51, 16  ;;  %v5992_v0 = vrot.slane %v5990_v61, 4  ;;  %v13329_v6 = vcombine.low %v18757_v11, %v18765_v20 }
 0x299   : > { %v18795_v50 = vadd.f32 %v14105_v9, %v18408_v48  ;;  %v18807_v25 = vadd.f32 %v14184_v19, %v18560_v18  ;;  %v18811_v48 = vsel %vm16510_vm0, %v5959_v4, %v5963_v10  ;;  %v5995_v18 = vrot.slane %v5993_v3, 5 }
 0x29a   : > { %v14107_v62 = vpop.f32.mrf.mxu0  ;;  %v14186_v45 = vpop.f32.mrf.mxu1  ;;  %v6001_v4 = vrot.slane %v5999_v16, 5  ;;  %v6005_v10 = vrot.slane %v6003_v34, 4  ;;  %v13296_v61 = vcombine.high %v18813_v55, %v18815_v63  ;;  %v5973_v16 = vrot.slane %v5972_v1, 4 }
 0x29b   : > { %v14108_v41 = vadd.f32 %v14107_v62, %v14106_v33  ;;  %v14187_v49 = vadd.f32 %v14186_v45, %v14185_v14  ;;  %v18826_v33 = vld [vmem:[#allocation2 + $0xd0] sm:$0x11]  ;;  %v5983_v34 = vrot.slane %v5982_v60, 4  ;;  %v5987_v62 = vrot.slane %v5985_v54, 5 }
 0x29c   : > { %v14237_v15 = vpop.f32.mrf.mxu0  ;;  %5701 = vmatmul.mubr.bf16.gmra.mxu0 %v13291_v28  ;;  %v13293_v28 = vcombine.low %v18759_v26, %v18761_v38  ;;  %v14188_v31 = vpop.f32.mrf.mxu1  ;;  %22081 = vst [vmem:[#allocation39_spill] sm:$0xff] %v18826_v33  ;;  %v5996_v14 = vor.u32 %v5995_v18, %v5992_v0  ;;  %v6023_v51 = vshll.u32 %v18685_v56, 16  ;;  %v6027_v1 = vshrl.u32 %v18685_v56, 16 }
 0x29d   : > { %v18820_v24 = vadd.f32 %v14108_v41, %v18419_v42  ;;  %5708 = vmatprep.mubr.bf16.mxu0 %v13294_v52  ;;  %v18831_v42 = vadd.f32 %v14187_v49, %v18579_v47  ;;  %v13332_v52 = vcombine.high %v18804_v35, %v18811_v48  ;;  %v6006_v41 = vor.u32 %v6005_v10, %v6001_v4 }
 0x29e   : > { %v14238_v9 = vpop.f32.mrf.mxu0  ;;  %v14189_v19 = vpop.f32.mrf.mxu1  ;;  %v6014_v47 = vshrl.u32 %v18683_v12, 16  ;;  %v6017_v49 = vshll.u32 %v18683_v12, 16  ;;  %v13331_v18 = vcombine.low %v18804_v35, %v18811_v48  ;;  %v18851_v10 = vsel %vm16510_vm0, %v5973_v16, %v18790_v29  ;;  %v18864_v29 = vld [vmem:[#allocation2 + $0xe8] sm:$0x11] }
 0x29f   : > { %v14239_v2 = vadd.f32 %v14238_v9, %v14237_v15  ;;  %v14190_v20 = vadd.f32 %v14189_v19, %v14188_v31  ;;  %v6009_v15 = vshll.u32 %v18826_v33, 16  ;;  %6542 = vmatmul.mubr.bf16.gmra.mxu1 %v13329_v6  ;;  %v18855_v12 = vsel %vm16510_vm0, %v5983_v34, %v5987_v62  ;;  %v18860_v31 = vld [vmem:[#allocation2 + $0x138] sm:$0xff]  ;;  %22082 = vst [vmem:[#allocation40_spill] sm:$0xff] %v18864_v29  ;;  %v22093_v33 = vld [vmem:[#allocation31_spill] sm:$0xff] }
 0x2a0   : > { %v14240_v3 = vpop.f32.mrf.mxu0  ;;  %v14191_v9 = vpop.f32.mrf.mxu1  ;;  %6549 = vmatprep.mubr.bf16.mxu1 %v13332_v52  ;;  %v5997_v56 = vrot.slane %v5996_v14, 4  ;;  %v6007_v35 = vrot.slane %v6006_v41, 4  ;;  %v6019_v19 = vrot.slane %v6017_v49, 5  ;;  %v6025_v16 = vrot.slane %v6023_v51, 5 }
 0x2a1   : > { %v18836_v11 = vadd.f32 %v14239_v2, %v18435_v43  ;;  %v18844_v54 = vadd.f32 %v14190_v20, %v18601_v27  ;;  %v6011_v48 = vrot.slane %v6009_v15, 5  ;;  %v6029_v34 = vrot.slane %v6027_v1, 4 }
 0x2a2   : > { %v14241_v45 = vpop.f32.mrf.mxu0  ;;  %v14192_v0 = vpop.f32.mrf.mxu1  ;;  %v13295_v20 = vcombine.low %v18813_v55, %v18815_v63 }
 0x2a3   : > { %v14242_v60 = vadd.f32 %v14241_v45, %v14240_v3  ;;  %v14193_v6 = vadd.f32 %v14192_v0, %v14191_v9  ;;  %v6016_v3 = vrot.slane %v6014_v47, 4  ;;  %v18877_v45 = vsel %vm16510_vm0, %v5997_v56, %v6001_v4 }
 0x2a4   : > { %v14243_v43 = vpop.f32.mrf.mxu0  ;;  %5709 = vmatmul.mubr.bf16.gmra.mxu0 %v13293_v28  ;;  %v18862_v28 = vld [vmem:[#allocation2 + $0x140] sm:$0xff]  ;;  %v14194_v52 = vpop.f32.mrf.mxu1  ;;  %v18884_v9 = vsel %vm16510_vm0, %v6007_v35, %v6011_v48  ;;  %v6033_v47 = vshll.u32 %v18864_v29, 16  ;;  %v6038_v0 = vshrl.u32 %v18734_v5, 16  ;;  %v6041_v4 = vshll.u32 %v18734_v5, 16 }
 0x2a5   : > { %v18858_v27 = vadd.f32 %v14242_v60, %v18444_v57  ;;  %5716 = vmatprep.mubr.bf16.mxu0 %v13296_v61  ;;  %v18867_v57 = vadd.f32 %v14193_v6, %v18619_v39  ;;  %v13334_v61 = vcombine.high %v18851_v10, %v18855_v12  ;;  %v13298_v41 = vcombine.high %v18860_v31, %v18862_v28 }
 0x2a6   : > { %v14244_v2 = vpop.f32.mrf.mxu0  ;;  %v14195_v15 = vpop.f32.mrf.mxu1  ;;  %v6020_v60 = vor.u32 %v6019_v19, %v6016_v3  ;;  %v6047_v6 = vshll.u32 %v18736_v30, 16  ;;  %v6051_v35 = vshrl.u32 %v18736_v30, 16  ;;  %v22085_v3 = vld [vmem:[#allocation42_spill] sm:$0xff]  ;;  %v13336_v19 = vcombine.high %v18877_v45, %v18884_v9  ;;  %v18903_v30 = vld [vmem:[#allocation2 + $0x150] sm:$0xff] }
 0x2a7   : > { %v14245_v62 = vadd.f32 %v14244_v2, %v14243_v43  ;;  %22083 = vst [vmem:[#allocation27_spill] sm:$0xff] %v18867_v57  ;;  %v14196_v39 = vadd.f32 %v14195_v15, %v14194_v52  ;;  %6550 = vmatmul.mubr.bf16.gmra.mxu1 %v13331_v18  ;;  %v6030_v43 = vor.u32 %v6029_v34, %v6025_v16  ;;  %v6035_v34 = vrot.slane %v6033_v47, 5 }
 0x2a8   : > { %v14246_v14 = vpop.f32.mrf.mxu0  ;;  %v14197_v1 = vpop.f32.mrf.mxu1  ;;  %6557 = vmatprep.mubr.bf16.mxu1 %v13334_v61  ;;  %v13297_v18 = vcombine.low %v18860_v31, %v18862_v28  ;;  %v13333_v52 = vcombine.low %v18851_v10, %v18855_v12  ;;  %v18905_v61 = vld [vmem:[#allocation2 + $0x158] sm:$0xff]  ;;  %v6065_v29 = vshll.u32 %v18759_v26, 16 }
 0x2a9   : > { %v18880_v51 = vadd.f32 %v14245_v62, %v18462_v58  ;;  %v18890_v58 = vadd.f32 %v14196_v39, %v18648_v13  ;;  %v6031_v15 = vrot.slane %v6030_v43, 4  ;;  %v6040_v39 = vrot.slane %v6038_v0, 4  ;;  %v22088_v0 = vld [vmem:[#allocation30_spill] sm:$0xff] }
 0x2aa   : > { %v14247_v49 = vpop.f32.mrf.mxu0  ;;  %v14198_v2 = vpop.f32.mrf.mxu1  ;;  %v6075_v43 = vshrl.u32 %v18761_v38, 16 }
 0x2ab   : > { %v14248_v56 = vadd.f32 %v14247_v49, %v14246_v14  ;;  %22084 = vst [vmem:[#allocation41_spill] sm:$0xff] %v18890_v58  ;;  %v14199_v13 = vadd.f32 %v14198_v2, %v14197_v1  ;;  %v6043_v49 = vrot.slane %v6041_v4, 5  ;;  %v18912_v1 = vrot.slane %v6047_v6, 5 }
 0x2ac   : > { %v14249_v48 = vpop.f32.mrf.mxu0  ;;  %5717 = vmatmul.mubr.bf16.gmra.mxu0 %v13295_v20  ;;  %v14200_v14 = vpop.f32.mrf.mxu1  ;;  %v6021_v20 = vrot.slane %v6020_v60, 4  ;;  %v6071_v60 = vshll.u32 %v18761_v38, 16 }
 0x2ad   : > { %v18899_v5 = vadd.f32 %v14248_v56, %v22085_v3  ;;  %5724 = vmatprep.mubr.bf16.mxu0 %v13298_v41  ;;  %v18908_v12 = vadd.f32 %v14199_v13, %v18666_v32  ;;  %v18910_v41 = vld [vmem:[#allocation2 + $0x100] sm:$0x11]  ;;  %v6053_v56 = vrot.slane %v6051_v35, 4  ;;  %v6062_v3 = vshrl.u32 %v18759_v26, 16 }
 0x2ae   : > { %v14250_v62 = vpop.f32.mrf.mxu0  ;;  %22087 = vst [vmem:[#allocation42_spill] sm:$0xff] %v18910_v41  ;;  %v14201_v2 = vpop.f32.mrf.mxu1  ;;  %v13300_v32 = vcombine.high %v18903_v30, %v18905_v61  ;;  %v18925_v35 = vsel %vm16510_vm0, %v6021_v20, %v6025_v16  ;;  %v18929_v26 = vsel %vm16510_vm0, %v6031_v15, %v6035_v34  ;;  %v6057_v38 = vshll.u32 %v18910_v41, 16 }
 0x2af   : > { %v14251_v10 = vadd.f32 %v14250_v62, %v14249_v48  ;;  %22086 = vst [vmem:[#allocation22_spill] sm:$0xff] %v18908_v12  ;;  %v14202_v48 = vadd.f32 %v14201_v2, %v14200_v14  ;;  %6558 = vmatmul.mubr.bf16.gmra.mxu1 %v13333_v52  ;;  %v18937_v14 = vld [vmem:[#allocation2 + $0x170] sm:$0xff]  ;;  %v6044_v52 = vor.u32 %v6043_v49, %v6040_v39  ;;  %v6064_v12 = vrot.slane %v6062_v3, 4 }
 0x2b0   : > { %v14252_v47 = vpop.f32.mrf.mxu0  ;;  %v14203_v13 = vpop.f32.mrf.mxu1  ;;  %6565 = vmatprep.mubr.bf16.mxu1 %v13336_v19  ;;  %v6054_v2 = vor.u32 %v6053_v56, %v18912_v1  ;;  %v6067_v34 = vrot.slane %v6065_v29, 5  ;;  %v18940_v15 = vrot.slane %v6071_v60, 5  ;;  %v6077_v41 = vrot.slane %v6075_v43, 4 }
 0x2b1   : > { %v18919_v4 = vadd.f32 %v14251_v10, %v22088_v0  ;;  %v18933_v10 = vadd.f32 %v14202_v48, %v18689_v37  ;;  %v18935_v0 = vld [vmem:[#allocation2 + $0x168] sm:$0xff]  ;;  %v18945_v48 = vld [vmem:[#allocation2 + $0x118] sm:$0x11]  ;;  %v13299_v19 = vcombine.low %v18903_v30, %v18905_v61  ;;  %v13335_v29 = vcombine.low %v18877_v45, %v18884_v9 }
 0x2b2   : > { %v14253_v6 = vpop.f32.mrf.mxu0  ;;  %v14204_v20 = vpop.f32.mrf.mxu1  ;;  %v13338_v49 = vcombine.high %v18925_v35, %v18929_v26  ;;  %v6045_v60 = vrot.slane %v6044_v52, 4  ;;  %v6059_v43 = vrot.slane %v6057_v38, 5  ;;  %v6081_v58 = vshll.u32 %v18945_v48, 16 }
 0x2b3   : > { %v14254_v62 = vadd.f32 %v14253_v6, %v14252_v47  ;;  %22089 = vst [vmem:[#allocation30_spill] sm:$0xff] %v18933_v10  ;;  %v22090_v47 = vld [vmem:[#allocation43_spill] sm:$0xff]  ;;  %v14205_v37 = vadd.f32 %v14204_v20, %v14203_v13  ;;  %v6068_v20 = vor.u32 %v6067_v34, %v6064_v12  ;;  %v6086_v9 = vshrl.u32 %v18813_v55, 16 }
 0x2b4   : > { %v14255_v16 = vpop.f32.mrf.mxu0  ;;  %5725 = vmatmul.mubr.bf16.gmra.mxu0 %v13297_v18  ;;  %22091 = vst [vmem:[#allocation43_spill] sm:$0xff] %v18945_v48  ;;  %v13302_v18 = vcombine.high %v18935_v0, %v18937_v14  ;;  %v14206_v39 = vpop.f32.mrf.mxu1  ;;  %v6095_v38 = vshll.u32 %v18815_v63, 16  ;;  %v6099_v52 = vshrl.u32 %v18815_v63, 16  ;;  %v18974_v34 = vld [vmem:[#allocation2 + $0x188] sm:$0xff] }
 0x2b5   : > { %v18943_v6 = vadd.f32 %v14254_v62, %v22090_v47  ;;  %5732 = vmatprep.mubr.bf16.mxu0 %v13300_v32  ;;  %v18956_v3 = vadd.f32 %v14205_v37, %v18707_v40  ;;  %v6055_v62 = vrot.slane %v6054_v2, 4  ;;  %v6078_v47 = vor.u32 %v6077_v41, %v18940_v15 }
 0x2b6   : > { %v14256_v10 = vpop.f32.mrf.mxu0  ;;  %v14207_v13 = vpop.f32.mrf.mxu1  ;;  %v13301_v41 = vcombine.low %v18935_v0, %v18937_v14 }
 0x2b7   : > { %v14257_v56 = vadd.f32 %v14256_v10, %v14255_v16  ;;  %22092 = vst [vmem:[#allocation45_spill] sm:$0xff] %v18956_v3  ;;  %v14208_v45 = vadd.f32 %v14207_v13, %v14206_v39  ;;  %v6089_v10 = vshll.u32 %v18813_v55, 16  ;;  %6566 = vmatmul.mubr.bf16.gmra.mxu1 %v13335_v29  ;;  %v18979_v55 = vsel %vm16510_vm0, %v6045_v60, %v18912_v1 }
 0x2b8   : > { %v14258_v32 = vpop.f32.mrf.mxu0  ;;  %v14209_v16 = vpop.f32.mrf.mxu1  ;;  %6573 = vmatprep.mubr.bf16.mxu1 %v13338_v49  ;;  %v18983_v39 = vsel %vm16510_vm0, %v6055_v62, %v6059_v43  ;;  %v6069_v29 = vrot.slane %v6068_v20, 4  ;;  %v13337_v43 = vcombine.low %v18925_v35, %v18929_v26  ;;  %v18994_v62 = vrot.slane %v6095_v38, 5  ;;  %v15927_v38 = vld [vmem:[#allocation2 + $0x38] sm:$0xff] }
 0x2b9   : > { %v18961_v57 = vadd.f32 %v14257_v56, %v22093_v33  ;;  %v18970_v2 = vadd.f32 %v14208_v45, %v18732_v23  ;;  %v18972_v33 = vld [vmem:[#allocation2 + $0x180] sm:$0xff]  ;;  %v6079_v23 = vrot.slane %v6078_v47, 4  ;;  %v6083_v56 = vrot.slane %v6081_v58, 5  ;;  %v18988_v45 = vld [vmem:[#allocation2 + $0x198] sm:$0xff] }
 0x2ba   : > { %v14259_v40 = vpop.f32.mrf.mxu0  ;;  %v14210_v63 = vpop.f32.mrf.mxu1  ;;  %v6091_v1 = vrot.slane %v6089_v10, 5  ;;  %v6101_v58 = vrot.slane %v6099_v52, 4  ;;  %v19003_v10 = vld [vmem:[#allocation2 + $0x130] sm:$0x11]  ;;  %v6744_v52 = vrot.slane %v15927_v38, 5 }
 0x2bb   : > { %v14260_v12 = vadd.f32 %v14259_v40, %v14258_v32  ;;  %22094 = vst [vmem:[#allocation31_spill] sm:$0xff] %v18970_v2  ;;  %v22095_v32 = vld [vmem:[#allocation36_spill] sm:$0xff]  ;;  %v14211_v49 = vadd.f32 %v14210_v63, %v14209_v16  ;;  %v6088_v40 = vrot.slane %v6086_v9, 4  ;;  %v13340_v9 = vcombine.high %v18979_v55, %v18983_v39  ;;  %22097 = vst [vmem:[#allocation46_spill] sm:$0xff] %v19003_v10  ;;  %v19005_v63 = vld [vmem:[#allocation2 + $0x8] sm:$0xff] }
 0x2bc   : > { %v14261_v37 = vpop.f32.mrf.mxu0  ;;  %5733 = vmatmul.mubr.bf16.gmra.mxu0 %v13299_v19  ;;  %v13304_v19 = vcombine.high %v18972_v33, %v18974_v34  ;;  %v14212_v48 = vpop.f32.mrf.mxu1  ;;  %v6102_v38 = vor.u32 %v6101_v58, %v18994_v62  ;;  %v6105_v26 = vshll.u32 %v19003_v10, 16 }
 0x2bd   : > { %v18986_v13 = vadd.f32 %v14260_v12, %v22095_v32  ;;  %5740 = vmatprep.mubr.bf16.mxu0 %v13302_v18  ;;  %v18999_v47 = vadd.f32 %v14211_v49, %v18750_v21  ;;  %v19014_v21 = vsel %vm16510_vm0, %v6069_v29, %v18940_v15  ;;  %v19021_v18 = vsel %vm16510_vm0, %v6079_v23, %v6083_v56 }
 0x2be   : > { %v14262_v60 = vpop.f32.mrf.mxu0  ;;  %v14213_v12 = vpop.f32.mrf.mxu1  ;;  %v6092_v35 = vor.u32 %v6091_v1, %v6088_v40  ;;  %v6110_v15 = vshrl.u32 %v18860_v31, 16  ;;  %v6113_v29 = vshll.u32 %v18860_v31, 16  ;;  %v6119_v23 = vshll.u32 %v18862_v28, 16 }
 0x2bf   : > { %v14263_v20 = vadd.f32 %v14262_v60, %v14261_v37  ;;  %22096 = vst [vmem:[#allocation36_spill] sm:$0xff] %v18999_v47  ;;  %v22098_v37 = vld [vmem:[#allocation32_spill] sm:$0xff]  ;;  %v14214_v49 = vadd.f32 %v14213_v12, %v14212_v48  ;;  %6574 = vmatmul.mubr.bf16.gmra.mxu1 %v13337_v43  ;;  %v6123_v56 = vshrl.u32 %v18862_v28, 16  ;;  %v13339_v43 = vcombine.low %v18979_v55, %v18983_v39 }
 0x2c0   : > { %v14264_v16 = vpop.f32.mrf.mxu0  ;;  %v6678_v60 = vld [vmem:[#allocation2 + $0x30] sm:$0xee]  ;;  %v14215_v2 = vpop.f32.mrf.mxu1  ;;  %6581 = vmatprep.mubr.bf16.mxu1 %v13340_v9  ;;  %v6746_v12 = vrot.slane %v6744_v52, 4  ;;  %v6093_v9 = vrot.slane %v6092_v35, 4  ;;  %v6112_v10 = vrot.slane %v6110_v15, 4  ;;  %v6137_v35 = vshll.u32 %v18903_v30, 16 }
 0x2c1   : > { %v19017_v32 = vadd.f32 %v14263_v20, %v22098_v37  ;;  %v19028_v48 = vadd.f32 %v14214_v49, %v18779_v46  ;;  %v13371_v58 = vrot.slane %v6678_v60, 9  ;;  %v6747_v37 = vrot.slane %v18568_v59, 5  ;;  %v19043_v59 = vld [vmem:[#allocation2 + $0x148] sm:$0x11] }
 0x2c2   : > { %v14265_v47 = vpop.f32.mrf.mxu0  ;;  %v14216_v1 = vpop.f32.mrf.mxu1  ;;  %v6107_v49 = vrot.slane %v6105_v26, 5  ;;  %22101 = vst [vmem:[#allocation48_spill] sm:$0xff] %v19043_v59  ;;  %v6147_v26 = vshrl.u32 %v18905_v61, 16 }
 0x2c3   : > { %v14266_v20 = vadd.f32 %v14265_v47, %v14264_v16  ;;  %22099 = vst [vmem:[#allocation32_spill] sm:$0xff] %v19028_v48  ;;  %v14217_v46 = vadd.f32 %v14216_v1, %v14215_v2  ;;  %v13342_v47 = vcombine.high %v19014_v21, %v19021_v18  ;;  %v6115_v48 = vrot.slane %v6113_v29, 5  ;;  %v501_v29 = vld [vmem:[#allocation3 + $0x6c] sm:$0x1] }
 0x2c4   : > { %v14267_v40 = vpop.f32.mrf.mxu0  ;;  %5741 = vmatmul.mubr.bf16.gmra.mxu0 %v13301_v41  ;;  %v14218_v16 = vpop.f32.mrf.mxu1  ;;  %v6103_v41 = vrot.slane %v6102_v38, 4  ;;  %v6143_v38 = vshll.u32 %v18905_v61, 16 }
 0x2c5   : > { %v19036_v31 = vadd.f32 %v14266_v20, %v18588_v22  ;;  %5748 = vmatprep.mubr.bf16.mxu0 %v13304_v19  ;;  %v19041_v39 = vadd.f32 %v14217_v46, %v18795_v50  ;;  %v19045_v22 = vrot.slane %v6119_v23, 5  ;;  %v6125_v19 = vrot.slane %v6123_v56, 4  ;;  %v15928_v46 = vld [vmem:[#allocation2 + $0x50] sm:$0xff] }
 0x2c6   : > { %v14268_v28 = vpop.f32.mrf.mxu0  ;;  %v14219_v60 = vpop.f32.mrf.mxu1  ;;  %v6134_v20 = vshrl.u32 %v18903_v30, 16  ;;  %v19060_v23 = vsel %vm17204_vm6, %v6746_v12, %v6747_v37  ;;  %v6679_v30 = vld [vmem:[#allocation2 + $0x48] sm:$0xee]  ;;  %v19069_v61 = vsel %vm16510_vm0, %v6103_v41, %v6107_v49  ;;  %v19079_v41 = vrot.slane %v6143_v38, 5 }
 0x2c7   : > { %v14269_v55 = vadd.f32 %v14268_v28, %v14267_v40  ;;  %22100 = vst [vmem:[#allocation47_spill] sm:$0xff] %v19041_v39  ;;  %v14220_v50 = vadd.f32 %v14219_v60, %v14218_v16  ;;  %v19056_v40 = vsel %vm17204_vm6, %v13371_v58, %v6744_v52  ;;  %6582 = vmatmul.mubr.bf16.gmra.mxu1 %v13339_v43  ;;  %v6751_v28 = vrot.slane %v15928_v46, 5  ;;  %v22105_v46 = vld [vmem:[#allocation33_spill] sm:$0xff] }
 0x2c8   : > { %v14270_v2 = vpop.f32.mrf.mxu0  ;;  %v14349_v1 = vpop.f32.mrf.mxu1  ;;  %v6129_v52 = vshll.u32 %v19043_v59, 16  ;;  %6589 = vmatprep.mubr.bf16.mxu1 %v13342_v47  ;;  %v6116_v43 = vor.u32 %v6115_v48, %v6112_v10  ;;  %v6126_v37 = vor.u32 %v6125_v19, %v19045_v22  ;;  %v6139_v60 = vrot.slane %v6137_v35, 5  ;;  %v19089_v19 = vld [vmem:[#allocation2 + $0x160] sm:$0x11] }
 0x2c9   : > { %v19052_v15 = vadd.f32 %v14269_v55, %v18610_v53  ;;  %v19065_v53 = vsel %vm16510_vm0, %v6093_v9, %v18994_v62  ;;  %v19073_v12 = vadd.f32 %v14220_v50, %v18820_v24  ;;  %v22104_v55 = vcombine.low %v18972_v33, %v18974_v34 }
 0x2ca   : > { %v14271_v56 = vpop.f32.mrf.mxu0  ;;  %v14350_v62 = vpop.f32.mrf.mxu1  ;;  %v6136_v9 = vrot.slane %v6134_v20, 4  ;;  %v6149_v49 = vrot.slane %v6147_v26, 4  ;;  %v22107_v24 = vcombine.high %v18988_v45, %v19005_v63  ;;  %v13388_v10 = vcombine.high %v19056_v40, %v19060_v23  ;;  %v22108_v26 = vld [vmem:[#allocation44_spill] sm:$0xff] }
 0x2cb   : > { %v14272_v58 = vadd.f32 %v14271_v56, %v14270_v2  ;;  %22103 = vst [vmem:[#allocation49_spill] sm:$0xff] %v19073_v12  ;;  %v14351_v48 = vadd.f32 %v14350_v62, %v14349_v1  ;;  %v13372_v47 = vrot.slane %v6679_v30, 9  ;;  %v13341_v35 = vcombine.low %v19014_v21, %v19021_v18  ;;  %v22109_v21 = vld [vmem:[#allocation37_spill] sm:$0xff] }
 0x2cc   : > { %v14273_v16 = vpop.f32.mrf.mxu0  ;;  %5749 = vmatmul.mubr.bf16.gmra.mxu0 %v22104_v55  ;;  %v14352_v20 = vpop.f32.mrf.mxu1  ;;  %v6753_v38 = vrot.slane %v6751_v28, 4  ;;  %v6754_v56 = vrot.slane %v22108_v26, 5  ;;  %v6131_v1 = vrot.slane %v6129_v52, 5  ;;  %v6127_v59 = vrot.slane %v6126_v37, 4 }
 0x2cd   : > { %v19082_v2 = vadd.f32 %v14272_v58, %v22105_v46  ;;  %5756 = vmatprep.mubr.bf16.mxu0 %v22107_v24  ;;  %v13344_v58 = vcombine.high %v19065_v53, %v19069_v61  ;;  %v19097_v46 = vadd.f32 %v14351_v48, %v18836_v11  ;;  %v6117_v24 = vrot.slane %v6116_v43, 4 }
 0x2ce   : > { %v14274_v50 = vpop.f32.mrf.mxu0  ;;  %v14353_v62 = vpop.f32.mrf.mxu1  ;;  %v6140_v12 = vor.u32 %v6139_v60, %v6136_v9  ;;  %v6150_v39 = vor.u32 %v6149_v49, %v19079_v41  ;;  %v6153_v18 = vshll.u32 %v19089_v19, 16  ;;  %v19108_v52 = vsel %vm17204_vm6, %v13372_v47, %v6751_v28 }
 0x2cf   : > { %22106 = vst [vmem:[#allocation33_spill] sm:$0xff] %v19082_v2  ;;  %v14275_v55 = vadd.f32 %v14274_v50, %v14273_v16  ;;  %v14354_v26 = vadd.f32 %v14353_v62, %v14352_v20  ;;  %v6158_v2 = vshrl.u32 %v18935_v0, 16  ;;  %v6161_v16 = vshll.u32 %v18935_v0, 16  ;;  %6590 = vmatmul.mubr.bf16.gmra.mxu1 %v13341_v35  ;;  %v15929_v0 = vld [vmem:[#allocation2 + $0x68] sm:$0xff] }
 0x2d0   : > { %v14276_v30 = vpop.f32.mrf.mxu0  ;;  %v19112_v43 = vsel %vm17204_vm6, %v6753_v38, %v6754_v56  ;;  %v14355_v37 = vpop.f32.mrf.mxu1  ;;  %v6167_v9 = vshll.u32 %v18937_v14, 16  ;;  %v6171_v60 = vshrl.u32 %v18937_v14, 16  ;;  %6597 = vmatprep.mubr.bf16.mxu1 %v13344_v58  ;;  %v6758_v50 = vrot.slane %v15929_v0, 5  ;;  %v22111_v58 = vld [vmem:[#allocation34_spill] sm:$0xff] }
 0x2d1   : > { %v19102_v3 = vadd.f32 %v14275_v55, %v22109_v21  ;;  %v19117_v48 = vadd.f32 %v14354_v26, %v18858_v27  ;;  %v19122_v28 = vsel %vm16510_vm0, %v6117_v24, %v19045_v22  ;;  %v22110_v20 = vcombine.low %v18988_v45, %v19005_v63  ;;  %v6680_v22 = vld [vmem:[#allocation2 + $0x60] sm:$0xee] }
 0x2d2   : > { %v14277_v11 = vpop.f32.mrf.mxu0  ;;  %v14356_v35 = vpop.f32.mrf.mxu1  ;;  %v19129_v14 = vsel %vm16510_vm0, %v6127_v59, %v6131_v1  ;;  %v6141_v27 = vrot.slane %v6140_v12, 4  ;;  %v6151_v38 = vrot.slane %v6150_v39, 4  ;;  %v6155_v56 = vrot.slane %v6153_v18, 5 }
 0x2d3   : > { %v14278_v49 = vadd.f32 %v14277_v11, %v14276_v30  ;;  %v14357_v30 = vadd.f32 %v14356_v35, %v14355_v37  ;;  %v6160_v24 = vrot.slane %v6158_v2, 4  ;;  %v6163_v62 = vrot.slane %v6161_v16, 5  ;;  %v19147_v16 = vld [vmem:[#allocation2 + $0x178] sm:$0x11] }
 0x2d4   : > { %v14279_v47 = vpop.f32.mrf.mxu0  ;;  %5757 = vmatmul.mubr.bf16.gmra.mxu0 %v22110_v20  ;;  %v13387_v26 = vcombine.low %v19056_v40, %v19060_v23  ;;  %v14358_v11 = vpop.f32.mrf.mxu1  ;;  %v13343_v59 = vcombine.low %v19065_v53, %v19069_v61  ;;  %v19138_v1 = vrot.slane %v6167_v9, 5  ;;  %v6173_v39 = vrot.slane %v6171_v60, 4  ;;  %v22112_v53 = vld [vmem:[#allocation21_spill] sm:$0xff]  ;;  %v22113_v60 = vld [vmem:[#allocation38_spill] sm:$0xff] }
 0x2d5   : > { %v19132_v55 = vadd.f32 %v14278_v49, %v22111_v58  ;;  %7142 = vmatprep.mubr.bf16.mxu0 %v13388_v10  ;;  %v13390_v18 = vcombine.high %v19108_v52, %v19112_v43  ;;  %v19143_v10 = vadd.f32 %v14357_v30, %v18880_v51  ;;  %v13346_v2 = vcombine.high %v19122_v28, %v19129_v14 }
 0x2d6   : > { %v14280_v21 = vpop.f32.mrf.mxu0  ;;  %v14359_v23 = vpop.f32.mrf.mxu1  ;;  %v13373_v37 = vrot.slane %v6680_v22, 9  ;;  %v6760_v49 = vrot.slane %v6758_v50, 4  ;;  %v6761_v61 = vrot.slane %v22112_v53, 5  ;;  %v19153_v9 = vsel %vm16510_vm0, %v6141_v27, %v19079_v41 }
 0x2d7   : > { %v14281_v12 = vadd.f32 %v14280_v21, %v14279_v47  ;;  %v14360_v51 = vadd.f32 %v14359_v23, %v14358_v11  ;;  %v19160_v47 = vsel %vm16510_vm0, %v6151_v38, %v6155_v56  ;;  %v6164_v20 = vor.u32 %v6163_v62, %v6160_v24  ;;  %6598 = vmatmul.mubr.bf16.gmra.mxu1 %v13343_v59  ;;  %v15930_v59 = vld [vmem:[#allocation2 + $0x80] sm:$0xff] }
 0x2d8   : > { %v14282_v40 = vpop.f32.mrf.mxu0  ;;  %v14361_v58 = vpop.f32.mrf.mxu1  ;;  %v6174_v30 = vor.u32 %v6173_v39, %v19138_v1  ;;  %v6177_v22 = vshll.u32 %v19147_v16, 16  ;;  %v6182_v21 = vshrl.u32 %v18972_v33, 16  ;;  %v6185_v41 = vshll.u32 %v18972_v33, 16  ;;  %6605 = vmatprep.mubr.bf16.mxu1 %v13346_v2 }
 0x2d9   : > { %v19156_v0 = vadd.f32 %v14281_v12, %v22113_v60  ;;  %v19167_v12 = vadd.f32 %v14360_v51, %v18899_v5  ;;  %v6191_v38 = vshll.u32 %v18974_v34, 16  ;;  %v6195_v56 = vshrl.u32 %v18974_v34, 16 }
 0x2da   : > { %v14283_v35 = vpop.f32.mrf.mxu0  ;;  %v19173_v62 = vsel %vm17204_vm6, %v13373_v37, %v6758_v50  ;;  %v19177_v11 = vsel %vm17204_vm6, %v6760_v49, %v6761_v61  ;;  %v14362_v33 = vpop.f32.mrf.mxu1  ;;  %v13345_v5 = vcombine.low %v19122_v28, %v19129_v14  ;;  %v6765_v39 = vrot.slane %v15930_v59, 5  ;;  %v19189_v14 = vld [vmem:[#allocation2 + $0x190] sm:$0x11] }
 0x2db   : > { %v14284_v27 = vadd.f32 %v14283_v35, %v14282_v40  ;;  %v14363_v34 = vadd.f32 %v14362_v33, %v14361_v58  ;;  %v13348_v50 = vcombine.high %v19153_v9, %v19160_v47  ;;  %v6165_v40 = vrot.slane %v6164_v20, 4 }
 0x2dc   : > { %v14285_v24 = vpop.f32.mrf.mxu0  ;;  %7143 = vmatmul.mubr.bf16.vlgmr.msra.gmra.mxu0 %v13387_v26  ;;  %v6681_v26 = vld [vmem:[#allocation2 + $0x78] sm:$0xee]  ;;  %v14364_v37 = vpop.f32.mrf.mxu1  ;;  %v6175_v49 = vrot.slane %v6174_v30, 4  ;;  %v6179_v53 = vrot.slane %v6177_v22, 5  ;;  %v6184_v61 = vrot.slane %v6182_v21, 4  ;;  %v6187_v60 = vrot.slane %v6185_v41, 5 }
 0x2dd   : > { %v19182_v2 = vadd.f32 %v14284_v27, %v18716_v7  ;;  %7150 = vmatprep.mubr.bf16.mxu0 %v13390_v18  ;;  %v19187_v28 = vadd.f32 %v14363_v34, %v18919_v4  ;;  %v19191_v7 = vrot.slane %v6191_v38, 5  ;;  %v6197_v18 = vrot.slane %v6195_v56, 4 }
 0x2de   : > { %v14286_v23 = vpop.f32.mrf.mxu0  ;;  %v13389_v58 = vcombine.low %v19108_v52, %v19112_v43  ;;  %v13392_v20 = vcombine.high %v19173_v62, %v19177_v11  ;;  %v14365_v30 = vpop.f32.mrf.mxu1  ;;  %v13374_v22 = vrot.slane %v6681_v26, 9  ;;  %v6767_v4 = vrot.slane %v6765_v39, 4 }
 0x2df   : > { %v14287_v51 = vadd.f32 %v14286_v23, %v14285_v24  ;;  %v14366_v41 = vadd.f32 %v14365_v30, %v14364_v37  ;;  %v6768_v27 = vrot.slane %v18697_v44, 5  ;;  %v13391_v38 = vcombine.low %v19173_v62, %v19177_v11  ;;  %6606 = vmatmul.mubr.bf16.gmra.mxu1 %v13345_v5  ;;  %v22114_v23 = vld [vmem:[#allocation28_spill] sm:$0xff] }
 0x2e0   : > { %v14288_v35 = vpop.f32.mrf.mxu0  ;;  %v14367_v56 = vpop.f32.mrf.mxu1  ;;  %v19206_v52 = vsel %vm16510_vm0, %v6165_v40, %v19138_v1  ;;  %v19210_v43 = vsel %vm16510_vm0, %v6175_v49, %v6179_v53  ;;  %6613 = vmatprep.mubr.bf16.mxu1 %v13348_v50  ;;  %v6188_v59 = vor.u32 %v6187_v60, %v6184_v61  ;;  %v6198_v62 = vor.u32 %v6197_v18, %v19191_v7  ;;  %v15931_v60 = vld [vmem:[#allocation2 + $0x98] sm:$0xff] }
 0x2e1   : > { %v19198_v21 = vadd.f32 %v14287_v51, %v18741_v36  ;;  %v6201_v36 = vshll.u32 %v19189_v14, 16  ;;  %v19214_v44 = vadd.f32 %v14366_v41, %v18943_v6  ;;  %v6206_v1 = vshrl.u32 %v18988_v45, 16 }
 0x2e2   : > { %v14289_v24 = vpop.f32.mrf.mxu0  ;;  %v14368_v5 = vpop.f32.mrf.mxu1  ;;  %v6209_v34 = vshll.u32 %v18988_v45, 16  ;;  %v6215_v26 = vshll.u32 %v19005_v63, 16  ;;  %v6219_v40 = vshrl.u32 %v19005_v63, 16  ;;  %v19226_v6 = vsel %vm17204_vm6, %v13374_v22, %v6765_v39 }
 0x2e3   : > { %v14290_v33 = vadd.f32 %v14289_v24, %v14288_v35  ;;  %v19230_v50 = vsel %vm17204_vm6, %v6767_v4, %v6768_v27  ;;  %v14369_v49 = vadd.f32 %v14368_v5, %v14367_v56  ;;  %v13347_v45 = vcombine.low %v19153_v9, %v19160_v47 }
 0x2e4   : > { %v14291_v11 = vpop.f32.mrf.mxu0  ;;  %7151 = vmatmul.mubr.bf16.gmra.mxu0 %v13389_v58  ;;  %v14370_v61 = vpop.f32.mrf.mxu1  ;;  %v6772_v63 = vrot.slane %v15931_v60, 5  ;;  %v13350_v51 = vcombine.high %v19206_v52, %v19210_v43  ;;  %v6203_v18 = vrot.slane %v6201_v36, 5  ;;  %v6682_v58 = vld [vmem:[#allocation2 + $0x90] sm:$0xee]  ;;  %v6199_v30 = vrot.slane %v6198_v62, 4 }
 0x2e5   : > { %v19222_v37 = vadd.f32 %v14290_v33, %v22114_v23  ;;  %7158 = vmatprep.mubr.bf16.mxu0 %v13392_v20  ;;  %v19237_v39 = vadd.f32 %v14369_v49, %v18961_v57  ;;  %v6189_v20 = vrot.slane %v6188_v59, 4  ;;  %v6208_v4 = vrot.slane %v6206_v1, 4  ;;  %v19244_v33 = vld [vmem:[#allocation2 + $0x1a8] sm:$0x11] }
 0x2e6   : > { %v14292_v53 = vpop.f32.mrf.mxu0  ;;  %v14371_v41 = vpop.f32.mrf.mxu1  ;;  %v6211_v27 = vrot.slane %v6209_v34, 5  ;;  %v6217_v24 = vrot.slane %v6215_v26, 5  ;;  %v6221_v56 = vrot.slane %v6219_v40, 4  ;;  %v13394_v47 = vcombine.high %v19226_v6, %v19230_v50  ;;  %v22115_v59 = vld [vmem:[#allocation35_spill] sm:$0xff] }
 0x2e7   : > { %v14293_v35 = vadd.f32 %v14292_v53, %v14291_v11  ;;  %v14372_v36 = vadd.f32 %v14371_v41, %v14370_v61  ;;  %v13375_v11 = vrot.slane %v6682_v58, 9  ;;  %v6774_v5 = vrot.slane %v6772_v63, 4  ;;  %6614 = vmatmul.mubr.bf16.gmra.mxu1 %v13347_v45  ;;  %v15932_v58 = vld [vmem:[#allocation2 + $0xb0] sm:$0xff] }
 0x2e8   : > { %v14294_v22 = vpop.f32.mrf.mxu0  ;;  %v6775_v62 = vrot.slane %v22115_v59, 5  ;;  %v14373_v23 = vpop.f32.mrf.mxu1  ;;  %6621 = vmatprep.mubr.bf16.mxu1 %v13350_v51  ;;  %v19257_v49 = vsel %vm16510_vm0, %v6199_v30, %v6203_v18  ;;  %v6212_v53 = vor.u32 %v6211_v27, %v6208_v4  ;;  %v6222_v61 = vor.u32 %v6221_v56, %v6217_v24  ;;  %v22116_v59 = vld [vmem:[#allocation29_spill] sm:$0xff] }
 0x2e9   : > { %v19240_v9 = vadd.f32 %v14293_v35, %v18788_v17  ;;  %v19248_v34 = vadd.f32 %v14372_v36, %v18986_v13  ;;  %v19253_v17 = vsel %vm16510_vm0, %v6189_v20, %v19191_v7  ;;  %v6225_v45 = vshll.u32 %v19244_v33, 16 }
 0x2ea   : > { %v14295_v57 = vpop.f32.mrf.mxu0  ;;  %v14374_v40 = vpop.f32.mrf.mxu1  ;;  %v19265_v7 = vsel %vm17204_vm6, %v13375_v11, %v6772_v63  ;;  %v13349_v18 = vcombine.low %v19206_v52, %v19210_v43  ;;  %v6779_v20 = vrot.slane %v15932_v58, 5  ;;  %v13352_v41 = vcombine.high %v19253_v17, %v19257_v49 }
 0x2eb   : > { %v14296_v1 = vadd.f32 %v14295_v57, %v14294_v22  ;;  %v14375_v60 = vadd.f32 %v14374_v40, %v14373_v23  ;;  %v6683_v22 = vld [vmem:[#allocation2 + $0xa8] sm:$0xee]  ;;  %v13393_v63 = vcombine.low %v19226_v6, %v19230_v50  ;;  %v6213_v56 = vrot.slane %v6212_v53, 4 }
 0x2ec   : > { %v14297_v26 = vpop.f32.mrf.mxu0  ;;  %7159 = vmatmul.mubr.bf16.gmra.mxu0 %v13391_v38  ;;  %v6776_v38 = vsel %vm17204_vm6, %v6774_v5, %v6775_v62  ;;  %v14376_v35 = vpop.f32.mrf.mxu1  ;;  %v6227_v36 = vrot.slane %v6225_v45, 5  ;;  %v13376_v11 = vrot.slane %v6683_v22, 9  ;;  %v6781_v5 = vrot.slane %v6779_v20, 4 }
 0x2ed   : > { %v19261_v13 = vadd.f32 %v14296_v1, %v18807_v25  ;;  %7166 = vmatprep.mubr.bf16.mxu0 %v13394_v47  ;;  %v19272_v25 = vadd.f32 %v14375_v60, %v19017_v32  ;;  %v6223_v47 = vrot.slane %v6222_v61, 4  ;;  %v13396_v43 = vcombine.high %v19265_v7, %v6776_v38 }
 0x2ee   : > { %v14298_v51 = vpop.f32.mrf.mxu0  ;;  %v14377_v27 = vpop.f32.mrf.mxu1  ;;  %v6782_v62 = vrot.slane %v22116_v59, 5 }
 0x2ef   : > { %v14299_v30 = vadd.f32 %v14298_v51, %v14297_v26  ;;  %v14378_v57 = vadd.f32 %v14377_v27, %v14376_v35  ;;  %6622 = vmatmul.mubr.bf16.gmra.mxu1 %v13349_v18  ;;  %v6228_v40 = vsel %vm16510_vm0, %v6223_v47, %v6227_v36  ;;  %v13351_v35 = vcombine.low %v19253_v17, %v19257_v49  ;;  %v22118_v49 = vld [vmem:[#allocation39_spill] sm:$0xff] }
 0x2f0   : > { %v14300_v4 = vpop.f32.mrf.mxu0  ;;  %v14379_v23 = vpop.f32.mrf.mxu1  ;;  %6629 = vmatprep.mubr.bf16.mxu1 %v13352_v41  ;;  %v6783_v60 = vsel %vm17204_vm6, %v6781_v5, %v6782_v62 }
 0x2f1   : > { %v19279_v52 = vadd.f32 %v14299_v30, %v18831_v42  ;;  %v19284_v6 = vadd.f32 %v14378_v57, %v19036_v31  ;;  %v6218_v42 = vsel %vm16510_vm0, %v6213_v56, %v6217_v24  ;;  %v6780_v31 = vsel %vm17204_vm6, %v13376_v11, %v6779_v20  ;;  %v15933_v24 = vld [vmem:[#allocation2 + $0xc8] sm:$0xff]  ;;  %v22119_v11 = vld [vmem:[#allocation33_spill] sm:$0xff] }
 0x2f2   : > { %v14301_v32 = vpop.f32.mrf.mxu0  ;;  %v14380_v26 = vpop.f32.mrf.mxu1  ;;  %v6786_v18 = vrot.slane %v15933_v24, 5  ;;  %v13354_v22 = vcombine.high %v6218_v42, %v6228_v40  ;;  %v22117_v20 = vld [vmem:[#allocation27_spill] sm:$0xff]  ;;  %v13398_v56 = vcombine.high %v6780_v31, %v6783_v60  ;;  %v6789_v57 = vrot.slane %v22118_v49, 5 }
 0x2f3   : > { %v14302_v1 = vadd.f32 %v14301_v32, %v14300_v4  ;;  %v14381_v61 = vadd.f32 %v14380_v26, %v14379_v23  ;;  %v13395_v4 = vcombine.low %v19265_v7, %v6776_v38  ;;  %v22120_v38 = vld [vmem:[#allocation41_spill] sm:$0xff] }
 0x2f4   : > { %v14303_v50 = vpop.f32.mrf.mxu0  ;;  %7167 = vmatmul.mubr.bf16.gmra.mxu0 %v13393_v63  ;;  %v14382_v51 = vpop.f32.mrf.mxu1  ;;  %v6788_v17 = vrot.slane %v6786_v18, 4 }
 0x2f5   : > { %v19291_v53 = vadd.f32 %v14302_v1, %v18844_v54  ;;  %7174 = vmatprep.mubr.bf16.mxu0 %v13396_v43  ;;  %v19300_v30 = vadd.f32 %v14381_v61, %v19052_v15  ;;  %v6684_v54 = vld [vmem:[#allocation2 + $0xc0] sm:$0xee] }
 0x2f6   : > { %v14304_v45 = vpop.f32.mrf.mxu0  ;;  %v14383_v63 = vpop.f32.mrf.mxu1  ;;  %v13377_v43 = vrot.slane %v6684_v54, 9  ;;  %v6790_v26 = vsel %vm17204_vm6, %v6788_v17, %v6789_v57  ;;  %v6685_v54 = vld [vmem:[#allocation2 + $0xd8] sm:$0xee] }
 0x2f7   : > { %v14305_v58 = vadd.f32 %v14304_v45, %v14303_v50  ;;  %v14384_v47 = vadd.f32 %v14383_v63, %v14382_v51  ;;  %6630 = vmatmul.mubr.bf16.gmra.mxu1 %v13351_v35  ;;  %v13353_v45 = vcombine.low %v6218_v42, %v6228_v40  ;;  %v15934_v51 = vld [vmem:[#allocation2 + $0xe0] sm:$0xff]  ;;  %v22122_v42 = vld [vmem:[#allocation40_spill] sm:$0xff] }
 0x2f8   : > { %v14306_v41 = vpop.f32.mrf.mxu0  ;;  %v14385_v32 = vpop.f32.mrf.mxu1  ;;  %6637 = vmatprep.mubr.bf16.mxu1 %v13354_v22  ;;  %v6787_v50 = vsel %vm17204_vm6, %v13377_v43, %v6786_v18  ;;  %v6793_v35 = vrot.slane %v15934_v51, 5  ;;  %v22121_v63 = vld [vmem:[#allocation22_spill] sm:$0xff]  ;;  %v13378_v43 = vrot.slane %v6685_v54, 9  ;;  %v6796_v40 = vrot.slane %v22122_v42, 5  ;;  %v6686_v51 = vld [vmem:[#allocation2 + $0xf0] sm:$0xee] }
 0x2f9   : > { %v19304_v27 = vadd.f32 %v14305_v58, %v22117_v20  ;;  %v19308_v5 = vadd.f32 %v14384_v47, %v22119_v11  ;;  %v15758_v47 = vld [vmem:[#allocation10 + $0x78] sm:$0xff]   ;;  %v13399_v54 = vcombine.low %v6787_v50, %v6790_v26 }
 0x2fa   : > { %v14307_v36 = vpop.f32.mrf.mxu0  ;;  %v14386_v7 = vpop.f32.mrf.mxu1  ;;  %v6795_v17 = vrot.slane %v6793_v35, 4  ;;  %14997 = vmatprep.subr.bf16.mxu1 %v15758_v47 }
 0x2fb   : > { %v14308_v15 = vadd.f32 %v14307_v36, %v14306_v41  ;;  %v14387_v23 = vadd.f32 %v14386_v7, %v14385_v32  ;;  %v13397_v41 = vcombine.low %v6780_v31, %v6783_v60  ;;  %14998 = vmatpush3.bf16.msra.mxu1 %v15758_v47  ;;  %v22123_v32 = vld [vmem:[#allocation30_spill] sm:$0xff]  ;;  %v6794_v7 = vsel %vm17204_vm6, %v13378_v43, %v6793_v35 }
 0x2fc   : > { %v14309_v59 = vpop.f32.mrf.mxu0  ;;  %7175 = vmatmul.mubr.bf16.gmra.mxu0 %v13395_v4  ;;  %v14388_v61 = vpop.f32.mrf.mxu1 }
 0x2fd   : > { %v19311_v62 = vadd.f32 %v14308_v15, %v22120_v38  ;;  %7182 = vmatprep.mubr.bf16.mxu0 %v13398_v56  ;;  %v19318_v58 = vadd.f32 %v14387_v23, %v19102_v3  ;;  %v13400_v56 = vcombine.high %v6787_v50, %v6790_v26  ;;  %v6797_v38 = vsel %vm17204_vm6, %v6795_v17, %v6796_v40  ;;  %v22126_v50 = vld [vmem:[#allocation31_spill] sm:$0xff] }
 0x2fe   : > { %v14310_v1 = vpop.f32.mrf.mxu0  ;;  %v14389_v4 = vpop.f32.mrf.mxu1 }
 0x2ff   : > { %v14311_v24 = vadd.f32 %v14310_v1, %v14309_v59  ;;  %v14390_v18 = vadd.f32 %v14389_v4, %v14388_v61  ;;  %6638 = vmatmul.mubr.bf16.gmra.mxu1 %v13353_v45 }
 0x300   : > { %v14312_v22 = vpop.f32.mrf.mxu0  ;;  %v14391_v49 = vpop.f32.mrf.mxu1 }
 0x301   : > { %v19321_v20 = vadd.f32 %v14311_v24, %v22121_v63  ;;  %v19325_v3 = vadd.f32 %v14390_v18, %v19132_v55  ;;  %v15935_v55 = vld [vmem:[#allocation2 + $0xf8] sm:$0xff]  ;;  %v13402_v63 = vcombine.high %v6794_v7, %v6797_v38  ;;  %v13379_v18 = vrot.slane %v6686_v51, 9 }
 0x302   : > { %v14313_v36 = vpop.f32.mrf.mxu0  ;;  %v14392_v60 = vpop.f32.mrf.mxu1  ;;  %v6800_v1 = vrot.slane %v15935_v55, 5 }
 0x303   : > { %v14314_v57 = vadd.f32 %v14313_v36, %v14312_v22  ;;  %v14393_v11 = vadd.f32 %v14392_v60, %v14391_v49  ;;  %v22125_v36 = vld [vmem:[#allocation42_spill] sm:$0xff] }
 0x304   : > { %v14315_v31 = vpop.f32.mrf.mxu0  ;;  %7183 = vmatmul.mubr.bf16.gmra.mxu0 %v13397_v41  ;;  %v14394_v23 = vpop.f32.mrf.mxu1  ;;  %v22124_v41 = vld [vmem:[#allocation45_spill] sm:$0xff]  ;;  %v6802_v47 = vrot.slane %v6800_v1, 4  ;;  %v6803_v43 = vrot.slane %v22125_v36, 5  ;;  %v6801_v60 = vsel %vm17204_vm6, %v13379_v18, %v6800_v1  ;;  %v22128_v36 = vld [vmem:[#allocation43_spill] sm:$0xff] }
 0x305   : > { %v19328_v15 = vadd.f32 %v14314_v57, %v22123_v32  ;;  %7190 = vmatprep.mubr.bf16.mxu0 %v13400_v56  ;;  %v19335_v45 = vadd.f32 %v14393_v11, %v19156_v0  ;;  %v15759_v1 = vld [vmem:[#allocation10 + $0x70] sm:$0xff]  }
 0x306   : > { %v14316_v59 = vpop.f32.mrf.mxu0  ;;  %v14395_v22 = vpop.f32.mrf.mxu1  ;;  %v6804_v32 = vsel %vm17204_vm6, %v6802_v47, %v6803_v43  ;;  %v6810_v43 = vrot.slane %v22128_v36, 5  ;;  %14999 = vmatprep.subr.bf16.mxu1 %v15759_v1 }
 0x307   : > { %v14317_v61 = vadd.f32 %v14316_v59, %v14315_v31  ;;  %v14396_v56 = vadd.f32 %v14395_v22, %v14394_v23  ;;  %v15936_v59 = vld [vmem:[#allocation2 + $0x110] sm:$0xff]  ;;  %15000 = vmatpush3.bf16.msra.mxu1 %v15759_v1 }
 0x308   : > { %v14318_v24 = vpop.f32.mrf.mxu0  ;;  %v14397_v17 = vpop.f32.mrf.mxu1  ;;  %v6807_v23 = vrot.slane %v15936_v59, 5  ;;  %v22127_v22 = vld [vmem:[#allocation36_spill] sm:$0xff] }
 0x309   : > { %v19338_v4 = vadd.f32 %v14317_v61, %v22124_v41  ;;  %v19342_v40 = vadd.f32 %v14396_v56, %v19182_v2  ;;  %v6687_v61 = vld [vmem:[#allocation2 + $0x108] sm:$0xee] }
 0x30a   : > { %v14319_v35 = vpop.f32.mrf.mxu0  ;;  %v14398_v49 = vpop.f32.mrf.mxu1  ;;  %v13380_v18 = vrot.slane %v6687_v61, 9  ;;  %v6809_v47 = vrot.slane %v6807_v23, 4 }
 0x30b   : > { %v14320_v42 = vadd.f32 %v14319_v35, %v14318_v24  ;;  %v14399_v57 = vadd.f32 %v14398_v49, %v14397_v17  ;;  %v13401_v24 = vcombine.low %v6794_v7, %v6797_v38  ;;  %v22129_v38 = vld [vmem:[#allocation32_spill] sm:$0xff] }
 0x30c   : > { %v14321_v0 = vpop.f32.mrf.mxu0  ;;  %7191 = vmatmul.mubr.bf16.gmra.mxu0 %v13399_v54  ;;  %v14400_v11 = vpop.f32.mrf.mxu1 }
 0x30d   : > { %v19345_v26 = vadd.f32 %v14320_v42, %v22126_v50  ;;  %7198 = vmatprep.mubr.bf16.mxu0 %v13402_v63  ;;  %v19352_v55 = vadd.f32 %v14399_v57, %v19198_v21  ;;  %v13404_v63 = vcombine.high %v6801_v60, %v6804_v32 }
 0x30e   : > { %v14322_v31 = vpop.f32.mrf.mxu0  ;;  %v14401_v54 = vpop.f32.mrf.mxu1 }
 0x30f   : > { %v14323_v2 = vadd.f32 %v14322_v31, %v14321_v0  ;;  %v14402_v56 = vadd.f32 %v14401_v54, %v14400_v11  ;;  %v6808_v31 = vsel %vm17204_vm6, %v13380_v18, %v6807_v23  ;;  %v6811_v11 = vsel %vm17204_vm6, %v6809_v47, %v6810_v43  ;;  %v22131_v47 = vld [vmem:[#allocation46_spill] sm:$0xff] }
 0x310   : > { %v14324_v51 = vpop.f32.mrf.mxu0  ;;  %v14403_v17 = vpop.f32.mrf.mxu1  ;;  %v6817_v43 = vrot.slane %v22131_v47, 5  ;;  %v13405_v47 = vcombine.low %v6808_v31, %v6811_v11 }
 0x311   : > { %v19355_v41 = vadd.f32 %v14323_v2, %v22127_v22  ;;  %v19359_v21 = vadd.f32 %v14402_v56, %v19222_v37  ;;  %v15937_v37 = vld [vmem:[#allocation2 + $0x128] sm:$0xff]  ;;  %v13403_v22 = vcombine.low %v6801_v60, %v6804_v32  ;;  %v22132_v60 = vld [vmem:[#allocation49_spill] sm:$0xff] }
 0x312   : > { %v14325_v35 = vpop.f32.mrf.mxu0  ;;  %v14404_v7 = vpop.f32.mrf.mxu1  ;;  %v6814_v2 = vrot.slane %v15937_v37, 5 }
 0x313   : > { %v14326_v42 = vadd.f32 %v14325_v35, %v14324_v51  ;;  %v14405_v50 = vadd.f32 %v14404_v7, %v14403_v17  ;;  %v13406_v35 = vcombine.high %v6808_v31, %v6811_v11 }
 0x314   : > { %v14327_v0 = vpop.f32.mrf.mxu0  ;;  %7199 = vmatmul.mubr.bf16.gmra.mxu0 %v13401_v24  ;;  %v14406_v59 = vpop.f32.mrf.mxu1  ;;  %v6688_v24 = vld [vmem:[#allocation2 + $0x120] sm:$0xee]  ;;  %v6816_v17 = vrot.slane %v6814_v2, 4 }
 0x315   : > { %v19362_v49 = vadd.f32 %v14326_v42, %v22129_v38  ;;  %7206 = vmatprep.mubr.bf16.mxu0 %v13404_v63  ;;  %v19369_v51 = vadd.f32 %v14405_v50, %v19240_v9  ;;  %v22130_v63 = vld [vmem:[#allocation47_spill] sm:$0xff]  ;;  %v13381_v18 = vrot.slane %v6688_v24, 9 }
 0x316   : > { %v14328_v57 = vpop.f32.mrf.mxu0  ;;  %v14407_v56 = vpop.f32.mrf.mxu1 }
 0x317   : > { %v14329_v61 = vadd.f32 %v14328_v57, %v14327_v0  ;;  %v14408_v36 = vadd.f32 %v14407_v56, %v14406_v59  ;;  %v477_v57 = vld [vmem:[#allocation3 + $0xc] sm:$0x1]  ;;  %v6815_v37 = vsel %vm17204_vm6, %v13381_v18, %v6814_v2 }
 0x318   : > { %v14330_v54 = vpop.f32.mrf.mxu0  ;;  %v14409_v42 = vpop.f32.mrf.mxu1 }
 0x319   : > { %v19372_v1 = vadd.f32 %v14329_v61, %v22130_v63  ;;  %v19376_v0 = vadd.f32 %v14408_v36, %v19261_v13  ;;  %v6818_v61 = vsel %vm17204_vm6, %v6816_v17, %v6817_v43  ;;  %v15761_v43 = vld [vmem:[#allocation10 + $0xb8] sm:$0xff]  }
 0x31a   : > { %v14331_v23 = vpop.f32.mrf.mxu0  ;;  %v14410_v38 = vpop.f32.mrf.mxu1  ;;  %v13408_v18 = vcombine.high %v6815_v37, %v6818_v61  ;;  %15093 = vmatprep.subr.bf16.mxu0 %v15761_v43 }
 0x31b   : > { %v14332_v7 = vadd.f32 %v14331_v23, %v14330_v54  ;;  %v14411_v50 = vadd.f32 %v14410_v38, %v14409_v42  ;;  %v15938_v54 = vld [vmem:[#allocation2 + $0x140] sm:$0xff]  ;;  %15094 = vmatpush3.bf16.msra.mxu0 %v15761_v43  ;;  %v13407_v43 = vcombine.low %v6815_v37, %v6818_v61  ;;  %v15763_v61 = vld [vmem:[#allocation10 + $0xa8] sm:$0xff]  }
 0x31c   : > { %v14461_v9 = vpop.f32.mrf.mxu0  ;;  %7207 = vmatmul.mubr.bf16.gmra.mxu0 %v13403_v22  ;;  %v14412_v24 = vpop.f32.mrf.mxu1  ;;  %v6821_v13 = vrot.slane %v15938_v54, 5  ;;  %v478_v22 = vsel %vm16435_vm4, 0, %v477_v57  ;;  %v22134_v54 = vld [vmem:[#allocation48_spill] sm:$0xff] }
 0x31d   : > { %v19379_v32 = vadd.f32 %v14332_v7, %v22132_v60  ;;  %7214 = vmatprep.mubr.bf16.mxu0 %v13406_v35  ;;  %v19388_v36 = vadd.f32 %v14411_v50, %v19279_v52  ;;  %v6689_v35 = vld [vmem:[#allocation2 + $0x138] sm:$0xee]  ;;  %479 = vst [vmem:[#allocation3 + $0xc] sm:$0x1] %v478_v22  ;;  %v6824_v57 = vrot.slane %v22134_v54, 5 }
 0x31e   : > { %v14462_v59 = vpop.f32.mrf.mxu0  ;;  %v14413_v42 = vpop.f32.mrf.mxu1  ;;  %v13382_v38 = vrot.slane %v6689_v35, 9  ;;  %v6823_v60 = vrot.slane %v6821_v13, 4  ;;  %v15939_v35 = vld [vmem:[#allocation2 + $0x158] sm:$0xff]  ;;  %v531_v54 = vld [vmem:[#allocation3 + $0x14] sm:$0x1] }
 0x31f   : > { %v14463_v63 = vadd.f32 %v14462_v59, %v14461_v9  ;;  %v14414_v17 = vadd.f32 %v14413_v42, %v14412_v24  ;;  %v532_v37 = vsel %vm16447_vm8, 0, %v531_v54 }
 0x320   : > { %v14464_v23 = vpop.f32.mrf.mxu0  ;;  %v14415_v9 = vpop.f32.mrf.mxu1  ;;  %v19402_v22 = vsel %vm17204_vm6, %v13382_v38, %v6821_v13  ;;  %533 = vst [vmem:[#allocation3 + $0x14] sm:$0x1] %v532_v37 }
 0x321   : > { %v19391_v2 = vadd.f32 %v14463_v63, %v19097_v46  ;;  %v19395_v52 = vadd.f32 %v14414_v17, %v19291_v53  ;;  %v19406_v63 = vsel %vm17204_vm6, %v6823_v60, %v6824_v57 }
 0x322   : > { %v14465_v7 = vpop.f32.mrf.mxu0  ;;  %v14416_v31 = vpop.f32.mrf.mxu1  ;;  %v13410_v38 = vcombine.high %v19402_v22, %v19406_v63 }
 0x323   : > { %v14466_v59 = vadd.f32 %v14465_v7, %v14464_v23  ;;  %v14417_v11 = vadd.f32 %v14416_v31, %v14415_v9  ;;  %v6828_v23 = vrot.slane %v15939_v35, 5 }
 0x324   : > { %v14467_v50 = vpop.f32.mrf.mxu0  ;;  %7215 = vmatmul.mubr.bf16.gmra.mxu0 %v13405_v47  ;;  %v14418_v53 = vpop.f32.mrf.mxu1  ;;  %v15762_v47 = vld [vmem:[#allocation10 + $0xb0] sm:$0xff]  }
 0x325   : > { %v19398_v46 = vadd.f32 %v14466_v59, %v19117_v48  ;;  %7222 = vmatprep.mubr.bf16.mxu0 %v13408_v18  ;;  %v19409_v48 = vadd.f32 %v14417_v11, %v19304_v27  ;;  %v6690_v18 = vld [vmem:[#allocation2 + $0x150] sm:$0xee]  ;;  %15095 = vmatprep.subr.bf16.mxu0 %v15762_v47  ;;  %v6830_v59 = vrot.slane %v6828_v23, 4  ;;  %v6831_v27 = vrot.slane %v19089_v19, 5 }
 0x326   : > { %v14468_v24 = vpop.f32.mrf.mxu0  ;;  %v14419_v7 = vpop.f32.mrf.mxu1  ;;  %15096 = vmatpush3.bf16.msra.mxu0 %v15762_v47  ;;  %v13383_v9 = vrot.slane %v6690_v18, 9  ;;  %v15760_v19 = vld [vmem:[#allocation10 + $0x68] sm:$0xff]  }
 0x327   : > { %v14469_v42 = vadd.f32 %v14468_v24, %v14467_v50  ;;  %v14420_v60 = vadd.f32 %v14419_v7, %v14418_v53  ;;  %15097 = vmatprep.subr.bf16.mxu0 %v15763_v61  ;;  %v15940_v7 = vld [vmem:[#allocation2 + $0x170] sm:$0xff]  ;;  %15001 = vmatprep.subr.bf16.mxu1 %v15760_v19 }
 0x328   : > { %v14470_v17 = vpop.f32.mrf.mxu0  ;;  %v14421_v50 = vpop.f32.mrf.mxu1  ;;  %15002 = vmatpush3.bf16.msra.mxu1 %v15760_v19  ;;  %v15766_v19 = vld [vmem:[#allocation10 + $0x98] sm:$0xff]  }
 0x329   : > { %v19412_v13 = vadd.f32 %v14469_v42, %v19143_v10  ;;  %v19420_v10 = vadd.f32 %v14420_v60, %v19311_v62  ;;  %v480_v42 = vld [vmem:[#allocation3 + $0x18] sm:$0x1]  ;;  %v19431_v62 = vsel %vm17204_vm6, %v6830_v59, %v6831_v27  ;;  %v6835_v60 = vrot.slane %v15940_v7, 5  ;;  %v474_v7 = vld [vmem:[#allocation3] sm:$0x1] }
 0x32a   : > { %v14471_v57 = vpop.f32.mrf.mxu0  ;;  %v14422_v53 = vpop.f32.mrf.mxu1  ;;  %15098 = vmatpush3.bf16.msra.mxu0 %v15763_v61 }
 0x32b   : > { %v14472_v11 = vadd.f32 %v14471_v57, %v14470_v17  ;;  %v14423_v47 = vadd.f32 %v14422_v53, %v14421_v50  ;;  %v19427_v17 = vsel %vm17204_vm6, %v13383_v9, %v6828_v23  ;;  %v6691_v50 = vld [vmem:[#allocation2 + $0x168] sm:$0xee]  ;;  %v13409_v9 = vcombine.low %v19402_v22, %v19406_v63 }
 0x32c   : > { %v14473_v24 = vpop.f32.mrf.mxu0  ;;  %7223 = vmatmul.mubr.bf16.gmra.mxu0 %v13407_v43  ;;  %v14424_v43 = vpop.f32.mrf.mxu1  ;;  %v13412_v37 = vcombine.high %v19427_v17, %v19431_v62  ;;  %v6838_v53 = vrot.slane %v19147_v16, 5  ;;  %v475_v16 = vsel %vm16435_vm4, 0, %v474_v7  ;;  %v15768_v7 = vld [vmem:[#allocation10 + $0x90] sm:$0xff]  }
 0x32d   : > { %v19423_v35 = vadd.f32 %v14472_v11, %v19167_v12  ;;  %7230 = vmatprep.mubr.bf16.mxu0 %v13410_v38  ;;  %v481_v12 = vsel %vm16435_vm4, 0, %v480_v42  ;;  %v15765_v38 = vld [vmem:[#allocation10 + $0xa0] sm:$0xff]   ;;  %v19436_v57 = vadd.f32 %v14423_v47, %v19321_v20  ;;  %v13384_v11 = vrot.slane %v6691_v50, 9  ;;  %v534_v42 = vld [vmem:[#allocation3 + $0x20] sm:$0x1] }
 0x32e   : > { %v14474_v18 = vpop.f32.mrf.mxu0  ;;  %482 = vst [vmem:[#allocation3 + $0x18] sm:$0x1] %v481_v12  ;;  %v14425_v59 = vpop.f32.mrf.mxu1  ;;  %15099 = vmatprep.subr.bf16.mxu0 %v15765_v38  ;;  %v528_v50 = vld [vmem:[#allocation3 + $0x8] sm:$0x1]  ;;  %476 = vst [vmem:[#allocation3] sm:$0x1] %v475_v16 }
 0x32f   : > { %22136 = vst [vmem:[#allocation44_spill] sm:$0xff] %v19423_v35  ;;  %v14475_v54 = vadd.f32 %v14474_v18, %v14473_v24  ;;  %v14426_v61 = vadd.f32 %v14425_v59, %v14424_v43  ;;  %15100 = vmatpush3.bf16.msra.mxu0 %v15765_v38  ;;  %v6837_v24 = vrot.slane %v6835_v60, 4  ;;  %v15764_v18 = vld [vmem:[#allocation10 + $0x60] sm:$0xff]   ;;  %v6692_v59 = vld [vmem:[#allocation2 + $0x180] sm:$0xee] }
 0x330   : > { %v14476_v23 = vpop.f32.mrf.mxu0  ;;  %v14427_v47 = vpop.f32.mrf.mxu1  ;;  %v15941_v38 = vld [vmem:[#allocation2 + $0x188] sm:$0xff]  ;;  %15003 = vmatprep.subr.bf16.mxu1 %v15764_v18  ;;  %15101 = vmatprep.subr.bf16.mxu0 %v15766_v19 }
 0x331   : > { %v19441_v27 = vadd.f32 %v14475_v54, %v19187_v28  ;;  %v19447_v63 = vadd.f32 %v14426_v61, %v19328_v15  ;;  %v535_v28 = vsel %vm16447_vm8, 0, %v534_v42  ;;  %v6842_v54 = vrot.slane %v15941_v38, 5  ;;  %15004 = vmatpush3.bf16.msra.mxu1 %v15764_v18 }
 0x332   : > { %v14477_v20 = vpop.f32.mrf.mxu0  ;;  %v14428_v43 = vpop.f32.mrf.mxu1  ;;  %536 = vst [vmem:[#allocation3 + $0x20] sm:$0x1] %v535_v28  ;;  %v19464_v42 = vsel %vm17204_vm6, %v6837_v24, %v6838_v53  ;;  %v13385_v53 = vrot.slane %v6692_v59, 9  ;;  %v6845_v38 = vrot.slane %v19189_v14, 5 }
 0x333   : > { %22137 = vst [vmem:[#allocation37_spill] sm:$0xff] %v19441_v27  ;;  %v14478_v22 = vadd.f32 %v14477_v20, %v14476_v23  ;;  %v14429_v15 = vadd.f32 %v14428_v43, %v14427_v47  ;;  %v19460_v20 = vsel %vm17204_vm6, %v13384_v11, %v6835_v60  ;;  %15102 = vmatpush3.bf16.msra.mxu0 %v15766_v19  ;;  %v6844_v43 = vrot.slane %v6842_v54, 4  ;;  %v540_v27 = vld [vmem:[#allocation3 + $0x38] sm:$0x1] }
 0x334   : > { %v14479_v12 = vpop.f32.mrf.mxu0  ;;  %7231 = vmatmul.mubr.bf16.gmra.mxu0 %v13409_v9  ;;  %v529_v9 = vsel %vm16447_vm8, 0, %v528_v50  ;;  %v14430_v28 = vpop.f32.mrf.mxu1  ;;  %v13411_v11 = vcombine.low %v19427_v17, %v19431_v62  ;;  %15103 = vmatprep.subr.bf16.mxu0 %v15768_v7  ;;  %v15769_v17 = vld [vmem:[#allocation10 + $0x50] sm:$0xff]   ;;  %v15770_v62 = vld [vmem:[#allocation10 + $0x88] sm:$0xff]  }
 0x335   : > { %v19454_v23 = vadd.f32 %v14478_v22, %v19214_v44  ;;  %7238 = vmatprep.mubr.bf16.mxu0 %v13412_v37  ;;  %v483_v44 = vld [vmem:[#allocation3 + $0x24] sm:$0x1]  ;;  %v15767_v37 = vld [vmem:[#allocation10 + $0x58] sm:$0xff]   ;;  %530 = vst [vmem:[#allocation3 + $0x8] sm:$0x1] %v529_v9  ;;  %v19467_v18 = vadd.f32 %v14429_v15, %v19338_v4  ;;  %v13414_v4 = vcombine.high %v19460_v20, %v19464_v42 }
 0x336   : > { %v14480_v61 = vpop.f32.mrf.mxu0  ;;  %v484_v22 = vsel %vm16435_vm4, 0, %v483_v44  ;;  %v14431_v24 = vpop.f32.mrf.mxu1  ;;  %15005 = vmatprep.subr.bf16.mxu1 %v15767_v37  ;;  %v537_v15 = vld [vmem:[#allocation3 + $0x2c] sm:$0x1]  ;;  %v19492_v44 = vsel %vm17204_vm6, %v6844_v43, %v6845_v38  ;;  %v15942_v38 = vld [vmem:[#allocation2 + $0x8] sm:$0xff] }
 0x337   : > { %22138 = vst [vmem:[#allocation34_spill] sm:$0xff] %v19454_v23  ;;  %v14481_v47 = vadd.f32 %v14480_v61, %v14479_v12  ;;  %485 = vst [vmem:[#allocation3 + $0x24] sm:$0x1] %v484_v22  ;;  %v14432_v16 = vadd.f32 %v14431_v24, %v14430_v28  ;;  %15006 = vmatpush3.bf16.msra.mxu1 %v15767_v37  ;;  %v538_v14 = vsel %vm16447_vm8, 0, %v537_v15  ;;  %15104 = vmatpush3.bf16.msra.mxu0 %v15768_v7  ;;  %v15771_v15 = vld [vmem:[#allocation10 + $0x48] sm:$0xff]  }
 0x338   : > { %v14482_v60 = vpop.f32.mrf.mxu0  ;;  %v14433_v50 = vpop.f32.mrf.mxu1  ;;  %v19488_v28 = vsel %vm17204_vm6, %v13385_v53, %v6842_v54  ;;  %539 = vst [vmem:[#allocation3 + $0x2c] sm:$0x1] %v538_v14  ;;  %15007 = vmatprep.subr.bf16.mxu1 %v15769_v17  ;;  %15105 = vmatprep.subr.bf16.mxu0 %v15770_v62  ;;  %v15772_v14 = vld [vmem:[#allocation10 + $0x80] sm:$0xff]   ;;  %v13413_v23 = vcombine.low %v19460_v20, %v19464_v42 }
 0x339   : > { %v19475_v12 = vadd.f32 %v14481_v47, %v19237_v39  ;;  %v19480_v9 = vadd.f32 %v14432_v16, %v19345_v26  ;;  %v19484_v39 = vld [vmem:[#allocation3 + $0x4] sm:$0xf]  ;;  %v7907_v26 = vld [vmem:[#allocation3] sm:$0xf]  ;;  %v6849_v16 = vrot.slane %v15942_v38, 5 }
 0x33a   : > { %v14483_v19 = vpop.f32.mrf.mxu0  ;;  %v14434_v37 = vpop.f32.mrf.mxu1  ;;  %v7981_v47 = vshll.u32 %v19484_v39, 16  ;;  %v7985_v22 = vshrl.u32 %v19484_v39, 16  ;;  %v7972_v54 = vshrl.u32 %v7907_v26, 16  ;;  %v7975_v24 = vshll.u32 %v7907_v26, 16 }
 0x33b   : > { %22139 = vst [vmem:[#allocation21_spill] sm:$0xff] %v19475_v12  ;;  %v14484_v59 = vadd.f32 %v14483_v19, %v14482_v60  ;;  %v14435_v60 = vadd.f32 %v14434_v37, %v14433_v50  ;;  %v486_v19 = vld [vmem:[#allocation3 + $0x30] sm:$0x1]  ;;  %15008 = vmatpush3.bf16.msra.mxu1 %v15769_v17  ;;  %15106 = vmatpush3.bf16.msra.mxu0 %v15770_v62  ;;  %v6851_v38 = vrot.slane %v6849_v16, 4 }
 0x33c   : > { %v14485_v61 = vpop.f32.mrf.mxu0  ;;  %7239 = vmatmul.mubr.bf16.gmra.mxu0 %v13411_v11  ;;  %v6693_v11 = vld [vmem:[#allocation2 + $0x198] sm:$0xee]  ;;  %v14436_v43 = vpop.f32.mrf.mxu1  ;;  %15009 = vmatprep.subr.bf16.mxu1 %v15771_v15  ;;  %v7974_v17 = vrot.slane %v7972_v54, 4  ;;  %v7983_v26 = vrot.slane %v7981_v47, 5 }
 0x33d   : > { %v19497_v7 = vadd.f32 %v14484_v59, %v19248_v34  ;;  %7246 = vmatprep.mubr.bf16.mxu0 %v13414_v4  ;;  %v19502_v34 = vadd.f32 %v14435_v60, %v19355_v41  ;;  %v487_v4 = vsel %vm16435_vm4, 0, %v486_v19  ;;  %v13416_v59 = vcombine.high %v19488_v28, %v19492_v44  ;;  %15107 = vmatprep.subr.bf16.mxu0 %v15772_v14  ;;  %v19511_v60 = vld [vmem:[#allocation3 + $0x8] sm:$0x1] }
 0x33e   : > { %v14486_v53 = vpop.f32.mrf.mxu0  ;;  %v14437_v37 = vpop.f32.mrf.mxu1  ;;  %488 = vst [vmem:[#allocation3 + $0x30] sm:$0x1] %v487_v4  ;;  %v13386_v42 = vrot.slane %v6693_v11, 9  ;;  %v6852_v19 = vrot.slane %v19244_v33, 5  ;;  %v15773_v4 = vld [vmem:[#allocation10 + $0x40] sm:$0xff]   ;;  %v7991_v54 = vshll.u32 %v19511_v60, 16 }
 0x33f   : > { %22140 = vst [vmem:[#allocation38_spill] sm:$0xff] %v19497_v7  ;;  %v14487_v12 = vadd.f32 %v14486_v53, %v14485_v61  ;;  %v7977_v61 = vrot.slane %v7975_v24, 5  ;;  %v14438_v41 = vadd.f32 %v14437_v37, %v14436_v43  ;;  %v7987_v53 = vrot.slane %v7985_v22, 4  ;;  %15010 = vmatpush3.bf16.msra.mxu1 %v15771_v15  ;;  %15108 = vmatpush3.bf16.msra.mxu0 %v15772_v14 }
 0x340   : > { %v14488_v50 = vpop.f32.mrf.mxu0  ;;  %v14439_v7 = vpop.f32.mrf.mxu1  ;;  %15011 = vmatprep.subr.bf16.mxu1 %v15773_v4  ;;  %v7993_v43 = vrot.slane %v7991_v54, 5  ;;  %v543_v54 = vld [vmem:[#allocation3 + $0x44] sm:$0x1] }
 0x341   : > { %v19509_v20 = vadd.f32 %v14487_v12, %v19272_v25  ;;  %v7978_v35 = vor.u32 %v7977_v61, %v7974_v17  ;;  %v19516_v25 = vadd.f32 %v14438_v41, %v19362_v49  ;;  %v541_v12 = vsel %vm16447_vm8, 0, %v540_v27  ;;  %v8949_v41 = vld [vmem:[#allocation3] sm:$0xe] }
 0x342   : > { %v14489_v62 = vpop.f32.mrf.mxu0  ;;  %v7988_v22 = vor.u32 %v7987_v53, %v7983_v26  ;;  %v14440_v24 = vpop.f32.mrf.mxu1  ;;  %542 = vst [vmem:[#allocation3 + $0x38] sm:$0x1] %v541_v12  ;;  %v6850_v17 = vsel %vm17204_vm6, %v13386_v42, %v6849_v16  ;;  %v6853_v27 = vsel %vm17204_vm6, %v6851_v38, %v6852_v19  ;;  %v8999_v61 = vrot.slane %v19484_v39, 5 }
 0x343   : > { %v14490_v47 = vadd.f32 %v14489_v62, %v14488_v50  ;;  %v7979_v33 = vrot.slane %v7978_v35, 4  ;;  %v14441_v50 = vadd.f32 %v14440_v24, %v14439_v7  ;;  %15012 = vmatpush3.bf16.msra.mxu1 %v15773_v4  ;;  %v13415_v53 = vcombine.low %v19488_v28, %v19492_v44 }
 0x344   : > { %v14491_v11 = vpop.f32.mrf.mxu0  ;;  %7247 = vmatmul.mubr.bf16.gmra.mxu0 %v13413_v23  ;;  %v7989_v37 = vrot.slane %v7988_v22, 4  ;;  %v14442_v14 = vpop.f32.mrf.mxu1  ;;  %v489_v23 = vld [vmem:[#allocation3 + $0x3c] sm:$0x1]  ;;  %v13418_v38 = vcombine.high %v6850_v17, %v6853_v27  ;;  %v9001_v12 = vrot.slane %v8999_v61, 4  ;;  %v9002_v22 = vrot.slane %v19511_v60, 5 }
 0x345   : > { %v19521_v15 = vadd.f32 %v14490_v47, %v19284_v6  ;;  %7254 = vmatprep.mubr.bf16.mxu0 %v13416_v59  ;;  %v7984_v35 = vsel %vm16510_vm0, %v7979_v33, %v7983_v26  ;;  %v19531_v59 = vadd.f32 %v14441_v50, %v19372_v1  ;;  %v490_v7 = vsel %vm16435_vm4, 0, %v489_v23 }
 0x346   : > { %v14492_v49 = vpop.f32.mrf.mxu0  ;;  %v7994_v16 = vsel %vm16510_vm0, %v7989_v37, %v7993_v43  ;;  %v14443_v39 = vpop.f32.mrf.mxu1  ;;  %491 = vst [vmem:[#allocation3 + $0x3c] sm:$0x1] %v490_v7  ;;  %v13516_v47 = vrot.slane %v8949_v41, 9  ;;  %v544_v44 = vsel %vm16447_vm8, 0, %v543_v54  ;;  %v492_v37 = vld [vmem:[#allocation3 + $0x48] sm:$0x1] }
 0x347   : > { %v14493_v6 = vadd.f32 %v14492_v49, %v14491_v11  ;;  %v13468_v62 = vcombine.low %v7984_v35, %v7994_v16  ;;  %v14444_v1 = vadd.f32 %v14443_v39, %v14442_v14  ;;  %545 = vst [vmem:[#allocation3 + $0x44] sm:$0x1] %v544_v44  ;;  %v493_v14 = vsel %vm16435_vm4, 0, %v492_v37 }
 0x348   : > { %v14494_v42 = vpop.f32.mrf.mxu0  ;;  %v19542_v4 = vpop.f32.mrf.mxu1  ;;  %v9000_v60 = vsel %vm17204_vm6, %v13516_v47, %v8999_v61  ;;  %v13417_v35 = vcombine.low %v6850_v17, %v6853_v27  ;;  %494 = vst [vmem:[#allocation3 + $0x48] sm:$0x1] %v493_v14 }
 0x349   : > { %v19540_v26 = vadd.f32 %v14493_v6, %v19300_v30  ;;  %15013 = vmatprep.mubr.bf16.mxu1 %v13468_v62  ;;  %v19546_v28 = vadd.f32 %v14444_v1, %v19379_v32  ;;  %v9003_v32 = vsel %vm17204_vm6, %v9001_v12, %v9002_v22 }
 0x34a   : > { %v14495_v19 = vpop.f32.mrf.mxu0  ;;  %v19550_v24 = vpop.f32.mrf.mxu1  ;;  %v13532_v7 = vcombine.low %v9000_v60, %v9003_v32 }
 0x34b   : > { %v14496_v11 = vadd.f32 %v14495_v19, %v14494_v42  ;;  %v546_v19 = vld [vmem:[#allocation3 + $0x50] sm:$0x1] }
 0x34c   : > { %v14497_v30 = vpop.f32.mrf.mxu0  ;;  %7255 = vmatmul.mubr.bf16.gmra.mxu0 %v13415_v53  ;;  %v19555_v50 = vpop.f32.mrf.mxu1  ;;  %v547_v12 = vsel %vm16447_vm8, 0, %v546_v19 }
 0x34d   : > { %v19553_v33 = vadd.f32 %v14496_v11, %v19308_v5  ;;  %7262 = vmatprep.mubr.bf16.mxu0 %v13418_v38  ;;  %548 = vst [vmem:[#allocation3 + $0x50] sm:$0x1] %v547_v12 }
 0x34e   : > { %v14498_v43 = vpop.f32.mrf.mxu0  ;;  %v19563_v6 = vpop.f32.mrf.mxu1 }
 0x34f   : > { %v14499_v49 = vadd.f32 %v14498_v43, %v14497_v30  ;;  %v495_v30 = vld [vmem:[#allocation3 + $0x54] sm:$0x1] }
 0x350   : > { %v14500_v23 = vpop.f32.mrf.mxu0  ;;  %v19568_v16 = vpop.f32.mrf.mxu1 }
 0x351   : > { %v19566_v5 = vadd.f32 %v14499_v49, %v19318_v58 }
 0x352   : > { %v14501_v41 = vpop.f32.mrf.mxu0  ;;  %v19570_v53 = vpop.f32.mrf.mxu1 }
 0x353   : > { %v14502_v61 = vadd.f32 %v14501_v41, %v14500_v23 }
 0x354   : > { %v14503_v42 = vpop.f32.mrf.mxu0  ;;  %7263 = vmatmul.mubr.bf16.gmra.mxu0 %v13417_v35  ;;  %v19575_v27 = vpop.f32.mrf.mxu1 }
 0x355   : > { %v19573_v39 = vadd.f32 %v14502_v61, %v19325_v3  ;;  %15109 = vmatprep.mubr.bf16.mxu0 %v13532_v7  ;;  %v549_v61 = vld [vmem:[#allocation3 + $0x5c] sm:$0x1] }
 0x356   : > { %v14504_v17 = vpop.f32.mrf.mxu0  ;;  %v19577_v58 = vpop.f32.mrf.mxu1 }
 0x357   : > { %v14505_v62 = vadd.f32 %v14504_v17, %v14503_v42  ;;  %v550_v17 = vsel %vm16447_vm8, 0, %v549_v61 }
 0x358   : > { %v14506_v38 = vpop.f32.mrf.mxu0  ;;  %v19582_v47 = vpop.f32.mrf.mxu1  ;;  %551 = vst [vmem:[#allocation3 + $0x5c] sm:$0x1] %v550_v17 }
 0x359   : > { %v19580_v1 = vadd.f32 %v14505_v62, %v19335_v45  ;;  %v496_v45 = vsel %vm16435_vm4, 0, %v495_v30  ;;  %v498_v30 = vld [vmem:[#allocation3 + $0x60] sm:$0x1] }
 0x35a   : > { %v14507_v54 = vpop.f32.mrf.mxu0  ;;  %v19586_v11 = vpop.f32.mrf.mxu1  ;;  %497 = vst [vmem:[#allocation3 + $0x54] sm:$0x1] %v496_v45 }
 0x35b   : > { %22141 = vst [vmem:[#allocation28_spill] sm:$0xff] %v19580_v1  ;;  %v14508_v3 = vadd.f32 %v14507_v54, %v14506_v38 }
 0x35c   : > { %v14509_v22 = vpop.f32.mrf.mxu0  ;;  %v19591_v60 = vpop.f32.mrf.mxu1 }
 0x35d   : > { %v19589_v44 = vadd.f32 %v14508_v3, %v19342_v40 }
 0x35e   : > { %v14510_v43 = vpop.f32.mrf.mxu0  ;;  %v19595_v49 = vpop.f32.mrf.mxu1 }
 0x35f   : > { %22142 = vst [vmem:[#allocation35_spill] sm:$0xff] %v19589_v44  ;;  %v14511_v32 = vadd.f32 %v14510_v43, %v14509_v22  ;;  %v499_v43 = vsel %vm16435_vm4, 0, %v498_v30 }
 0x360   : > { %v14512_v37 = vpop.f32.mrf.mxu0  ;;  %v19600_v35 = vpop.f32.mrf.mxu1  ;;  %500 = vst [vmem:[#allocation3 + $0x60] sm:$0x1] %v499_v43 }
 0x361   : > { %v19598_v14 = vadd.f32 %v14511_v32, %v19352_v55 }
 0x362   : > { %v14513_v23 = vpop.f32.mrf.mxu0  ;;  %v19602_v41 = vpop.f32.mrf.mxu1 }
 0x363   : > { %22143 = vst [vmem:[#allocation29_spill] sm:$0xff] %v19598_v14  ;;  %v14514_v40 = vadd.f32 %v14513_v23, %v14512_v37  ;;  %v558_v14 = vld [vmem:[#allocation3 + $0x80] sm:$0x1] }
 0x364   : > { %v14515_v7 = vpop.f32.mrf.mxu0  ;;  %v19609_v38 = vpop.f32.mrf.mxu1 }
 0x365   : > { %v19605_v42 = vadd.f32 %v14514_v40, %v19359_v21 }
 0x366   : > { %v14516_v62 = vpop.f32.mrf.mxu0  ;;  %v19611_v54 = vpop.f32.mrf.mxu1 }
 0x367   : > { %22144 = vst [vmem:[#allocation27_spill] sm:$0xff] %v19605_v42  ;;  %v14517_v55 = vadd.f32 %v14516_v62, %v14515_v7  ;;  %v552_v62 = vld [vmem:[#allocation3 + $0x68] sm:$0x1] }
 0x368   : > { %v14518_v19 = vpop.f32.mrf.mxu0  ;;  %v19616_v22 = vpop.f32.mrf.mxu1 }
 0x369   : > { %v19614_v12 = vadd.f32 %v14517_v55, %v19369_v51 }
 0x36a   : > { %v14519_v3 = vpop.f32.mrf.mxu0  ;;  %v19620_v32 = vpop.f32.mrf.mxu1 }
 0x36b   : > { %22145 = vst [vmem:[#allocation39_spill] sm:$0xff] %v19614_v12  ;;  %v14520_v21 = vadd.f32 %v14519_v3, %v14518_v19  ;;  %v553_v3 = vsel %vm16447_vm8, 0, %v552_v62 }
 0x36c   : > { %v14521_v45 = vpop.f32.mrf.mxu0  ;;  %v19625_v40 = vpop.f32.mrf.mxu1  ;;  %554 = vst [vmem:[#allocation3 + $0x68] sm:$0x1] %v553_v3 }
 0x36d   : > { %v19623_v37 = vadd.f32 %v14520_v21, %v19376_v0 }
 0x36e   : > { %v14522_v23 = vpop.f32.mrf.mxu0  ;;  %v19627_v61 = vpop.f32.mrf.mxu1 }
 0x36f   : > { %22146 = vst [vmem:[#allocation33_spill] sm:$0xff] %v19623_v37  ;;  %v14523_v51 = vadd.f32 %v14522_v23, %v14521_v45 }
 0x370   : > { %v14524_v7 = vpop.f32.mrf.mxu0  ;;  %v19632_v19 = vpop.f32.mrf.mxu1 }
 0x371   : > { %v19630_v17 = vadd.f32 %v14523_v51, %v19388_v36 }
 0x372   : > { %v14525_v55 = vpop.f32.mrf.mxu0  ;;  %v19636_v21 = vpop.f32.mrf.mxu1 }
 0x373   : > { %22147 = vst [vmem:[#allocation41_spill] sm:$0xff] %v19630_v17  ;;  %v14526_v30 = vadd.f32 %v14525_v55, %v14524_v7  ;;  %v502_v7 = vsel %vm16435_vm4, 0, %v501_v29 }
 0x374   : > { %v14527_v0 = vpop.f32.mrf.mxu0  ;;  %v19641_v23 = vpop.f32.mrf.mxu1  ;;  %503 = vst [vmem:[#allocation3 + $0x6c] sm:$0x1] %v502_v7  ;;  %v504_v7 = vld [vmem:[#allocation3 + $0x78] sm:$0x1] }
 0x375   : > { %v19639_v43 = vadd.f32 %v14526_v30, %v19395_v52 }
 0x376   : > { %v14528_v45 = vpop.f32.mrf.mxu0  ;;  %v19643_v8 = vpop.f32.mrf.mxu1 }
 0x377   : > { %22148 = vst [vmem:[#allocation22_spill] sm:$0xff] %v19639_v43  ;;  %v14529_v36 = vadd.f32 %v14528_v45, %v14527_v0  ;;  %v555_v43 = vld [vmem:[#allocation3 + $0x74] sm:$0x1] }
 0x378   : > { %v14530_v51 = vpop.f32.mrf.mxu0  ;;  %v19650_v55 = vpop.f32.mrf.mxu1  ;;  %v556_v45 = vsel %vm16447_vm8, 0, %v555_v43 }
 0x379   : > { %v19646_v17 = vadd.f32 %v14529_v36, %v19409_v48  ;;  %557 = vst [vmem:[#allocation3 + $0x74] sm:$0x1] %v556_v45 }
 0x37a   : > { %v14531_v62 = vpop.f32.mrf.mxu0  ;;  %v19652_v30 = vpop.f32.mrf.mxu1 }
 0x37b   : > { %22149 = vst [vmem:[#allocation40_spill] sm:$0xff] %v19646_v17  ;;  %v14532_v52 = vadd.f32 %v14531_v62, %v14530_v51 }
 0x37c   : > { %v14533_v3 = vpop.f32.mrf.mxu0  ;;  %v19659_v36 = vpop.f32.mrf.mxu1 }
 0x37d   : > { %v19655_v0 = vadd.f32 %v14532_v52, %v19420_v10  ;;  %v505_v10 = vsel %vm16435_vm4, 0, %v504_v7 }
 0x37e   : > { %v14534_v48 = vpop.f32.mrf.mxu0  ;;  %v19661_v37 = vpop.f32.mrf.mxu1  ;;  %506 = vst [vmem:[#allocation3 + $0x78] sm:$0x1] %v505_v10 }
 0x37f   : > { %22150 = vst [vmem:[#allocation30_spill] sm:$0xff] %v19655_v0  ;;  %v14535_v29 = vadd.f32 %v14534_v48, %v14533_v3 }
 0x380   : > { %v14536_v17 = vpop.f32.mrf.mxu0  ;;  %v19666_v12 = vpop.f32.mrf.mxu1 }
 0x381   : > { %v19664_v51 = vadd.f32 %v14535_v29, %v19436_v57 }
 0x382   : > { %v14537_v62 = vpop.f32.mrf.mxu0  ;;  %v19670_v0 = vpop.f32.mrf.mxu1 }
 0x383   : > { %22151 = vst [vmem:[#allocation45_spill] sm:$0xff] %v19664_v51  ;;  %v14538_v52 = vadd.f32 %v14537_v62, %v14536_v17  ;;  %v559_v62 = vsel %vm16447_vm8, 0, %v558_v14 }
 0x384   : > { %v14539_v43 = vpop.f32.mrf.mxu0  ;;  %v19675_v48 = vpop.f32.mrf.mxu1  ;;  %560 = vst [vmem:[#allocation3 + $0x80] sm:$0x1] %v559_v62 }
 0x385   : > { %v19673_v3 = vadd.f32 %v14538_v52, %v19447_v63 }
 0x386   : > { %v14540_v45 = vpop.f32.mrf.mxu0  ;;  %v19677_v51 = vpop.f32.mrf.mxu1 }
 0x387   : > { %22152 = vst [vmem:[#allocation42_spill] sm:$0xff] %v19673_v3  ;;  %v14541_v57 = vadd.f32 %v14540_v45, %v14539_v43 }
 0x388   : > { %v14542_v29 = vpop.f32.mrf.mxu0  ;;  %v19682_v17 = vpop.f32.mrf.mxu1 }
 0x389   : > { %v19680_v42 = vadd.f32 %v14541_v57, %v19467_v18  ;;  %v507_v18 = vld [vmem:[#allocation3 + $0x84] sm:$0x1] }
 0x38a   : > { %v14543_v7 = vpop.f32.mrf.mxu0  ;;  %v19686_v52 = vpop.f32.mrf.mxu1 }
 0x38b   : > { %22153 = vst [vmem:[#allocation31_spill] sm:$0xff] %v19680_v42  ;;  %v14544_v10 = vadd.f32 %v14543_v7, %v14542_v29  ;;  %v508_v42 = vsel %vm16435_vm4, 0, %v507_v18 }
 0x38c   : > { %v14545_v63 = vpop.f32.mrf.mxu0  ;;  %v19691_v3 = vpop.f32.mrf.mxu1  ;;  %509 = vst [vmem:[#allocation3 + $0x84] sm:$0x1] %v508_v42 }
 0x38d   : > { %v19689_v43 = vadd.f32 %v14544_v10, %v19480_v9 }
 0x38e   : > { %v14546_v45 = vpop.f32.mrf.mxu0  ;;  %v19695_v1 = vpop.f32.mrf.mxu1 }
 0x38f   : > { %22154 = vst [vmem:[#allocation36_spill] sm:$0xff] %v19689_v43  ;;  %v14547_v57 = vadd.f32 %v14546_v45, %v14545_v63  ;;  %22155 = vst [vmem:[#allocation43_spill] sm:$0xff] %v19695_v1  ;;  %v561_v43 = vld [vmem:[#allocation3 + $0x8c] sm:$0x1] }
 0x390   : > { %v14548_v44 = vpop.f32.mrf.mxu0  ;;  %v19700_v7 = vpop.f32.mrf.mxu1  ;;  %v562_v45 = vsel %vm16447_vm8, 0, %v561_v43  ;;  %v14578_v43 = vadd.f32 %v19563_v6, %v19555_v50  ;;  %v14587_v50 = vadd.f32 %v19586_v11, %v19582_v47  ;;  %v14590_v6 = vadd.f32 %v19595_v49, %v19591_v60  ;;  %v22158_v49 = vld [vmem:[#allocation44_spill] sm:$0xff] }
 0x391   : > { %v19698_v14 = vadd.f32 %v14547_v57, %v19502_v34  ;;  %563 = vst [vmem:[#allocation3 + $0x8c] sm:$0x1] %v562_v45  ;;  %v14602_v47 = vadd.f32 %v19627_v61, %v19625_v40  ;;  %v14605_v11 = vadd.f32 %v19636_v21, %v19632_v19  ;;  %v22160_v61 = vld [vmem:[#allocation34_spill] sm:$0xff]  ;;  %v14614_v21 = vadd.f32 %v19661_v37, %v19659_v36 }
 0x392   : > { %v14549_v29 = vpop.f32.mrf.mxu0  ;;  %v19702_v10 = vpop.f32.mrf.mxu1  ;;  %v19764_v19 = vadd.f32 %v14590_v6, %v22160_v61  ;;  %v22167_v61 = vld [vmem:[#allocation27_spill] sm:$0xff] }
 0x393   : > { %22156 = vst [vmem:[#allocation32_spill] sm:$0xff] %v19698_v14  ;;  %v14550_v9 = vadd.f32 %v14549_v29, %v14548_v44  ;;  %v14575_v29 = vadd.f32 %v19550_v24, %v19542_v4  ;;  %v19783_v36 = vadd.f32 %v14602_v47, %v19521_v15  ;;  %v14623_v15 = vadd.f32 %v19686_v52, %v19682_v17 }
 0x394   : > { %v14551_v62 = vpop.f32.mrf.mxu0  ;;  %v19709_v1 = vpop.f32.mrf.mxu1 }
 0x395   : > { %v19705_v63 = vadd.f32 %v14550_v9, %v19516_v25  ;;  %v14581_v9 = vadd.f32 %v19570_v53, %v19568_v16  ;;  %v6646_v24 = vadd.f32 %v14575_v29, %v19391_v2  ;;  %v14599_v2 = vadd.f32 %v19620_v32, %v19616_v22  ;;  %v564_v22 = vld [vmem:[#allocation3 + $0x98] sm:$0x1]  ;;  %v22159_v32 = vld [vmem:[#allocation37_spill] sm:$0xff] }
 0x396   : > { %v14552_v18 = vpop.f32.mrf.mxu0  ;;  %v19711_v57 = vpop.f32.mrf.mxu1  ;;  %v19761_v40 = vadd.f32 %v14587_v50, %v22159_v32  ;;  %v22166_v32 = vld [vmem:[#allocation29_spill] sm:$0xff] }
 0x397   : > { %22157 = vst [vmem:[#allocation47_spill] sm:$0xff] %v19705_v63  ;;  %v14553_v34 = vadd.f32 %v14552_v18, %v14551_v62  ;;  %v510_v62 = vld [vmem:[#allocation3 + $0x90] sm:$0x1]  ;;  %v19780_v37 = vadd.f32 %v14599_v2, %v19509_v20  ;;  %v14620_v20 = vadd.f32 %v19677_v51, %v19675_v48  ;;  %v22164_v2 = vld [vmem:[#allocation28_spill] sm:$0xff]  ;;  %v14632_v48 = vadd.f32 %v19711_v57, %v19709_v1 }
 0x398   : > { %v14554_v42 = vpop.f32.mrf.mxu0  ;;  %v19718_v25 = vpop.f32.mrf.mxu1 }
 0x399   : > { %v19714_v44 = vadd.f32 %v14553_v34, %v19531_v59  ;;  %v511_v59 = vsel %vm16435_vm4, 0, %v510_v62  ;;  %v14584_v34 = vadd.f32 %v19577_v58, %v19575_v27  ;;  %v14593_v27 = vadd.f32 %v19602_v41, %v19600_v35  ;;  %v22162_v62 = vld [vmem:[#allocation38_spill] sm:$0xff] }
 0x39a   : > { %v14555_v14 = vpop.f32.mrf.mxu0  ;;  %v14634_v63 = vpop.f32.mrf.mxu1  ;;  %512 = vst [vmem:[#allocation3 + $0x90] sm:$0x1] %v511_v59  ;;  %v14596_v58 = vadd.f32 %v19611_v54, %v19609_v38  ;;  %v14608_v41 = vadd.f32 %v19643_v8, %v19641_v23  ;;  %v14611_v38 = vadd.f32 %v19652_v30, %v19650_v55  ;;  %v22161_v8 = vld [vmem:[#allocation21_spill] sm:$0xff]  ;;  %v14617_v55 = vadd.f32 %v19670_v0, %v19666_v12 }
 0x39b   : > { %v14556_v45 = vadd.f32 %v14555_v14, %v14554_v42  ;;  %v6647_v14 = vadd.f32 %v14578_v43, %v19398_v46  ;;  %v6648_v42 = vadd.f32 %v14581_v9, %v19412_v13  ;;  %v19751_v46 = vld [vmem:[%s21899_s3] ss:$0 sm:$0xff]  ;;  %v19754_v35 = vadd.f32 %v14584_v34, %v22158_v49 }
 0x39c   : > { %v14685_v18 = vpop.f32.mrf.mxu0  ;;  %v14636_v53 = vpop.f32.mrf.mxu1  ;;  %v565_v9 = vsel %vm16447_vm8, 0, %v564_v22  ;;  %v19771_v23 = vadd.f32 %v14593_v27, %v22161_v8  ;;  %v19786_v59 = vadd.f32 %v14605_v11, %v19540_v26  ;;  %v19789_v12 = vadd.f32 %v14608_v41, %v19553_v33  ;;  %v22163_v26 = vld [vmem:[#allocation43_spill] sm:$0xff] }
 0x39d   : > { %v19729_v4 = vadd.f32 %v14556_v45, %v19546_v28  ;;  %566 = vst [vmem:[#allocation3 + $0x98] sm:$0x1] %v565_v9  ;;  %v19792_v0 = vadd.f32 %v14611_v38, %v19566_v5  ;;  %v14626_v27 = vadd.f32 %v22163_v26, %v19691_v3  ;;  %v19804_v5 = vadd.f32 %v14617_v55, %v22164_v2  ;;  %v22168_v8 = vld [vmem:[#allocation39_spill] sm:$0xff]  ;;  %v22170_v26 = vld [vmem:[#allocation41_spill] sm:$0xff] }
 0x39e   : > { %v14686_v16 = vpop.f32.mrf.mxu0  ;;  %v14637_v60 = vpop.f32.mrf.mxu1  ;;  %v14629_v11 = vadd.f32 %v19702_v10, %v19700_v7  ;;  %v14635_v17 = vadd.f32 %v14634_v63, %v19718_v25  ;;  %v19818_v7 = vadd.f32 %v14623_v15, %v22166_v32  ;;  %v19823_v25 = vld [vmem:[#allocation10 + $0x38] sm:$0xff]   ;;  %v22173_v32 = vld [vmem:[#allocation40_spill] sm:$0xff] }
 0x39f   : > { %v14687_v28 = vadd.f32 %v14686_v16, %v14685_v18  ;;  %v19777_v18 = vadd.f32 %v14596_v58, %v22162_v62  ;;  %v19795_v16 = vadd.f32 %v14614_v21, %v19573_v39  ;;  %v513_v58 = vld [vmem:[#allocation3 + $0x9c] sm:$0x1]  ;;  %v14638_v38 = vadd.f32 %v14637_v60, %v14636_v53  ;;  %v567_v21 = vld [vmem:[#allocation3 + $0xa4] sm:$0x1]  ;;  %v7792_v60 = vld [vmem:[#allocation3 + $0xc] sm:$0xf]  ;;  %15045 = vmatprep.subr.bf16.mxu1 %v19823_v25 }
 0x3a0   : > { %v14688_v13 = vpop.f32.mrf.mxu0  ;;  %v14639_v43 = vpop.f32.mrf.mxu1  ;;  %v514_v52 = vsel %vm16435_vm4, 0, %v513_v58  ;;  %v19821_v1 = vadd.f32 %v14626_v27, %v22167_v61  ;;  %v19827_v55 = vadd.f32 %v14629_v11, %v22168_v8  ;;  %v19836_v27 = vadd.f32 %v14635_v17, %v22170_v26  ;;  %v7796_v17 = vld [vmem:[#allocation3 + $0x14] sm:$0x1] }
 0x3a1   : > { %v7271_v54 = vadd.f32 %v14687_v28, %v6646_v24  ;;  %515 = vst [vmem:[#allocation3 + $0x9c] sm:$0x1] %v514_v52 }
 0x3a2   : > { %v14689_v29 = vpop.f32.mrf.mxu0  ;;  %v14640_v24 = vpop.f32.mrf.mxu1 }
 0x3a3   : > { %v7309_v30 = vadd.f32 %v19751_v46, %v7271_v54  ;;  %v14690_v45 = vadd.f32 %v14689_v29, %v14688_v13  ;;  %v22165_v54 = vld [vmem:[#allocation35_spill] sm:$0xff] }
 0x3a4   : > { %v14691_v34 = vpop.f32.mrf.mxu0  ;;  %v14642_v33 = vpop.f32.mrf.mxu1  ;;  %v19815_v22 = vadd.f32 %v14620_v20, %v22165_v54 }
 0x3a5   : > { %v7341_v50 = vmax.f32 %v7309_v30, 0.0  ;;  %v7272_v6 = vadd.f32 %v14690_v45, %v6647_v14  ;;  %v22169_v30 = vld [vmem:[#allocation33_spill] sm:$0xff] }
 0x3a6   : > { %v14692_v28 = vpop.f32.mrf.mxu0  ;;  %v14643_v3 = vpop.f32.mrf.mxu1  ;;  %v19830_v45 = vadd.f32 %v14632_v48, %v22169_v30 }
 0x3a7   : > { %v13740_v47 = vpack.c.bf16 %v7341_v50, %v7341_v50  ;;  %v7310_v14 = vadd.f32 %v19751_v46, %v7272_v6  ;;  %v14693_v39 = vadd.f32 %v14692_v28, %v14691_v34  ;;  %v14641_v34 = vadd.f32 %v14640_v24, %v14639_v43  ;;  %v22171_v28 = vld [vmem:[#allocation22_spill] sm:$0xff] }
 0x3a8   : > { %v14694_v51 = vpop.f32.mrf.mxu0  ;;  %v14645_v57 = vpop.f32.mrf.mxu1  ;;  %v568_v6 = vsel %vm16447_vm8, 0, %v567_v21  ;;  %v19839_v58 = vadd.f32 %v14638_v38, %v22171_v28  ;;  %v14644_v43 = vadd.f32 %v14643_v3, %v14642_v33 }
 0x3a9   : > { %v7470_v13 = vshrl.u32 %v13740_v47, 16  ;;  %v7342_v49 = vmax.f32 %v7310_v14, 0.0  ;;  %v7273_v41 = vadd.f32 %v14693_v39, %v6648_v42  ;;  %v7473_v10 = vshll.u32 %v13740_v47, 16  ;;  %569 = vst [vmem:[#allocation3 + $0xa4] sm:$0x1] %v568_v6 }
 0x3aa   : > { %v14695_v63 = vpop.f32.mrf.mxu0  ;;  %v14646_v50 = vpop.f32.mrf.mxu1  ;;  %v516_v6 = vld [vmem:[#allocation3 + $0xa8] sm:$0x1] }
 0x3ab   : > { %v7472_v29 = vrot.slane %v7470_v13, 7  ;;  %v13741_v9 = vpack.c.bf16 %v7342_v49, %v7342_v49  ;;  %v7311_v53 = vadd.f32 %v19751_v46, %v7273_v41  ;;  %v14696_v42 = vadd.f32 %v14695_v63, %v14694_v51 }
 0x3ac   : > { %v14697_v62 = vpop.f32.mrf.mxu0  ;;  %v14647_v24 = vadd.f32 %v14646_v50, %v14645_v57  ;;  %v14648_v39 = vpop.f32.mrf.mxu1 }
 0x3ad   : > { %v7475_v20 = vor.u32 %v7473_v10, %v7472_v29  ;;  %v7478_v15 = vshrl.u32 %v13741_v9, 16  ;;  %v7343_v2 = vmax.f32 %v7311_v53, 0.0  ;;  %v7274_v47 = vadd.f32 %v14696_v42, %v19754_v35  ;;  %v22174_v53 = vld [vmem:[#allocation30_spill] sm:$0xff]  ;;  %v22175_v42 = vld [vmem:[#allocation45_spill] sm:$0xff] }
 0x3ae   : > { %v14698_v14 = vpop.f32.mrf.mxu0  ;;  %v7481_v52 = vshll.u32 %v13741_v9, 16  ;;  %v7476_v49 = vrot.slane %v7472_v29, 4  ;;  %v19846_v10 = vadd.f32 %v14641_v34, %v22173_v32  ;;  %v14649_v35 = vpop.f32.mrf.mxu1  ;;  %v19850_v29 = vadd.f32 %v14644_v43, %v22174_v53 }
 0x3af   : > { %v7793_v51 = vsel %vm16494_vm2, %v7475_v20, %v7792_v60  ;;  %v7480_v48 = vrot.slane %v7478_v15, 7  ;;  %v14699_v13 = vadd.f32 %v14698_v14, %v14697_v62  ;;  %v13742_v41 = vpack.c.bf16 %v7343_v2, %v7343_v2  ;;  %v7799_v14 = vld [vmem:[#allocation3 + $0x18] sm:$0xf] }
 0x3b0   : > { %7794 = vst [vmem:[#allocation3 + $0xc] sm:$0xf] %v7793_v51  ;;  %v7312_v38 = vadd.f32 %v19751_v46, %v7274_v47  ;;  %v14700_v54 = vpop.f32.mrf.mxu0  ;;  %v14650_v63 = vadd.f32 %v14649_v35, %v14648_v39  ;;  %v19853_v60 = vadd.f32 %v14647_v24, %v22175_v42  ;;  %v14651_v8 = vpop.f32.mrf.mxu1  ;;  %v517_v47 = vsel %vm16435_vm4, 0, %v516_v6  ;;  %v22177_v39 = vld [vmem:[#allocation42_spill] sm:$0xff] }
 0x3b1   : > { %v7483_v33 = vor.u32 %v7481_v52, %v7480_v48  ;;  %v7485_v3 = vrot.slane %v7480_v48, 4  ;;  %v7275_v61 = vadd.f32 %v14699_v13, %v19761_v40  ;;  %v7487_v57 = vshrl.u32 %v13742_v41, 16  ;;  %518 = vst [vmem:[#allocation3 + $0xa8] sm:$0x1] %v517_v47 }
 0x3b2   : > { %v7344_v21 = vmax.f32 %v7312_v38, 0.0  ;;  %v14701_v9 = vpop.f32.mrf.mxu0  ;;  %v7490_v15 = vshll.u32 %v13742_v41, 16  ;;  %v14652_v2 = vpop.f32.mrf.mxu1  ;;  %v19864_v51 = vadd.f32 %v14650_v63, %v22177_v39  ;;  %v7806_v39 = vld [vmem:[#allocation3 + $0x24] sm:$0xf] }
 0x3b3   : > { %v7484_v62 = vsel %vm16485_vm1, %v7476_v49, %v7483_v33  ;;  %v7797_v34 = vsel %vm16435_vm4, %v7485_v3, %v7796_v17  ;;  %v7313_v50 = vadd.f32 %v19751_v46, %v7275_v61  ;;  %v14702_v40 = vadd.f32 %v14701_v9, %v14700_v54  ;;  %v22178_v33 = vld [vmem:[#allocation31_spill] sm:$0xff] }
 0x3b4   : > { %7795 = vst [vmem:[#allocation3 + $0x10] sm:$0xf] %v7484_v62  ;;  %7798 = vst [vmem:[#allocation3 + $0x14] sm:$0x1] %v7797_v34  ;;  %v7489_v20 = vrot.slane %v7487_v57, 7  ;;  %v13743_v26 = vpack.c.bf16 %v7344_v21, %v7344_v21  ;;  %v14703_v28 = vpop.f32.mrf.mxu0  ;;  %v14653_v48 = vadd.f32 %v14652_v2, %v14651_v8 }
 0x3b5   : > { %v7345_v43 = vmax.f32 %v7313_v50, 0.0  ;;  %v7276_v24 = vadd.f32 %v14702_v40, %v19764_v19  ;;  %v7803_v57 = vld [vmem:[#allocation3 + $0x20] sm:$0x1] }
 0x3b6   : > { %v7492_v52 = vor.u32 %v7490_v15, %v7489_v20  ;;  %v7493_v13 = vrot.slane %v7489_v20, 4  ;;  %v7495_v49 = vshrl.u32 %v13743_v26, 16  ;;  %v7498_v17 = vshll.u32 %v13743_v26, 16  ;;  %v14704_v41 = vpop.f32.mrf.mxu0 }
 0x3b7   : > { %v13744_v38 = vpack.c.bf16 %v7345_v43, %v7345_v43  ;;  %v7314_v54 = vadd.f32 %v19751_v46, %v7276_v24  ;;  %v14705_v32 = vadd.f32 %v14704_v41, %v14703_v28  ;;  %v8950_v35 = vld [vmem:[#allocation3 + $0xc] sm:$0xe]  ;;  %v19868_v3 = vadd.f32 %v14653_v48, %v22178_v33 }
 0x3b8   : > { %v7909_v61 = vld [vmem:[#allocation3 + $0xc] sm:$0xf]  ;;  %v7800_v19 = vsel %vm16494_vm2, %v7492_v52, %v7799_v14  ;;  %v7497_v63 = vrot.slane %v7495_v49, 7  ;;  %v14706_v21 = vpop.f32.mrf.mxu0  ;;  %v13517_v9 = vrot.slane %v8950_v35, 9 }
 0x3b9   : > { %v7996_v53 = vshrl.u32 %v7909_v61, 16  ;;  %7801 = vst [vmem:[#allocation3 + $0x18] sm:$0xf] %v7800_v19  ;;  %v7504_v42 = vshrl.u32 %v13744_v38, 16  ;;  %v7507_v8 = vshll.u32 %v13744_v38, 16  ;;  %v7346_v62 = vmax.f32 %v7314_v54, 0.0 }
 0x3ba   : > { %v7277_v34 = vadd.f32 %v14705_v32, %v19771_v23  ;;  %v7500_v50 = vor.u32 %v7498_v17, %v7497_v63  ;;  %v7502_v40 = vrot.slane %v7497_v63, 4  ;;  %v14707_v6 = vpop.f32.mrf.mxu0  ;;  %v7999_v15 = vshll.u32 %v7909_v61, 16  ;;  %v19887_v63 = vpop.f32.mrf.mxu1 }
 0x3bb   : > { %v7998_v20 = vrot.slane %v7996_v53, 4  ;;  %v7506_v26 = vrot.slane %v7504_v42, 7  ;;  %v13745_v28 = vpack.c.bf16 %v7346_v62, %v7346_v62  ;;  %v14708_v47 = vadd.f32 %v14707_v6, %v14706_v21  ;;  %v19874_v14 = vld [vmem:[#allocation3 + $0x10] sm:$0xf]  ;;  %v19876_v43 = vld [vmem:[#allocation3 + $0x14] sm:$0x1] }
 0x3bc   : > { %v7315_v2 = vadd.f32 %v19751_v46, %v7277_v34  ;;  %v7501_v24 = vsel %vm16485_vm1, %v7493_v13, %v7500_v50  ;;  %v7804_v23 = vsel %vm16435_vm4, %v7502_v40, %v7803_v57  ;;  %v14709_v48 = vpop.f32.mrf.mxu0  ;;  %v9006_v52 = vrot.slane %v19874_v14, 5 }
 0x3bd   : > { %v9009_v49 = vrot.slane %v19876_v43, 5  ;;  %7802 = vst [vmem:[#allocation3 + $0x1c] sm:$0xf] %v7501_v24  ;;  %7805 = vst [vmem:[#allocation3 + $0x20] sm:$0x1] %v7804_v23  ;;  %v7509_v17 = vor.u32 %v7507_v8, %v7506_v26  ;;  %v7510_v41 = vrot.slane %v7506_v26, 4  ;;  %v7278_v35 = vadd.f32 %v14708_v47, %v19777_v18 }
 0x3be   : > { %v7512_v38 = vshrl.u32 %v13745_v28, 16  ;;  %v7515_v54 = vshll.u32 %v13745_v28, 16  ;;  %v7347_v32 = vmax.f32 %v7315_v2, 0.0  ;;  %v14710_v33 = vpop.f32.mrf.mxu0  ;;  %v9007_v61 = vsel %vm17204_vm6, %v13517_v9, %v9006_v52  ;;  %v7810_v8 = vld [vmem:[#allocation3 + $0x2c] sm:$0x1] }
 0x3bf   : > { %v9008_v19 = vrot.slane %v9006_v52, 4  ;;  %v7807_v57 = vsel %vm16494_vm2, %v7509_v17, %v7806_v39  ;;  %v14711_v53 = vadd.f32 %v14710_v33, %v14709_v48  ;;  %v8001_v42 = vrot.slane %v7999_v15, 5  ;;  %v14655_v39 = vpop.f32.mrf.mxu1  ;;  %v7813_v33 = vld [vmem:[#allocation3 + $0x30] sm:$0xf] }
 0x3c0   : > { %v7514_v21 = vrot.slane %v7512_v38, 7  ;;  %7808 = vst [vmem:[#allocation3 + $0x24] sm:$0xf] %v7807_v57  ;;  %v13746_v62 = vpack.c.bf16 %v7347_v32, %v7347_v32  ;;  %v7316_v34 = vadd.f32 %v19751_v46, %v7278_v35  ;;  %v14712_v50 = vpop.f32.mrf.mxu0  ;;  %v8005_v9 = vshll.u32 %v19874_v14, 16 }
 0x3c1   : > { %v9010_v18 = vsel %vm17204_vm6, %v9008_v19, %v9009_v49  ;;  %v7279_v26 = vadd.f32 %v14711_v53, %v19780_v37  ;;  %v8002_v23 = vor.u32 %v8001_v42, %v7998_v20  ;;  %v8015_v19 = vshll.u32 %v19876_v43, 16 }
 0x3c2   : > { %v7517_v40 = vor.u32 %v7515_v54, %v7514_v21  ;;  %v7519_v6 = vrot.slane %v7514_v21, 4  ;;  %v13533_v28 = vcombine.low %v9007_v61, %v9010_v18  ;;  %v7521_v2 = vshrl.u32 %v13746_v62, 16  ;;  %v14713_v15 = vpop.f32.mrf.mxu0 }
 0x3c3   : > { %v7524_v47 = vshll.u32 %v13746_v62, 16  ;;  %v7348_v24 = vmax.f32 %v7316_v34, 0.0  ;;  %v7317_v49 = vadd.f32 %v19751_v46, %v7279_v26  ;;  %v14714_v17 = vadd.f32 %v14713_v15, %v14712_v50  ;;  %v14657_v62 = vpop.f32.mrf.mxu1  ;;  %v7817_v34 = vld [vmem:[#allocation3 + $0x38] sm:$0x1] }
 0x3c4   : > { %v7518_v48 = vsel %vm16485_vm1, %v7510_v41, %v7517_v40  ;;  %v7811_v52 = vsel %vm16435_vm4, %v7519_v6, %v7810_v8  ;;  %15110 = vmatmul.mubr.bf16.vlgmr.msra.gmra.mxu0 %v13533_v28  ;;  %v7523_v37 = vrot.slane %v7521_v2, 7  ;;  %v14715_v54 = vpop.f32.mrf.mxu0  ;;  %v8003_v32 = vrot.slane %v8002_v23, 4 }
 0x3c5   : > { %7809 = vst [vmem:[#allocation3 + $0x28] sm:$0xf] %v7518_v48  ;;  %7812 = vst [vmem:[#allocation3 + $0x2c] sm:$0x1] %v7811_v52  ;;  %v13747_v38 = vpack.c.bf16 %v7348_v24, %v7348_v24  ;;  %v8007_v35 = vrot.slane %v8005_v9, 5  ;;  %v7349_v20 = vmax.f32 %v7317_v49, 0.0  ;;  %v7280_v61 = vadd.f32 %v14714_v17, %v19783_v36 }
 0x3c6   : > { %v8009_v41 = vshrl.u32 %v19874_v14, 16  ;;  %v7526_v57 = vor.u32 %v7524_v47, %v7523_v37  ;;  %v7527_v21 = vrot.slane %v7523_v37, 4  ;;  %v14716_v8 = vpop.f32.mrf.mxu0  ;;  %v8017_v43 = vrot.slane %v8015_v19, 5  ;;  %v7820_v52 = vld [vmem:[#allocation3 + $0x3c] sm:$0xf] }
 0x3c7   : > { %v7529_v53 = vshrl.u32 %v13747_v38, 16  ;;  %v7532_v42 = vshll.u32 %v13747_v38, 16  ;;  %v13748_v50 = vpack.c.bf16 %v7349_v20, %v7349_v20  ;;  %v7318_v18 = vadd.f32 %v19751_v46, %v7280_v61  ;;  %v14658_v38 = vpop.f32.mrf.mxu1  ;;  %v19912_v61 = vld [vmem:[#allocation3 + $0x1c] sm:$0xf] }
 0x3c8   : > { %v14717_v40 = vadd.f32 %v14716_v8, %v14715_v54  ;;  %v8008_v6 = vsel %vm16510_vm0, %v8003_v32, %v8007_v35  ;;  %v7814_v36 = vsel %vm16494_vm2, %v7526_v57, %v7813_v33  ;;  %v8011_v26 = vrot.slane %v8009_v41, 4  ;;  %v14718_v28 = vpop.f32.mrf.mxu0  ;;  %v8951_v41 = vld [vmem:[#allocation3 + $0x18] sm:$0xe] }
 0x3c9   : > { %v7531_v14 = vrot.slane %v7529_v53, 7  ;;  %7815 = vst [vmem:[#allocation3 + $0x30] sm:$0xf] %v7814_v36  ;;  %v7538_v2 = vshrl.u32 %v13748_v50, 16  ;;  %v7541_v47 = vshll.u32 %v13748_v50, 16  ;;  %v7350_v24 = vmax.f32 %v7318_v18, 0.0 }
 0x3ca   : > { %v7281_v15 = vadd.f32 %v14717_v40, %v19786_v59  ;;  %v8012_v49 = vor.u32 %v8011_v26, %v8007_v35  ;;  %v14656_v17 = vadd.f32 %v14655_v39, %v19887_v63  ;;  %v14719_v37 = vpop.f32.mrf.mxu0  ;;  %v22181_v35 = vld [vmem:[#allocation36_spill] sm:$0xff]  ;;  %v19926_v26 = vpop.f32.mrf.mxu1 }
 0x3cb   : > { %v7534_v23 = vor.u32 %v7532_v42, %v7531_v14  ;;  %v7536_v48 = vrot.slane %v7531_v14, 4  ;;  %v7540_v54 = vrot.slane %v7538_v2, 7  ;;  %v13749_v32 = vpack.c.bf16 %v7350_v24, %v7350_v24  ;;  %v19921_v18 = vld [vmem:[#allocation3 + $0x20] sm:$0x1] }
 0x3cc   : > { %v7319_v33 = vadd.f32 %v19751_v46, %v7281_v15  ;;  %v14720_v20 = vadd.f32 %v14719_v37, %v14718_v28  ;;  %v8013_v57 = vrot.slane %v8012_v49, 4  ;;  %v19919_v53 = vadd.f32 %v14656_v17, %v22181_v35  ;;  %v14721_v63 = vpop.f32.mrf.mxu0  ;;  %v15775_v15 = vld [vmem:[#allocation10 + $0x30] sm:$0xff]   ;;  %v14661_v35 = vpop.f32.mrf.mxu1 }
 0x3cd   : > { %v7535_v19 = vsel %vm16485_vm1, %v7527_v21, %v7534_v23  ;;  %v7818_v59 = vsel %vm16435_vm4, %v7536_v48, %v7817_v34  ;;  %v7543_v39 = vor.u32 %v7541_v47, %v7540_v54  ;;  %v7544_v42 = vrot.slane %v7540_v54, 4  ;;  %v7824_v23 = vld [vmem:[#allocation3 + $0x44] sm:$0x1] }
 0x3ce   : > { %7816 = vst [vmem:[#allocation3 + $0x34] sm:$0xf] %v7535_v19  ;;  %7819 = vst [vmem:[#allocation3 + $0x38] sm:$0x1] %v7818_v59  ;;  %v7546_v8 = vshrl.u32 %v13749_v32, 16  ;;  %v7549_v50 = vshll.u32 %v13749_v32, 16  ;;  %v8018_v21 = vsel %vm16510_vm0, %v8013_v57, %v8017_v43  ;;  %v7282_v36 = vadd.f32 %v14720_v20, %v19789_v12  ;;  %v14722_v14 = vpop.f32.mrf.mxu0 }
 0x3cf   : > { %v7351_v40 = vmax.f32 %v7319_v33, 0.0  ;;  %v13518_v34 = vrot.slane %v8951_v41, 9  ;;  %v7821_v28 = vsel %vm16494_vm2, %v7543_v39, %v7820_v52  ;;  %v13469_v47 = vcombine.low %v8008_v6, %v8018_v21  ;;  %v7911_v6 = vld [vmem:[#allocation3 + $0x18] sm:$0xf]  ;;  %v15778_v33 = vld [vmem:[#allocation10 + $0x138] sm:$0xff]   ;;  %v22182_v59 = vld [vmem:[#allocation32_spill] sm:$0xff] }
 0x3d0   : > { %v7548_v2 = vrot.slane %v7546_v8, 7  ;;  %v9013_v24 = vrot.slane %v19912_v61, 5  ;;  %7822 = vst [vmem:[#allocation3 + $0x3c] sm:$0xf] %v7821_v28  ;;  %v7320_v49 = vadd.f32 %v19751_v46, %v7282_v36  ;;  %v9016_v43 = vrot.slane %v19921_v18, 5  ;;  %v14724_v17 = vpop.f32.mrf.mxu0  ;;  %15189 = vmatprep.subr.bf16.mxu0 %v15778_v33 }
 0x3d1   : > { %v13750_v48 = vpack.c.bf16 %v7351_v40, %v7351_v40  ;;  %v14659_v12 = vadd.f32 %v14658_v38, %v14657_v62  ;;  %15014 = vmatmul.mubr.bf16.vlgmr.msra.gmra.mxu1 %v13469_v47  ;;  %v15776_v40 = vld [vmem:[#allocation10 + $0x28] sm:$0xff]   ;;  %v7827_v36 = vld [vmem:[#allocation3 + $0x48] sm:$0xf]  ;;  %v8023_v47 = vshll.u32 %v7911_v6, 16  ;;  %15190 = vmatpush3.bf16.msra.mxu0 %v15778_v33 }
 0x3d2   : > { %v7551_v37 = vor.u32 %v7549_v50, %v7548_v2  ;;  %v7553_v54 = vrot.slane %v7548_v2, 4  ;;  %v9014_v52 = vsel %vm17204_vm6, %v13518_v34, %v9013_v24  ;;  %v9015_v32 = vrot.slane %v9013_v24, 4  ;;  %v14725_v39 = vpop.f32.mrf.mxu0  ;;  %15046 = vmatpush3.bf16.msra.mxu1 %v19823_v25 }
 0x3d3   : > { %v7555_v20 = vshrl.u32 %v13750_v48, 16  ;;  %v7558_v41 = vshll.u32 %v13750_v48, 16  ;;  %v7352_v19 = vmax.f32 %v7320_v49, 0.0  ;;  %v19936_v57 = vadd.f32 %v14659_v12, %v22182_v59  ;;  %15047 = vmatprep.subr.bf16.mxu1 %v15775_v15 }
 0x3d4   : > { %v7552_v62 = vsel %vm16485_vm1, %v7544_v42, %v7551_v37  ;;  %v7825_v38 = vsel %vm16435_vm4, %v7553_v54, %v7824_v23  ;;  %v9017_v8 = vsel %vm17204_vm6, %v9015_v32, %v9016_v43  ;;  %v14723_v50 = vadd.f32 %v14722_v14, %v14721_v63  ;;  %v19945_v25 = vpop.f32.mrf.mxu0  ;;  %v14663_v43 = vpop.f32.mrf.mxu1  ;;  %v7831_v37 = vld [vmem:[#allocation3 + $0x50] sm:$0x1] }
 0x3d5   : > { %7823 = vst [vmem:[#allocation3 + $0x40] sm:$0xf] %v7552_v62  ;;  %7826 = vst [vmem:[#allocation3 + $0x44] sm:$0x1] %v7825_v38  ;;  %v7557_v21 = vrot.slane %v7555_v20, 7  ;;  %v13751_v34 = vpack.c.bf16 %v7352_v19, %v7352_v19  ;;  %v13534_v28 = vcombine.low %v9014_v52, %v9017_v8  ;;  %v8020_v2 = vshrl.u32 %v7911_v6, 16 }
 0x3d6   : > { %v7283_v42 = vadd.f32 %v14723_v50, %v19792_v0  ;;  %v8029_v24 = vshll.u32 %v19912_v61, 16  ;;  %v8033_v23 = vshrl.u32 %v19912_v61, 16  ;;  %v14728_v12 = vpop.f32.mrf.mxu0  ;;  %15048 = vmatpush3.bf16.msra.mxu1 %v15775_v15  ;;  %v8025_v32 = vrot.slane %v8023_v47, 5  ;;  %v15777_v6 = vld [vmem:[#allocation10 + $0x20] sm:$0xff]   ;;  %v8952_v19 = vld [vmem:[#allocation3 + $0x24] sm:$0xe] }
 0x3d7   : > { %v7560_v63 = vor.u32 %v7558_v41, %v7557_v21  ;;  %v7561_v14 = vrot.slane %v7557_v21, 4  ;;  %v7563_v48 = vshrl.u32 %v13751_v34, 16  ;;  %v7566_v49 = vshll.u32 %v13751_v34, 16  ;;  %15113 = vmatprep.mubr.bf16.mxu0 %v13534_v28  ;;  %15049 = vmatprep.subr.bf16.mxu1 %v15776_v40  ;;  %v15780_v50 = vld [vmem:[#allocation10 + $0x130] sm:$0xff]   ;;  %v15781_v21 = vld [vmem:[#allocation10 + $0x128] sm:$0xff]  }
 0x3d8   : > { %v7321_v54 = vadd.f32 %v19751_v46, %v7283_v42  ;;  %v8022_v52 = vrot.slane %v8020_v2, 4  ;;  %v8031_v0 = vrot.slane %v8029_v24, 5  ;;  %v8035_v20 = vrot.slane %v8033_v23, 4  ;;  %v19954_v59 = vpop.f32.mrf.mxu0  ;;  %v22183_v23 = vld [vmem:[#allocation47_spill] sm:$0xff]  ;;  %15191 = vmatprep.subr.bf16.mxu0 %v15780_v50 }
 0x3d9   : > { %v7828_v61 = vsel %vm16494_vm2, %v7560_v63, %v7827_v36  ;;  %v7565_v33 = vrot.slane %v7563_v48, 7  ;;  %v8039_v41 = vshll.u32 %v19921_v18, 16  ;;  %v14662_v38 = vadd.f32 %v14661_v35, %v19926_v26  ;;  %v14664_v36 = vpop.f32.mrf.mxu1  ;;  %v19965_v26 = vld [vmem:[#allocation3 + $0x2c] sm:$0x1]  ;;  %15192 = vmatpush3.bf16.msra.mxu0 %v15780_v50 }
 0x3da   : > { %7829 = vst [vmem:[#allocation3 + $0x48] sm:$0xf] %v7828_v61  ;;  %v7353_v15 = vmax.f32 %v7321_v54, 0.0  ;;  %v8026_v62 = vor.u32 %v8025_v32, %v8022_v52  ;;  %v14726_v8 = vadd.f32 %v14725_v39, %v14724_v17  ;;  %v8036_v2 = vor.u32 %v8035_v20, %v8031_v0  ;;  %v19957_v47 = vpop.f32.mrf.mxu0  ;;  %15050 = vmatpush3.bf16.msra.mxu1 %v15776_v40  ;;  %v19963_v54 = vld [vmem:[#allocation3 + $0x28] sm:$0xf]  ;;  %v15779_v17 = vld [vmem:[#allocation10 + $0x18] sm:$0xff]  }
 0x3db   : > { %v7568_v34 = vor.u32 %v7566_v49, %v7565_v33  ;;  %v7570_v28 = vrot.slane %v7565_v33, 4  ;;  %v8041_v42 = vrot.slane %v8039_v41, 5  ;;  %v19960_v63 = vadd.f32 %v14662_v38, %v22183_v23  ;;  %15051 = vmatprep.subr.bf16.mxu1 %v15777_v6  ;;  %v7913_v20 = vld [vmem:[#allocation3 + $0x24] sm:$0xf]  ;;  %15193 = vmatprep.subr.bf16.mxu0 %v15781_v21  ;;  %v15783_v23 = vld [vmem:[#allocation10 + $0x120] sm:$0xff]  }
 0x3dc   : > { %v13752_v18 = vpack.c.bf16 %v7353_v15, %v7353_v15  ;;  %v8027_v24 = vrot.slane %v8026_v62, 4  ;;  %v7284_v48 = vadd.f32 %v14726_v8, %v19795_v16  ;;  %v8037_v40 = vrot.slane %v8036_v2, 4  ;;  %v19971_v52 = vpop.f32.mrf.mxu0  ;;  %v14666_v15 = vpop.f32.mrf.mxu1 }
 0x3dd   : > { %v7569_v35 = vsel %vm16485_vm1, %v7561_v14, %v7568_v34  ;;  %v7832_v39 = vsel %vm16435_vm4, %v7570_v28, %v7831_v37  ;;  %v13519_v49 = vrot.slane %v8952_v19, 9  ;;  %v9020_v37 = vrot.slane %v19963_v54, 5  ;;  %v7834_v34 = vld [vmem:[#allocation3 + $0x54] sm:$0xf]  ;;  %15194 = vmatpush3.bf16.msra.mxu0 %v15781_v21 }
 0x3de   : > { %7830 = vst [vmem:[#allocation3 + $0x4c] sm:$0xf] %v7569_v35  ;;  %7833 = vst [vmem:[#allocation3 + $0x50] sm:$0x1] %v7832_v39  ;;  %v7572_v16 = vshrl.u32 %v13752_v18, 16  ;;  %v7575_v32 = vshll.u32 %v13752_v18, 16  ;;  %v8032_v61 = vsel %vm16510_vm0, %v8027_v24, %v8031_v0  ;;  %v7322_v33 = vadd.f32 %v19751_v46, %v7284_v48  ;;  %v19980_v62 = vpop.f32.mrf.mxu0  ;;  %15052 = vmatpush3.bf16.msra.mxu1 %v15777_v6 }
 0x3df   : > { %v8042_v14 = vsel %vm16510_vm0, %v8037_v40, %v8041_v42  ;;  %v9023_v41 = vrot.slane %v19965_v26, 5  ;;  %v14665_v19 = vadd.f32 %v14664_v36, %v14663_v43  ;;  %v14729_v50 = vadd.f32 %v14728_v12, %v19945_v25  ;;  %15053 = vmatprep.subr.bf16.mxu1 %v15779_v17  ;;  %v15782_v12 = vld [vmem:[#allocation10 + $0x10] sm:$0xff]   ;;  %v15784_v48 = vld [vmem:[#allocation10 + $0x118] sm:$0xff]   ;;  %15195 = vmatprep.subr.bf16.mxu0 %v15783_v23 }
 0x3e0   : > { %v19982_v38 = vrot.slane %v7572_v16, 7  ;;  %v13470_v8 = vcombine.low %v8032_v61, %v8042_v14  ;;  %v7354_v0 = vmax.f32 %v7322_v33, 0.0  ;;  %v9021_v28 = vsel %vm17204_vm6, %v13519_v49, %v9020_v37  ;;  %v19990_v36 = vpop.f32.mrf.mxu0  ;;  %v14667_v49 = vpop.f32.mrf.mxu1  ;;  %v8953_v33 = vld [vmem:[#allocation3 + $0x30] sm:$0xe]  ;;  %v7838_v14 = vld [vmem:[#allocation3 + $0x5c] sm:$0x1] }
 0x3e1   : > { %v9022_v2 = vrot.slane %v9020_v37, 4  ;;  %v19988_v42 = vadd.f32 %v14665_v19, %v19714_v44  ;;  %v8044_v43 = vshrl.u32 %v7913_v20, 16  ;;  %v7285_v25 = vadd.f32 %v14729_v50, %v19804_v5  ;;  %15196 = vmatpush3.bf16.msra.mxu0 %v15783_v23  ;;  %v15786_v23 = vld [vmem:[#allocation10 + $0x110] sm:$0xff]  }
 0x3e2   : > { %v7577_v6 = vor.u32 %v7575_v32, %v19982_v38  ;;  %v7578_v18 = vrot.slane %v19982_v38, 4  ;;  %15017 = vmatprep.mubr.bf16.mxu1 %v13470_v8  ;;  %v13753_v24 = vpack.c.bf16 %v7354_v0, %v7354_v0  ;;  %v8047_v39 = vshll.u32 %v7913_v20, 16  ;;  %v19998_v21 = vpop.f32.mrf.mxu0  ;;  %15054 = vmatpush3.bf16.msra.mxu1 %v15779_v17  ;;  %v20004_v38 = vld [vmem:[#allocation3 + $0x34] sm:$0xf] }
 0x3e3   : > { %v9024_v35 = vsel %vm17204_vm6, %v9022_v2, %v9023_v41  ;;  %v8046_v44 = vrot.slane %v8044_v43, 4  ;;  %v8053_v40 = vshll.u32 %v19963_v54, 16  ;;  %15055 = vmatprep.subr.bf16.mxu1 %v15782_v12  ;;  %v7323_v37 = vadd.f32 %v19751_v46, %v7285_v25  ;;  %15197 = vmatprep.subr.bf16.mxu0 %v15784_v48  ;;  %v15785_v25 = vld [vmem:[#allocation10 + $0x8] sm:$0xff]  }
 0x3e4   : > { %v7835_v16 = vsel %vm16494_vm2, %v7577_v6, %v7834_v34  ;;  %v7580_v32 = vshrl.u32 %v13753_v24, 16  ;;  %v7583_v61 = vshll.u32 %v13753_v24, 16  ;;  %v13535_v5 = vcombine.low %v9021_v28, %v9024_v35  ;;  %v20006_v17 = vpop.f32.mrf.mxu0  ;;  %v20011_v28 = vld [vmem:[#allocation3 + $0x38] sm:$0x1] }
 0x3e5   : > { %7836 = vst [vmem:[#allocation3 + $0x54] sm:$0xf] %v7835_v16  ;;  %v8049_v20 = vrot.slane %v8047_v39, 5  ;;  %v8055_v41 = vrot.slane %v8053_v40, 5  ;;  %v8057_v19 = vshrl.u32 %v19963_v54, 16  ;;  %v8063_v0 = vshll.u32 %v19965_v26, 16  ;;  %15198 = vmatpush3.bf16.msra.mxu0 %v15784_v48 }
 0x3e6   : > { %v7582_v8 = vrot.slane %v7580_v32, 7  ;;  %15114 = vmatmul.mubr.bf16.gmra.mxu0 %v13535_v5  ;;  %v14668_v50 = vadd.f32 %v14667_v49, %v14666_v15  ;;  %v14732_v34 = vadd.f32 %v19957_v47, %v19954_v59  ;;  %v7355_v2 = vmax.f32 %v7323_v37, 0.0  ;;  %v20013_v24 = vpop.f32.mrf.mxu0  ;;  %15056 = vmatpush3.bf16.msra.mxu1 %v15782_v12  ;;  %v15787_v5 = vld [vmem:[#allocation10 + $0x108] sm:$0xff]  }
 0x3e7   : > { %v8050_v43 = vor.u32 %v8049_v20, %v8046_v44  ;;  %v8059_v6 = vrot.slane %v8057_v19, 4  ;;  %v13520_v54 = vrot.slane %v8953_v33, 9  ;;  %v8065_v40 = vrot.slane %v8063_v0, 5  ;;  %15057 = vmatprep.subr.bf16.mxu1 %v15785_v25  ;;  %15199 = vmatprep.subr.bf16.mxu0 %v15786_v23 }
 0x3e8   : > { %v7585_v35 = vor.u32 %v7583_v61, %v7582_v8  ;;  %v7587_v39 = vrot.slane %v7582_v8, 4  ;;  %v20016_v26 = vadd.f32 %v14668_v50, %v19729_v4  ;;  %v13754_v15 = vpack.c.bf16 %v7355_v2, %v7355_v2  ;;  %v20019_v16 = vpop.f32.mrf.mxu0  ;;  %v7915_v61 = vld [vmem:[#allocation3 + $0x30] sm:$0xf] }
 0x3e9   : > { %v8051_v59 = vrot.slane %v8050_v43, 4  ;;  %v8060_v47 = vor.u32 %v8059_v6, %v8055_v41  ;;  %v7286_v49 = vadd.f32 %v14732_v34, %v19815_v22  ;;  %v9027_v32 = vrot.slane %v20004_v38, 5  ;;  %15200 = vmatpush3.bf16.msra.mxu0 %v15786_v23  ;;  %v7841_v43 = vld [vmem:[#allocation3 + $0x60] sm:$0xf] }
 0x3ea   : > { %v7586_v12 = vsel %vm16485_vm1, %v7578_v18, %v7585_v35  ;;  %v7839_v44 = vsel %vm16435_vm4, %v7587_v39, %v7838_v14  ;;  %v9030_v4 = vrot.slane %v20011_v28, 5  ;;  %v7589_v22 = vshrl.u32 %v13754_v15, 16  ;;  %v20029_v20 = vpop.f32.mrf.mxu0  ;;  %15058 = vmatpush3.bf16.msra.mxu1 %v15785_v25  ;;  %15201 = vmatprep.subr.bf16.mxu0 %v15787_v5 }
 0x3eb   : > { %7837 = vst [vmem:[#allocation3 + $0x58] sm:$0xf] %v7586_v12  ;;  %7840 = vst [vmem:[#allocation3 + $0x5c] sm:$0x1] %v7839_v44  ;;  %v7592_v33 = vshll.u32 %v13754_v15, 16  ;;  %v8056_v48 = vsel %vm16510_vm0, %v8051_v59, %v8055_v41  ;;  %v8061_v37 = vrot.slane %v8060_v47, 4  ;;  %v7324_v18 = vadd.f32 %v19751_v46, %v7286_v49 }
 0x3ec   : > { %v9028_v14 = vsel %vm17204_vm6, %v13520_v54, %v9027_v32  ;;  %v9029_v19 = vrot.slane %v9027_v32, 4  ;;  %v14735_v8 = vadd.f32 %v19980_v62, %v19971_v52  ;;  %v20036_v0 = vrot.slane %v7589_v22, 7  ;;  %v20040_v2 = vpop.f32.mrf.mxu0  ;;  %v8954_v12 = vld [vmem:[#allocation3 + $0x3c] sm:$0xe] }
 0x3ed   : > { %v8066_v50 = vsel %vm16510_vm0, %v8061_v37, %v8065_v40  ;;  %v8068_v34 = vshrl.u32 %v7915_v61, 16  ;;  %v8071_v41 = vshll.u32 %v7915_v61, 16  ;;  %v7356_v25 = vmax.f32 %v7324_v18, 0.0  ;;  %v20057_v61 = vld [vmem:[#allocation3 + $0x40] sm:$0xf]  ;;  %15202 = vmatpush3.bf16.msra.mxu0 %v15787_v5 }
 0x3ee   : > { %v13471_v6 = vcombine.low %v8056_v48, %v8066_v50  ;;  %v9031_v54 = vsel %vm17204_vm6, %v9029_v19, %v9030_v4  ;;  %v7287_v35 = vadd.f32 %v14735_v8, %v19818_v7  ;;  %v7594_v52 = vor.u32 %v7592_v33, %v20036_v0  ;;  %v20047_v15 = vpop.f32.mrf.mxu0  ;;  %v15789_v33 = vld [vmem:[#allocation10 + $0x100] sm:$0xff]   ;;  %v20061_v19 = vld [vmem:[#allocation3 + $0x44] sm:$0x1] }
 0x3ef   : > { %v7595_v62 = vrot.slane %v20036_v0, 4  ;;  %v13536_v39 = vcombine.low %v9028_v14, %v9031_v54  ;;  %v8070_v40 = vrot.slane %v8068_v34, 4  ;;  %v13755_v59 = vpack.c.bf16 %v7356_v25, %v7356_v25  ;;  %15203 = vmatprep.subr.bf16.mxu0 %v15789_v33 }
 0x3f0   : > { %15018 = vmatmul.mubr.bf16.gmra.mxu1 %v13471_v6  ;;  %v7325_v23 = vadd.f32 %v19751_v46, %v7287_v35  ;;  %v8073_v47 = vrot.slane %v8071_v41, 5  ;;  %v8077_v49 = vshll.u32 %v20004_v38, 16  ;;  %v7842_v7 = vsel %vm16494_vm2, %v7594_v52, %v7841_v43  ;;  %v20059_v22 = vpop.f32.mrf.mxu0  ;;  %v15788_v46 = vld [vmem:[#allocation10] sm:$0xff]   ;;  %v20069_v6 = vld [vmem:[%s21899_s3] ss:$0 sm:$0xff] }
 0x3f1   : > { %15117 = vmatprep.mubr.bf16.mxu0 %v13536_v39  ;;  %v8081_v44 = vshrl.u32 %v20004_v38, 16  ;;  %v8087_v32 = vshll.u32 %v20011_v28, 16  ;;  %v14738_v4 = vadd.f32 %v19998_v21, %v19990_v36  ;;  %7843 = vst [vmem:[#allocation3 + $0x60] sm:$0xf] %v7842_v7  ;;  %v7597_v48 = vshrl.u32 %v13755_v59, 16  ;;  %15059 = vmatprep.subr.bf16.mxu1 %v15788_v46 }
 0x3f2   : > { %v7600_v37 = vshll.u32 %v13755_v59, 16  ;;  %v7357_v18 = vmax.f32 %v7325_v23, 0.0  ;;  %v8074_v14 = vor.u32 %v8073_v47, %v8070_v40  ;;  %v8079_v38 = vrot.slane %v8077_v49, 5  ;;  %v7845_v21 = vld [vmem:[#allocation3 + $0x68] sm:$0x1]  ;;  %v20064_v41 = vpop.f32.mrf.mxu0  ;;  %15060 = vmatpush3.bf16.msra.mxu1 %v15788_v46  ;;  %15204 = vmatpush3.bf16.msra.mxu0 %v15789_v33 }
 0x3f3   : > { %v8083_v8 = vrot.slane %v8081_v44, 4  ;;  %v8089_v28 = vrot.slane %v8087_v32, 5  ;;  %v7288_v0 = vadd.f32 %v14738_v4, %v19821_v1  ;;  %v7599_v36 = vrot.slane %v7597_v48, 7  ;;  %v7917_v35 = vld [vmem:[#allocation3 + $0x3c] sm:$0xf] }
 0x3f4   : > { %v13756_v50 = vpack.c.bf16 %v7357_v18, %v7357_v18  ;;  %v8075_v5 = vrot.slane %v8074_v14, 4  ;;  %v13521_v34 = vrot.slane %v8954_v12, 9  ;;  %v9034_v1 = vrot.slane %v20057_v61, 5  ;;  %v20082_v46 = vpop.f32.mrf.mxu0  ;;  %v7848_v33 = vld [vmem:[#allocation3 + $0x6c] sm:$0xf] }
 0x3f5   : > { %v8084_v43 = vor.u32 %v8083_v8, %v8079_v38  ;;  %v7326_v25 = vadd.f32 %v20069_v6, %v7288_v0  ;;  %v9037_v54 = vrot.slane %v20061_v19, 5  ;;  %v7602_v52 = vor.u32 %v7600_v37, %v7599_v36 }
 0x3f6   : > { %v7604_v39 = vrot.slane %v7599_v36, 4  ;;  %v7606_v40 = vshrl.u32 %v13756_v50, 16  ;;  %v7609_v59 = vshll.u32 %v13756_v50, 16  ;;  %v8080_v23 = vsel %vm16510_vm0, %v8075_v5, %v8079_v38  ;;  %v15792_v38 = vld [vmem:[#allocation10 + $0xf8] sm:$0xff]  }
 0x3f7   : > { %v8085_v47 = vrot.slane %v8084_v43, 4  ;;  %v7358_v49 = vmax.f32 %v7326_v25, 0.0  ;;  %v9035_v12 = vsel %vm17204_vm6, %v13521_v34, %v9034_v1  ;;  %v7603_v7 = vsel %vm16485_vm1, %v7595_v62, %v7602_v52  ;;  %v8955_v43 = vld [vmem:[#allocation3 + $0x48] sm:$0xe]  ;;  %15141 = vmatprep.subr.bf16.mxu1 %v15792_v38 }
 0x3f8   : > { %v7846_v44 = vsel %vm16435_vm4, %v7604_v39, %v7845_v21  ;;  %v7608_v32 = vrot.slane %v7606_v40, 7  ;;  %v9036_v4 = vrot.slane %v9034_v1, 4  ;;  %7844 = vst [vmem:[#allocation3 + $0x64] sm:$0xf] %v7603_v7  ;;  %v14741_v18 = vadd.f32 %v20013_v24, %v20006_v17  ;;  %v20094_v1 = vpop.f32.mrf.mxu0  ;;  %v20099_v40 = vld [vmem:[#allocation3 + $0x4c] sm:$0xf] }
 0x3f9   : > { %7847 = vst [vmem:[#allocation3 + $0x68] sm:$0x1] %v7846_v44  ;;  %v8090_v48 = vsel %vm16510_vm0, %v8085_v47, %v8089_v28  ;;  %v13757_v37 = vpack.c.bf16 %v7358_v49, %v7358_v49  ;;  %v8092_v14 = vshrl.u32 %v7917_v35, 16  ;;  %v8095_v24 = vshll.u32 %v7917_v35, 16  ;;  %v7919_v38 = vld [vmem:[#allocation3 + $0x48] sm:$0xf] }
 0x3fa   : > { %v7611_v62 = vor.u32 %v7609_v59, %v7608_v32  ;;  %v7612_v8 = vrot.slane %v7608_v32, 4  ;;  %v13472_v0 = vcombine.low %v8080_v23, %v8090_v48  ;;  %v9038_v36 = vsel %vm17204_vm6, %v9036_v4, %v9037_v54  ;;  %v7852_v59 = vld [vmem:[#allocation3 + $0x74] sm:$0x1] }
 0x3fb   : > { %v7614_v21 = vshrl.u32 %v13757_v37, 16  ;;  %v7617_v50 = vshll.u32 %v13757_v37, 16  ;;  %v13537_v5 = vcombine.low %v9035_v12, %v9038_v36  ;;  %v7289_v34 = vadd.f32 %v14741_v18, %v19827_v55  ;;  %v20105_v37 = vpop.f32.mrf.mxu0 }
 0x3fc   : > { %v7849_v28 = vsel %vm16494_vm2, %v7611_v62, %v7848_v33  ;;  %15021 = vmatprep.mubr.bf16.mxu1 %v13472_v0  ;;  %v8094_v17 = vrot.slane %v8092_v14, 4  ;;  %v8101_v25 = vshll.u32 %v20057_v61, 16  ;;  %v8105_v39 = vshrl.u32 %v20057_v61, 16  ;;  %v7961_v61 = vld [vmem:[#allocation3 + $0x50] sm:$0x1] }
 0x3fd   : > { %7850 = vst [vmem:[#allocation3 + $0x6c] sm:$0xf] %v7849_v28  ;;  %v7616_v52 = vrot.slane %v7614_v21, 7  ;;  %15118 = vmatmul.mubr.bf16.gmra.mxu0 %v13537_v5  ;;  %v7327_v54 = vadd.f32 %v20069_v6, %v7289_v34  ;;  %v8111_v55 = vshll.u32 %v20061_v19, 16  ;;  %v8097_v23 = vrot.slane %v8095_v24, 5  ;;  %v20118_v24 = vpop.f32.mrf.mxu0 }
 0x3fe   : > { %v8103_v47 = vrot.slane %v8101_v25, 5  ;;  %v14744_v35 = vadd.f32 %v20029_v20, %v20019_v16  ;;  %v13522_v49 = vrot.slane %v8955_v43, 9  ;;  %v8107_v32 = vrot.slane %v8105_v39, 4 }
 0x3ff   : > { %v7619_v12 = vor.u32 %v7617_v50, %v7616_v52  ;;  %v7621_v7 = vrot.slane %v7616_v52, 4  ;;  %v7359_v44 = vmax.f32 %v7327_v54, 0.0  ;;  %v8098_v4 = vor.u32 %v8097_v23, %v8094_v17 }
 0x400   : > { %v8113_v33 = vrot.slane %v8111_v55, 5  ;;  %v7290_v48 = vadd.f32 %v14744_v35, %v19830_v45  ;;  %v9041_v19 = vrot.slane %v20099_v40, 5  ;;  %v8108_v14 = vor.u32 %v8107_v32, %v8103_v47  ;;  %v7855_v55 = vld [vmem:[#allocation3 + $0x78] sm:$0xf] }
 0x401   : > { %v7620_v18 = vsel %vm16485_vm1, %v7612_v8, %v7619_v12  ;;  %v7853_v16 = vsel %vm16435_vm4, %v7621_v7, %v7852_v59  ;;  %v13758_v20 = vpack.c.bf16 %v7359_v44, %v7359_v44  ;;  %v8099_v62 = vrot.slane %v8098_v4, 4 }
 0x402   : > { %7851 = vst [vmem:[#allocation3 + $0x70] sm:$0xf] %v7620_v18  ;;  %7854 = vst [vmem:[#allocation3 + $0x74] sm:$0x1] %v7853_v16  ;;  %v7328_v0 = vadd.f32 %v20069_v6, %v7290_v48  ;;  %v9042_v45 = vsel %vm17204_vm6, %v13522_v49, %v9041_v19  ;;  %v9043_v36 = vrot.slane %v9041_v19, 4  ;;  %v8109_v5 = vrot.slane %v8108_v14, 4  ;;  %v20127_v48 = vpop.f32.mrf.mxu0 }
 0x403   : > { %v7623_v21 = vshrl.u32 %v13758_v20, 16  ;;  %v7626_v50 = vshll.u32 %v13758_v20, 16  ;;  %v9044_v34 = vrot.slane %v7961_v61, 5  ;;  %v8104_v8 = vsel %vm16510_vm0, %v8099_v62, %v8103_v47  ;;  %v20132_v20 = vld [vmem:[#allocation3 + $0x58] sm:$0xf] }
 0x404   : > { %v7360_v43 = vmax.f32 %v7328_v0, 0.0  ;;  %v14747_v28 = vadd.f32 %v20047_v15, %v20040_v2  ;;  %v8116_v17 = vshrl.u32 %v7919_v38, 16  ;;  %v8114_v52 = vsel %vm16510_vm0, %v8109_v5, %v8113_v33  ;;  %v8956_v33 = vld [vmem:[#allocation3 + $0x54] sm:$0xe] }
 0x405   : > { %v7625_v25 = vrot.slane %v7623_v21, 7  ;;  %v9045_v54 = vsel %vm17204_vm6, %v9043_v36, %v9044_v34  ;;  %v8119_v39 = vshll.u32 %v7919_v38, 16  ;;  %v13473_v59 = vcombine.low %v8104_v8, %v8114_v52  ;;  %v7859_v36 = vld [vmem:[#allocation3 + $0x80] sm:$0x1] }
 0x406   : > { %v13759_v23 = vpack.c.bf16 %v7360_v43, %v7360_v43  ;;  %v13538_v35 = vcombine.low %v9042_v45, %v9045_v54  ;;  %v7291_v47 = vadd.f32 %v14747_v28, %v19836_v27  ;;  %v8118_v2 = vrot.slane %v8116_v17, 4  ;;  %v7962_v45 = vld [vmem:[#allocation3 + $0x5c] sm:$0x1] }
 0x407   : > { %v7628_v49 = vor.u32 %v7626_v50, %v7625_v25  ;;  %v7629_v12 = vrot.slane %v7625_v25, 4  ;;  %v8121_v15 = vrot.slane %v8119_v39, 5  ;;  %15022 = vmatmul.mubr.bf16.gmra.mxu1 %v13473_v59  ;;  %v8125_v4 = vshll.u32 %v20099_v40, 16 }
 0x408   : > { %v7631_v7 = vshrl.u32 %v13759_v23, 16  ;;  %v7634_v44 = vshll.u32 %v13759_v23, 16  ;;  %15121 = vmatprep.mubr.bf16.mxu0 %v13538_v35  ;;  %v7329_v32 = vadd.f32 %v20069_v6, %v7291_v47  ;;  %v8129_v27 = vshrl.u32 %v20099_v40, 16 }
 0x409   : > { %v7856_v19 = vsel %vm16494_vm2, %v7628_v49, %v7855_v55  ;;  %v8122_v18 = vor.u32 %v8121_v15, %v8118_v2  ;;  %v8135_v16 = vshll.u32 %v7961_v61, 16  ;;  %v8127_v62 = vrot.slane %v8125_v4, 5  ;;  %v14758_v61 = vpop.f32.mrf.mxu0 }
 0x40a   : > { %7857 = vst [vmem:[#allocation3 + $0x78] sm:$0xf] %v7856_v19  ;;  %v7633_v14 = vrot.slane %v7631_v7, 7  ;;  %v7361_v38 = vmax.f32 %v7329_v32, 0.0  ;;  %v14750_v0 = vadd.f32 %v20064_v41, %v20059_v22  ;;  %v8131_v50 = vrot.slane %v8129_v27, 4 }
 0x40b   : > { %v8123_v21 = vrot.slane %v8122_v18, 4  ;;  %v8137_v5 = vrot.slane %v8135_v16, 5  ;;  %v13523_v34 = vrot.slane %v8956_v33, 9  ;;  %v9048_v52 = vrot.slane %v20132_v20, 5  ;;  %v7921_v22 = vld [vmem:[#allocation3 + $0x54] sm:$0xf]  ;;  %v20149_v7 = vpop.f32.mrf.mxu0 }
 0x40c   : > { %v7636_v8 = vor.u32 %v7634_v44, %v7633_v14  ;;  %v7638_v43 = vrot.slane %v7633_v14, 4  ;;  %v13760_v28 = vpack.c.bf16 %v7361_v38, %v7361_v38  ;;  %v7292_v40 = vadd.f32 %v14750_v0, %v19839_v58  ;;  %v7862_v44 = vld [vmem:[#allocation3 + $0x84] sm:$0xf]  ;;  %v8957_v38 = vld [vmem:[#allocation3 + $0x60] sm:$0xe] }
 0x40d   : > { %v8128_v17 = vsel %vm16510_vm0, %v8123_v21, %v8127_v62  ;;  %v8132_v25 = vor.u32 %v8131_v50, %v8127_v62  ;;  %v9051_v54 = vrot.slane %v7962_v45, 5  ;;  %v9049_v35 = vsel %vm17204_vm6, %v13523_v34, %v9048_v52  ;;  %v20160_v34 = vld [vmem:[#allocation3 + $0x64] sm:$0xf] }
 0x40e   : > { %v7637_v41 = vsel %vm16485_vm1, %v7629_v12, %v7636_v8  ;;  %v7860_v39 = vsel %vm16435_vm4, %v7638_v43, %v7859_v36  ;;  %v7640_v55 = vshrl.u32 %v13760_v28, 16  ;;  %v7643_v59 = vshll.u32 %v13760_v28, 16  ;;  %v20162_v8 = vpop.f32.mrf.mxu0 }
 0x40f   : > { %7858 = vst [vmem:[#allocation3 + $0x7c] sm:$0xf] %v7637_v41  ;;  %7861 = vst [vmem:[#allocation3 + $0x80] sm:$0x1] %v7860_v39  ;;  %v8133_v58 = vrot.slane %v8132_v25, 4  ;;  %v7330_v23 = vadd.f32 %v20069_v6, %v7292_v40  ;;  %v9050_v47 = vrot.slane %v9048_v52, 4  ;;  %v14753_v2 = vadd.f32 %v20094_v1, %v20082_v46 }
 0x410   : > { %v7642_v49 = vrot.slane %v7640_v55, 7  ;;  %v8140_v15 = vshrl.u32 %v7921_v22, 16  ;;  %v8143_v12 = vshll.u32 %v7921_v22, 16  ;;  %v8149_v19 = vshll.u32 %v20132_v20, 16  ;;  %v7866_v55 = vld [vmem:[#allocation3 + $0x8c] sm:$0x1] }
 0x411   : > { %v8138_v32 = vsel %vm16510_vm0, %v8133_v58, %v8137_v5  ;;  %v7362_v4 = vmax.f32 %v7330_v23, 0.0  ;;  %v9052_v33 = vsel %vm17204_vm6, %v9050_v47, %v9051_v54  ;;  %v7293_v1 = vadd.f32 %v14753_v2, %v19846_v10  ;;  %v20173_v47 = vpop.f32.mrf.mxu0 }
 0x412   : > { %v7645_v18 = vor.u32 %v7643_v59, %v7642_v49  ;;  %v7646_v27 = vrot.slane %v7642_v49, 4  ;;  %v13474_v16 = vcombine.low %v8128_v17, %v8138_v32  ;;  %v13539_v14 = vcombine.low %v9049_v35, %v9052_v33  ;;  %v20165_v17 = vld [vmem:[#allocation3 + $0x68] sm:$0x1] }
 0x413   : > { %v13761_v46 = vpack.c.bf16 %v7362_v4, %v7362_v4  ;;  %v8142_v62 = vrot.slane %v8140_v15, 4  ;;  %v8145_v0 = vrot.slane %v8143_v12, 5  ;;  %v8151_v21 = vrot.slane %v8149_v19, 5  ;;  %v7923_v4 = vld [vmem:[#allocation3 + $0x60] sm:$0xf] }
 0x414   : > { %v7863_v36 = vsel %vm16494_vm2, %v7645_v18, %v7862_v44  ;;  %15025 = vmatprep.mubr.bf16.mxu1 %v13474_v16  ;;  %15122 = vmatmul.mubr.bf16.gmra.mxu0 %v13539_v14  ;;  %v8153_v50 = vshrl.u32 %v20132_v20, 16  ;;  %v8159_v5 = vshll.u32 %v7962_v45, 16  ;;  %v7331_v10 = vadd.f32 %v20069_v6, %v7293_v1 }
 0x415   : > { %7864 = vst [vmem:[#allocation3 + $0x84] sm:$0xf] %v7863_v36  ;;  %v7648_v43 = vshrl.u32 %v13761_v46, 16  ;;  %v7651_v28 = vshll.u32 %v13761_v46, 16  ;;  %v8146_v40 = vor.u32 %v8145_v0, %v8142_v62  ;;  %v14756_v54 = vadd.f32 %v20118_v24, %v20105_v37  ;;  %v15803_v24 = vld [vmem:[#allocation10 + $0x1b8] sm:$0xff]   ;;  %v14764_v46 = vpop.f32.mrf.mxu0 }
 0x416   : > { %v8155_v25 = vrot.slane %v8153_v50, 4  ;;  %v8161_v52 = vrot.slane %v8159_v5, 5  ;;  %v13524_v22 = vrot.slane %v8957_v38, 9  ;;  %v7363_v45 = vmax.f32 %v7331_v10, 0.0  ;;  %15285 = vmatprep.subr.bf16.mxu0 %v15803_v24 }
 0x417   : > { %v7650_v20 = vrot.slane %v7648_v43, 7  ;;  %v8147_v41 = vrot.slane %v8146_v40, 4  ;;  %v9055_v39 = vrot.slane %v20160_v34, 5  ;;  %v7294_v58 = vadd.f32 %v14756_v54, %v19850_v29 }
 0x418   : > { %v8156_v59 = vor.u32 %v8155_v25, %v8151_v21  ;;  %v9058_v23 = vrot.slane %v20165_v17, 5  ;;  %v14759_v35 = vadd.f32 %v14758_v61, %v20127_v48  ;;  %v13762_v15 = vpack.c.bf16 %v7363_v45, %v7363_v45  ;;  %v20192_v45 = vld [vmem:[#allocation3 + $0x70] sm:$0xf] }
 0x419   : > { %v7653_v49 = vor.u32 %v7651_v28, %v7650_v20  ;;  %v7655_v2 = vrot.slane %v7650_v20, 4  ;;  %v8152_v37 = vsel %vm16510_vm0, %v8147_v41, %v8151_v21  ;;  %v7332_v44 = vadd.f32 %v20069_v6, %v7294_v58  ;;  %v20194_v41 = vpop.f32.mrf.mxu0 }
 0x41a   : > { %v8157_v12 = vrot.slane %v8156_v59, 4  ;;  %v9056_v32 = vsel %vm17204_vm6, %v13524_v22, %v9055_v39  ;;  %v9057_v29 = vrot.slane %v9055_v39, 4  ;;  %v7657_v33 = vshrl.u32 %v13762_v15, 16 }
 0x41b   : > { %v7654_v48 = vsel %vm16485_vm1, %v7646_v27, %v7653_v49  ;;  %v7867_v61 = vsel %vm16435_vm4, %v7655_v2, %v7866_v55  ;;  %v7660_v19 = vshll.u32 %v13762_v15, 16  ;;  %v7364_v16 = vmax.f32 %v7332_v44, 0.0  ;;  %v7869_v27 = vld [vmem:[#allocation3 + $0x90] sm:$0xf]  ;;  %v7873_v2 = vld [vmem:[#allocation3 + $0x98] sm:$0x1] }
 0x41c   : > { %7865 = vst [vmem:[#allocation3 + $0x88] sm:$0xf] %v7654_v48  ;;  %7868 = vst [vmem:[#allocation3 + $0x8c] sm:$0x1] %v7867_v61  ;;  %v8162_v18 = vsel %vm16510_vm0, %v8157_v12, %v8161_v52  ;;  %v9059_v14 = vsel %vm17204_vm6, %v9057_v29, %v9058_v23  ;;  %v7295_v38 = vadd.f32 %v14759_v35, %v19853_v60  ;;  %v7659_v1 = vrot.slane %v7657_v33, 7  ;;  %v14767_v61 = vpop.f32.mrf.mxu0 }
 0x41d   : > { %v13475_v62 = vcombine.low %v8152_v37, %v8162_v18  ;;  %v13540_v0 = vcombine.low %v9056_v32, %v9059_v14  ;;  %v8164_v36 = vshrl.u32 %v7923_v4, 16  ;;  %v13763_v21 = vpack.c.bf16 %v7364_v16, %v7364_v16  ;;  %v8958_v60 = vld [vmem:[#allocation3 + $0x6c] sm:$0xe]  ;;  %v7964_v48 = vld [vmem:[#allocation3 + $0x74] sm:$0x1] }
 0x41e   : > { %v7333_v50 = vadd.f32 %v20069_v6, %v7295_v38  ;;  %v8167_v5 = vshll.u32 %v7923_v4, 16  ;;  %v8173_v43 = vshll.u32 %v20160_v34, 16  ;;  %v7662_v28 = vor.u32 %v7660_v19, %v7659_v1 }
 0x41f   : > { %v7663_v10 = vrot.slane %v7659_v1, 4  ;;  %15026 = vmatmul.mubr.bf16.gmra.mxu1 %v13475_v62  ;;  %15125 = vmatprep.mubr.bf16.mxu0 %v13540_v0  ;;  %v8166_v40 = vrot.slane %v8164_v36, 4  ;;  %v8177_v25 = vshrl.u32 %v20160_v34, 16  ;;  %v7665_v52 = vshrl.u32 %v13763_v21, 16  ;;  %v7876_v1 = vld [vmem:[#allocation3 + $0x9c] sm:$0xf] }
 0x420   : > { %v7668_v54 = vshll.u32 %v13763_v21, 16  ;;  %v7365_v22 = vmax.f32 %v7333_v50, 0.0  ;;  %v8169_v20 = vrot.slane %v8167_v5, 5  ;;  %v7870_v39 = vsel %vm16494_vm2, %v7662_v28, %v7869_v27 }
 0x421   : > { %v8175_v55 = vrot.slane %v8173_v43, 5  ;;  %v8179_v59 = vrot.slane %v8177_v25, 4  ;;  %v8183_v58 = vshll.u32 %v20165_v17, 16  ;;  %7871 = vst [vmem:[#allocation3 + $0x90] sm:$0xf] %v7870_v39  ;;  %v7667_v23 = vrot.slane %v7665_v52, 7  ;;  %v20219_v43 = vpop.f32.mrf.mxu0 }
 0x422   : > { %v13764_v35 = vpack.c.bf16 %v7365_v22, %v7365_v22  ;;  %v8170_v34 = vor.u32 %v8169_v20, %v8166_v40  ;;  %v14762_v49 = vadd.f32 %v20162_v8, %v20149_v7  ;;  %v13525_v24 = vrot.slane %v8958_v60, 9  ;;  %v7925_v7 = vld [vmem:[#allocation3 + $0x6c] sm:$0xf]  ;;  %v570_v60 = vld [vmem:[#allocation3 + $0xb0] sm:$0x1] }
 0x423   : > { %v8180_v15 = vor.u32 %v8179_v59, %v8175_v55  ;;  %v8185_v37 = vrot.slane %v8183_v58, 5  ;;  %v9062_v12 = vrot.slane %v20192_v45, 5  ;;  %v7670_v44 = vor.u32 %v7668_v54, %v7667_v23  ;;  %v20227_v39 = vld [vmem:[#allocation3 + $0x7c] sm:$0xf] }
 0x424   : > { %v7672_v32 = vrot.slane %v7667_v23, 4  ;;  %v7674_v29 = vshrl.u32 %v13764_v35, 16  ;;  %v7677_v4 = vshll.u32 %v13764_v35, 16  ;;  %v8171_v17 = vrot.slane %v8170_v34, 4  ;;  %v519_v23 = vld [vmem:[#allocation3 + $0xb4] sm:$0x1] }
 0x425   : > { %v8181_v33 = vrot.slane %v8180_v15, 4  ;;  %v7296_v19 = vadd.f32 %v14762_v49, %v19864_v51  ;;  %v9063_v18 = vsel %vm17204_vm6, %v13525_v24, %v9062_v12  ;;  %v7671_v8 = vsel %vm16485_vm1, %v7663_v10, %v7670_v44  ;;  %v20233_v44 = vld [vmem:[#allocation3 + $0x80] sm:$0x1] }
 0x426   : > { %v7874_v16 = vsel %vm16435_vm4, %v7672_v32, %v7873_v2  ;;  %v20209_v14 = vrot.slane %v7674_v29, 7  ;;  %v9064_v38 = vrot.slane %v9062_v12, 4  ;;  %7872 = vst [vmem:[#allocation3 + $0x94] sm:$0xf] %v7671_v8  ;;  %v8176_v27 = vsel %vm16510_vm0, %v8171_v17, %v8175_v55  ;;  %v14770_v2 = vpop.f32.mrf.mxu0 }
 0x427   : > { %7875 = vst [vmem:[#allocation3 + $0x98] sm:$0x1] %v7874_v16  ;;  %v8186_v51 = vsel %vm16510_vm0, %v8181_v33, %v8185_v37  ;;  %v7334_v62 = vadd.f32 %v20069_v6, %v7296_v19  ;;  %v9065_v0 = vrot.slane %v7964_v48, 5  ;;  %v14765_v5 = vadd.f32 %v14764_v46, %v20173_v47  ;;  %v8959_v47 = vld [vmem:[#allocation3 + $0x78] sm:$0xe] }
 0x428   : > { %v7679_v36 = vor.u32 %v7677_v4, %v20209_v14  ;;  %v7680_v21 = vrot.slane %v20209_v14, 4  ;;  %v13476_v50 = vcombine.low %v8176_v27, %v8186_v51  ;;  %v8188_v40 = vshrl.u32 %v7925_v7, 16 }
 0x429   : > { %v7366_v28 = vmax.f32 %v7334_v62, 0.0  ;;  %v9066_v10 = vsel %vm17204_vm6, %v9064_v38, %v9065_v0  ;;  %v8191_v25 = vshll.u32 %v7925_v7, 16  ;;  %v7297_v22 = vadd.f32 %v14765_v5, %v19868_v3  ;;  %v14772_v38 = vpop.f32.mrf.mxu0 }
 0x42a   : > { %v7877_v52 = vsel %vm16494_vm2, %v7679_v36, %v7876_v1  ;;  %15029 = vmatprep.mubr.bf16.mxu1 %v13476_v50  ;;  %v13541_v54 = vcombine.low %v9063_v18, %v9066_v10  ;;  %v8197_v20 = vshll.u32 %v20192_v45, 16  ;;  %v8190_v55 = vrot.slane %v8188_v40, 4  ;;  %v7880_v18 = vld [vmem:[#allocation3 + $0xa4] sm:$0x1]  ;;  %v7927_v36 = vld [vmem:[#allocation3 + $0x78] sm:$0xf] }
 0x42b   : > { %7878 = vst [vmem:[#allocation3 + $0x9c] sm:$0xf] %v7877_v52  ;;  %v13765_v46 = vpack.c.bf16 %v7366_v28, %v7366_v28  ;;  %v8193_v59 = vrot.slane %v8191_v25, 5  ;;  %v8201_v58 = vshrl.u32 %v20192_v45, 16  ;;  %v7335_v35 = vadd.f32 %v20069_v6, %v7297_v22  ;;  %v7883_v25 = vld [vmem:[#allocation3 + $0xa8] sm:$0xf] }
 0x42c   : > { %15126 = vmatmul.mubr.bf16.gmra.mxu0 %v13541_v54  ;;  %v8199_v34 = vrot.slane %v8197_v20, 5  ;;  %v8207_v49 = vshll.u32 %v7964_v48, 16  ;;  %v571_v3 = vsel %vm16447_vm8, 0, %v570_v60  ;;  %v14768_v45 = vadd.f32 %v14767_v61, %v20194_v41  ;;  %v573_v22 = vld [vmem:[#allocation3 + $0xbc] sm:$0x1]  ;;  %v14773_v20 = vpop.f32.mrf.mxu0 }
 0x42d   : > { %v7682_v15 = vshrl.u32 %v13765_v46, 16  ;;  %v7685_v37 = vshll.u32 %v13765_v46, 16  ;;  %v8194_v24 = vor.u32 %v8193_v59, %v8190_v55  ;;  %v8203_v12 = vrot.slane %v8201_v58, 4  ;;  %572 = vst [vmem:[#allocation3 + $0xb0] sm:$0x1] %v571_v3 }
 0x42e   : > { %v7367_v32 = vmax.f32 %v7335_v35, 0.0  ;;  %v8209_v29 = vrot.slane %v8207_v49, 5  ;;  %v13526_v4 = vrot.slane %v8959_v47, 9  ;;  %v9069_v48 = vrot.slane %v20227_v39, 5  ;;  %v8960_v59 = vld [vmem:[#allocation3 + $0x84] sm:$0xe] }
 0x42f   : > { %v7684_v17 = vrot.slane %v7682_v15, 7  ;;  %v8195_v33 = vrot.slane %v8194_v24, 4  ;;  %v8204_v19 = vor.u32 %v8203_v12, %v8199_v34  ;;  %v7298_v8 = vadd.f32 %v14768_v45, %v19919_v53 }
 0x430   : > { %v13766_v7 = vpack.c.bf16 %v7367_v32, %v7367_v32  ;;  %v9072_v16 = vrot.slane %v20233_v44, 5  ;;  %v520_v14 = vsel %vm16435_vm4, 0, %v519_v23  ;;  %v9070_v53 = vsel %vm17204_vm6, %v13526_v4, %v9069_v48  ;;  %v20260_v32 = vld [vmem:[#allocation3 + $0x88] sm:$0xf] }
 0x431   : > { %v7687_v1 = vor.u32 %v7685_v37, %v7684_v17  ;;  %v7689_v27 = vrot.slane %v7684_v17, 4  ;;  %v8200_v41 = vsel %vm16510_vm0, %v8195_v33, %v8199_v34  ;;  %v8205_v61 = vrot.slane %v8204_v19, 4  ;;  %521 = vst [vmem:[#allocation3 + $0xb4] sm:$0x1] %v520_v14 }
 0x432   : > { %v7691_v51 = vshrl.u32 %v13766_v7, 16  ;;  %v7694_v62 = vshll.u32 %v13766_v7, 16  ;;  %v7336_v0 = vadd.f32 %v20069_v6, %v7298_v8  ;;  %v9071_v10 = vrot.slane %v9069_v48, 4 }
 0x433   : > { %v7688_v50 = vsel %vm16485_vm1, %v7680_v21, %v7687_v1  ;;  %v7881_v5 = vsel %vm16435_vm4, %v7689_v27, %v7880_v18  ;;  %v8210_v28 = vsel %vm16510_vm0, %v8205_v61, %v8209_v29  ;;  %v14771_v54 = vadd.f32 %v14770_v2, %v20219_v43  ;;  %v14775_v29 = vpop.f32.mrf.mxu0 }
 0x434   : > { %7879 = vst [vmem:[#allocation3 + $0xa0] sm:$0xf] %v7688_v50  ;;  %7882 = vst [vmem:[#allocation3 + $0xa4] sm:$0x1] %v7881_v5  ;;  %v7693_v40 = vrot.slane %v7691_v51, 7  ;;  %v13477_v60 = vcombine.low %v8200_v41, %v8210_v28  ;;  %v7368_v52 = vmax.f32 %v7336_v0, 0.0  ;;  %v9073_v21 = vsel %vm17204_vm6, %v9071_v10, %v9072_v16 }
 0x435   : > { %v8212_v47 = vshrl.u32 %v7927_v36, 16  ;;  %v8215_v46 = vshll.u32 %v7927_v36, 16  ;;  %v8221_v55 = vshll.u32 %v20227_v39, 16  ;;  %v13542_v34 = vcombine.low %v9070_v53, %v9073_v21  ;;  %v7887_v7 = vld [vmem:[#allocation3 + $0xb0] sm:$0x1] }
 0x436   : > { %v7696_v58 = vor.u32 %v7694_v62, %v7693_v40  ;;  %v7697_v23 = vrot.slane %v7693_v40, 4  ;;  %15030 = vmatmul.mubr.bf16.gmra.mxu1 %v13477_v60  ;;  %v13767_v35 = vpack.c.bf16 %v7368_v52, %v7368_v52  ;;  %v7299_v49 = vadd.f32 %v14771_v54, %v19936_v57  ;;  %v522_v51 = vld [vmem:[#allocation3 + $0xc0] sm:$0x1]  ;;  %v14776_v62 = vpop.f32.mrf.mxu0  ;;  %v7929_v50 = vld [vmem:[#allocation3 + $0x84] sm:$0xf] }
 0x437   : > { %v8214_v3 = vrot.slane %v8212_v47, 4  ;;  %v8217_v15 = vrot.slane %v8215_v46, 5  ;;  %v8223_v43 = vrot.slane %v8221_v55, 5  ;;  %15129 = vmatprep.mubr.bf16.mxu0 %v13542_v34  ;;  %v8225_v12 = vshrl.u32 %v20227_v39, 16 }
 0x438   : > { %v7884_v2 = vsel %vm16494_vm2, %v7696_v58, %v7883_v25  ;;  %v7699_v37 = vshrl.u32 %v13767_v35, 16  ;;  %v7702_v24 = vshll.u32 %v13767_v35, 16  ;;  %v7337_v45 = vadd.f32 %v20069_v6, %v7299_v49  ;;  %v14778_v47 = vpop.f32.mrf.mxu0  ;;  %v7890_v35 = vld [vmem:[#allocation3 + $0xb4] sm:$0xf] }
 0x439   : > { %7885 = vst [vmem:[#allocation3 + $0xa8] sm:$0xf] %v7884_v2  ;;  %v8218_v4 = vor.u32 %v8217_v15, %v8214_v3  ;;  %v8231_v57 = vshll.u32 %v20233_v44, 16  ;;  %v574_v17 = vsel %vm16447_vm8, 0, %v573_v22  ;;  %v8227_v19 = vrot.slane %v8225_v12, 4 }
 0x43a   : > { %v7701_v33 = vrot.slane %v7699_v37, 7  ;;  %575 = vst [vmem:[#allocation3 + $0xbc] sm:$0x1] %v574_v17  ;;  %v14774_v48 = vadd.f32 %v14773_v20, %v14772_v38  ;;  %v13527_v18 = vrot.slane %v8960_v59, 9  ;;  %v7369_v8 = vmax.f32 %v7337_v45, 0.0 }
 0x43b   : > { %v8219_v39 = vrot.slane %v8218_v4, 4  ;;  %v8233_v16 = vrot.slane %v8231_v57, 5  ;;  %v9076_v14 = vrot.slane %v20260_v32, 5  ;;  %v8228_v41 = vor.u32 %v8227_v19, %v8223_v43  ;;  %v7966_v44 = vld [vmem:[#allocation3 + $0x8c] sm:$0x1]  ;;  %v14779_v57 = vpop.f32.mrf.mxu0 }
 0x43c   : > { %v7704_v1 = vor.u32 %v7702_v24, %v7701_v33  ;;  %v7706_v27 = vrot.slane %v7701_v33, 4  ;;  %v7300_v61 = vadd.f32 %v14774_v48, %v19960_v63  ;;  %v13768_v0 = vpack.c.bf16 %v7369_v8, %v7369_v8  ;;  %v8961_v17 = vld [vmem:[#allocation3 + $0x90] sm:$0xe] }
 0x43d   : > { %v8224_v53 = vsel %vm16510_vm0, %v8219_v39, %v8223_v43  ;;  %v9077_v38 = vsel %vm17204_vm6, %v13527_v18, %v9076_v14  ;;  %v9078_v36 = vrot.slane %v9076_v14, 4  ;;  %v8229_v10 = vrot.slane %v8228_v41, 4  ;;  %v20289_v18 = vld [vmem:[#allocation3 + $0x94] sm:$0xf]  ;;  %v7967_v14 = vld [vmem:[#allocation3 + $0x98] sm:$0x1] }
 0x43e   : > { %v7705_v5 = vsel %vm16485_vm1, %v7697_v23, %v7704_v1  ;;  %v7888_v28 = vsel %vm16435_vm4, %v7706_v27, %v7887_v7  ;;  %v7338_v63 = vadd.f32 %v20069_v6, %v7300_v61  ;;  %v7708_v40 = vshrl.u32 %v13768_v0, 16  ;;  %v576_v23 = vld [vmem:[#allocation3 + $0xc8] sm:$0x1] }
 0x43f   : > { %7886 = vst [vmem:[#allocation3 + $0xac] sm:$0xf] %v7705_v5  ;;  %7889 = vst [vmem:[#allocation3 + $0xb0] sm:$0x1] %v7888_v28  ;;  %v7711_v25 = vshll.u32 %v13768_v0, 16  ;;  %v9079_v60 = vrot.slane %v7966_v44, 5  ;;  %v8234_v54 = vsel %vm16510_vm0, %v8229_v10, %v8233_v16  ;;  %v14777_v20 = vadd.f32 %v14776_v62, %v14775_v29 }
 0x440   : > { %v523_v52 = vsel %vm16435_vm4, 0, %v522_v51  ;;  %v7370_v22 = vmax.f32 %v7338_v63, 0.0  ;;  %v8236_v21 = vshrl.u32 %v7929_v50, 16  ;;  %v7710_v46 = vrot.slane %v7708_v40, 7  ;;  %v20297_v5 = vld [vmem:[#allocation3 + $0x90] sm:$0xf] }
 0x441   : > { %524 = vst [vmem:[#allocation3 + $0xc0] sm:$0x1] %v523_v52  ;;  %v13478_v55 = vcombine.low %v8224_v53, %v8234_v54  ;;  %v9080_v59 = vsel %vm17204_vm6, %v9078_v36, %v9079_v60  ;;  %v8239_v58 = vshll.u32 %v7929_v50, 16  ;;  %v7301_v3 = vadd.f32 %v14777_v20, %v19988_v42  ;;  %v7894_v1 = vld [vmem:[#allocation3 + $0xbc] sm:$0x1] }
 0x442   : > { %v13769_v34 = vpack.c.bf16 %v7370_v22, %v7370_v22  ;;  %v13543_v49 = vcombine.low %v9077_v38, %v9080_v59  ;;  %v8238_v15 = vrot.slane %v8236_v21, 4  ;;  %v7713_v43 = vor.u32 %v7711_v25, %v7710_v46 }
 0x443   : > { %v7714_v2 = vrot.slane %v7710_v46, 4  ;;  %15033 = vmatprep.mubr.bf16.mxu1 %v13478_v55  ;;  %v8241_v37 = vrot.slane %v8239_v58, 5  ;;  %v8245_v24 = vshll.u32 %v20260_v32, 16  ;;  %v7339_v45 = vadd.f32 %v20069_v6, %v7301_v3 }
 0x444   : > { %v7716_v12 = vshrl.u32 %v13769_v34, 16  ;;  %v7719_v29 = vshll.u32 %v13769_v34, 16  ;;  %15130 = vmatmul.mubr.bf16.gmra.mxu0 %v13543_v49  ;;  %v8249_v4 = vshrl.u32 %v20260_v32, 16  ;;  %v7891_v33 = vsel %vm16494_vm2, %v7713_v43, %v7890_v35  ;;  %v7968_v43 = vld [vmem:[#allocation3 + $0xa4] sm:$0x1] }
 0x445   : > { %v8242_v42 = vor.u32 %v8241_v37, %v8238_v15  ;;  %v8247_v19 = vrot.slane %v8245_v24, 5  ;;  %v8255_v48 = vshll.u32 %v7966_v44, 16  ;;  %7892 = vst [vmem:[#allocation3 + $0xb4] sm:$0xf] %v7891_v33  ;;  %v7371_v8 = vmax.f32 %v7339_v45, 0.0 }
 0x446   : > { %v7718_v7 = vrot.slane %v7716_v12, 7  ;;  %v8251_v39 = vrot.slane %v8249_v4, 4  ;;  %v577_v16 = vsel %vm16447_vm8, 0, %v576_v23  ;;  %v14780_v41 = vadd.f32 %v14779_v57, %v14778_v47  ;;  %v8962_v47 = vld [vmem:[#allocation3 + $0x9c] sm:$0xe] }
 0x447   : > { %v8243_v32 = vrot.slane %v8242_v42, 4  ;;  %v8257_v27 = vrot.slane %v8255_v48, 5  ;;  %578 = vst [vmem:[#allocation3 + $0xc8] sm:$0x1] %v577_v16  ;;  %v13528_v61 = vrot.slane %v8961_v17, 9  ;;  %v13770_v0 = vpack.c.bf16 %v7371_v8, %v7371_v8 }
 0x448   : > { %v7721_v51 = vor.u32 %v7719_v29, %v7718_v7  ;;  %v7723_v62 = vrot.slane %v7718_v7, 4  ;;  %v8252_v44 = vor.u32 %v8251_v39, %v8247_v19  ;;  %v7302_v38 = vadd.f32 %v14780_v41, %v20016_v26  ;;  %v7897_v46 = vld [vmem:[#allocation3 + $0xc0] sm:$0xf]  ;;  %v20314_v23 = vld [vmem:[#allocation3 + $0x9c] sm:$0xf] }
 0x449   : > { %v8248_v53 = vsel %vm16510_vm0, %v8243_v32, %v8247_v19  ;;  %v9083_v36 = vrot.slane %v20289_v18, 5  ;;  %v9086_v50 = vrot.slane %v7967_v14, 5  ;;  %v7725_v63 = vshrl.u32 %v13770_v0, 16  ;;  %v20316_v15 = vld [vmem:[#allocation3 + $0xa0] sm:$0xf] }
 0x44a   : > { %v7722_v28 = vsel %vm16485_vm1, %v7714_v2, %v7721_v51  ;;  %v7895_v10 = vsel %vm16435_vm4, %v7723_v62, %v7894_v1  ;;  %v7728_v40 = vshll.u32 %v13770_v0, 16  ;;  %v8253_v25 = vrot.slane %v8252_v44, 4  ;;  %v20326_v0 = vld [vmem:[#allocation3 + $0xa8] sm:$0xf] }
 0x44b   : > { %7893 = vst [vmem:[#allocation3 + $0xb8] sm:$0xf] %v7722_v28  ;;  %7896 = vst [vmem:[#allocation3 + $0xbc] sm:$0x1] %v7895_v10  ;;  %v7340_v60 = vadd.f32 %v20069_v6, %v7302_v38  ;;  %v9084_v26 = vsel %vm17204_vm6, %v13528_v61, %v9083_v36  ;;  %v9085_v52 = vrot.slane %v9083_v36, 4  ;;  %v7727_v54 = vrot.slane %v7725_v63, 7 }
 0x44c   : > { %v8260_v22 = vshrl.u32 %v20297_v5, 16  ;;  %v8263_v20 = vshll.u32 %v20297_v5, 16  ;;  %v8269_v21 = vshll.u32 %v20289_v18, 16  ;;  %v8258_v55 = vsel %vm16510_vm0, %v8253_v25, %v8257_v27  ;;  %v8963_v27 = vld [vmem:[#allocation3 + $0xa8] sm:$0xe] }
 0x44d   : > { %v7372_v59 = vmax.f32 %v7340_v60, 0.0  ;;  %v9087_v6 = vsel %vm17204_vm6, %v9085_v52, %v9086_v50  ;;  %v8273_v58 = vshrl.u32 %v20289_v18, 16  ;;  %v7730_v35 = vor.u32 %v7728_v40, %v7727_v54  ;;  %v20332_v50 = vld [vmem:[#allocation3 + $0xac] sm:$0xf]  ;;  %v7969_v25 = vld [vmem:[#allocation3 + $0xb0] sm:$0x1] }
 0x44e   : > { %v7731_v34 = vrot.slane %v7727_v54, 4  ;;  %v13479_v49 = vcombine.low %v8248_v53, %v8258_v55  ;;  %v13544_v3 = vcombine.low %v9084_v26, %v9087_v6  ;;  %v8262_v37 = vrot.slane %v8260_v22, 4  ;;  %v8964_v6 = vld [vmem:[#allocation3 + $0xb4] sm:$0xe] }
 0x44f   : > { %v13771_v2 = vpack.c.bf16 %v7372_v59, %v7372_v59  ;;  %v8265_v24 = vrot.slane %v8263_v20, 5  ;;  %v8271_v12 = vrot.slane %v8269_v21, 5  ;;  %v7898_v29 = vsel %vm16494_vm2, %v7730_v35, %v7897_v46 }
 0x450   : > { %15034 = vmatmul.mubr.bf16.gmra.mxu1 %v13479_v49  ;;  %15133 = vmatprep.mubr.bf16.mxu0 %v13544_v3  ;;  %v8275_v45 = vrot.slane %v8273_v58, 4  ;;  %v8279_v4 = vshll.u32 %v7967_v14, 16  ;;  %v13529_v57 = vrot.slane %v8962_v47, 9  ;;  %7899 = vst [vmem:[#allocation3 + $0xc0] sm:$0xf] %v7898_v29  ;;  %v9090_v19 = vrot.slane %v20316_v15, 5 }
 0x451   : > { %v7733_v17 = vshrl.u32 %v13771_v2, 16  ;;  %v7736_v33 = vshll.u32 %v13771_v2, 16  ;;  %v8266_v42 = vor.u32 %v8265_v24, %v8262_v37  ;;  %v9093_v8 = vrot.slane %v7968_v43, 5  ;;  %v7901_v14 = vld [vmem:[#allocation3 + $0xc8] sm:$0x1] }
 0x452   : > { %v8276_v48 = vor.u32 %v8275_v45, %v8271_v12  ;;  %v8281_v7 = vrot.slane %v8279_v4, 5  ;;  %v8284_v39 = vshrl.u32 %v20314_v23, 16  ;;  %v9091_v11 = vsel %vm17204_vm6, %v13529_v57, %v9090_v19  ;;  %v20347_v24 = vld [vmem:[#allocation3 + $0xb8] sm:$0xf]  ;;  %v7970_v57 = vld [vmem:[#allocation3 + $0xbc] sm:$0x1] }
 0x453   : > { %v7735_v16 = vrot.slane %v7733_v17, 7  ;;  %v8267_v1 = vrot.slane %v8266_v42, 4  ;;  %v9092_v32 = vrot.slane %v9090_v19, 4  ;;  %v8287_v51 = vshll.u32 %v20314_v23, 16  ;;  %v9815_v17 = vld [vmem:[#allocation3 + $0xc] sm:$0xf] }
 0x454   : > { %v8277_v41 = vrot.slane %v8276_v48, 4  ;;  %v8286_v61 = vrot.slane %v8284_v39, 4  ;;  %v8293_v62 = vshll.u32 %v20316_v15, 16  ;;  %v8297_v54 = vshrl.u32 %v20316_v15, 16 }
 0x455   : > { %v7738_v44 = vor.u32 %v7736_v33, %v7735_v16  ;;  %v7740_v53 = vrot.slane %v7735_v16, 4  ;;  %v8272_v38 = vsel %vm16510_vm0, %v8267_v1, %v8271_v12  ;;  %v9094_v36 = vsel %vm17204_vm6, %v9092_v32, %v9093_v8  ;;  %v9816_v1 = vld [vmem:[#allocation3 + $0x10] sm:$0xf] }
 0x456   : > { %v8282_v28 = vsel %vm16510_vm0, %v8277_v41, %v8281_v7  ;;  %v13545_v10 = vcombine.low %v9091_v11, %v9094_v36  ;;  %v8289_v63 = vrot.slane %v8287_v51, 5  ;;  %v8295_v40 = vrot.slane %v8293_v62, 5 }
 0x457   : > { %v7739_v60 = vsel %vm16485_vm1, %v7731_v34, %v7738_v44  ;;  %v7902_v26 = vsel %vm16435_vm4, %v7740_v53, %v7901_v14  ;;  %v13480_v52 = vcombine.low %v8272_v38, %v8282_v28  ;;  %v8303_v20 = vshll.u32 %v7968_v43, 16  ;;  %v9817_v14 = vld [vmem:[#allocation3 + $0x14] sm:$0x1] }
 0x458   : > { %7900 = vst [vmem:[#allocation3 + $0xc4] sm:$0xf] %v7739_v60  ;;  %7903 = vst [vmem:[#allocation3 + $0xc8] sm:$0x1] %v7902_v26  ;;  %15134 = vmatmul.mubr.bf16.gmra.mxu0 %v13545_v10  ;;  %v8290_v22 = vor.u32 %v8289_v63, %v8286_v61  ;;  %v13530_v21 = vrot.slane %v8963_v27, 9  ;;  %v9097_v47 = vrot.slane %v20332_v50, 5 }
 0x459   : > { %15037 = vmatprep.mubr.bf16.mxu1 %v13480_v52  ;;  %v8299_v46 = vrot.slane %v8297_v54, 4  ;;  %v9100_v55 = vrot.slane %v7969_v25, 5  ;;  %v8308_v30 = vshrl.u32 %v20326_v0, 16  ;;  %v8311_v59 = vshll.u32 %v20326_v0, 16  ;;  %v20359_v53 = vld [vmem:[#allocation3 + $0xb4] sm:$0xf] }
 0x45a   : > { %v8291_v58 = vrot.slane %v8290_v22, 4  ;;  %v8305_v35 = vrot.slane %v8303_v20, 5  ;;  %v9098_v34 = vsel %vm17204_vm6, %v13530_v21, %v9097_v47  ;;  %v9099_v49 = vrot.slane %v9097_v47, 4 }
 0x45b   : > { %v8300_v3 = vor.u32 %v8299_v46, %v8295_v40  ;;  %v8310_v2 = vrot.slane %v8308_v30, 4  ;;  %v8313_v43 = vrot.slane %v8311_v59, 5  ;;  %v8317_v37 = vshll.u32 %v20332_v50, 16 }
 0x45c   : > { %v8296_v12 = vsel %vm16510_vm0, %v8291_v58, %v8295_v40  ;;  %v9101_v29 = vsel %vm17204_vm6, %v9099_v49, %v9100_v55  ;;  %v8321_v45 = vshrl.u32 %v20332_v50, 16  ;;  %v8327_v4 = vshll.u32 %v7969_v25, 16  ;;  %v9818_v55 = vld [vmem:[#allocation3 + $0x18] sm:$0xf] }
 0x45d   : > { %v8301_v33 = vrot.slane %v8300_v3, 4  ;;  %v13546_v42 = vcombine.low %v9098_v34, %v9101_v29  ;;  %v8314_v19 = vor.u32 %v8313_v43, %v8310_v2  ;;  %v8319_v48 = vrot.slane %v8317_v37, 5  ;;  %v9819_v2 = vld [vmem:[#allocation3 + $0x1c] sm:$0xf] }
 0x45e   : > { %v8323_v7 = vrot.slane %v8321_v45, 4  ;;  %v8329_v8 = vrot.slane %v8327_v4, 5  ;;  %v13531_v39 = vrot.slane %v8964_v6, 9  ;;  %v9104_v16 = vrot.slane %v20347_v24, 5 }
 0x45f   : > { %v8306_v11 = vsel %vm16510_vm0, %v8301_v33, %v8305_v35  ;;  %15137 = vmatprep.mubr.bf16.mxu0 %v13546_v42  ;;  %v8315_v32 = vrot.slane %v8314_v19, 4  ;;  %v9107_v27 = vrot.slane %v7970_v57, 5  ;;  %v9864_v41 = vshrl.u32 %v9815_v17, 16  ;;  %v9820_v42 = vld [vmem:[#allocation3 + $0x20] sm:$0x1] }
 0x460   : > { %v13481_v61 = vcombine.low %v8296_v12, %v8306_v11  ;;  %v8324_v51 = vor.u32 %v8323_v7, %v8319_v48  ;;  %v9105_v62 = vsel %vm17204_vm6, %v13531_v39, %v9104_v16  ;;  %v9106_v44 = vrot.slane %v9104_v16, 4  ;;  %v9821_v39 = vld [vmem:[#allocation3 + $0x24] sm:$0xf] }
 0x461   : > { %v8320_v38 = vsel %vm16510_vm0, %v8315_v32, %v8319_v48  ;;  %v9866_v36 = vrot.slane %v9864_v41, 4  ;;  %v9867_v28 = vshll.u32 %v9815_v17, 16  ;;  %v9873_v10 = vshll.u32 %v9816_v1, 16  ;;  %v9822_v32 = vld [vmem:[#allocation3 + $0x28] sm:$0xf] }
 0x462   : > { %15038 = vmatmul.mubr.bf16.gmra.mxu1 %v13481_v61  ;;  %v8325_v63 = vrot.slane %v8324_v51, 4  ;;  %v9108_v40 = vsel %vm17204_vm6, %v9106_v44, %v9107_v27  ;;  %v9877_v25 = vshrl.u32 %v9816_v1, 16  ;;  %v9883_v60 = vshll.u32 %v9817_v14, 16 }
 0x463   : > { %v13547_v26 = vcombine.low %v9105_v62, %v9108_v40  ;;  %v9869_v52 = vrot.slane %v9867_v28, 5  ;;  %v9875_v54 = vrot.slane %v9873_v10, 5  ;;  %v8332_v22 = vshrl.u32 %v20359_v53, 16  ;;  %v9823_v10 = vld [vmem:[#allocation3 + $0x2c] sm:$0x1] }
 0x464   : > { %v8330_v20 = vsel %vm16510_vm0, %v8325_v63, %v8329_v8  ;;  %v9879_v21 = vrot.slane %v9877_v25, 4  ;;  %v9885_v47 = vrot.slane %v9883_v60, 5  ;;  %v8335_v46 = vshll.u32 %v20359_v53, 16 }
 0x465   : > { %v13482_v30 = vcombine.low %v8320_v38, %v8330_v20  ;;  %15138 = vmatmul.mubr.bf16.gmra.mxu0 %v13547_v26  ;;  %v9870_v59 = vor.u32 %v9869_v52, %v9866_v36  ;;  %v8334_v6 = vrot.slane %v8332_v22, 4  ;;  %v8341_v58 = vshll.u32 %v20347_v24, 16 }
 0x466   : > { %v9880_v35 = vor.u32 %v9879_v21, %v9875_v54  ;;  %v8337_v34 = vrot.slane %v8335_v46, 5  ;;  %v8345_v49 = vshrl.u32 %v20347_v24, 16  ;;  %v8351_v3 = vshll.u32 %v7970_v57, 16 }
 0x467   : > { %15041 = vmatprep.mubr.bf16.mxu1 %v13482_v30  ;;  %v9871_v43 = vrot.slane %v9870_v59, 4  ;;  %v8343_v37 = vrot.slane %v8341_v58, 5  ;;  %v9888_v12 = vshrl.u32 %v9818_v55, 16  ;;  %v9891_v29 = vshll.u32 %v9818_v55, 16  ;;  %v15944_v59 = vld [vmem:[#allocation3 + $0x4] sm:$0xf] }
 0x468   : > { %v9881_v45 = vrot.slane %v9880_v35, 4  ;;  %v8338_v4 = vor.u32 %v8337_v34, %v8334_v6  ;;  %v8347_v17 = vrot.slane %v8345_v49, 4  ;;  %v8353_v33 = vrot.slane %v8351_v3, 5  ;;  %v15945_v6 = vld [vmem:[#allocation3] sm:$0xf] }
 0x469   : > { %v9876_v19 = vsel %vm16510_vm0, %v9871_v43, %v9875_v54  ;;  %v9890_v48 = vrot.slane %v9888_v12, 4  ;;  %v9893_v7 = vrot.slane %v9891_v29, 5  ;;  %v9897_v8 = vshll.u32 %v9819_v2, 16  ;;  %v9824_v54 = vld [vmem:[#allocation3 + $0x30] sm:$0xf] }
 0x46a   : > { %v9886_v57 = vsel %vm16510_vm0, %v9881_v45, %v9885_v47  ;;  %v8339_v16 = vrot.slane %v8338_v4, 4  ;;  %v8348_v1 = vor.u32 %v8347_v17, %v8343_v37  ;;  %v9901_v11 = vshrl.u32 %v9819_v2, 16  ;;  %v9825_v35 = vld [vmem:[#allocation3 + $0x34] sm:$0xf]  ;;  %v15946_v49 = vld [vmem:[#allocation3 + $0xc] sm:$0xf] }
 0x46b   : > { %v13580_v27 = vcombine.low %v9876_v19, %v9886_v57  ;;  %v9894_v14 = vor.u32 %v9893_v7, %v9890_v48  ;;  %v9899_v41 = vrot.slane %v9897_v8, 5  ;;  %v9907_v61 = vshll.u32 %v9820_v42, 16  ;;  %v15947_v3 = vld [vmem:[#allocation3 + $0x10] sm:$0xf]  ;;  %v15948_v43 = vld [vmem:[#allocation3 + $0x1c] sm:$0xf] }
 0x46c   : > { %v8344_v51 = vsel %vm16510_vm0, %v8339_v16, %v8343_v37  ;;  %v8349_v62 = vrot.slane %v8348_v1, 4  ;;  %v9903_v44 = vrot.slane %v9901_v11, 4  ;;  %v9912_v38 = vshrl.u32 %v9821_v39, 16  ;;  %v15949_v37 = vld [vmem:[#allocation3 + $0x18] sm:$0xf]  ;;  %v15806_v57 = vld [vmem:[#allocation10 + $0x1b0] sm:$0xff]  }
 0x46d   : > { %15205 = vmatprep.mubr.bf16.mxu0 %v13580_v27  ;;  %v9895_v36 = vrot.slane %v9894_v14, 4  ;;  %v9909_v28 = vrot.slane %v9907_v61, 5  ;;  %v9915_v63 = vshll.u32 %v9821_v39, 16  ;;  %v9921_v40 = vshll.u32 %v9822_v32, 16  ;;  %v9826_v29 = vld [vmem:[#allocation3 + $0x38] sm:$0x1] }
 0x46e   : > { %v8354_v25 = vsel %vm16510_vm0, %v8349_v62, %v8353_v33  ;;  %v9904_v60 = vor.u32 %v9903_v44, %v9899_v41  ;;  %v9914_v26 = vrot.slane %v9912_v38, 4  ;;  %v9925_v52 = vshrl.u32 %v9822_v32, 16  ;;  %v9827_v19 = vld [vmem:[#allocation3 + $0x3c] sm:$0xf]  ;;  %v9828_v27 = vld [vmem:[#allocation3 + $0x40] sm:$0xf] }
 0x46f   : > { %v13483_v22 = vcombine.low %v8344_v51, %v8354_v25  ;;  %v9900_v20 = vsel %vm16510_vm0, %v9895_v36, %v9899_v41  ;;  %v9917_v21 = vrot.slane %v9915_v63, 5  ;;  %v9923_v47 = vrot.slane %v9921_v40, 5  ;;  %v9829_v61 = vld [vmem:[#allocation3 + $0x44] sm:$0x1] }
 0x470   : > { %v9905_v46 = vrot.slane %v9904_v60, 4  ;;  %v9927_v55 = vrot.slane %v9925_v52, 4  ;;  %v9931_v30 = vshll.u32 %v9823_v10, 16  ;;  %v13492_v58 = vcombine.low %v15945_v6, %v15944_v59  ;;  %v15950_v10 = vld [vmem:[#allocation10 + $0x1b8] sm:$0xff]   ;;  %v9830_v52 = vld [vmem:[#allocation3 + $0x48] sm:$0xf] }
 0x471   : > { %15042 = vmatmul.mubr.bf16.gmra.mxu1 %v13483_v22  ;;  %v9918_v34 = vor.u32 %v9917_v21, %v9914_v26  ;;  %v13493_v2 = vcombine.low %v15946_v49, %v15947_v3  ;;  %v13494_v12 = vcombine.low %v15949_v37, %v15948_v43  ;;  %v9936_v45 = vshrl.u32 %v9824_v54, 16  ;;  %v15795_v26 = vld [vmem:[#allocation10 + $0xf0] sm:$0xff]   ;;  %v15952_v6 = vld [vmem:[#allocation3 + $0x24] sm:$0xf]  ;;  %v9832_v3 = vld [vmem:[#allocation3 + $0x50] sm:$0x1] }
 0x472   : > { %v9910_v4 = vsel %vm16510_vm0, %v9905_v46, %v9909_v28  ;;  %v9928_v17 = vor.u32 %v9927_v55, %v9923_v47  ;;  %v9933_v33 = vrot.slane %v9931_v30, 5  ;;  %15061 = vmatprep.mubr.bf16.mxu1 %v13492_v58  ;;  %v9939_v42 = vshll.u32 %v9824_v54, 16  ;;  %v15808_v46 = vld [vmem:[#allocation10 + $0x1a8] sm:$0xff]   ;;  %v15951_v59 = vld [vmem:[#allocation3 + $0x28] sm:$0xf]  ;;  %v15955_v43 = vld [vmem:[#allocation10 + $0xf8] sm:$0xff]  }
 0x473   : > { %v13581_v48 = vcombine.low %v9900_v20, %v9910_v4  ;;  %v9919_v7 = vrot.slane %v9918_v34, 4  ;;  %v9938_v8 = vrot.slane %v9936_v45, 4  ;;  %v9945_v39 = vshll.u32 %v9825_v35, 16  ;;  %v15954_v34 = vld [vmem:[#allocation3 + $0x30] sm:$0xf] }
 0x474   : > { %v9929_v16 = vrot.slane %v9928_v17, 4  ;;  %v9941_v1 = vrot.slane %v9939_v42, 5  ;;  %v9949_v11 = vshrl.u32 %v9825_v35, 16  ;;  %v9955_v32 = vshll.u32 %v9826_v29, 16  ;;  %v15953_v35 = vld [vmem:[#allocation3 + $0x34] sm:$0xf] }
 0x475   : > { %15206 = vmatmul.mubr.bf16.vlgmr.msra.gmra.mxu0 %v13581_v48  ;;  %v9924_v14 = vsel %vm16510_vm0, %v9919_v7, %v9923_v47  ;;  %v9947_v41 = vrot.slane %v9945_v39, 5  ;;  %v9960_v51 = vshrl.u32 %v9827_v19, 16  ;;  %v9963_v62 = vshll.u32 %v9827_v19, 16  ;;  %v9831_v47 = vld [vmem:[#allocation3 + $0x4c] sm:$0xf]  ;;  %v15798_v19 = vld [vmem:[#allocation10 + $0xe8] sm:$0xff]  }
 0x476   : > { %v9934_v44 = vsel %vm16510_vm0, %v9929_v16, %v9933_v33  ;;  %v9942_v38 = vor.u32 %v9941_v1, %v9938_v8  ;;  %v9951_v36 = vrot.slane %v9949_v11, 4  ;;  %v9957_v28 = vrot.slane %v9955_v32, 5  ;;  %15286 = vmatpush3.bf16.msra.mxu0 %v15950_v10  ;;  %v9833_v39 = vld [vmem:[#allocation3 + $0x54] sm:$0xf]  ;;  %v9834_v16 = vld [vmem:[#allocation3 + $0x58] sm:$0xf] }
 0x477   : > { %v13582_v63 = vcombine.low %v9924_v14, %v9934_v44  ;;  %v9962_v40 = vrot.slane %v9960_v51, 4  ;;  %v9965_v25 = vrot.slane %v9963_v62, 5  ;;  %v9969_v60 = vshll.u32 %v9828_v27, 16  ;;  %15287 = vmatprep.subr.bf16.mxu0 %v15806_v57  ;;  %v9835_v14 = vld [vmem:[#allocation3 + $0x5c] sm:$0x1] }
 0x478   : > { %v9943_v54 = vrot.slane %v9942_v38, 4  ;;  %v9952_v22 = vor.u32 %v9951_v36, %v9947_v41  ;;  %v9973_v20 = vshrl.u32 %v9828_v27, 16  ;;  %v9979_v21 = vshll.u32 %v9829_v61, 16 }
 0x479   : > { %15209 = vmatprep.mubr.bf16.mxu0 %v13582_v63  ;;  %15062 = vmatmul.mubr.bf16.vlgmr.msra.gmra.mxu1 %v13493_v2  ;;  %v9966_v55 = vor.u32 %v9965_v25, %v9962_v40  ;;  %v9971_v30 = vrot.slane %v9969_v60, 5  ;;  %v13495_v58 = vcombine.low %v15952_v6, %v15951_v59  ;;  %v13496_v49 = vcombine.low %v15954_v34, %v15953_v35  ;;  %v15801_v60 = vld [vmem:[#allocation10 + $0xe0] sm:$0xff]   ;;  %v9837_v6 = vld [vmem:[#allocation3 + $0x64] sm:$0xf]  ;;  %v15956_v34 = vld [vmem:[#allocation3 + $0x40] sm:$0xf] }
 0x47a   : > { %15065 = vmatprep.mubr.bf16.mxu1 %v13494_v12  ;;  %15142 = vmatpush3.bf16.msra.mxu1 %v15955_v43  ;;  %v9948_v37 = vsel %vm16510_vm0, %v9943_v54, %v9947_v41  ;;  %v9953_v29 = vrot.slane %v9952_v22, 4  ;;  %v9975_v45 = vrot.slane %v9973_v20, 4  ;;  %v9981_v4 = vrot.slane %v9979_v21, 5  ;;  %v15811_v41 = vld [vmem:[#allocation10 + $0x1a0] sm:$0xff]   ;;  %v9836_v20 = vld [vmem:[#allocation3 + $0x60] sm:$0xf] }
 0x47b   : > { %v9967_v17 = vrot.slane %v9966_v55, 4  ;;  %15143 = vmatprep.subr.bf16.mxu1 %v15795_v26  ;;  %v9984_v2 = vshrl.u32 %v9830_v52, 16  ;;  %v9987_v33 = vshll.u32 %v9830_v52, 16  ;;  %v9993_v42 = vshll.u32 %v9831_v47, 16  ;;  %15288 = vmatpush3.bf16.msra.mxu0 %v15806_v57  ;;  %v15813_v21 = vld [vmem:[#allocation10 + $0x198] sm:$0xff]  }
 0x47c   : > { %v9958_v48 = vsel %vm16510_vm0, %v9953_v29, %v9957_v28  ;;  %v9976_v7 = vor.u32 %v9975_v45, %v9971_v30  ;;  %v9997_v12 = vshrl.u32 %v9831_v47, 16  ;;  %v10003_v8 = vshll.u32 %v9832_v3, 16  ;;  %15289 = vmatprep.subr.bf16.mxu0 %v15808_v46  ;;  %v15958_v43 = vld [vmem:[#allocation3 + $0x4c] sm:$0xf]  ;;  %v9838_v45 = vld [vmem:[#allocation3 + $0x68] sm:$0x1] }
 0x47d   : > { %v13583_v1 = vcombine.low %v9948_v37, %v9958_v48  ;;  %v9972_v11 = vsel %vm16510_vm0, %v9967_v17, %v9971_v30  ;;  %v9986_v32 = vrot.slane %v9984_v2, 4  ;;  %v9989_v27 = vrot.slane %v9987_v33, 5  ;;  %v15959_v37 = vld [vmem:[#allocation3 + $0x48] sm:$0xf] }
 0x47e   : > { %v9977_v61 = vrot.slane %v9976_v7, 4  ;;  %15144 = vmatpush3.bf16.msra.mxu1 %v15795_v26  ;;  %v9995_v57 = vrot.slane %v9993_v42, 5  ;;  %v9999_v51 = vrot.slane %v9997_v12, 4  ;;  %v10005_v62 = vrot.slane %v10003_v8, 5  ;;  %v9839_v42 = vld [vmem:[#allocation3 + $0x6c] sm:$0xf] }
 0x47f   : > { %15210 = vmatmul.mubr.bf16.gmra.mxu0 %v13583_v1  ;;  %v9990_v44 = vor.u32 %v9989_v27, %v9986_v32  ;;  %v10008_v38 = vshrl.u32 %v9833_v39, 16  ;;  %v10011_v36 = vshll.u32 %v9833_v39, 16  ;;  %v10017_v28 = vshll.u32 %v9834_v16, 16  ;;  %15145 = vmatprep.subr.bf16.mxu1 %v15798_v19  ;;  %v15816_v8 = vld [vmem:[#allocation10 + $0x190] sm:$0xff]   ;;  %v9840_v32 = vld [vmem:[#allocation3 + $0x70] sm:$0xf] }
 0x480   : > { %v9982_v10 = vsel %vm16510_vm0, %v9977_v61, %v9981_v4  ;;  %v10000_v63 = vor.u32 %v9999_v51, %v9995_v57  ;;  %v10021_v40 = vshrl.u32 %v9834_v16, 16  ;;  %v10027_v25 = vshll.u32 %v9835_v14, 16  ;;  %15290 = vmatpush3.bf16.msra.mxu0 %v15808_v46  ;;  %v15805_v4 = vld [vmem:[#allocation10 + $0xd8] sm:$0xff]   ;;  %v15810_v51 = vld [vmem:[#allocation10 + $0xd0] sm:$0xff]  }
 0x481   : > { %v13584_v52 = vcombine.low %v9972_v11, %v9982_v10  ;;  %15066 = vmatmul.mubr.bf16.gmra.mxu1 %v13495_v58  ;;  %v9991_v26 = vrot.slane %v9990_v44, 4  ;;  %v10010_v54 = vrot.slane %v10008_v38, 4  ;;  %v10013_v22 = vrot.slane %v10011_v36, 5  ;;  %15291 = vmatprep.subr.bf16.mxu0 %v15811_v41  ;;  %v15957_v58 = vld [vmem:[#allocation3 + $0x3c] sm:$0xf] }
 0x482   : > { %15069 = vmatprep.mubr.bf16.mxu1 %v13496_v49  ;;  %v10001_v47 = vrot.slane %v10000_v63, 4  ;;  %v10019_v55 = vrot.slane %v10017_v28, 5  ;;  %v10023_v30 = vrot.slane %v10021_v40, 4  ;;  %v10029_v59 = vrot.slane %v10027_v25, 5  ;;  %15146 = vmatpush3.bf16.msra.mxu1 %v15798_v19  ;;  %v9842_v25 = vld [vmem:[#allocation3 + $0x78] sm:$0xf] }
 0x483   : > { %15213 = vmatprep.mubr.bf16.mxu0 %v13584_v52  ;;  %v9996_v35 = vsel %vm16510_vm0, %v9991_v26, %v9995_v57  ;;  %v10014_v46 = vor.u32 %v10013_v22, %v10010_v54  ;;  %v13497_v3 = vcombine.low %v15957_v58, %v15956_v34  ;;  %v13498_v29 = vcombine.low %v15959_v37, %v15958_v43  ;;  %v9841_v57 = vld [vmem:[#allocation3 + $0x74] sm:$0x1]  ;;  %v15815_v34 = vld [vmem:[#allocation10 + $0xc8] sm:$0xff]  }
 0x484   : > { %v10006_v49 = vsel %vm16510_vm0, %v10001_v47, %v10005_v62  ;;  %v10024_v17 = vor.u32 %v10023_v30, %v10019_v55  ;;  %v10032_v2 = vshrl.u32 %v9836_v20, 16  ;;  %v10035_v33 = vshll.u32 %v9836_v20, 16  ;;  %15147 = vmatprep.subr.bf16.mxu1 %v15801_v60  ;;  %15292 = vmatpush3.bf16.msra.mxu0 %v15811_v41  ;;  %v9843_v20 = vld [vmem:[#allocation3 + $0x7c] sm:$0xf]  ;;  %v15960_v30 = vld [vmem:[#allocation3 + $0x58] sm:$0xf] }
 0x485   : > { %v13585_v19 = vcombine.low %v9996_v35, %v10006_v49  ;;  %v10015_v48 = vrot.slane %v10014_v46, 4  ;;  %v10041_v7 = vshll.u32 %v9837_v6, 16  ;;  %v10045_v12 = vshrl.u32 %v9837_v6, 16  ;;  %15293 = vmatprep.subr.bf16.mxu0 %v15813_v21  ;;  %v15962_v6 = vld [vmem:[#allocation3 + $0x64] sm:$0xf] }
 0x486   : > { %v10025_v39 = vrot.slane %v10024_v17, 4  ;;  %v10034_v16 = vrot.slane %v10032_v2, 4  ;;  %v10037_v1 = vrot.slane %v10035_v33, 5  ;;  %v10051_v11 = vshll.u32 %v9838_v45, 16  ;;  %15148 = vmatpush3.bf16.msra.mxu1 %v15801_v60  ;;  %v15818_v60 = vld [vmem:[#allocation10 + $0x188] sm:$0xff]  }
 0x487   : > { %15214 = vmatmul.mubr.bf16.gmra.mxu0 %v13585_v19  ;;  %v10020_v27 = vsel %vm16510_vm0, %v10015_v48, %v10019_v55  ;;  %v10043_v14 = vrot.slane %v10041_v7, 5  ;;  %v10047_v61 = vrot.slane %v10045_v12, 4  ;;  %v10056_v41 = vshrl.u32 %v9839_v42, 16  ;;  %15149 = vmatprep.subr.bf16.mxu1 %v15805_v4  ;;  %v15963_v35 = vld [vmem:[#allocation3 + $0x60] sm:$0xf] }
 0x488   : > { %v10030_v62 = vsel %vm16510_vm0, %v10025_v39, %v10029_v59  ;;  %v10038_v44 = vor.u32 %v10037_v1, %v10034_v16  ;;  %v10053_v38 = vrot.slane %v10051_v11, 5  ;;  %v10059_v36 = vshll.u32 %v9839_v42, 16  ;;  %15294 = vmatpush3.bf16.msra.mxu0 %v15813_v21  ;;  %v15961_v21 = vld [vmem:[#allocation3 + $0x54] sm:$0xf]  ;;  %v9845_v2 = vld [vmem:[#allocation3 + $0x84] sm:$0xf] }
 0x489   : > { %v13586_v28 = vcombine.low %v10020_v27, %v10030_v62  ;;  %15070 = vmatmul.mubr.bf16.gmra.mxu1 %v13497_v3  ;;  %v10048_v10 = vor.u32 %v10047_v61, %v10043_v14  ;;  %v10058_v63 = vrot.slane %v10056_v41, 4  ;;  %v10065_v40 = vshll.u32 %v9840_v32, 16  ;;  %15295 = vmatprep.subr.bf16.mxu0 %v15816_v8  ;;  %v9846_v7 = vld [vmem:[#allocation3 + $0x88] sm:$0xf]  ;;  %v15822_v11 = vld [vmem:[#allocation10 + $0x180] sm:$0xff]  }
 0x48a   : > { %15073 = vmatprep.mubr.bf16.mxu1 %v13498_v29  ;;  %v10039_v52 = vrot.slane %v10038_v44, 4  ;;  %v10061_v26 = vrot.slane %v10059_v36, 5  ;;  %v10069_v54 = vshrl.u32 %v9840_v32, 16  ;;  %v10075_v22 = vshll.u32 %v9841_v57, 16  ;;  %15150 = vmatpush3.bf16.msra.mxu1 %v15805_v4  ;;  %v9844_v29 = vld [vmem:[#allocation3 + $0x80] sm:$0x1] }
 0x48b   : > { %15217 = vmatprep.mubr.bf16.mxu0 %v13586_v28  ;;  %v10049_v47 = vrot.slane %v10048_v10, 4  ;;  %v10067_v55 = vrot.slane %v10065_v40, 5  ;;  %v13499_v59 = vcombine.low %v15961_v21, %v15960_v30  ;;  %v13500_v46 = vcombine.low %v15963_v35, %v15962_v6  ;;  %15151 = vmatprep.subr.bf16.mxu1 %v15810_v51  ;;  %v9847_v62 = vld [vmem:[#allocation3 + $0x8c] sm:$0x1]  ;;  %v20411_v40 = vld [vmem:[#allocation10 + $0x238] sm:$0xff]  }
 0x48c   : > { %v10044_v58 = vsel %vm16510_vm0, %v10039_v52, %v10043_v14  ;;  %v10062_v3 = vor.u32 %v10061_v26, %v10058_v63  ;;  %v10071_v43 = vrot.slane %v10069_v54, 4  ;;  %v10077_v37 = vrot.slane %v10075_v22, 5  ;;  %15296 = vmatpush3.bf16.msra.mxu0 %v15816_v8  ;;  %v15821_v8 = vld [vmem:[#allocation10 + $0xc0] sm:$0xff]   ;;  %v9848_v63 = vld [vmem:[#allocation3 + $0x90] sm:$0xf] }
 0x48d   : > { %v10054_v45 = vsel %vm16510_vm0, %v10049_v47, %v10053_v38  ;;  %v10080_v4 = vshrl.u32 %v9842_v25, 16  ;;  %v10083_v49 = vshll.u32 %v9842_v25, 16  ;;  %v10089_v17 = vshll.u32 %v9843_v20, 16  ;;  %15297 = vmatprep.subr.bf16.mxu0 %v15818_v60  ;;  %v20413_v22 = vld [vmem:[#allocation10 + $0x178] sm:$0xff]   ;;  %v15965_v30 = vld [vmem:[#allocation3 + $0x6c] sm:$0xf] }
 0x48e   : > { %v13587_v33 = vcombine.low %v10044_v58, %v10054_v45  ;;  %v10063_v42 = vrot.slane %v10062_v3, 4  ;;  %v10072_v19 = vor.u32 %v10071_v43, %v10067_v55  ;;  %v10093_v48 = vshrl.u32 %v9843_v20, 16  ;;  %15152 = vmatpush3.bf16.msra.mxu1 %v15810_v51  ;;  %v20419_v3 = vld [vmem:[#allocation3 + $0x98] sm:$0x1] }
 0x48f   : > { %v10082_v12 = vrot.slane %v10080_v4, 4  ;;  %v10085_v39 = vrot.slane %v10083_v49, 5  ;;  %v10091_v16 = vrot.slane %v10089_v17, 5  ;;  %v10099_v1 = vshll.u32 %v9844_v29, 16  ;;  %15153 = vmatprep.subr.bf16.mxu1 %v15815_v34  ;;  %v9851_v49 = vld [vmem:[#allocation3 + $0x9c] sm:$0xf] }
 0x490   : > { %15218 = vmatmul.mubr.bf16.gmra.mxu0 %v13587_v33  ;;  %v10068_v32 = vsel %vm16510_vm0, %v10063_v42, %v10067_v55  ;;  %v10073_v27 = vrot.slane %v10072_v19, 4  ;;  %v10095_v14 = vrot.slane %v10093_v48, 4  ;;  %v10104_v61 = vshrl.u32 %v9845_v2, 16  ;;  %v15964_v55 = vld [vmem:[#allocation3 + $0x70] sm:$0xf] }
 0x491   : > { %15074 = vmatmul.mubr.bf16.gmra.mxu1 %v13499_v59  ;;  %v10086_v57 = vor.u32 %v10085_v39, %v10082_v12  ;;  %v10101_v41 = vrot.slane %v10099_v1, 5  ;;  %v10107_v44 = vshll.u32 %v9845_v2, 16  ;;  %v10113_v51 = vshll.u32 %v9846_v7, 16  ;;  %15298 = vmatpush3.bf16.msra.mxu0 %v15818_v60  ;;  %v20415_v59 = vld [vmem:[#allocation3 + $0x94] sm:$0xf] }
 0x492   : > { %v10078_v38 = vsel %vm16510_vm0, %v10073_v27, %v10077_v37  ;;  %15077 = vmatprep.mubr.bf16.mxu1 %v13500_v46  ;;  %v10096_v36 = vor.u32 %v10095_v14, %v10091_v16  ;;  %v10106_v28 = vrot.slane %v10104_v61, 4  ;;  %v10117_v10 = vshrl.u32 %v9846_v7, 16  ;;  %15154 = vmatpush3.bf16.msra.mxu1 %v15815_v34  ;;  %v15966_v46 = vld [vmem:[#allocation3 + $0x7c] sm:$0xf]  ;;  %v15967_v34 = vld [vmem:[#allocation3 + $0x78] sm:$0xf] }
 0x493   : > { %v13588_v25 = vcombine.low %v10068_v32, %v10078_v38  ;;  %v10087_v52 = vrot.slane %v10086_v57, 4  ;;  %v10109_v26 = vrot.slane %v10107_v44, 5  ;;  %v10115_v54 = vrot.slane %v10113_v51, 5  ;;  %15155 = vmatprep.subr.bf16.mxu1 %v15821_v8  ;;  %15299 = vmatprep.subr.bf16.mxu0 %v15822_v11  ;;  %v20428_v39 = vld [vmem:[#allocation3 + $0xa0] sm:$0xf] }
 0x494   : > { %v10097_v60 = vrot.slane %v10096_v36, 4  ;;  %v10119_v20 = vrot.slane %v10117_v10, 4  ;;  %v10123_v47 = vshll.u32 %v9847_v62, 16  ;;  %v13501_v21 = vcombine.low %v15965_v30, %v15964_v55  ;;  %v20434_v61 = vld [vmem:[#allocation3 + $0xa4] sm:$0x1] }
 0x495   : > { %15221 = vmatprep.mubr.bf16.mxu0 %v13588_v25  ;;  %v10092_v6 = vsel %vm16510_vm0, %v10087_v52, %v10091_v16  ;;  %v10110_v35 = vor.u32 %v10109_v26, %v10106_v28  ;;  %v13502_v58 = vcombine.low %v15967_v34, %v15966_v46  ;;  %v10128_v43 = vshrl.u32 %v9848_v63, 16  ;;  %15300 = vmatpush3.bf16.msra.mxu0 %v15822_v11  ;;  %v9854_v51 = vld [vmem:[#allocation3 + $0xa8] sm:$0xf] }
 0x496   : > { %v10102_v37 = vsel %vm16510_vm0, %v10097_v60, %v10101_v41  ;;  %v10120_v29 = vor.u32 %v10119_v20, %v10115_v54  ;;  %v10125_v45 = vrot.slane %v10123_v47, 5  ;;  %v10131_v4 = vshll.u32 %v9848_v63, 16  ;;  %15156 = vmatpush3.bf16.msra.mxu1 %v15821_v8  ;;  %15381 = vmatprep.subr.bf16.mxu0 %v20411_v40  ;;  %v20438_v63 = vld [vmem:[#allocation3 + $0xac] sm:$0xf]  ;;  %v15969_v60 = vld [vmem:[#allocation3 + $0x84] sm:$0xf] }
 0x497   : > { %v13589_v17 = vcombine.low %v10092_v6, %v10102_v37  ;;  %v10111_v2 = vrot.slane %v10110_v35, 4  ;;  %v10130_v33 = vrot.slane %v10128_v43, 4  ;;  %v10137_v42 = vshll.u32 %v20415_v59, 16  ;;  %15237 = vmatprep.subr.bf16.mxu1 %v20413_v22  ;;  %v20441_v47 = vld [vmem:[#allocation3 + $0xb0] sm:$0x1] }
 0x498   : > { %v10121_v19 = vrot.slane %v10120_v29, 4  ;;  %v10133_v48 = vrot.slane %v10131_v4, 5  ;;  %v10141_v7 = vshrl.u32 %v20415_v59, 16  ;;  %v10147_v12 = vshll.u32 %v20419_v3, 16  ;;  %v9857_v4 = vld [vmem:[#allocation3 + $0xb4] sm:$0xf] }
 0x499   : > { %15222 = vmatmul.mubr.bf16.gmra.mxu0 %v13589_v17  ;;  %15078 = vmatmul.mubr.bf16.gmra.mxu1 %v13501_v21  ;;  %v10139_v16 = vrot.slane %v10137_v42, 5  ;;  %v10152_v1 = vshrl.u32 %v9851_v49, 16  ;;  %v10155_v8 = vshll.u32 %v9851_v49, 16  ;;  %v10116_v11 = vsel %vm16510_vm0, %v10111_v2, %v10115_v54  ;;  %v15968_v54 = vld [vmem:[#allocation3 + $0x88] sm:$0xf] }
 0x49a   : > { %v10126_v32 = vsel %vm16510_vm0, %v10121_v19, %v10125_v45  ;;  %15081 = vmatprep.mubr.bf16.mxu1 %v13502_v58  ;;  %v10134_v27 = vor.u32 %v10133_v48, %v10130_v33  ;;  %v10143_v14 = vrot.slane %v10141_v7, 4  ;;  %v10161_v44 = vshll.u32 %v20428_v39, 16  ;;  %v20452_v49 = vld [vmem:[#allocation3 + $0xb8] sm:$0xf] }
 0x49b   : > { %v13590_v57 = vcombine.low %v10116_v11, %v10126_v32  ;;  %v10154_v41 = vrot.slane %v10152_v1, 4  ;;  %v10157_v62 = vrot.slane %v10155_v8, 5  ;;  %v10149_v28 = vrot.slane %v10147_v12, 5  ;;  %v20456_v12 = vld [vmem:[#allocation3 + $0xbc] sm:$0x1] }
 0x49c   : > { %v10135_v38 = vrot.slane %v10134_v27, 4  ;;  %v10144_v36 = vor.u32 %v10143_v14, %v10139_v16  ;;  %v10165_v10 = vshrl.u32 %v20428_v39, 16  ;;  %v10163_v52 = vrot.slane %v10161_v44, 5 }
 0x49d   : > { %15225 = vmatprep.mubr.bf16.mxu0 %v13590_v57  ;;  %v10158_v25 = vor.u32 %v10157_v62, %v10154_v41  ;;  %v10171_v26 = vshll.u32 %v20434_v61, 16  ;;  %v13503_v20 = vcombine.low %v15969_v60, %v15968_v54  ;;  %v13504_v6 = vcombine.low %v20297_v5, %v20289_v18 }
 0x49e   : > { %v10140_v55 = vsel %vm16510_vm0, %v10135_v38, %v10139_v16  ;;  %v10145_v30 = vrot.slane %v10144_v36, 4  ;;  %v10167_v21 = vrot.slane %v10165_v10, 4  ;;  %v10176_v46 = vshrl.u32 %v9854_v51, 16 }
 0x49f   : > { %v10159_v35 = vrot.slane %v10158_v25, 4  ;;  %v10179_v34 = vshll.u32 %v9854_v51, 16  ;;  %v10185_v58 = vshll.u32 %v20438_v63, 16  ;;  %v10189_v29 = vshrl.u32 %v20438_v63, 16  ;;  %v9860_v51 = vld [vmem:[#allocation3 + $0xc0] sm:$0xf] }
 0x4a0   : > { %v10150_v43 = vsel %vm16510_vm0, %v10145_v30, %v10149_v28  ;;  %v10168_v37 = vor.u32 %v10167_v21, %v10163_v52  ;;  %v10195_v45 = vshll.u32 %v20441_v47, 16  ;;  %v10173_v2 = vrot.slane %v10171_v26, 5  ;;  %v20463_v25 = vld [vmem:[#allocation3 + $0xc4] sm:$0xf]  ;;  %v20473_v30 = vld [vmem:[#allocation3 + $0xc8] sm:$0x1] }
 0x4a1   : > { %v13591_v17 = vcombine.low %v10140_v55, %v10150_v43  ;;  %15082 = vmatmul.mubr.bf16.gmra.mxu1 %v13503_v20  ;;  %v10178_v18 = vrot.slane %v10176_v46, 4  ;;  %v10181_v5 = vrot.slane %v10179_v34, 5  ;;  %v10164_v33 = vsel %vm16510_vm0, %v10159_v35, %v10163_v52  ;;  %v525_v43 = vld [vmem:[#allocation3 + $0xcc] sm:$0x1] }
 0x4a2   : > { %v10169_v42 = vrot.slane %v10168_v37, 4  ;;  %15085 = vmatprep.mubr.bf16.mxu1 %v13504_v6  ;;  %v10187_v19 = vrot.slane %v10185_v58, 5  ;;  %v10191_v48 = vrot.slane %v10189_v29, 4  ;;  %v10200_v16 = vshrl.u32 %v9857_v4, 16 }
 0x4a3   : > { %15226 = vmatmul.mubr.bf16.gmra.mxu0 %v13591_v17  ;;  %v10182_v7 = vor.u32 %v10181_v5, %v10178_v18  ;;  %v10203_v1 = vshll.u32 %v9857_v4, 16  ;;  %v10209_v8 = vshll.u32 %v20452_v49, 16  ;;  %v10197_v27 = vrot.slane %v10195_v45, 5 }
 0x4a4   : > { %v10174_v11 = vsel %vm16510_vm0, %v10169_v42, %v10173_v2  ;;  %v10192_v32 = vor.u32 %v10191_v48, %v10187_v19  ;;  %v10213_v14 = vshrl.u32 %v20452_v49, 16  ;;  %v10202_v62 = vrot.slane %v10200_v16, 4  ;;  %v15823_v16 = vld [vmem:[#allocation3 + $0xc] sm:$0xff]  }
 0x4a5   : > { %v13592_v57 = vcombine.low %v10164_v33, %v10174_v11  ;;  %v10183_v41 = vrot.slane %v10182_v7, 4  ;;  %v10205_v44 = vrot.slane %v10203_v1, 5  ;;  %v10211_v36 = vrot.slane %v10209_v8, 5  ;;  %v15819_v11 = vld [vmem:[#allocation3 + $0x18] sm:$0xff]  }
 0x4a6   : > { %v10193_v38 = vrot.slane %v10192_v32, 4  ;;  %v10215_v28 = vrot.slane %v10213_v14, 4  ;;  %v10219_v10 = vshll.u32 %v20456_v12, 16  ;;  %v13505_v54 = vcombine.low %v20314_v23, %v20316_v15  ;;  %v15826_v32 = vld [vmem:[#allocation3 + $0x18] sm:$0xff]   ;;  %v15828_v14 = vld [vmem:[#allocation3 + $0x24] sm:$0xff]  }
 0x4a7   : > { %15229 = vmatprep.mubr.bf16.mxu0 %v13592_v57  ;;  %v10188_v52 = vsel %vm16510_vm0, %v10183_v41, %v10187_v19  ;;  %v10206_v26 = vor.u32 %v10205_v44, %v10202_v62  ;;  %v13506_v60 = vcombine.low %v20326_v0, %v20332_v50  ;;  %v10224_v21 = vshrl.u32 %v9860_v51, 16  ;;  %v15824_v57 = vld [vmem:[#allocation3 + $0x24] sm:$0xff]   ;;  %v15831_v62 = vld [vmem:[#allocation3 + $0x30] sm:$0xff]   ;;  %v15842_v44 = vld [vmem:[#allocation10 + $0x160] sm:$0xff]  }
 0x4a8   : > { %v10198_v20 = vsel %vm16510_vm0, %v10193_v38, %v10197_v27  ;;  %v10216_v55 = vor.u32 %v10215_v28, %v10211_v36  ;;  %v10227_v6 = vshll.u32 %v9860_v51, 16  ;;  %v10233_v34 = vshll.u32 %v20463_v25, 16  ;;  %v15832_v27 = vld [vmem:[#allocation10 + $0x170] sm:$0xff]   ;;  %v15837_v41 = vld [vmem:[#allocation10 + $0x168] sm:$0xff]  }
 0x4a9   : > { %v13593_v35 = vcombine.low %v10188_v52, %v10198_v20  ;;  %v10207_v46 = vrot.slane %v10206_v26, 4  ;;  %15086 = vmatmul.mubr.bf16.gmra.mxu1 %v13505_v54  ;;  %v10237_v58 = vshrl.u32 %v20463_v25, 16  ;;  %v10221_v15 = vrot.slane %v10219_v10, 5  ;;  %v15852_v51 = vld [vmem:[#allocation10 + $0x228] sm:$0xff]   ;;  %v15830_v28 = vld [vmem:[#allocation3 + $0x48] sm:$0xff]   ;;  %v15848_v10 = vld [vmem:[#allocation10 + $0x158] sm:$0xff]   ;;  %v20492_v52 = vpop.f32.mrf.mxu0 }
 0x4aa   : > { %v10217_v23 = vrot.slane %v10216_v55, 4  ;;  %15089 = vmatprep.mubr.bf16.mxu1 %v13506_v60  ;;  %v10226_v0 = vrot.slane %v10224_v21, 4  ;;  %v10229_v50 = vrot.slane %v10227_v6, 5  ;;  %v10235_v37 = vrot.slane %v10233_v34, 5  ;;  %v15833_v38 = vld [vmem:[#allocation3 + $0x3c] sm:$0xff]   ;;  %22184 = vst [vmem:[#allocation46_spill] sm:$0xff] %v20492_v52  ;;  %v20498_v34 = vpop.f32.mrf.mxu1 }
 0x4ab   : > { %15230 = vmatmul.mubr.bf16.gmra.mxu0 %v13593_v35  ;;  %v10239_v29 = vrot.slane %v10237_v58, 4  ;;  %v10243_v45 = vshll.u32 %v20473_v30, 16  ;;  %v10212_v4 = vsel %vm16510_vm0, %v10207_v46, %v10211_v36  ;;  %v526_v18 = vsel %vm16435_vm4, 0, %v525_v43  ;;  %v15829_v36 = vld [vmem:[#allocation3 + $0x3c] sm:$0xff]   ;;  %v15855_v26 = vld [vmem:[#allocation10 + $0x150] sm:$0xff]   ;;  %v15859_v54 = vld [vmem:[#allocation10 + $0x218] sm:$0xff]   ;;  %v20494_v60 = vpop.f32.mrf.mxu0 }
 0x4ac   : > { %v10222_v17 = vsel %vm16510_vm0, %v10217_v23, %v10221_v15  ;;  %v10230_v2 = vor.u32 %v10229_v50, %v10226_v0  ;;  %527 = vst [vmem:[#allocation3 + $0xcc] sm:$0x1] %v526_v18  ;;  %v13507_v7 = vcombine.low %v20359_v53, %v20347_v24  ;;  %v15849_v24 = vld [vmem:[#allocation10 + $0x230] sm:$0xff]   ;;  %v15825_v53 = vld [vmem:[#allocation3 + $0x30] sm:$0xff]   ;;  %22185 = vst [vmem:[#allocation49_spill] sm:$0xff] %v20494_v60 }
 0x4ad   : > { %v13594_v5 = vcombine.low %v10212_v4, %v10222_v17  ;;  %v10240_v33 = vor.u32 %v10239_v29, %v10235_v37  ;;  %v10245_v48 = vrot.slane %v10243_v45, 5  ;;  %v15838_v20 = vld [vmem:[#allocation3 + $0x54] sm:$0xff]   ;;  %v15863_v21 = vld [vmem:[#allocation10 + $0x210] sm:$0xff]   ;;  %v15835_v6 = vld [vmem:[#allocation3 + $0x60] sm:$0xff]   ;;  %v20496_v46 = vpop.f32.mrf.mxu0  ;;  %22187 = vst [vmem:[#allocation48_spill] sm:$0xff] %v20498_v34  ;;  %v20504_v45 = vpop.f32.mrf.mxu1 }
 0x4ae   : > { %v10231_v42 = vrot.slane %v10230_v2, 4  ;;  %v15834_v55 = vld [vmem:[#allocation3 + $0x54] sm:$0xff]   ;;  %v15862_v35 = vld [vmem:[#allocation10 + $0x148] sm:$0xff]   ;;  %22186 = vst [vmem:[#allocation19_spill] sm:$0xff] %v20496_v46  ;;  %v15843_v0 = vld [vmem:[#allocation3 + $0x6c] sm:$0xff]  }
 0x4af   : > { %15233 = vmatprep.mubr.bf16.mxu0 %v13594_v5  ;;  %v10241_v19 = vrot.slane %v10240_v33, 4  ;;  %v15841_v58 = vld [vmem:[#allocation3 + $0x60] sm:$0xff]   ;;  %v15868_v23 = vld [vmem:[#allocation10 + $0x140] sm:$0xff]   ;;  %v20500_v15 = vpop.f32.mrf.mxu0  ;;  %22190 = vst [vmem:[#allocation37_spill] sm:$0xff] %v20504_v45  ;;  %v20506_v17 = vld [vmem:[#allocation10 + $0x1f8] sm:$0xff]   ;;  %v20510_v5 = vpop.f32.mrf.mxu1 }
 0x4b0   : > { %v10236_v1 = vsel %vm16510_vm0, %v10231_v42, %v10235_v37  ;;  %v15866_v43 = vld [vmem:[#allocation10 + $0x208] sm:$0xff]   ;;  %22188 = vst [vmem:[#allocation20_spill] sm:$0xff] %v20500_v15  ;;  %v15839_v37 = vld [vmem:[#allocation3 + $0x6c] sm:$0xff]   ;;  %v15869_v29 = vld [vmem:[#allocation10 + $0x200] sm:$0xff]   ;;  %v10711_v42 = vrot.slane %v20415_v59, 5 }
 0x4b1   : > { %v10246_v8 = vsel %vm16510_vm0, %v10241_v19, %v10245_v48  ;;  %15090 = vmatmul.mubr.bf16.gmra.mxu1 %v13507_v7  ;;  %v20502_v50 = vpop.f32.mrf.mxu0  ;;  %v15840_v4 = vld [vmem:[#allocation3 + $0x78] sm:$0xff]   ;;  %v10579_v18 = vld [vmem:[#allocation3 + $0x90] sm:$0xe]  ;;  %22192 = vst [vmem:[#allocation21_spill] sm:$0xff] %v20510_v5  ;;  %v15850_v19 = vld [vmem:[#allocation3 + $0x84] sm:$0xff]  }
 0x4b2   : > { %v13595_v56 = vcombine.low %v10236_v1, %v10246_v8  ;;  %15157 = vmatprep.mubr.bf16.mxu1 %v15823_v16  ;;  %22189 = vst [vmem:[#allocation44_spill] sm:$0xff] %v20502_v50  ;;  %v15847_v33 = vld [vmem:[#allocation3 + $0x78] sm:$0xff]   ;;  %v13615_v48 = vrot.slane %v10579_v18, 9  ;;  %v10713_v7 = vrot.slane %v10711_v42, 4  ;;  %v10714_v16 = vrot.slane %v20419_v3, 5 }
 0x4b3   : > { %v20508_v2 = vpop.f32.mrf.mxu0  ;;  %v10580_v1 = vld [vmem:[#allocation3 + $0x9c] sm:$0xe]  ;;  %v10742_v18 = vrot.slane %v20473_v30, 5  ;;  %v20772_v15 = vld [vmem:[#allocation3 + $0x74] sm:$0x1] }
 0x4b4   : > { %15234 = vmatmul.mubr.bf16.gmra.mxu0 %v13595_v56  ;;  %22191 = vst [vmem:[#allocation34_spill] sm:$0xff] %v20508_v2  ;;  %v15844_v56 = vld [vmem:[#allocation3 + $0x84] sm:$0xff]   ;;  %v20522_v59 = vsel %vm17204_vm6, %v13615_v48, %v10711_v42  ;;  %v20569_v42 = vld [vmem:[#allocation3 + $0x1c] sm:$0xf]  ;;  %v10574_v2 = vld [vmem:[#allocation3 + $0x54] sm:$0xe] }
 0x4b5   : > { %15301 = vmatprep.mubr.bf16.mxu0 %v15819_v11  ;;  %v20515_v8 = vpop.f32.mrf.mxu0  ;;  %v10718_v11 = vrot.slane %v20428_v39, 5  ;;  %v20799_v60 = vld [vmem:[#allocation3 + $0x88] sm:$0xf]  ;;  %v20844_v52 = vld [vmem:[#allocation3 + $0x98] sm:$0x1] }
 0x4b6   : > { %22193 = vst [vmem:[#allocation38_spill] sm:$0xff] %v20515_v8  ;;  %22250 = vst [vmem:[#allocation62_spill] sm:$0xff] %v20844_v52 }
 0x4b9   : > { %15158 = vmatmul.mubr.bf16.vlgmr.msra.gmra.mxu1 %v15826_v32  ;;  %v20518_v32 = vpop.f32.mrf.mxu1 }
 0x4ba   : > { %15161 = vmatprep.mubr.bf16.mxu1 %v15828_v14  ;;  %15238 = vmatpush3.bf16.msra.mxu1 %v20413_v22  ;;  %v15856_v22 = vld [vmem:[#allocation10 + $0x220] sm:$0xff]   ;;  %22194 = vst [vmem:[#allocation43_spill] sm:$0xff] %v20518_v32  ;;  %v20526_v14 = vsel %vm17204_vm6, %v10713_v7, %v10714_v16 }
 0x4bb   : > { %15239 = vmatprep.subr.bf16.mxu1 %v15832_v27  ;;  %v20531_v39 = vpop.f32.mrf.mxu1  ;;  %v10569_v7 = vld [vmem:[#allocation3 + $0x18] sm:$0xe]  ;;  %v20810_v32 = vld [vmem:[#allocation3 + $0x7c] sm:$0xf] }
 0x4bc   : > { %15302 = vmatmul.mubr.bf16.vlgmr.msra.gmra.mxu0 %v15824_v57  ;;  %v13616_v57 = vrot.slane %v10580_v1, 9  ;;  %22195 = vst [vmem:[#allocation28_spill] sm:$0xff] %v20531_v39  ;;  %v15861_v1 = vld [vmem:[#allocation3 + $0xa8] sm:$0xff]  }
 0x4bd   : > { %15305 = vmatprep.mubr.bf16.mxu0 %v15825_v53  ;;  %15382 = vmatpush3.bf16.msra.mxu0 %v20411_v40  ;;  %v15836_v40 = vld [vmem:[#allocation3 + $0x48] sm:$0xff]   ;;  %v10721_v53 = vrot.slane %v20434_v61, 5 }
 0x4be   : > { %15240 = vmatpush3.bf16.msra.mxu1 %v15832_v27  ;;  %15383 = vmatprep.subr.bf16.mxu0 %v15849_v24  ;;  %v15846_v27 = vld [vmem:[#allocation3 + $0x90] sm:$0xff]  }
 0x4bf   : > { %15241 = vmatprep.subr.bf16.mxu1 %v15837_v41 }
 0x4c1   : > { %15162 = vmatmul.mubr.bf16.gmra.mxu1 %v15831_v62  ;;  %15384 = vmatpush3.bf16.msra.mxu0 %v15849_v24  ;;  %v10720_v24 = vrot.slane %v10718_v11, 4  ;;  %v20533_v62 = vpop.f32.mrf.mxu0 }
 0x4c2   : > { %15165 = vmatprep.mubr.bf16.mxu1 %v15833_v38  ;;  %15242 = vmatpush3.bf16.msra.mxu1 %v15837_v41  ;;  %v10581_v41 = vld [vmem:[#allocation3 + $0xa8] sm:$0xe]  ;;  %22196 = vst [vmem:[#allocation35_spill] sm:$0xff] %v20533_v62  ;;  %v10725_v38 = vrot.slane %v20438_v63, 5 }
 0x4c3   : > { %15243 = vmatprep.subr.bf16.mxu1 %v15842_v44  ;;  %15385 = vmatprep.subr.bf16.mxu0 %v15852_v51 }
 0x4c4   : > { %15306 = vmatmul.mubr.bf16.gmra.mxu0 %v15829_v36  ;;  %v15854_v36 = vld [vmem:[#allocation3 + $0x90] sm:$0xff]  }
 0x4c5   : > { %15309 = vmatprep.mubr.bf16.mxu0 %v15830_v28  ;;  %15386 = vmatpush3.bf16.msra.mxu0 %v15852_v51  ;;  %v20541_v51 = vsel %vm17204_vm6, %v10720_v24, %v10721_v53  ;;  %v15857_v28 = vld [vmem:[#allocation3 + $0x9c] sm:$0xff]  }
 0x4c6   : > { %15244 = vmatpush3.bf16.msra.mxu1 %v15842_v44  ;;  %15387 = vmatprep.subr.bf16.mxu0 %v15856_v22  ;;  %v20537_v44 = vsel %vm17204_vm6, %v13616_v57, %v10718_v11  ;;  %v12272_v57 = vrot.slane %v20569_v42, 5 }
 0x4c7   : > { %15245 = vmatprep.subr.bf16.mxu1 %v15848_v10 }
 0x4c9   : > { %15166 = vmatmul.mubr.bf16.gmra.mxu1 %v15836_v40  ;;  %15388 = vmatpush3.bf16.msra.mxu0 %v15856_v22  ;;  %v20546_v22 = vpop.f32.mrf.mxu0  ;;  %v10727_v40 = vrot.slane %v10725_v38, 4 }
 0x4ca   : > { %15169 = vmatprep.mubr.bf16.mxu1 %v15838_v20  ;;  %15246 = vmatpush3.bf16.msra.mxu1 %v15848_v10  ;;  %22197 = vst [vmem:[#allocation29_spill] sm:$0xff] %v20546_v22  ;;  %v13617_v10 = vrot.slane %v10581_v41, 9  ;;  %v20549_v20 = vpop.f32.mrf.mxu1  ;;  %v15858_v41 = vld [vmem:[#allocation3 + $0xb4] sm:$0xff]  }
 0x4cb   : > { %15247 = vmatprep.subr.bf16.mxu1 %v15855_v26  ;;  %15389 = vmatprep.subr.bf16.mxu0 %v15859_v54  ;;  %22198 = vst [vmem:[#allocation27_spill] sm:$0xff] %v20549_v20 }
 0x4cc   : > { %15310 = vmatmul.mubr.bf16.gmra.mxu0 %v15834_v55  ;;  %v10732_v55 = vrot.slane %v20452_v49, 5  ;;  %v20554_v63 = vsel %vm17204_vm6, %v13617_v10, %v10725_v38  ;;  %v10735_v49 = vrot.slane %v20456_v12, 5  ;;  %v10568_v38 = vld [vmem:[#allocation3 + $0xc] sm:$0xe]  ;;  %v20598_v10 = vld [vmem:[#allocation3 + $0x20] sm:$0x1] }
 0x4cd   : > { %15313 = vmatprep.mubr.bf16.mxu0 %v15835_v6  ;;  %15390 = vmatpush3.bf16.msra.mxu0 %v15859_v54  ;;  %v10582_v54 = vld [vmem:[#allocation3 + $0xb4] sm:$0xe]  ;;  %v15851_v6 = vld [vmem:[#allocation3 + $0x9c] sm:$0xff]  }
 0x4ce   : > { %15248 = vmatpush3.bf16.msra.mxu1 %v15855_v26  ;;  %15391 = vmatprep.subr.bf16.mxu0 %v15863_v21  ;;  %v10728_v26 = vrot.slane %v20441_v47, 5  ;;  %v15853_v47 = vld [vmem:[#allocation3 + $0xa8] sm:$0xff]  }
 0x4cf   : > { %15249 = vmatprep.subr.bf16.mxu1 %v15862_v35 }
 0x4d1   : > { %15170 = vmatmul.mubr.bf16.gmra.mxu1 %v15841_v58  ;;  %15392 = vmatpush3.bf16.msra.mxu0 %v15863_v21  ;;  %v10583_v21 = vld [vmem:[#allocation3 + $0xc0] sm:$0xe]  ;;  %v10739_v58 = vrot.slane %v20463_v25, 5  ;;  %v15970_v25 = vld [vmem:[#allocation3 + $0x10] sm:$0xf] }
 0x4d2   : > { %15173 = vmatprep.mubr.bf16.mxu1 %v15843_v0  ;;  %15250 = vmatpush3.bf16.msra.mxu1 %v15862_v35  ;;  %v20558_v35 = vsel %vm17204_vm6, %v10727_v40, %v10728_v26  ;;  %v10734_v0 = vrot.slane %v10732_v55, 4  ;;  %v15971_v40 = vld [vmem:[#allocation3 + $0x14] sm:$0x1] }
 0x4d3   : > { %15393 = vmatprep.subr.bf16.mxu0 %v15866_v43  ;;  %15251 = vmatprep.subr.bf16.mxu1 %v15868_v23  ;;  %v10637_v26 = vrot.slane %v15971_v40, 5 }
 0x4d4   : > { %15314 = vmatmul.mubr.bf16.gmra.mxu0 %v15839_v37  ;;  %v20564_v37 = vpop.f32.mrf.mxu0  ;;  %v20577_v12 = vsel %vm17204_vm6, %v10734_v0, %v10735_v49  ;;  %v20606_v49 = vld [vmem:[#allocation3 + $0x34] sm:$0xf] }
 0x4d5   : > { %15317 = vmatprep.mubr.bf16.mxu0 %v15840_v4  ;;  %15394 = vmatpush3.bf16.msra.mxu0 %v15866_v43  ;;  %22199 = vst [vmem:[#allocation39_spill] sm:$0xff] %v20564_v37  ;;  %v10741_v4 = vrot.slane %v10739_v58, 4 }
 0x4d6   : > { %15395 = vmatprep.subr.bf16.mxu0 %v15869_v29  ;;  %15252 = vmatpush3.bf16.msra.mxu1 %v15868_v23  ;;  %v13618_v23 = vrot.slane %v10582_v54, 9  ;;  %v20591_v11 = vpop.f32.mrf.mxu0 }
 0x4d7   : > { %15333 = vmatprep.subr.bf16.mxu1 %v20506_v17  ;;  %v20587_v16 = vsel %vm17204_vm6, %v10741_v4, %v10742_v18  ;;  %22201 = vst [vmem:[#allocation41_spill] sm:$0xff] %v20591_v11 }
 0x4d8   : > { %v20573_v48 = vsel %vm17204_vm6, %v13618_v23, %v10732_v55  ;;  %v20600_v54 = vpop.f32.mrf.mxu0  ;;  %v12206_v55 = vld [vmem:[#allocation3 + $0x18] sm:$0xe]  ;;  %v13604_v23 = vrot.slane %v10568_v38, 9 }
 0x4d9   : > { %15174 = vmatmul.mubr.bf16.gmra.mxu1 %v15847_v33  ;;  %15396 = vmatpush3.bf16.msra.mxu0 %v15869_v29  ;;  %v13619_v29 = vrot.slane %v10583_v21, 9  ;;  %v20567_v33 = vpop.f32.mrf.mxu1  ;;  %22204 = vst [vmem:[#allocation40_spill] sm:$0xff] %v20600_v54  ;;  %v12274_v21 = vrot.slane %v12272_v57, 4  ;;  %v15975_v54 = vld [vmem:[#allocation3 + $0x2c] sm:$0x1] }
 0x4da   : > { %15177 = vmatprep.mubr.bf16.mxu1 %v15850_v19  ;;  %22200 = vst [vmem:[#allocation33_spill] sm:$0xff] %v20567_v33  ;;  %v10634_v19 = vrot.slane %v15970_v25, 5  ;;  %v20608_v18 = vpop.f32.mrf.mxu0  ;;  %v12275_v25 = vrot.slane %v20598_v10, 5  ;;  %v10651_v11 = vrot.slane %v15975_v54, 5  ;;  %v20639_v54 = vld [vmem:[#allocation3 + $0x4c] sm:$0xf] }
 0x4db   : > { %v20583_v30 = vsel %vm17204_vm6, %v13619_v29, %v10739_v58  ;;  %v20594_v24 = vpop.f32.mrf.mxu1  ;;  %v15972_v58 = vld [vmem:[#allocation3 + $0x1c] sm:$0xf]  ;;  %v15973_v29 = vld [vmem:[#allocation3 + $0x28] sm:$0xf]  ;;  %22205 = vst [vmem:[#allocation30_spill] sm:$0xff] %v20608_v18 }
 0x4dc   : > { %15318 = vmatmul.mubr.bf16.gmra.mxu0 %v15844_v56  ;;  %22202 = vst [vmem:[#allocation22_spill] sm:$0xff] %v20594_v24  ;;  %v10636_v53 = vrot.slane %v10634_v19, 4  ;;  %v10648_v4 = vrot.slane %v15973_v29, 5  ;;  %v10635_v40 = vsel %vm17204_vm6, %v13604_v23, %v10634_v19  ;;  %v12207_v56 = vld [vmem:[#allocation3 + $0x24] sm:$0xe]  ;;  %v20621_v61 = vpop.f32.mrf.mxu0 }
 0x4dd   : > { %15321 = vmatprep.mubr.bf16.mxu0 %v15846_v27  ;;  %v15864_v27 = vld [vmem:[#allocation3 + $0xb4] sm:$0xff]   ;;  %22207 = vst [vmem:[#allocation23_spill] sm:$0xff] %v20621_v61  ;;  %v20623_v19 = vld [vmem:[#allocation3 + $0x2c] sm:$0x1]  ;;  %v15974_v23 = vld [vmem:[#allocation3 + $0x20] sm:$0x1] }
 0x4de   : > { %v10638_v0 = vsel %vm17204_vm6, %v10636_v53, %v10637_v26  ;;  %v12276_v53 = vsel %vm17204_vm6, %v12274_v21, %v12275_v25  ;;  %v10650_v43 = vrot.slane %v10648_v4, 4  ;;  %v10644_v3 = vrot.slane %v15974_v23, 5  ;;  %v10570_v18 = vld [vmem:[#allocation3 + $0x24] sm:$0xe]  ;;  %v20633_v61 = vld [vmem:[#allocation3 + $0x34] sm:$0xf] }
 0x4df   : > { %v13620_v26 = vcombine.low %v10635_v40, %v10638_v0  ;;  %v20627_v40 = vld [vmem:[#allocation3 + $0x38] sm:$0x1]  ;;  %v15983_v24 = vld [vmem:[#allocation3 + $0x5c] sm:$0x1]  ;;  %v20755_v33 = vld [vmem:[#allocation3 + $0x70] sm:$0xf] }
 0x4e0   : > { %v10652_v22 = vsel %vm17204_vm6, %v10650_v43, %v10651_v11  ;;  %v12289_v62 = vrot.slane %v20627_v40, 5  ;;  %v10679_v50 = vrot.slane %v15983_v24, 5 }
 0x4e1   : > { %15178 = vmatmul.mubr.bf16.gmra.mxu1 %v15854_v36  ;;  %v20596_v36 = vpop.f32.mrf.mxu1 }
 0x4e2   : > { %15181 = vmatprep.mubr.bf16.mxu1 %v15857_v28  ;;  %22203 = vst [vmem:[#allocation24_spill] sm:$0xff] %v20596_v36  ;;  %v15860_v28 = vld [vmem:[#allocation3 + $0xc0] sm:$0xff]  }
 0x4e4   : > { %15322 = vmatmul.mubr.bf16.gmra.mxu0 %v15851_v6  ;;  %v20602_v6 = vld [vmem:[#allocation3 + $0x28] sm:$0xf] }
 0x4e5   : > { %15325 = vmatprep.mubr.bf16.mxu0 %v15853_v47  ;;  %v10641_v47 = vrot.slane %v15972_v58, 5  ;;  %v12279_v38 = vrot.slane %v20602_v6, 5  ;;  %v12286_v58 = vrot.slane %v20606_v49, 5 }
 0x4e7   : > { %v10643_v29 = vrot.slane %v10641_v47, 4  ;;  %v12281_v25 = vrot.slane %v12279_v38, 4  ;;  %v12288_v37 = vrot.slane %v12286_v58, 4 }
 0x4e9   : > { %15182 = vmatmul.mubr.bf16.gmra.mxu1 %v15861_v1  ;;  %v20611_v1 = vpop.f32.mrf.mxu1 }
 0x4ea   : > { %15185 = vmatprep.mubr.bf16.mxu1 %v15864_v27  ;;  %22206 = vst [vmem:[#allocation45_spill] sm:$0xff] %v20611_v1  ;;  %v13692_v27 = vrot.slane %v12206_v55, 9  ;;  %v15871_v1 = vld [vmem:[#allocation10 + $0x1f0] sm:$0xff]  }
 0x4eb   : > { %v20625_v21 = vpop.f32.mrf.mxu1 }
 0x4ec   : > { %15326 = vmatmul.mubr.bf16.gmra.mxu0 %v15858_v41  ;;  %v15867_v41 = vld [vmem:[#allocation3 + $0xc0] sm:$0xff]   ;;  %v12273_v55 = vsel %vm17204_vm6, %v13692_v27, %v12272_v57  ;;  %22208 = vst [vmem:[#allocation42_spill] sm:$0xff] %v20625_v21  ;;  %v13605_v57 = vrot.slane %v10569_v7, 9  ;;  %v10645_v27 = vsel %vm17204_vm6, %v10643_v29, %v10644_v3  ;;  %v20644_v3 = vpop.f32.mrf.mxu0  ;;  %v13693_v29 = vrot.slane %v12207_v56, 9 }
 0x4ed   : > { %15329 = vmatprep.mubr.bf16.mxu0 %v15860_v28  ;;  %v15865_v28 = vld [vmem:[#allocation3 + $0xcc] sm:$0xff]   ;;  %v13708_v0 = vcombine.low %v12273_v55, %v12276_v53  ;;  %v12282_v53 = vrot.slane %v20623_v19, 5  ;;  %v13606_v55 = vrot.slane %v10570_v18, 9  ;;  %22209 = vst [vmem:[#allocation31_spill] sm:$0xff] %v20644_v3  ;;  %v20649_v23 = vpop.f32.mrf.mxu1  ;;  %v12290_v56 = vsel %vm17204_vm6, %v12288_v37, %v12289_v62  ;;  %v20658_v3 = vld [vmem:[#allocation3 + $0x44] sm:$0x1] }
 0x4ee   : > { %22210 = vst [vmem:[#allocation26_spill] sm:$0xff] %v20649_v23  ;;  %v20669_v62 = vpop.f32.mrf.mxu0 }
 0x4ef   : > { %v12283_v43 = vsel %vm17204_vm6, %v12281_v25, %v12282_v53  ;;  %v10649_v18 = vsel %vm17204_vm6, %v13606_v55, %v10648_v4  ;;  %v20663_v8 = vpop.f32.mrf.mxu1  ;;  %v12280_v25 = vsel %vm17204_vm6, %v13693_v29, %v12279_v38  ;;  %v12209_v4 = vld [vmem:[#allocation3 + $0x3c] sm:$0xe]  ;;  %22214 = vst [vmem:[#allocation36_spill] sm:$0xff] %v20669_v62 }
 0x4f0   : > { %22212 = vst [vmem:[#allocation25_spill] sm:$0xff] %v20663_v8  ;;  %v10572_v38 = vld [vmem:[#allocation3 + $0x3c] sm:$0xe] }
 0x4f1   : > { %15186 = vmatmul.mubr.bf16.gmra.mxu1 %v15867_v41  ;;  %v12208_v41 = vld [vmem:[#allocation3 + $0x30] sm:$0xe] }
 0x4f2   : > { %15253 = vmatprep.mubr.bf16.mxu1 %v13620_v26  ;;  %v20631_v26 = vld [vmem:[#allocation3 + $0x40] sm:$0xf]  ;;  %v13694_v21 = vrot.slane %v12208_v41, 9  ;;  %v13622_v41 = vcombine.low %v10649_v18, %v10652_v22  ;;  %v13709_v22 = vcombine.low %v12280_v25, %v12283_v43  ;;  %v15978_v18 = vld [vmem:[#allocation3 + $0x38] sm:$0x1]  ;;  %v20678_v25 = vpop.f32.mrf.mxu0 }
 0x4f3   : > { %v21939_v7 = vrot.slane %v20631_v26, 5  ;;  %v15872_v43 = vld [vmem:[#allocation10 + $0x1e8] sm:$0xff]   ;;  %22215 = vst [vmem:[#allocation32_spill] sm:$0xff] %v20678_v25 }
 0x4f4   : > { %15330 = vmatmul.mubr.bf16.gmra.mxu0 %v15865_v28  ;;  %v20641_v28 = vld [vmem:[#allocation3 + $0x40] sm:$0xf]  ;;  %v12287_v37 = vsel %vm17204_vm6, %v13694_v21, %v12286_v58  ;;  %v22216_v58 = vrot.slane %v20639_v54, 5 }
 0x4f5   : > { %15397 = vmatprep.mubr.bf16.mxu0 %v13708_v0  ;;  %v10642_v0 = vsel %vm17204_vm6, %v13605_v57, %v10641_v47  ;;  %v22211_v57 = vrot.slane %v20633_v61, 5  ;;  %v22213_v53 = vrot.slane %v20641_v28, 5  ;;  %v13710_v29 = vcombine.low %v12287_v37, %v12290_v56  ;;  %v12210_v47 = vld [vmem:[#allocation3 + $0x48] sm:$0xe]  ;;  %v20686_v56 = vld [vmem:[#allocation3 + $0x4c] sm:$0xf] }
 0x4f6   : > { %v13621_v11 = vcombine.low %v10642_v0, %v10645_v27  ;;  %v10571_v27 = vld [vmem:[#allocation3 + $0x30] sm:$0xe]  ;;  %v20674_v0 = vld [vmem:[#allocation3 + $0x50] sm:$0x1]  ;;  %v13696_v8 = vrot.slane %v12210_v47, 9  ;;  %v22218_v37 = vrot.slane %v20633_v61, 5 }
 0x4f7   : > { %v10657_v23 = vrot.slane %v22211_v57, 4  ;;  %v10664_v55 = vrot.slane %v22213_v53, 4  ;;  %v10658_v57 = vrot.slane %v15978_v18, 5  ;;  %v15979_v53 = vld [vmem:[#allocation3 + $0x44] sm:$0x1]  ;;  %v13607_v21 = vrot.slane %v10571_v27, 9 }
 0x4f8   : > { %v10665_v62 = vrot.slane %v15979_v53, 5  ;;  %v20684_v18 = vld [vmem:[#allocation3 + $0x58] sm:$0xf]  ;;  %v13608_v53 = vrot.slane %v10572_v38, 9  ;;  %v12303_v36 = vrot.slane %v20674_v0, 5 }
 0x4f9   : > { %15254 = vmatmul.mubr.bf16.vlgmr.msra.gmra.mxu1 %v13621_v11  ;;  %v12295_v11 = vrot.slane %v21939_v7, 4  ;;  %v20689_v7 = vpop.f32.mrf.mxu1  ;;  %v20696_v27 = vld [vmem:[#allocation3 + $0x58] sm:$0xf] }
 0x4fa   : > { %15257 = vmatprep.mubr.bf16.mxu1 %v13622_v41  ;;  %15334 = vmatpush3.bf16.msra.mxu1 %v20506_v17  ;;  %v12302_v17 = vrot.slane %v22216_v58, 4  ;;  %v10659_v41 = vsel %vm17204_vm6, %v10657_v23, %v10658_v57  ;;  %22217 = vst [vmem:[#allocation47_spill] sm:$0xff] %v20689_v7  ;;  %v10666_v25 = vsel %vm17204_vm6, %v10664_v55, %v10665_v62  ;;  %v20694_v58 = vld [vmem:[#allocation3 + $0x64] sm:$0xf]  ;;  %v13695_v57 = vrot.slane %v12209_v4, 9  ;;  %v15873_v47 = vld [vmem:[#allocation10 + $0x1e0] sm:$0xff]   ;;  %v20713_v23 = vpop.f32.mrf.mxu0 }
 0x4fb   : > { %15335 = vmatprep.subr.bf16.mxu1 %v15871_v1  ;;  %v22219_v62 = vrot.slane %v20641_v28, 5  ;;  %22220 = vst [vmem:[#allocation50_spill] sm:$0xff] %v20713_v23  ;;  %v22221_v28 = vrot.slane %v20686_v56, 5  ;;  %v20734_v4 = vld [vmem:[#allocation3 + $0x68] sm:$0x1] }
 0x4fc   : > { %15398 = vmatmul.mubr.bf16.vlgmr.msra.gmra.mxu0 %v13709_v22  ;;  %v12296_v22 = vrot.slane %v20658_v3, 5  ;;  %v12304_v61 = vsel %vm17204_vm6, %v12302_v17, %v12303_v36  ;;  %v12211_v36 = vld [vmem:[#allocation3 + $0x54] sm:$0xe]  ;;  %v22224_v17 = vrot.slane %v20696_v27, 5  ;;  %v15982_v23 = vld [vmem:[#allocation3 + $0x50] sm:$0x1] }
 0x4fd   : > { %15401 = vmatprep.mubr.bf16.mxu0 %v13710_v29  ;;  %v10656_v29 = vsel %vm17204_vm6, %v13607_v21, %v22218_v37  ;;  %v10663_v7 = vsel %vm17204_vm6, %v13608_v53, %v22219_v62  ;;  %v10671_v37 = vrot.slane %v22221_v28, 4  ;;  %v22223_v53 = vrot.slane %v20631_v26, 5 }
 0x4fe   : > { %15336 = vmatpush3.bf16.msra.mxu1 %v15871_v1  ;;  %v12297_v38 = vsel %vm17204_vm6, %v12295_v11, %v12296_v22  ;;  %v13623_v55 = vcombine.low %v10656_v29, %v10659_v41  ;;  %v13624_v21 = vcombine.low %v10663_v7, %v10666_v25  ;;  %v20715_v1 = vld [vmem:[#allocation3 + $0x5c] sm:$0x1]  ;;  %v10573_v41 = vld [vmem:[#allocation3 + $0x48] sm:$0xe]  ;;  %v20720_v22 = vpop.f32.mrf.mxu1  ;;  %v10678_v7 = vrot.slane %v22224_v17, 4 }
 0x4ff   : > { %15337 = vmatprep.subr.bf16.mxu1 %v15872_v43  ;;  %22222 = vst [vmem:[#allocation51_spill] sm:$0xff] %v20720_v22  ;;  %v12294_v29 = vsel %vm17204_vm6, %v13695_v57, %v22223_v53  ;;  %v20728_v25 = vld [vmem:[#allocation3 + $0x70] sm:$0xf]  ;;  %v22225_v11 = vrot.slane %v20639_v54, 5  ;;  %v10672_v22 = vrot.slane %v15982_v23, 5  ;;  %v13609_v17 = vrot.slane %v10573_v41, 9 }
 0x500   : > { %v13711_v62 = vcombine.low %v12294_v29, %v12297_v38  ;;  %v20738_v38 = vld [vmem:[#allocation3 + $0x7c] sm:$0xf]  ;;  %v15874_v29 = vld [vmem:[#allocation10 + $0x1d8] sm:$0xff]   ;;  %v20750_v41 = vpop.f32.mrf.mxu1 }
 0x501   : > { %15258 = vmatmul.mubr.bf16.gmra.mxu1 %v13623_v55  ;;  %v12301_v28 = vsel %vm17204_vm6, %v13696_v8, %v22225_v11  ;;  %v22226_v55 = vrot.slane %v20684_v18, 5  ;;  %v20740_v8 = vpop.f32.mrf.mxu0  ;;  %v22228_v11 = vrot.slane %v20694_v58, 5  ;;  %22229 = vst [vmem:[#allocation53_spill] sm:$0xff] %v20750_v41  ;;  %v22241_v46 = vrot.slane %v20738_v38, 5 }
 0x502   : > { %15261 = vmatprep.mubr.bf16.mxu1 %v13624_v21  ;;  %15338 = vmatpush3.bf16.msra.mxu1 %v15872_v43  ;;  %v13712_v57 = vcombine.low %v12301_v28, %v12304_v61  ;;  %22227 = vst [vmem:[#allocation52_spill] sm:$0xff] %v20740_v8  ;;  %v12212_v21 = vld [vmem:[#allocation3 + $0x60] sm:$0xe]  ;;  %v10673_v43 = vsel %vm17204_vm6, %v10671_v37, %v10672_v22  ;;  %v20747_v28 = vld [vmem:[#allocation3 + $0x64] sm:$0xf]  ;;  %v13697_v37 = vrot.slane %v12211_v36, 9  ;;  %v20764_v41 = vpop.f32.mrf.mxu1 }
 0x503   : > { %v12309_v53 = vrot.slane %v22226_v55, 4  ;;  %15339 = vmatprep.subr.bf16.mxu1 %v15873_v47  ;;  %v12316_v23 = vrot.slane %v22228_v11, 4  ;;  %v13610_v55 = vrot.slane %v10574_v2, 9  ;;  %v10680_v8 = vsel %vm17204_vm6, %v10678_v7, %v10679_v50  ;;  %22231 = vst [vmem:[#allocation54_spill] sm:$0xff] %v20764_v41  ;;  %v12213_v41 = vld [vmem:[#allocation3 + $0x6c] sm:$0xe] }
 0x504   : > { %15402 = vmatmul.mubr.bf16.gmra.mxu0 %v13711_v62  ;;  %v12310_v62 = vrot.slane %v20715_v1, 5  ;;  %v12317_v22 = vrot.slane %v20734_v4, 5  ;;  %v22230_v61 = vrot.slane %v20686_v56, 5  ;;  %v13698_v2 = vrot.slane %v12212_v21, 9  ;;  %v10575_v56 = vld [vmem:[#allocation3 + $0x60] sm:$0xe] }
 0x505   : > { %15405 = vmatprep.mubr.bf16.mxu0 %v13712_v57  ;;  %v22232_v11 = vrot.slane %v20696_v27, 5  ;;  %v22236_v27 = vrot.slane %v20747_v28, 5 }
 0x506   : > { %v10670_v24 = vsel %vm17204_vm6, %v13609_v17, %v22230_v61  ;;  %15340 = vmatpush3.bf16.msra.mxu1 %v15873_v47  ;;  %v12311_v50 = vsel %vm17204_vm6, %v12309_v53, %v12310_v62  ;;  %v15875_v17 = vld [vmem:[#allocation10 + $0x1d0] sm:$0xff]   ;;  %v20774_v61 = vpop.f32.mrf.mxu0  ;;  %v12318_v47 = vsel %vm17204_vm6, %v12316_v23, %v12317_v22  ;;  %v22234_v53 = vrot.slane %v20728_v25, 5 }
 0x507   : > { %v13625_v7 = vcombine.low %v10670_v24, %v10673_v43  ;;  %v10677_v36 = vsel %vm17204_vm6, %v13610_v55, %v22232_v11  ;;  %15341 = vmatprep.subr.bf16.mxu1 %v15874_v29  ;;  %22233 = vst [vmem:[#allocation55_spill] sm:$0xff] %v20774_v61  ;;  %v20780_v43 = vld [vmem:[#allocation3 + $0x80] sm:$0x1]  ;;  %v10685_v24 = vrot.slane %v22236_v27, 4  ;;  %v22237_v62 = vrot.slane %v20684_v18, 5 }
 0x508   : > { %v13626_v57 = vcombine.low %v10677_v36, %v10680_v8  ;;  %v12323_v21 = vrot.slane %v22234_v53, 4  ;;  %22235 = vst [vmem:[#allocation56_spill] sm:$0xff] %v20780_v43  ;;  %v22238_v11 = vrot.slane %v20694_v58, 5  ;;  %v12214_v8 = vld [vmem:[#allocation3 + $0x78] sm:$0xe]  ;;  %v22239_v36 = vrot.slane %v20755_v33, 5  ;;  %v20794_v20 = vpop.f32.mrf.mxu0 }
 0x509   : > { %v12308_v55 = vsel %vm17204_vm6, %v13697_v37, %v22237_v62  ;;  %15262 = vmatmul.mubr.bf16.gmra.mxu1 %v13625_v7  ;;  %v10576_v22 = vld [vmem:[#allocation3 + $0x6c] sm:$0xe]  ;;  %22240 = vst [vmem:[#allocation57_spill] sm:$0xff] %v20794_v20  ;;  %v12324_v27 = vrot.slane %v20772_v15, 5  ;;  %v12330_v37 = vrot.slane %v22241_v46, 4  ;;  %v15876_v20 = vld [vmem:[#allocation10 + $0x1c8] sm:$0xff]  }
 0x50a   : > { %v12315_v23 = vsel %vm17204_vm6, %v13698_v2, %v22238_v11  ;;  %v10692_v53 = vrot.slane %v22239_v36, 4  ;;  %v13713_v61 = vcombine.low %v12308_v55, %v12311_v50  ;;  %15265 = vmatprep.mubr.bf16.mxu1 %v13626_v57  ;;  %v15986_v62 = vld [vmem:[#allocation3 + $0x68] sm:$0x1]  ;;  %15342 = vmatpush3.bf16.msra.mxu1 %v15874_v29  ;;  %v20801_v2 = vpop.f32.mrf.mxu1  ;;  %v13699_v11 = vrot.slane %v12213_v41, 9  ;;  %v15987_v50 = vld [vmem:[#allocation3 + $0x74] sm:$0x1] }
 0x50b   : > { %v10686_v39 = vrot.slane %v15986_v62, 5  ;;  %22242 = vst [vmem:[#allocation58_spill] sm:$0xff] %v20801_v2  ;;  %v13714_v7 = vcombine.low %v12315_v23, %v12318_v47  ;;  %v12331_v36 = vrot.slane %v20780_v43, 5  ;;  %v10693_v57 = vrot.slane %v15987_v50, 5  ;;  %v20804_v55 = vld [vmem:[#allocation3 + $0x94] sm:$0xf]  ;;  %15343 = vmatprep.subr.bf16.mxu1 %v15875_v17 }
 0x50c   : > { %15406 = vmatmul.mubr.bf16.gmra.mxu0 %v13713_v61  ;;  %v12325_v46 = vsel %vm17204_vm6, %v12323_v21, %v12324_v27  ;;  %v13611_v62 = vrot.slane %v10575_v56, 9  ;;  %v13612_v47 = vrot.slane %v10576_v22, 9  ;;  %v12335_v50 = vrot.slane %v20799_v60, 5  ;;  %v20816_v2 = vld [vmem:[#allocation3 + $0x88] sm:$0xf] }
 0x50d   : > { %v10687_v29 = vsel %vm17204_vm6, %v10685_v24, %v10686_v39  ;;  %15409 = vmatprep.mubr.bf16.mxu0 %v13714_v7  ;;  %v10694_v23 = vsel %vm17204_vm6, %v10692_v53, %v10693_v57  ;;  %v13700_v21 = vrot.slane %v12214_v8, 9  ;;  %v12332_v56 = vsel %vm17204_vm6, %v12330_v37, %v12331_v36  ;;  %v20821_v39 = vpop.f32.mrf.mxu0  ;;  %v12215_v27 = vld [vmem:[#allocation3 + $0x84] sm:$0xe]  ;;  %v20828_v7 = vpop.f32.mrf.mxu1  ;;  %v20838_v36 = vld [vmem:[#allocation3 + $0x8c] sm:$0x1] }
 0x50e   : > { %22243 = vst [vmem:[#allocation59_spill] sm:$0xff] %v20821_v39  ;;  %v22244_v24 = vrot.slane %v20747_v28, 5  ;;  %v12342_v53 = vrot.slane %v20804_v55, 5  ;;  %15344 = vmatpush3.bf16.msra.mxu1 %v15875_v17  ;;  %22245 = vst [vmem:[#allocation60_spill] sm:$0xff] %v20828_v7  ;;  %v22246_v57 = vrot.slane %v20728_v25, 5  ;;  %v22247_v37 = vrot.slane %v20755_v33, 5 }
 0x50f   : > { %22248 = vst [vmem:[#allocation61_spill] sm:$0xff] %v20838_v36  ;;  %15345 = vmatprep.subr.bf16.mxu1 %v15876_v20  ;;  %v22249_v17 = vrot.slane %v20738_v38, 5  ;;  %v20852_v5 = vpop.f32.mrf.mxu0  ;;  %v20855_v34 = vpop.f32.mrf.mxu1 }
 0x510   : > { %v10684_v22 = vsel %vm17204_vm6, %v13611_v62, %v22244_v24  ;;  %v12322_v8 = vsel %vm17204_vm6, %v13699_v11, %v22246_v57  ;;  %v10691_v28 = vsel %vm17204_vm6, %v13612_v47, %v22247_v37  ;;  %v12216_v62 = vld [vmem:[#allocation3 + $0x90] sm:$0xe]  ;;  %v15877_v24 = vld [vmem:[#allocation10 + $0x1c0] sm:$0xff]   ;;  %v22251_v11 = vrot.slane %v20810_v32, 5  ;;  %22254 = vst [vmem:[#allocation64_spill] sm:$0xff] %v20852_v5  ;;  %22255 = vst [vmem:[#allocation65_spill] sm:$0xff] %v20855_v34 }
 0x511   : > { %v13627_v61 = vcombine.low %v10684_v22, %v10687_v29  ;;  %v13715_v41 = vcombine.low %v12322_v8, %v12325_v46  ;;  %v12329_v39 = vsel %vm17204_vm6, %v13700_v21, %v22249_v17  ;;  %v13628_v7 = vcombine.low %v10691_v28, %v10694_v23  ;;  %v20848_v29 = vld [vmem:[#allocation3 + $0xa0] sm:$0xf]  ;;  %v10577_v37 = vld [vmem:[#allocation3 + $0x78] sm:$0xe]  ;;  %v20863_v5 = vld [vmem:[#allocation3 + $0xac] sm:$0xf] }
 0x512   : > { %v10699_v33 = vrot.slane %v22251_v11, 4  ;;  %22252 = vst [vmem:[#allocation63_spill] sm:$0xff] %v20848_v29  ;;  %v13716_v47 = vcombine.low %v12329_v39, %v12332_v56  ;;  %v13701_v22 = vrot.slane %v12215_v27, 9  ;;  %v12337_v57 = vrot.slane %v12335_v50, 4  ;;  %v15990_v17 = vld [vmem:[#allocation3 + $0x80] sm:$0x1]  ;;  %15346 = vmatpush3.bf16.msra.mxu1 %v15876_v20 }
 0x513   : > { %15266 = vmatmul.mubr.bf16.gmra.mxu1 %v13627_v61  ;;  %v22253_v46 = vrot.slane %v20816_v2, 5  ;;  %v12338_v23 = vrot.slane %v20838_v36, 5  ;;  %v13702_v21 = vrot.slane %v12216_v62, 9  ;;  %v12344_v28 = vrot.slane %v12342_v53, 4  ;;  %v10578_v11 = vld [vmem:[#allocation3 + $0x84] sm:$0xe]  ;;  %15347 = vmatprep.subr.bf16.mxu1 %v15877_v24 }
 0x514   : > { %15269 = vmatprep.mubr.bf16.mxu1 %v13628_v7  ;;  %v10700_v45 = vrot.slane %v15990_v17, 5  ;;  %v12336_v61 = vsel %vm17204_vm6, %v13701_v22, %v12335_v50  ;;  %v12345_v56 = vrot.slane %v20844_v52, 5  ;;  %v15991_v39 = vld [vmem:[#allocation3 + $0x8c] sm:$0x1]  ;;  %v11453_v7 = vld [vmem:[#allocation3 + $0x18] sm:$0xf]  ;;  %15410 = vmatmul.mubr.bf16.gmra.mxu0 %v13715_v41  ;;  %v20867_v50 = vpop.f32.mrf.mxu1  ;;  %v20877_v52 = vpop.f32.mrf.mxu0 }
 0x515   : > { %v10706_v8 = vrot.slane %v22253_v46, 4  ;;  %v10707_v27 = vrot.slane %v15991_v39, 5  ;;  %v12349_v46 = vrot.slane %v20848_v29, 5  ;;  %v13613_v62 = vrot.slane %v10577_v37, 9  ;;  %22256 = vst [vmem:[#allocation66_spill] sm:$0xff] %v20863_v5  ;;  %15413 = vmatprep.mubr.bf16.mxu0 %v13716_v47  ;;  %22257 = vst [vmem:[#allocation67_spill] sm:$0xff] %v20867_v50 }
 0x516   : > { %v10701_v17 = vsel %vm17204_vm6, %v10699_v33, %v10700_v45  ;;  %v11511_v20 = vshll.u32 %v20569_v42, 16  ;;  %v11515_v34 = vshrl.u32 %v20569_v42, 16  ;;  %v12339_v22 = vsel %vm17204_vm6, %v12337_v57, %v12338_v23  ;;  %v12217_v45 = vld [vmem:[#allocation3 + $0x9c] sm:$0xe]  ;;  %v20875_v33 = vld [vmem:[#allocation3 + $0xb8] sm:$0xf]  ;;  %15348 = vmatpush3.bf16.msra.mxu1 %v15877_v24 }
 0x517   : > { %v12343_v39 = vsel %vm17204_vm6, %v13702_v21, %v12342_v53  ;;  %v13614_v41 = vrot.slane %v10578_v11, 9  ;;  %v10708_v37 = vsel %vm17204_vm6, %v10706_v8, %v10707_v27  ;;  %22258 = vst [vmem:[#allocation68_spill] sm:$0xff] %v20877_v52  ;;  %v12346_v42 = vsel %vm17204_vm6, %v12344_v28, %v12345_v56  ;;  %v20885_v23 = vld [vmem:[#allocation3 + $0xa4] sm:$0x1]  ;;  %v12218_v28 = vld [vmem:[#allocation3 + $0xa8] sm:$0xe] }
 0x518   : > { %v22259_v47 = vrot.slane %v20810_v32, 5  ;;  %22260 = vst [vmem:[#allocation69_spill] sm:$0xff] %v20885_v23  ;;  %v20887_v53 = vld [vmem:[#allocation3 + $0xc4] sm:$0xf]  ;;  %v11502_v21 = vshrl.u32 %v11453_v7, 16  ;;  %v11505_v8 = vshll.u32 %v11453_v7, 16  ;;  %v20894_v29 = vpop.f32.mrf.mxu0 }
 0x519   : > { %v22261_v27 = vrot.slane %v20816_v2, 5  ;;  %v12351_v50 = vrot.slane %v12349_v46, 4  ;;  %v12356_v32 = vrot.slane %v20863_v5, 5  ;;  %22262 = vst [vmem:[#allocation70_spill] sm:$0xff] %v20894_v29  ;;  %v20899_v24 = vrot.slane %v11511_v20, 5 }
 0x51a   : > { %v10698_v57 = vsel %vm17204_vm6, %v13613_v62, %v22259_v47  ;;  %v20896_v62 = vld [vmem:[#allocation3 + $0xb0] sm:$0x1]  ;;  %v21947_v47 = vrot.slane %v20875_v33, 5  ;;  %v11517_v7 = vrot.slane %v11515_v34, 4  ;;  %v13717_v2 = vcombine.low %v12336_v61, %v12339_v22  ;;  %v11456_v5 = vld [vmem:[#allocation3 + $0x24] sm:$0xf] }
 0x51b   : > { %v13629_v11 = vcombine.low %v10698_v57, %v10701_v17  ;;  %v10705_v52 = vsel %vm17204_vm6, %v13614_v41, %v22261_v27  ;;  %22263 = vst [vmem:[#allocation71_spill] sm:$0xff] %v20896_v62  ;;  %v20901_v17 = vpop.f32.mrf.mxu1  ;;  %v13703_v57 = vrot.slane %v12217_v45, 9  ;;  %v12352_v41 = vrot.slane %v20885_v23, 5  ;;  %v12219_v29 = vld [vmem:[#allocation3 + $0xb4] sm:$0xe]  ;;  %v20910_v45 = vpop.f32.mrf.mxu0 }
 0x51c   : > { %v13630_v56 = vcombine.low %v10705_v52, %v10708_v37  ;;  %22264 = vst [vmem:[#allocation72_spill] sm:$0xff] %v20901_v17  ;;  %v13718_v52 = vcombine.low %v12343_v39, %v12346_v42  ;;  %v13704_v37 = vrot.slane %v12218_v28, 9  ;;  %v11504_v36 = vrot.slane %v11502_v21, 4  ;;  %22265 = vst [vmem:[#allocation73_spill] sm:$0xff] %v20910_v45  ;;  %v12220_v27 = vld [vmem:[#allocation3 + $0xc0] sm:$0xe]  ;;  %15414 = vmatmul.mubr.bf16.gmra.mxu0 %v13717_v2 }
 0x51d   : > { %15270 = vmatmul.mubr.bf16.gmra.mxu1 %v13629_v11  ;;  %v11507_v43 = vrot.slane %v11505_v8, 5  ;;  %v12350_v20 = vsel %vm17204_vm6, %v13703_v57, %v12349_v46  ;;  %v12353_v34 = vsel %vm17204_vm6, %v12351_v50, %v12352_v41  ;;  %v12358_v61 = vrot.slane %v12356_v32, 4  ;;  %v20912_v11 = vld [vmem:[#allocation3 + $0xbc] sm:$0x1]  ;;  %v20916_v42 = vld [vmem:[#allocation3 + $0xc8] sm:$0x1]  ;;  %v20919_v28 = vpop.f32.mrf.mxu1 }
 0x51e   : > { %15273 = vmatprep.mubr.bf16.mxu1 %v13630_v56  ;;  %v12359_v22 = vrot.slane %v20896_v62, 5  ;;  %v12365_v39 = vrot.slane %v21947_v47, 4  ;;  %v11518_v21 = vor.u32 %v11517_v7, %v20899_v24  ;;  %v11526_v46 = vshrl.u32 %v11456_v5, 16  ;;  %22266 = vst [vmem:[#allocation74_spill] sm:$0xff] %v20919_v28  ;;  %15417 = vmatprep.mubr.bf16.mxu0 %v13718_v52  ;;  %v20931_v28 = vpop.f32.mrf.mxu0  ;;  %v579_v23 = vld [vmem:[#allocation3 + $0xd4] sm:$0x1] }
 0x51f   : > { %v11529_v8 = vshll.u32 %v11456_v5, 16  ;;  %v22267_v50 = vrot.slane %v20887_v53, 5  ;;  %v11521_v57 = vshll.u32 %v20598_v10, 16  ;;  %v11535_v41 = vshll.u32 %v20602_v6, 16  ;;  %v11459_v5 = vld [vmem:[#allocation3 + $0x30] sm:$0xf] }
 0x520   : > { %v11539_v2 = vshrl.u32 %v20602_v6, 16  ;;  %v13719_v45 = vcombine.low %v12350_v20, %v12353_v34  ;;  %v12357_v47 = vsel %vm17204_vm6, %v13704_v37, %v12356_v32  ;;  %v12366_v7 = vrot.slane %v20912_v11, 5  ;;  %22268 = vst [vmem:[#allocation75_spill] sm:$0xff] %v20931_v28  ;;  %v20938_v34 = vpop.f32.mrf.mxu1 }
 0x521   : > { %v12372_v56 = vrot.slane %v22267_v50, 4  ;;  %v11508_v17 = vor.u32 %v11507_v43, %v11504_v36  ;;  %v12360_v52 = vsel %vm17204_vm6, %v12358_v61, %v12359_v22  ;;  %v13705_v50 = vrot.slane %v12219_v29, 9 }
 0x522   : > { %v13706_v62 = vrot.slane %v12220_v27, 9  ;;  %v12373_v10 = vrot.slane %v20916_v42, 5  ;;  %v20936_v6 = vsel %vm17204_vm6, %v12365_v39, %v12366_v7  ;;  %v11519_v20 = vrot.slane %v11518_v21, 4  ;;  %v20956_v7 = vpop.f32.mrf.mxu1 }
 0x523   : > { %v11528_v32 = vrot.slane %v11526_v46, 4  ;;  %v11531_v37 = vrot.slane %v11529_v8, 5  ;;  %v22269_v43 = vcombine.low %v20522_v59, %v20526_v14  ;;  %v11523_v29 = vrot.slane %v11521_v57, 5  ;;  %v20954_v59 = vld [vmem:[#allocation3 + $0xd0] sm:$0xf] }
 0x524   : > { %v20945_v36 = vsel %vm17204_vm6, %v12372_v56, %v12373_v10  ;;  %v20947_v27 = vrot.slane %v11535_v41, 5  ;;  %v11541_v61 = vrot.slane %v11539_v2, 4  ;;  %v22270_v22 = vcombine.low %v20537_v44, %v20541_v51  ;;  %v20958_v56 = vpop.f32.mrf.mxu0  ;;  %15418 = vmatmul.mubr.bf16.gmra.mxu0 %v13719_v45 }
 0x525   : > { %15274 = vmatmul.mubr.bf16.gmra.mxu1 %v22269_v43  ;;  %v11509_v39 = vrot.slane %v11508_v17, 4  ;;  %v11550_v21 = vshrl.u32 %v11459_v5, 16  ;;  %v11553_v46 = vshll.u32 %v11459_v5, 16  ;;  %v580_v8 = vsel %vm16447_vm8, 0, %v579_v23  ;;  %22271 = vst [vmem:[#allocation76_spill] sm:$0xff] %v20958_v56 }
 0x526   : > { %15277 = vmatprep.mubr.bf16.mxu1 %v22270_v22  ;;  %v13720_v14 = vcombine.low %v12357_v47, %v12360_v52  ;;  %v11545_v57 = vshll.u32 %v20623_v19, 16  ;;  %v11559_v41 = vshll.u32 %v20606_v49, 16  ;;  %v11563_v44 = vshrl.u32 %v20606_v49, 16  ;;  %581 = vst [vmem:[#allocation3 + $0xd4] sm:$0x1] %v580_v8  ;;  %v20975_v45 = vpop.f32.mrf.mxu0 }
 0x527   : > { %v22272_v51 = vrot.slane %v20875_v33, 5  ;;  %v22273_v23 = vrot.slane %v20887_v53, 5  ;;  %v11524_v17 = vsel %vm16510_vm0, %v11519_v20, %v11523_v29  ;;  %v11532_v19 = vor.u32 %v11531_v37, %v11528_v32  ;;  %22274 = vst [vmem:[#allocation77_spill] sm:$0xff] %v20975_v45  ;;  %v11462_v52 = vld [vmem:[#allocation3 + $0x3c] sm:$0xf]  ;;  %v20983_v37 = vpop.f32.mrf.mxu1 }
 0x528   : > { %15421 = vmatprep.mubr.bf16.mxu0 %v13720_v14  ;;  %v11542_v5 = vor.u32 %v11541_v61, %v20947_v27  ;;  %v11552_v10 = vrot.slane %v11550_v21, 4  ;;  %v11555_v43 = vrot.slane %v11553_v46, 5  ;;  %v11569_v20 = vshll.u32 %v20627_v40, 16  ;;  %v12221_v32 = vld [vmem:[#allocation3 + $0xcc] sm:$0xe]  ;;  %v20995_v40 = vpop.f32.mrf.mxu0 }
 0x529   : > { %v12364_v31 = vsel %vm17204_vm6, %v13705_v50, %v22272_v51  ;;  %v12371_v47 = vsel %vm17204_vm6, %v13706_v62, %v22273_v23  ;;  %v12377_v50 = vrot.slane %v20954_v59, 5  ;;  %v11514_v62 = vsel %vm16510_vm0, %v11509_v39, %v20899_v24  ;;  %22276 = vst [vmem:[#allocation78_spill] sm:$0xff] %v20995_v40  ;;  %v11465_v46 = vld [vmem:[#allocation3 + $0x48] sm:$0xf]  ;;  %v11498_v56 = vld [vmem:[#allocation3 + $0xcc] sm:$0xf] }
 0x52a   : > { %v13721_v2 = vcombine.low %v12364_v31, %v20936_v6  ;;  %v13722_v49 = vcombine.low %v12371_v47, %v20945_v36  ;;  %v13668_v6 = vcombine.low %v11514_v62, %v11524_v17  ;;  %v20985_v36 = vrot.slane %v11545_v57, 5  ;;  %v21007_v17 = vpop.f32.mrf.mxu1 }
 0x52b   : > { %v20987_v29 = vrot.slane %v11559_v41, 5  ;;  %v11565_v61 = vrot.slane %v11563_v44, 4  ;;  %v20989_v22 = vrot.slane %v11532_v19, 4  ;;  %v11574_v8 = vshrl.u32 %v11462_v52, 16  ;;  %22278 = vst [vmem:[#allocation79_spill] sm:$0xff] %v21007_v17 }
 0x52c   : > { %v11577_v14 = vshll.u32 %v11462_v52, 16  ;;  %v11583_v51 = vshll.u32 %v20631_v26, 16  ;;  %v22275_v24 = vcombine.low %v20554_v63, %v20558_v35  ;;  %v11543_v39 = vrot.slane %v11542_v5, 4  ;;  %v11468_v19 = vld [vmem:[#allocation3 + $0x54] sm:$0xf]  ;;  %15422 = vmatmul.mubr.bf16.gmra.mxu0 %v13721_v2 }
 0x52d   : > { %v11587_v21 = vshrl.u32 %v20631_v26, 16  ;;  %v13707_v57 = vrot.slane %v12221_v32, 9  ;;  %v12379_v41 = vrot.slane %v12377_v50, 4  ;;  %v22277_v44 = vcombine.low %v20573_v48, %v20577_v12  ;;  %v21005_v35 = vld [vmem:[#allocation3 + $0xd4] sm:$0x1]  ;;  %15425 = vmatprep.mubr.bf16.mxu0 %v13722_v49 }
 0x52e   : > { %15278 = vmatmul.mubr.bf16.gmra.mxu1 %v22275_v24  ;;  %v11556_v31 = vor.u32 %v11555_v43, %v11552_v10  ;;  %v21001_v23 = vrot.slane %v11569_v20, 5  ;;  %v11607_v47 = vshll.u32 %v20639_v54, 16  ;;  %v11611_v63 = vshrl.u32 %v20639_v54, 16  ;;  %v21015_v54 = vpop.f32.mrf.mxu0 }
 0x52f   : > { %15281 = vmatprep.mubr.bf16.mxu1 %v22277_v44  ;;  %v11566_v26 = vor.u32 %v11565_v61, %v20987_v29  ;;  %v11631_v5 = vshll.u32 %v20684_v18, 16  ;;  %v11635_v52 = vshrl.u32 %v20684_v18, 16  ;;  %v12380_v48 = vrot.slane %v21005_v35, 5  ;;  %22279 = vst [vmem:[#allocation80_spill] sm:$0xff] %v21015_v54 }
 0x530   : > { %v11576_v12 = vrot.slane %v11574_v8, 4  ;;  %v11579_v62 = vrot.slane %v11577_v14, 5  ;;  %v21013_v10 = vrot.slane %v11583_v51, 5  ;;  %v11598_v43 = vshrl.u32 %v11465_v46, 16  ;;  %v21023_v14 = vpop.f32.mrf.mxu1 }
 0x531   : > { %v11589_v20 = vrot.slane %v11587_v21, 4  ;;  %v11601_v32 = vshll.u32 %v11465_v46, 16  ;;  %v12378_v61 = vsel %vm17204_vm6, %v13707_v57, %v12377_v50  ;;  %v12381_v24 = vsel %vm17204_vm6, %v12379_v41, %v12380_v48  ;;  %v11471_v21 = vld [vmem:[#allocation3 + $0x60] sm:$0xf] }
 0x532   : > { %v21021_v18 = vrot.slane %v11607_v47, 5  ;;  %v11613_v44 = vrot.slane %v11611_v63, 4  ;;  %v11622_v2 = vshrl.u32 %v11468_v19, 16  ;;  %v11625_v8 = vshll.u32 %v11468_v19, 16  ;;  %v21035_v63 = vpop.f32.mrf.mxu1 }
 0x533   : > { %v11538_v49 = vsel %vm16510_vm0, %v20989_v22, %v20947_v27  ;;  %v11548_v51 = vsel %vm16510_vm0, %v11543_v39, %v20985_v36  ;;  %v21032_v50 = vrot.slane %v11631_v5, 5  ;;  %v11637_v13 = vrot.slane %v11635_v52, 4  ;;  %v21040_v27 = vpop.f32.mrf.mxu0 }
 0x534   : > { %v11557_v46 = vrot.slane %v11556_v31, 4  ;;  %v11567_v57 = vrot.slane %v11566_v26, 4  ;;  %v11593_v41 = vshll.u32 %v20658_v3, 16  ;;  %v13723_v47 = vcombine.low %v12378_v61, %v12381_v24  ;;  %22281 = vst [vmem:[#allocation81_spill] sm:$0xff] %v21040_v27  ;;  %v21044_v48 = vpop.f32.mrf.mxu1 }
 0x535   : > { %v22280_v19 = vcombine.low %v20583_v30, %v20587_v16  ;;  %v11580_v22 = vor.u32 %v11579_v62, %v11576_v12  ;;  %v11590_v36 = vor.u32 %v11589_v20, %v21013_v10  ;;  %v11600_v39 = vrot.slane %v11598_v43, 4 }
 0x536   : > { %v11603_v5 = vrot.slane %v11601_v32, 5  ;;  %v11614_v31 = vor.u32 %v11613_v44, %v21021_v18  ;;  %v11624_v26 = vrot.slane %v11622_v2, 4  ;;  %v11627_v52 = vrot.slane %v11625_v8, 5  ;;  %15426 = vmatmul.mubr.bf16.gmra.mxu0 %v13723_v47  ;;  %v21053_v20 = vpop.f32.mrf.mxu1  ;;  %v21055_v32 = vpop.f32.mrf.mxu0 }
 0x537   : > { %15282 = vmatmul.mubr.bf16.gmra.mxu1 %v22280_v19  ;;  %v11646_v3 = vshrl.u32 %v11471_v21, 16  ;;  %v11638_v61 = vor.u32 %v11637_v13, %v21032_v50  ;;  %v11649_v24 = vshll.u32 %v11471_v21, 16  ;;  %v11655_v30 = vshll.u32 %v20694_v58, 16  ;;  %22282 = vst [vmem:[#allocation82_spill] sm:$0xff] %v21055_v32  ;;  %v11474_v21 = vld [vmem:[#allocation3 + $0x6c] sm:$0xf] }
 0x538   : > { %15349 = vmatprep.mubr.bf16.mxu1 %v13668_v6  ;;  %v11659_v16 = vshrl.u32 %v20694_v58, 16  ;;  %v13669_v12 = vcombine.low %v11538_v49, %v11548_v51  ;;  %v11562_v62 = vsel %vm16510_vm0, %v11557_v46, %v20987_v29  ;;  %v11595_v6 = vrot.slane %v11593_v41, 5  ;;  %v21061_v46 = vpop.f32.mrf.mxu1 }
 0x539   : > { %v11617_v43 = vshll.u32 %v20674_v0, 16  ;;  %v11572_v44 = vsel %vm16510_vm0, %v11567_v57, %v21001_v23  ;;  %v11581_v2 = vrot.slane %v11580_v22, 4  ;;  %v11604_v8 = vor.u32 %v11603_v5, %v11600_v39  ;;  %v21063_v0 = vpop.f32.mrf.mxu0 }
 0x53a   : > { %v11641_v58 = vshll.u32 %v20715_v1, 16  ;;  %v11591_v49 = vrot.slane %v11590_v36, 4  ;;  %v11615_v51 = vrot.slane %v11614_v31, 4  ;;  %v11628_v13 = vor.u32 %v11627_v52, %v11624_v26  ;;  %22283 = vst [vmem:[#allocation83_spill] sm:$0xff] %v21063_v0  ;;  %v21069_v22 = vpop.f32.mrf.mxu1  ;;  %v11477_v52 = vld [vmem:[#allocation3 + $0x78] sm:$0xf] }
 0x53b   : > { %v11648_v29 = vrot.slane %v11646_v3, 4  ;;  %v11639_v41 = vrot.slane %v11638_v61, 4  ;;  %v11651_v47 = vrot.slane %v11649_v24, 5  ;;  %v21065_v19 = vrot.slane %v11655_v30, 5  ;;  %v21071_v36 = vpop.f32.mrf.mxu0 }
 0x53c   : > { %v11661_v32 = vrot.slane %v11659_v16, 4  ;;  %v13670_v27 = vcombine.low %v11562_v62, %v11572_v44  ;;  %v11619_v23 = vrot.slane %v11617_v43, 5  ;;  %v11679_v57 = vshll.u32 %v20728_v25, 16  ;;  %22284 = vst [vmem:[#allocation84_spill] sm:$0xff] %v21071_v36  ;;  %v21080_v30 = vpop.f32.mrf.mxu1 }
 0x53d   : > { %v11683_v1 = vshrl.u32 %v20728_v25, 16  ;;  %v11586_v39 = vsel %vm16510_vm0, %v11581_v2, %v21013_v10  ;;  %v11643_v5 = vrot.slane %v11641_v58, 5  ;;  %v11670_v31 = vshrl.u32 %v11474_v21, 16  ;;  %v21082_v16 = vpop.f32.mrf.mxu0 }
 0x53e   : > { %v11673_v26 = vshll.u32 %v11474_v21, 16  ;;  %v11596_v3 = vsel %vm16510_vm0, %v11591_v49, %v11595_v6  ;;  %v11605_v61 = vrot.slane %v11604_v8, 4  ;;  %v11620_v25 = vsel %vm16510_vm0, %v11615_v51, %v11619_v23  ;;  %22285 = vst [vmem:[#allocation85_spill] sm:$0xff] %v21082_v16  ;;  %v21090_v8 = vpop.f32.mrf.mxu1 }
 0x53f   : > { %15350 = vmatmul.mubr.bf16.vlgmr.msra.gmra.mxu1 %v13669_v12  ;;  %v11629_v24 = vrot.slane %v11628_v13, 4  ;;  %v11644_v10 = vsel %vm16510_vm0, %v11639_v41, %v11643_v5  ;;  %v11652_v12 = vor.u32 %v11651_v47, %v11648_v29  ;;  %v11662_v62 = vor.u32 %v11661_v32, %v21065_v19  ;;  %v21100_v29 = vpop.f32.mrf.mxu0  ;;  %v11480_v5 = vld [vmem:[#allocation3 + $0x84] sm:$0xf] }
 0x540   : > { %15353 = vmatprep.mubr.bf16.mxu1 %v13670_v27  ;;  %v11665_v27 = vshll.u32 %v20734_v4, 16  ;;  %v21088_v43 = vrot.slane %v11679_v57, 5  ;;  %v11685_v6 = vrot.slane %v11683_v1, 4  ;;  %v11694_v44 = vshrl.u32 %v11477_v52, 16  ;;  %22286 = vst [vmem:[#allocation86_spill] sm:$0xff] %v21100_v29  ;;  %v21102_v41 = vpop.f32.mrf.mxu1 }
 0x541   : > { %v11697_v2 = vshll.u32 %v11477_v52, 16  ;;  %v11672_v58 = vrot.slane %v11670_v31, 4  ;;  %v11675_v49 = vrot.slane %v11673_v26, 5  ;;  %v11703_v51 = vshll.u32 %v20738_v38, 16  ;;  %v11483_v52 = vld [vmem:[#allocation3 + $0x90] sm:$0xf] }
 0x542   : > { %v11707_v13 = vshrl.u32 %v20738_v38, 16  ;;  %v13671_v21 = vcombine.low %v11586_v39, %v11596_v3  ;;  %v11610_v32 = vsel %vm16510_vm0, %v11605_v61, %v21021_v18  ;;  %v11634_v4 = vsel %vm16510_vm0, %v11629_v24, %v21032_v50  ;;  %v21105_v18 = vpop.f32.mrf.mxu0  ;;  %v21107_v3 = vpop.f32.mrf.mxu1 }
 0x543   : > { %v13672_v47 = vcombine.low %v11610_v32, %v11620_v25  ;;  %v13673_v23 = vcombine.low %v11634_v4, %v11644_v10  ;;  %v11653_v57 = vrot.slane %v11652_v12, 4  ;;  %v11667_v1 = vrot.slane %v11665_v27, 5  ;;  %22287 = vst [vmem:[#allocation87_spill] sm:$0xff] %v21105_v18 }
 0x544   : > { %v11663_v31 = vrot.slane %v11662_v62, 4  ;;  %v11686_v38 = vor.u32 %v11685_v6, %v21088_v43  ;;  %v11696_v39 = vrot.slane %v11694_v44, 4  ;;  %v11699_v26 = vrot.slane %v11697_v2, 5  ;;  %v21114_v6 = vpop.f32.mrf.mxu0  ;;  %v21116_v44 = vpop.f32.mrf.mxu1 }
 0x545   : > { %v11676_v50 = vor.u32 %v11675_v49, %v11672_v58  ;;  %v11689_v61 = vshll.u32 %v20772_v15, 16  ;;  %v21110_v24 = vrot.slane %v11703_v51, 5  ;;  %v11709_v25 = vrot.slane %v11707_v13, 4  ;;  %22288 = vst [vmem:[#allocation88_spill] sm:$0xff] %v21114_v6  ;;  %v22290_v6 = vld [vmem:[#allocation56_spill] sm:$0xff] }
 0x546   : > { %v11718_v10 = vshrl.u32 %v11480_v5, 16  ;;  %v11721_v12 = vshll.u32 %v11480_v5, 16  ;;  %v11727_v62 = vshll.u32 %v20799_v60, 16  ;;  %v11731_v27 = vshrl.u32 %v20799_v60, 16  ;;  %v21125_v60 = vpop.f32.mrf.mxu0  ;;  %v21127_v4 = vpop.f32.mrf.mxu1 }
 0x547   : > { %15354 = vmatmul.mubr.bf16.gmra.mxu1 %v13671_v21  ;;  %v11742_v2 = vshrl.u32 %v11483_v52, 16  ;;  %v11745_v32 = vshll.u32 %v11483_v52, 16  ;;  %v11751_v58 = vshll.u32 %v20804_v55, 16  ;;  %v11755_v15 = vshrl.u32 %v20804_v55, 16  ;;  %22289 = vst [vmem:[#allocation89_spill] sm:$0xff] %v21125_v60 }
 0x548   : > { %15357 = vmatprep.mubr.bf16.mxu1 %v13672_v47  ;;  %v11658_v49 = vsel %vm16510_vm0, %v11653_v57, %v21065_v19  ;;  %v11668_v51 = vsel %vm16510_vm0, %v11663_v31, %v11667_v1  ;;  %v11687_v13 = vrot.slane %v11686_v38, 4  ;;  %v11700_v21 = vor.u32 %v11699_v26, %v11696_v39  ;;  %v21133_v57 = vpop.f32.mrf.mxu0  ;;  %v21135_v1 = vpop.f32.mrf.mxu1 }
 0x549   : > { %v11677_v47 = vrot.slane %v11676_v50, 4  ;;  %v11691_v5 = vrot.slane %v11689_v61, 5  ;;  %v11710_v52 = vor.u32 %v11709_v25, %v21110_v24  ;;  %v11713_v18 = vshll.u32 %v22290_v6, 16  ;;  %22291 = vst [vmem:[#allocation56_spill] sm:$0xff] %v21133_v57  ;;  %v11486_v50 = vld [vmem:[#allocation3 + $0x9c] sm:$0xf] }
 0x54a   : > { %v11720_v55 = vrot.slane %v11718_v10, 4  ;;  %v11723_v29 = vrot.slane %v11721_v12, 5  ;;  %v21131_v16 = vrot.slane %v11727_v62, 5  ;;  %v11733_v19 = vrot.slane %v11731_v27, 4  ;;  %v21141_v10 = vpop.f32.mrf.mxu0  ;;  %v21143_v12 = vpop.f32.mrf.mxu1 }
 0x54b   : > { %v11744_v31 = vrot.slane %v11742_v2, 4  ;;  %v11747_v38 = vrot.slane %v11745_v32, 5  ;;  %v21137_v39 = vrot.slane %v11751_v58, 5  ;;  %v11757_v26 = vrot.slane %v11755_v15, 4  ;;  %22292 = vst [vmem:[#allocation90_spill] sm:$0xff] %v21141_v10 }
 0x54c   : > { %v13674_v61 = vcombine.low %v11658_v49, %v11668_v51  ;;  %v11692_v25 = vsel %vm16510_vm0, %v11687_v13, %v11691_v5  ;;  %v11701_v6 = vrot.slane %v11700_v21, 4  ;;  %v11682_v62 = vsel %vm16510_vm0, %v11677_v47, %v21088_v43  ;;  %v21149_v49 = vpop.f32.mrf.mxu0  ;;  %v21151_v51 = vpop.f32.mrf.mxu1  ;;  %v22294_v47 = vld [vmem:[#allocation61_spill] sm:$0xff] }
 0x54d   : > { %v11711_v27 = vrot.slane %v11710_v52, 4  ;;  %v11724_v2 = vor.u32 %v11723_v29, %v11720_v55  ;;  %v11734_v32 = vor.u32 %v11733_v19, %v21131_v16  ;;  %v11766_v58 = vshrl.u32 %v11486_v50, 16  ;;  %22293 = vst [vmem:[#allocation91_spill] sm:$0xff] %v21149_v49  ;;  %v22295_v29 = vld [vmem:[#allocation63_spill] sm:$0xff] }
 0x54e   : > { %v11769_v15 = vshll.u32 %v11486_v50, 16  ;;  %v13675_v13 = vcombine.low %v11682_v62, %v11692_v25  ;;  %v11715_v21 = vrot.slane %v11713_v18, 5  ;;  %v11748_v5 = vor.u32 %v11747_v38, %v11744_v31  ;;  %v11489_v50 = vld [vmem:[#allocation3 + $0xa8] sm:$0xf]  ;;  %v21162_v49 = vpop.f32.mrf.mxu1  ;;  %v22297_v31 = vld [vmem:[#allocation62_spill] sm:$0xff] }
 0x54f   : > { %15358 = vmatmul.mubr.bf16.gmra.mxu1 %v13673_v23  ;;  %v11758_v23 = vor.u32 %v11757_v26, %v21137_v39  ;;  %v11706_v43 = vsel %vm16510_vm0, %v11701_v6, %v21110_v24  ;;  %v11737_v52 = vshll.u32 %v22294_v47, 16  ;;  %v11775_v55 = vshll.u32 %v22295_v29, 16  ;;  %v22298_v26 = vld [vmem:[#allocation66_spill] sm:$0xff] }
 0x550   : > { %15361 = vmatprep.mubr.bf16.mxu1 %v13674_v61  ;;  %v11779_v19 = vshrl.u32 %v22295_v29, 16  ;;  %v21160_v61 = vpop.f32.mrf.mxu0  ;;  %v11716_v18 = vsel %vm16510_vm0, %v11711_v27, %v11715_v21  ;;  %v11761_v38 = vshll.u32 %v22297_v31, 16  ;;  %v11799_v25 = vshll.u32 %v22298_v26, 16  ;;  %v21169_v57 = vpop.f32.mrf.mxu1 }
 0x551   : > { %22296 = vst [vmem:[#allocation61_spill] sm:$0xff] %v21160_v61  ;;  %v11803_v24 = vshrl.u32 %v22298_v26, 16  ;;  %v11725_v6 = vrot.slane %v11724_v2, 4  ;;  %v11735_v62 = vrot.slane %v11734_v32, 4  ;;  %v11768_v47 = vrot.slane %v11766_v58, 4 }
 0x552   : > { %v11771_v10 = vrot.slane %v11769_v15, 5  ;;  %v11749_v29 = vrot.slane %v11748_v5, 4  ;;  %v11759_v60 = vrot.slane %v11758_v23, 4  ;;  %v11790_v61 = vshrl.u32 %v11489_v50, 16  ;;  %v21171_v0 = vpop.f32.mrf.mxu0  ;;  %v21175_v40 = vpop.f32.mrf.mxu1  ;;  %v11492_v15 = vld [vmem:[#allocation3 + $0xb4] sm:$0xf] }
 0x553   : > { %v11793_v36 = vshll.u32 %v11489_v50, 16  ;;  %22299 = vst [vmem:[#allocation63_spill] sm:$0xff] %v21171_v0  ;;  %v13676_v54 = vcombine.low %v11706_v43, %v11716_v18  ;;  %v11739_v27 = vrot.slane %v11737_v52, 5  ;;  %v21173_v21 = vrot.slane %v11775_v55, 5  ;;  %v22301_v52 = vld [vmem:[#allocation69_spill] sm:$0xff] }
 0x554   : > { %v11781_v31 = vrot.slane %v11779_v19, 4  ;;  %v11763_v2 = vrot.slane %v11761_v38, 5  ;;  %v21177_v32 = vrot.slane %v11799_v25, 5  ;;  %v11805_v58 = vrot.slane %v11803_v24, 4  ;;  %v21179_v26 = vpop.f32.mrf.mxu0  ;;  %v21187_v19 = vpop.f32.mrf.mxu1 }
 0x555   : > { %22300 = vst [vmem:[#allocation62_spill] sm:$0xff] %v21179_v26  ;;  %v11730_v5 = vsel %vm16510_vm0, %v11725_v6, %v21131_v16  ;;  %v11740_v23 = vsel %vm16510_vm0, %v11735_v62, %v11739_v27  ;;  %v11772_v43 = vor.u32 %v11771_v10, %v11768_v47  ;;  %v11785_v55 = vshll.u32 %v22301_v52, 16  ;;  %v11495_v6 = vld [vmem:[#allocation3 + $0xc0] sm:$0xf] }
 0x556   : > { %v11764_v50 = vsel %vm16510_vm0, %v11759_v60, %v11763_v2  ;;  %v11795_v18 = vrot.slane %v11793_v36, 5  ;;  %v21194_v38 = vpop.f32.mrf.mxu0  ;;  %v11782_v16 = vor.u32 %v11781_v31, %v21173_v21  ;;  %v11814_v25 = vshrl.u32 %v11492_v15, 16  ;;  %v21199_v62 = vpop.f32.mrf.mxu1 }
 0x557   : > { %15362 = vmatmul.mubr.bf16.gmra.mxu1 %v13675_v13  ;;  %v11754_v13 = vsel %vm16510_vm0, %v11749_v29, %v21137_v39  ;;  %22302 = vst [vmem:[#allocation66_spill] sm:$0xff] %v21194_v38  ;;  %v11823_v10 = vshll.u32 %v20875_v33, 16  ;;  %v11827_v24 = vshrl.u32 %v20875_v33, 16  ;;  %v11806_v47 = vor.u32 %v11805_v58, %v21177_v32  ;;  %v22304_v33 = vld [vmem:[#allocation71_spill] sm:$0xff] }
 0x558   : > { %15365 = vmatprep.mubr.bf16.mxu1 %v13676_v54  ;;  %v11792_v54 = vrot.slane %v11790_v61, 4  ;;  %v11817_v39 = vshll.u32 %v11492_v15, 16  ;;  %v11847_v29 = vshll.u32 %v20887_v53, 16  ;;  %v11851_v60 = vshrl.u32 %v20887_v53, 16  ;;  %v21204_v36 = vpop.f32.mrf.mxu0  ;;  %v21206_v52 = vpop.f32.mrf.mxu1 }
 0x559   : > { %22303 = vst [vmem:[#allocation69_spill] sm:$0xff] %v21204_v36  ;;  %v13677_v61 = vcombine.low %v11730_v5, %v11740_v23  ;;  %v13678_v27 = vcombine.low %v11754_v13, %v11764_v50  ;;  %v11773_v31 = vrot.slane %v11772_v43, 4  ;;  %v11787_v2 = vrot.slane %v11785_v55, 5 }
 0x55a   : > { %v11796_v38 = vor.u32 %v11795_v18, %v11792_v54  ;;  %v11809_v26 = vshll.u32 %v22304_v33, 16  ;;  %v11838_v0 = vshrl.u32 %v11495_v6, 16  ;;  %v11841_v45 = vshll.u32 %v11495_v6, 16  ;;  %v21211_v53 = vpop.f32.mrf.mxu0  ;;  %v21213_v36 = vpop.f32.mrf.mxu1 }
 0x55b   : > { %v11783_v58 = vrot.slane %v11782_v16, 4  ;;  %v11816_v15 = vrot.slane %v11814_v25, 4  ;;  %v21209_v28 = vrot.slane %v11823_v10, 5  ;;  %v11829_v17 = vrot.slane %v11827_v24, 4  ;;  %22305 = vst [vmem:[#allocation71_spill] sm:$0xff] %v21211_v53  ;;  %v22320_v53 = vld [vmem:[#allocation33_spill] sm:$0xff] }
 0x55c   : > { %v11807_v5 = vrot.slane %v11806_v47, 4  ;;  %v11819_v23 = vrot.slane %v11817_v39, 5  ;;  %v11849_v43 = vrot.slane %v11847_v29, 5  ;;  %v11853_v55 = vrot.slane %v11851_v60, 4  ;;  %v21217_v16 = vpop.f32.mrf.mxu0  ;;  %v21219_v25 = vpop.f32.mrf.mxu1 }
 0x55d   : > { %v11862_v13 = vshrl.u32 %v11498_v56, 16  ;;  %v11865_v50 = vshll.u32 %v11498_v56, 16  ;;  %v11871_v54 = vshll.u32 %v20954_v59, 16  ;;  %v11875_v18 = vshrl.u32 %v20954_v59, 16  ;;  %22306 = vst [vmem:[#allocation92_spill] sm:$0xff] %v21217_v16  ;;  %v22317_v16 = vld [vmem:[#allocation27_spill] sm:$0xff] }
 0x55e   : > { %v11797_v10 = vrot.slane %v11796_v38, 4  ;;  %v11811_v24 = vrot.slane %v11809_v26, 5  ;;  %v11840_v6 = vrot.slane %v11838_v0, 4  ;;  %v11843_v33 = vrot.slane %v11841_v45, 5  ;;  %v21227_v29 = vpop.f32.mrf.mxu0  ;;  %v21229_v59 = vpop.f32.mrf.mxu1 }
 0x55f   : > { %15366 = vmatmul.mubr.bf16.gmra.mxu1 %v13677_v61  ;;  %v11778_v47 = vsel %vm16510_vm0, %v11773_v31, %v21173_v21  ;;  %v11788_v39 = vsel %vm16510_vm0, %v11783_v58, %v11787_v2  ;;  %v11830_v56 = vor.u32 %v11829_v17, %v21209_v28  ;;  %22307 = vst [vmem:[#allocation93_spill] sm:$0xff] %v21227_v29  ;;  %v11833_v0 = vshll.u32 %v20912_v11, 16 }
 0x560   : > { %15369 = vmatprep.mubr.bf16.mxu1 %v13678_v27  ;;  %v11812_v60 = vsel %vm16510_vm0, %v11807_v5, %v11811_v24  ;;  %v11820_v38 = vor.u32 %v11819_v23, %v11816_v15  ;;  %v11854_v45 = vor.u32 %v11853_v55, %v11849_v43  ;;  %v11864_v26 = vrot.slane %v11862_v13, 4  ;;  %v21234_v31 = vpop.f32.mrf.mxu0  ;;  %v21236_v2 = vpop.f32.mrf.mxu1 }
 0x561   : > { %v11867_v61 = vrot.slane %v11865_v50, 5  ;;  %v11873_v27 = vrot.slane %v11871_v54, 5  ;;  %v11877_v21 = vrot.slane %v11875_v18, 4  ;;  %v13679_v17 = vcombine.low %v11778_v47, %v11788_v39 }
 0x562   : > { %v11802_v58 = vsel %vm16510_vm0, %v11797_v10, %v21177_v32  ;;  %v11844_v29 = vor.u32 %v11843_v33, %v11840_v6  ;;  %v11857_v5 = vshll.u32 %v20916_v42, 16  ;;  %v11831_v23 = vrot.slane %v11830_v56, 4  ;;  %v21242_v11 = vpop.f32.mrf.mxu1 }
 0x563   : > { %v13680_v15 = vcombine.low %v11802_v58, %v11812_v60  ;;  %v11835_v55 = vrot.slane %v11833_v0, 5  ;;  %v11855_v13 = vrot.slane %v11854_v45, 4  ;;  %v11821_v50 = vrot.slane %v11820_v38, 4  ;;  %v21245_v47 = vpop.f32.mrf.mxu0 }
 0x564   : > { %v11868_v54 = vor.u32 %v11867_v61, %v11864_v26  ;;  %v11878_v18 = vor.u32 %v11877_v21, %v11873_v27  ;;  %v11881_v24 = vshll.u32 %v21005_v35, 16  ;;  %v21247_v39 = vpop.f32.mrf.mxu1  ;;  %v11845_v32 = vrot.slane %v11844_v29, 4 }
 0x565   : > { %v11859_v10 = vrot.slane %v11857_v5, 5  ;;  %v11836_v42 = vsel %vm16510_vm0, %v11831_v23, %v11835_v55  ;;  %v21251_v6 = vpop.f32.mrf.mxu0  ;;  %v11826_v35 = vsel %vm16510_vm0, %v11821_v50, %v21209_v28 }
 0x566   : > { %v21253_v33 = vpop.f32.mrf.mxu1  ;;  %v11869_v60 = vrot.slane %v11868_v54, 4  ;;  %v11879_v38 = vrot.slane %v11878_v18, 4  ;;  %v11883_v0 = vrot.slane %v11881_v24, 5  ;;  %v13681_v26 = vcombine.low %v11826_v35, %v11836_v42 }
 0x567   : > { %15370 = vmatmul.mubr.bf16.gmra.mxu1 %v13679_v17  ;;  %v11860_v56 = vsel %vm16510_vm0, %v11855_v13, %v11859_v10  ;;  %v21260_v45 = vpop.f32.mrf.mxu0  ;;  %v11850_v61 = vsel %vm16510_vm0, %v11845_v32, %v11849_v43  ;;  %v22308_v10 = vld [vmem:[#allocation48_spill] sm:$0xff] }
 0x568   : > { %15373 = vmatprep.mubr.bf16.mxu1 %v13680_v15  ;;  %v21262_v29 = vpop.f32.mrf.mxu1  ;;  %v13682_v21 = vcombine.low %v11850_v61, %v11860_v56  ;;  %v11874_v28 = vsel %vm16510_vm0, %v11869_v60, %v11873_v27  ;;  %v11884_v5 = vsel %vm16510_vm0, %v11879_v38, %v11883_v0  ;;  %v8831_v42 = vadd.f32 %v21069_v22, %v22308_v10  ;;  %v22309_v38 = vld [vmem:[#allocation37_spill] sm:$0xff] }
 0x569   : > { %v21266_v17 = vpop.f32.mrf.mxu0  ;;  %v13683_v13 = vcombine.low %v11874_v28, %v11884_v5  ;;  %v22310_v61 = vld [vmem:[#allocation21_spill] sm:$0xff] }
 0x56a   : > { %v21268_v58 = vpop.f32.mrf.mxu1 }
 0x56b   : > { %v21274_v15 = vpop.f32.mrf.mxu0 }
 0x56c   : > { %v21276_v23 = vpop.f32.mrf.mxu1 }
 0x56d   : > { %v21278_v55 = vpop.f32.mrf.mxu0 }
 0x56e   : > { %v21280_v43 = vpop.f32.mrf.mxu1 }
 0x56f   : > { %15374 = vmatmul.mubr.bf16.gmra.mxu1 %v13681_v26  ;;  %v21282_v50 = vpop.f32.mrf.mxu0 }
 0x570   : > { %15377 = vmatprep.mubr.bf16.mxu1 %v13682_v21  ;;  %v8921_v54 = vpop.f32.mrf.mxu1  ;;  %v8834_v21 = vadd.f32 %v21090_v8, %v22310_v61 }
 0x571   : > { %v21285_v18 = vadd.f32 %v8921_v54, %v21023_v14  ;;  %v21287_v24 = vpop.f32.mrf.mxu0  ;;  %v8823_v14 = vadd.f32 %v21080_v30, %v22309_v38  ;;  %v22312_v54 = vld [vmem:[#allocation43_spill] sm:$0xff]  ;;  %v22314_v38 = vld [vmem:[#allocation28_spill] sm:$0xff] }
 0x572   : > { %v15091_v27 = vpop.f32.mrf.mxu1  ;;  %v8826_v30 = vadd.f32 %v21102_v41, %v22312_v54  ;;  %v8847_v8 = vadd.f32 %v21107_v3, %v22314_v38  ;;  %v8839_v41 = vadd.f32 %v21116_v44, %v22317_v16  ;;  %v8850_v3 = vadd.f32 %v21127_v4, %v22320_v53 }
 0x573   : > { %v21290_v9 = vadd.f32 %v15091_v27, %v21035_v63 }
 0x574   : > { %v8934_v32 = vpop.f32.mrf.mxu1  ;;  %v21294_v56 = vpop.f32.mrf.mxu0 }
 0x575   : > { %v21297_v35 = vadd.f32 %v8934_v32, %v21044_v48  ;;  %v22311_v48 = vld [vmem:[#allocation46_spill] sm:$0xff] }
 0x576   : > { %v15092_v60 = vpop.f32.mrf.mxu1  ;;  %v21301_v0 = vpop.f32.mrf.mxu0  ;;  %v9400_v5 = vadd.f32 %v22311_v48, %v8831_v42 }
 0x577   : > { %15378 = vmatmul.mubr.bf16.gmra.mxu1 %v13683_v13  ;;  %v21304_v26 = vadd.f32 %v15092_v60, %v21053_v20  ;;  %v22313_v20 = vld [vmem:[#allocation49_spill] sm:$0xff] }
 0x578   : > { %v8937_v63 = vpop.f32.mrf.mxu1  ;;  %v21308_v28 = vpop.f32.mrf.mxu0  ;;  %v9398_v10 = vadd.f32 %v22313_v20, %v8823_v14 }
 0x579   : > { %v21311_v22 = vadd.f32 %v8937_v63, %v21061_v46  ;;  %v22316_v63 = vld [vmem:[#allocation19_spill] sm:$0xff] }
 0x57a   : > { %v15159_v13 = vpop.f32.mrf.mxu1  ;;  %v21316_v27 = vpop.f32.mrf.mxu0  ;;  %v9401_v42 = vadd.f32 %v22316_v63, %v8834_v21 }
 0x57b   : > { %v21318_v32 = vadd.f32 %v15159_v13, %v9400_v5  ;;  %v22319_v13 = vld [vmem:[#allocation20_spill] sm:$0xff] }
 0x57c   : > { %v9656_v60 = vpop.f32.mrf.mxu1  ;;  %v21323_v61 = vpop.f32.mrf.mxu0  ;;  %v9399_v14 = vadd.f32 %v22319_v13, %v8826_v30 }
 0x57d   : > { %22315 = vst [vmem:[#allocation48_spill] sm:$0xff] %v21323_v61  ;;  %v21325_v46 = vadd.f32 %v9656_v60, %v9398_v10  ;;  %v22322_v60 = vld [vmem:[#allocation44_spill] sm:$0xff]  ;;  %v22323_v61 = vld [vmem:[#allocation22_spill] sm:$0xff] }
 0x57e   : > { %v15160_v48 = vpop.f32.mrf.mxu1  ;;  %v21330_v54 = vpop.f32.mrf.mxu0  ;;  %v9404_v21 = vadd.f32 %v22322_v60, %v8847_v8  ;;  %v8842_v44 = vadd.f32 %v21135_v1, %v22323_v61 }
 0x57f   : > { %22318 = vst [vmem:[#allocation37_spill] sm:$0xff] %v21330_v54  ;;  %v21332_v5 = vadd.f32 %v15160_v48, %v9401_v42  ;;  %v22325_v48 = vld [vmem:[#allocation34_spill] sm:$0xff]  ;;  %v22326_v54 = vld [vmem:[#allocation24_spill] sm:$0xff] }
 0x580   : > { %v9659_v20 = vpop.f32.mrf.mxu1  ;;  %v21337_v38 = vpop.f32.mrf.mxu0  ;;  %v9402_v30 = vadd.f32 %v22325_v48, %v8839_v41  ;;  %v8863_v4 = vadd.f32 %v21143_v12, %v22326_v54 }
 0x581   : > { %22321 = vst [vmem:[#allocation21_spill] sm:$0xff] %v21337_v38  ;;  %v21339_v10 = vadd.f32 %v9659_v20, %v9399_v14  ;;  %v22328_v20 = vld [vmem:[#allocation38_spill] sm:$0xff]  ;;  %v22329_v38 = vld [vmem:[#allocation45_spill] sm:$0xff] }
 0x582   : > { %v15163_v63 = vpop.f32.mrf.mxu1  ;;  %v21344_v16 = vpop.f32.mrf.mxu0  ;;  %v9405_v8 = vadd.f32 %v22328_v20, %v8850_v3  ;;  %v8855_v1 = vadd.f32 %v21151_v51, %v22329_v38 }
 0x583   : > { %22324 = vst [vmem:[#allocation46_spill] sm:$0xff] %v21344_v16  ;;  %v21346_v42 = vadd.f32 %v15163_v63, %v9404_v21  ;;  %v22331_v63 = vld [vmem:[#allocation35_spill] sm:$0xff]  ;;  %v22332_v16 = vld [vmem:[#allocation42_spill] sm:$0xff] }
 0x584   : > { %v9672_v13 = vpop.f32.mrf.mxu1  ;;  %v21351_v53 = vpop.f32.mrf.mxu0  ;;  %v9403_v41 = vadd.f32 %v22331_v63, %v8842_v44  ;;  %v8866_v12 = vadd.f32 %v21162_v49, %v22332_v16 }
 0x585   : > { %22327 = vst [vmem:[#allocation43_spill] sm:$0xff] %v21351_v53  ;;  %v21353_v14 = vadd.f32 %v9672_v13, %v9402_v30  ;;  %v22334_v13 = vld [vmem:[#allocation29_spill] sm:$0xff]  ;;  %v22335_v53 = vld [vmem:[#allocation26_spill] sm:$0xff] }
 0x586   : > { %v15164_v60 = vpop.f32.mrf.mxu1  ;;  %v21358_v61 = vpop.f32.mrf.mxu0  ;;  %v9408_v3 = vadd.f32 %v22334_v13, %v8863_v4  ;;  %v8858_v51 = vadd.f32 %v21169_v57, %v22335_v53 }
 0x587   : > { %22330 = vst [vmem:[#allocation49_spill] sm:$0xff] %v21358_v61  ;;  %v21360_v21 = vadd.f32 %v15164_v60, %v9405_v8  ;;  %v22337_v60 = vld [vmem:[#allocation39_spill] sm:$0xff]  ;;  %v22338_v61 = vld [vmem:[#allocation25_spill] sm:$0xff] }
 0x588   : > { %v9675_v48 = vpop.f32.mrf.mxu1  ;;  %v21365_v54 = vpop.f32.mrf.mxu0  ;;  %v9406_v44 = vadd.f32 %v22337_v60, %v8855_v1  ;;  %v8879_v49 = vadd.f32 %v21175_v40, %v22338_v61 }
 0x589   : > { %22333 = vst [vmem:[#allocation28_spill] sm:$0xff] %v21365_v54  ;;  %v21367_v30 = vadd.f32 %v9675_v48, %v9403_v41  ;;  %v22340_v48 = vld [vmem:[#allocation41_spill] sm:$0xff]  ;;  %v22341_v54 = vld [vmem:[#allocation47_spill] sm:$0xff] }
 0x58a   : > { %v15167_v20 = vpop.f32.mrf.mxu1  ;;  %v21372_v38 = vpop.f32.mrf.mxu0  ;;  %v9409_v4 = vadd.f32 %v22340_v48, %v8866_v12  ;;  %v8871_v57 = vadd.f32 %v21187_v19, %v22341_v54 }
 0x58b   : > { %22336 = vst [vmem:[#allocation19_spill] sm:$0xff] %v21372_v38  ;;  %v21374_v8 = vadd.f32 %v15167_v20, %v9408_v3  ;;  %v22343_v20 = vld [vmem:[#allocation40_spill] sm:$0xff]  ;;  %v22344_v38 = vld [vmem:[#allocation51_spill] sm:$0xff] }
 0x58c   : > { %v9688_v63 = vpop.f32.mrf.mxu1  ;;  %v21379_v16 = vpop.f32.mrf.mxu0  ;;  %v9407_v1 = vadd.f32 %v22343_v20, %v8858_v51  ;;  %v8882_v40 = vadd.f32 %v21199_v62, %v22344_v38 }
 0x58d   : > { %22339 = vst [vmem:[#allocation27_spill] sm:$0xff] %v21379_v16  ;;  %v21381_v41 = vadd.f32 %v9688_v63, %v9406_v44  ;;  %v22346_v63 = vld [vmem:[#allocation30_spill] sm:$0xff]  ;;  %v22347_v16 = vld [vmem:[#allocation53_spill] sm:$0xff] }
 0x58e   : > { %v15168_v13 = vpop.f32.mrf.mxu1  ;;  %v21386_v53 = vpop.f32.mrf.mxu0  ;;  %v9412_v12 = vadd.f32 %v22346_v63, %v8879_v49  ;;  %v8874_v19 = vadd.f32 %v21206_v52, %v22347_v16 }
 0x58f   : > { %22342 = vst [vmem:[#allocation20_spill] sm:$0xff] %v21386_v53  ;;  %v21388_v3 = vadd.f32 %v15168_v13, %v9409_v4  ;;  %v22349_v13 = vld [vmem:[#allocation23_spill] sm:$0xff]  ;;  %v22350_v53 = vld [vmem:[#allocation54_spill] sm:$0xff] }
 0x590   : > { %v9691_v60 = vpop.f32.mrf.mxu1  ;;  %v21393_v61 = vpop.f32.mrf.mxu0  ;;  %v9410_v51 = vadd.f32 %v22349_v13, %v8871_v57  ;;  %v8895_v62 = vadd.f32 %v21213_v36, %v22350_v53 }
 0x591   : > { %22345 = vst [vmem:[#allocation33_spill] sm:$0xff] %v21393_v61  ;;  %v21395_v44 = vadd.f32 %v9691_v60, %v9407_v1  ;;  %v22352_v60 = vld [vmem:[#allocation31_spill] sm:$0xff]  ;;  %v22353_v61 = vld [vmem:[#allocation58_spill] sm:$0xff] }
 0x592   : > { %v15171_v48 = vpop.f32.mrf.mxu1  ;;  %v21400_v54 = vpop.f32.mrf.mxu0  ;;  %v9413_v49 = vadd.f32 %v22352_v60, %v8882_v40  ;;  %v8887_v52 = vadd.f32 %v21219_v25, %v22353_v61 }
 0x593   : > { %22348 = vst [vmem:[#allocation44_spill] sm:$0xff] %v21400_v54  ;;  %v21402_v4 = vadd.f32 %v15171_v48, %v9412_v12  ;;  %v22355_v48 = vld [vmem:[#allocation36_spill] sm:$0xff] }
 0x594   : > { %v9704_v20 = vpop.f32.mrf.mxu1  ;;  %v21407_v38 = vpop.f32.mrf.mxu0  ;;  %v9411_v57 = vadd.f32 %v22355_v48, %v8874_v19  ;;  %v22356_v54 = vld [vmem:[#allocation60_spill] sm:$0xff] }
 0x595   : > { %22351 = vst [vmem:[#allocation22_spill] sm:$0xff] %v21407_v38  ;;  %v21409_v1 = vadd.f32 %v9704_v20, %v9410_v51  ;;  %v8898_v36 = vadd.f32 %v21229_v59, %v22356_v54  ;;  %v22358_v20 = vld [vmem:[#allocation32_spill] sm:$0xff]  ;;  %v22359_v38 = vld [vmem:[#allocation65_spill] sm:$0xff] }
 0x596   : > { %v15172_v63 = vpop.f32.mrf.mxu1  ;;  %v21414_v16 = vpop.f32.mrf.mxu0  ;;  %v9416_v40 = vadd.f32 %v22358_v20, %v8895_v62  ;;  %v8890_v25 = vadd.f32 %v21236_v2, %v22359_v38 }
 0x597   : > { %22354 = vst [vmem:[#allocation34_spill] sm:$0xff] %v21414_v16  ;;  %v21416_v12 = vadd.f32 %v15172_v63, %v9413_v49  ;;  %v22361_v63 = vld [vmem:[#allocation50_spill] sm:$0xff]  ;;  %v22362_v16 = vld [vmem:[#allocation67_spill] sm:$0xff] }
 0x598   : > { %v9707_v13 = vpop.f32.mrf.mxu1  ;;  %v21421_v53 = vpop.f32.mrf.mxu0  ;;  %v9414_v19 = vadd.f32 %v22361_v63, %v8887_v52  ;;  %v8911_v59 = vadd.f32 %v21242_v11, %v22362_v16 }
 0x599   : > { %22357 = vst [vmem:[#allocation24_spill] sm:$0xff] %v21421_v53  ;;  %v21423_v51 = vadd.f32 %v9707_v13, %v9411_v57  ;;  %v22364_v13 = vld [vmem:[#allocation52_spill] sm:$0xff] }
 0x59a   : > { %v15175_v60 = vpop.f32.mrf.mxu1  ;;  %v21428_v61 = vpop.f32.mrf.mxu0  ;;  %v9417_v62 = vadd.f32 %v22364_v13, %v8898_v36  ;;  %v22365_v53 = vld [vmem:[#allocation72_spill] sm:$0xff]  ;;  %v8906_v13 = vadd.f32 %v21262_v29, %v20938_v34  ;;  %v8919_v29 = vadd.f32 %v21276_v23, %v20983_v37 }
 0x59b   : > { %22360 = vst [vmem:[#allocation38_spill] sm:$0xff] %v21428_v61  ;;  %v21430_v49 = vadd.f32 %v15175_v60, %v9416_v40  ;;  %v8903_v2 = vadd.f32 %v21247_v39, %v22365_v53  ;;  %v22368_v60 = vld [vmem:[#allocation55_spill] sm:$0xff]  ;;  %v22369_v61 = vld [vmem:[#allocation74_spill] sm:$0xff] }
 0x59c   : > { %v9720_v48 = vpop.f32.mrf.mxu1  ;;  %v21435_v54 = vpop.f32.mrf.mxu0  ;;  %v9415_v52 = vadd.f32 %v22368_v60, %v8890_v25  ;;  %v8914_v11 = vadd.f32 %v21253_v33, %v22369_v61  ;;  %v8927_v33 = vadd.f32 %v21268_v58, %v20956_v7  ;;  %v22381_v58 = vld [vmem:[#allocation79_spill] sm:$0xff] }
 0x59d   : > { %22363 = vst [vmem:[#allocation45_spill] sm:$0xff] %v21435_v54  ;;  %v21437_v57 = vadd.f32 %v9720_v48, %v9414_v19  ;;  %v22371_v48 = vld [vmem:[#allocation57_spill] sm:$0xff] }
 0x59e   : > { %v15176_v20 = vpop.f32.mrf.mxu1  ;;  %v21442_v38 = vpop.f32.mrf.mxu0  ;;  %v9420_v54 = vadd.f32 %v22371_v48, %v8911_v59  ;;  %v22376_v59 = vld [vmem:[#allocation64_spill] sm:$0xff] }
 0x59f   : > { %22366 = vst [vmem:[#allocation35_spill] sm:$0xff] %v21442_v38  ;;  %v21444_v40 = vadd.f32 %v15176_v20, %v9417_v62  ;;  %v22373_v62 = vld [vmem:[#allocation59_spill] sm:$0xff] }
 0x5a0   : > { %v9723_v63 = vpop.f32.mrf.mxu1  ;;  %v21449_v16 = vpop.f32.mrf.mxu0  ;;  %v9418_v20 = vadd.f32 %v22373_v62, %v8903_v2  ;;  %v22379_v2 = vld [vmem:[#allocation68_spill] sm:$0xff]  ;;  %v8930_v62 = vadd.f32 %v21280_v43, %v22381_v58 }
 0x5a1   : > { %22367 = vst [vmem:[#allocation42_spill] sm:$0xff] %v21444_v40  ;;  %22370 = vst [vmem:[#allocation29_spill] sm:$0xff] %v21449_v16  ;;  %v9800_v19 = vadd.f32 %v9723_v63, %v9415_v52  ;;  %v9421_v63 = vadd.f32 %v22376_v59, %v8914_v11  ;;  %v22392_v58 = vld [vmem:[#allocation76_spill] sm:$0xff] }
 0x5a2   : > { %v15179_v36 = vpop.f32.mrf.mxu1  ;;  %v21454_v39 = vpop.f32.mrf.mxu0 }
 0x5a3   : > { %22372 = vst [vmem:[#allocation26_spill] sm:$0xff] %v21454_v39  ;;  %v9805_v53 = vadd.f32 %v15179_v36, %v9420_v54  ;;  %v21458_v25 = vadd.f32 %v21234_v31, %v9800_v19  ;;  %v9419_v19 = vadd.f32 %v22379_v2, %v8906_v13  ;;  %v22386_v13 = vld [vmem:[#allocation73_spill] sm:$0xff]  ;;  %v22389_v2 = vld [vmem:[#allocation75_spill] sm:$0xff] }
 0x5a4   : > { %v9736_v60 = vpop.f32.mrf.mxu1  ;;  %v21462_v61 = vpop.f32.mrf.mxu0 }
 0x5a5   : > { %22374 = vst [vmem:[#allocation39_spill] sm:$0xff] %v21458_v25  ;;  %22375 = vst [vmem:[#allocation25_spill] sm:$0xff] %v21462_v61  ;;  %v9803_v52 = vadd.f32 %v9736_v60, %v9418_v20  ;;  %v21466_v48 = vadd.f32 %v21245_v47, %v9805_v53  ;;  %v22383_v53 = vld [vmem:[#allocation70_spill] sm:$0xff] }
 0x5a6   : > { %v15180_v34 = vpop.f32.mrf.mxu1  ;;  %v21470_v54 = vpop.f32.mrf.mxu0  ;;  %v9424_v20 = vadd.f32 %v22383_v53, %v8927_v33  ;;  %v9423_v53 = vadd.f32 %v22392_v58, %v21285_v18 }
 0x5a7   : > { %22377 = vst [vmem:[#allocation41_spill] sm:$0xff] %v21466_v48  ;;  %22378 = vst [vmem:[#allocation47_spill] sm:$0xff] %v21470_v54  ;;  %v9806_v31 = vadd.f32 %v15180_v34, %v9421_v63  ;;  %v21474_v36 = vadd.f32 %v21251_v6, %v9803_v52  ;;  %v9422_v63 = vadd.f32 %v22386_v13, %v8919_v29  ;;  %v22424_v48 = vld [vmem:[#allocation83_spill] sm:$0xff] }
 0x5a8   : > { %v9739_v7 = vpop.f32.mrf.mxu1  ;;  %v21478_v11 = vpop.f32.mrf.mxu0  ;;  %v10536_v38 = vadd.f32 %v22424_v48, %v21325_v46 }
 0x5a9   : > { %22380 = vst [vmem:[#allocation40_spill] sm:$0xff] %v21474_v36  ;;  %22382 = vst [vmem:[#allocation51_spill] sm:$0xff] %v21478_v11  ;;  %v9804_v47 = vadd.f32 %v9739_v7, %v9419_v19  ;;  %v21482_v60 = vadd.f32 %v21260_v45, %v9806_v31  ;;  %v9425_v19 = vadd.f32 %v22389_v2, %v8930_v62 }
 0x5aa   : > { %v15183_v37 = vpop.f32.mrf.mxu1  ;;  %v21484_v23 = vpop.f32.mrf.mxu0 }
 0x5ab   : > { %22384 = vst [vmem:[#allocation30_spill] sm:$0xff] %v21482_v60  ;;  %22385 = vst [vmem:[#allocation53_spill] sm:$0xff] %v21484_v23  ;;  %v9809_v59 = vadd.f32 %v15183_v37, %v9424_v20  ;;  %v21488_v6 = vadd.f32 %v21266_v17, %v9804_v47  ;;  %v22395_v37 = vld [vmem:[#allocation77_spill] sm:$0xff] }
 0x5ac   : > { %v9752_v52 = vpop.f32.mrf.mxu1  ;;  %v21490_v34 = vpop.f32.mrf.mxu0  ;;  %v9428_v62 = vadd.f32 %v22395_v37, %v21290_v9 }
 0x5ad   : > { %22387 = vst [vmem:[#allocation23_spill] sm:$0xff] %v21488_v6  ;;  %22388 = vst [vmem:[#allocation54_spill] sm:$0xff] %v21490_v34  ;;  %v9807_v43 = vadd.f32 %v9752_v52, %v9422_v63  ;;  %v21494_v33 = vadd.f32 %v21274_v15, %v9809_v59  ;;  %v22398_v52 = vld [vmem:[#allocation78_spill] sm:$0xff] }
 0x5ae   : > { %v15184_v45 = vpop.f32.mrf.mxu1  ;;  %v21496_v31 = vpop.f32.mrf.mxu0  ;;  %v9426_v18 = vadd.f32 %v22398_v52, %v21297_v35 }
 0x5af   : > { %22390 = vst [vmem:[#allocation31_spill] sm:$0xff] %v21494_v33  ;;  %22391 = vst [vmem:[#allocation58_spill] sm:$0xff] %v21496_v31  ;;  %v9810_v7 = vadd.f32 %v15184_v45, %v9425_v19  ;;  %v21501_v29 = vadd.f32 %v21278_v55, %v9807_v43  ;;  %v22401_v45 = vld [vmem:[#allocation80_spill] sm:$0xff] }
 0x5b0   : > { %v9755_v17 = vpop.f32.mrf.mxu1  ;;  %v21503_v47 = vpop.f32.mrf.mxu0  ;;  %v9429_v9 = vadd.f32 %v22401_v45, %v21304_v26 }
 0x5b1   : > { %22393 = vst [vmem:[#allocation36_spill] sm:$0xff] %v21501_v29  ;;  %22394 = vst [vmem:[#allocation60_spill] sm:$0xff] %v21503_v47  ;;  %v9808_v20 = vadd.f32 %v9755_v17, %v9423_v53  ;;  %v21508_v15 = vadd.f32 %v21282_v50, %v9810_v7  ;;  %v22404_v17 = vld [vmem:[#allocation81_spill] sm:$0xff] }
 0x5b2   : > { %v15187_v59 = vpop.f32.mrf.mxu1  ;;  %v21510_v13 = vpop.f32.mrf.mxu0  ;;  %v9427_v35 = vadd.f32 %v22404_v17, %v21311_v22 }
 0x5b3   : > { %22396 = vst [vmem:[#allocation32_spill] sm:$0xff] %v21508_v15  ;;  %22397 = vst [vmem:[#allocation65_spill] sm:$0xff] %v21510_v13  ;;  %v9813_v63 = vadd.f32 %v15187_v59, %v9428_v62  ;;  %v21515_v55 = vadd.f32 %v21287_v24, %v9808_v20 }
 0x5b4   : > { %v9768_v43 = vpop.f32.mrf.mxu1  ;;  %v21517_v2 = vpop.f32.mrf.mxu0 }
 0x5b5   : > { %22399 = vst [vmem:[#allocation50_spill] sm:$0xff] %v21515_v55  ;;  %22400 = vst [vmem:[#allocation67_spill] sm:$0xff] %v21517_v2  ;;  %v9811_v19 = vadd.f32 %v9768_v43, %v9426_v18  ;;  %v21522_v50 = vadd.f32 %v21294_v56, %v9813_v63 }
 0x5b6   : > { %v15188_v7 = vpop.f32.mrf.mxu1  ;;  %v21524_v58 = vpop.f32.mrf.mxu0 }
 0x5b7   : > { %22402 = vst [vmem:[#allocation52_spill] sm:$0xff] %v21522_v50  ;;  %22403 = vst [vmem:[#allocation72_spill] sm:$0xff] %v21524_v58  ;;  %v9814_v53 = vadd.f32 %v15188_v7, %v9429_v9  ;;  %v21529_v24 = vadd.f32 %v21301_v0, %v9811_v19 }
 0x5b8   : > { %v9771_v20 = vpop.f32.mrf.mxu1  ;;  %v21531_v37 = vpop.f32.mrf.mxu0 }
 0x5b9   : > { %22405 = vst [vmem:[#allocation55_spill] sm:$0xff] %v21529_v24  ;;  %22406 = vst [vmem:[#allocation74_spill] sm:$0xff] %v21531_v37  ;;  %v9812_v62 = vadd.f32 %v9771_v20, %v9427_v35  ;;  %v21534_v59 = vadd.f32 %v21308_v28, %v9814_v53 }
 0x5ba   : > { %v15255_v26 = vpop.f32.mrf.mxu1  ;;  %v21539_v63 = vpop.f32.mrf.mxu0 }
 0x5bb   : > { %22407 = vst [vmem:[#allocation57_spill] sm:$0xff] %v21534_v59  ;;  %v21537_v56 = vadd.f32 %v21316_v27, %v9812_v62  ;;  %22409 = vst [vmem:[#allocation64_spill] sm:$0xff] %v21539_v63 }
 0x5bc   : > { %v10906_v52 = vpop.f32.mrf.mxu1  ;;  %v21541_v43 = vpop.f32.mrf.mxu0 }
 0x5bd   : > { %22408 = vst [vmem:[#allocation59_spill] sm:$0xff] %v21537_v56 }
 0x5be   : > { %v15256_v18 = vpop.f32.mrf.mxu1  ;;  %v21543_v19 = vpop.f32.mrf.mxu0 }
 0x5c0   : > { %v10909_v22 = vpop.f32.mrf.mxu1  ;;  %v21547_v7 = vpop.f32.mrf.mxu0 }
 0x5c2   : > { %v15259_v0 = vpop.f32.mrf.mxu1  ;;  %v21553_v27 = vpop.f32.mrf.mxu0 }
 0x5c4   : > { %v10922_v45 = vpop.f32.mrf.mxu1  ;;  %v21559_v20 = vpop.f32.mrf.mxu0 }
 0x5c6   : > { %v21545_v9 = vpop.f32.mrf.mxu1  ;;  %v21565_v37 = vpop.f32.mrf.mxu0 }
 0x5c8   : > { %v21549_v28 = vpop.f32.mrf.mxu1  ;;  %v21571_v2 = vpop.f32.mrf.mxu0 }
 0x5ca   : > { %v21551_v53 = vpop.f32.mrf.mxu1  ;;  %v21577_v24 = vpop.f32.mrf.mxu0 }
 0x5cc   : > { %v21555_v17 = vpop.f32.mrf.mxu1  ;;  %v21583_v31 = vpop.f32.mrf.mxu0 }
 0x5ce   : > { %v21557_v35 = vpop.f32.mrf.mxu1  ;;  %v21589_v15 = vpop.f32.mrf.mxu0 }
 0x5d0   : > { %v21561_v62 = vpop.f32.mrf.mxu1  ;;  %v21595_v11 = vpop.f32.mrf.mxu0 }
 0x5d2   : > { %v21601_v6 = vpop.f32.mrf.mxu0 }
 0x5d3   : > { %v21563_v63 = vpop.f32.mrf.mxu1 }
 0x5d4   : > { %v21607_v39 = vpop.f32.mrf.mxu0 }
 0x5d5   : > { %v21567_v58 = vpop.f32.mrf.mxu1 }
 0x5d7   : > { %v21569_v56 = vpop.f32.mrf.mxu1 }
 0x5d9   : > { %v21573_v59 = vpop.f32.mrf.mxu1 }
 0x5dd   : > { %v21575_v13 = vpop.f32.mrf.mxu1 }
 0x5df   : > { %v21579_v47 = vpop.f32.mrf.mxu1 }
 0x5e1   : > { %v21581_v50 = vpop.f32.mrf.mxu1 }
 0x5e2   : > { %22410 = vst [vmem:[#allocation68_spill] sm:$0xff] %v21581_v50 }
 0x5e3   : > { %v21585_v55 = vpop.f32.mrf.mxu1 }
 0x5e4   : > { %22411 = vst [vmem:[#allocation79_spill] sm:$0xff] %v21585_v55  ;;  %v22426_v55 = vld [vmem:[#allocation84_spill] sm:$0xff] }
 0x5e5   : > { %v21587_v34 = vpop.f32.mrf.mxu1  ;;  %v10539_v25 = vadd.f32 %v22426_v55, %v21332_v5  ;;  %v22432_v55 = vld [vmem:[#allocation87_spill] sm:$0xff] }
 0x5e6   : > { %22412 = vst [vmem:[#allocation70_spill] sm:$0xff] %v21587_v34  ;;  %v21615_v34 = vpop.f32.mrf.mxu0 }
 0x5e7   : > { %v21591_v23 = vpop.f32.mrf.mxu1 }
 0x5e8   : > { %22413 = vst [vmem:[#allocation73_spill] sm:$0xff] %v21591_v23 }
 0x5e9   : > { %v21593_v29 = vpop.f32.mrf.mxu1 }
 0x5ea   : > { %22414 = vst [vmem:[#allocation75_spill] sm:$0xff] %v21593_v29  ;;  %v22421_v29 = vld [vmem:[#allocation82_spill] sm:$0xff] }
 0x5eb   : > { %v21597_v33 = vpop.f32.mrf.mxu1  ;;  %v10538_v23 = vadd.f32 %v22421_v29, %v21318_v32  ;;  %22422 = vst [vmem:[#allocation82_spill] sm:$0xff] %v21615_v34  ;;  %v11036_v32 = vadd.f32 %v15256_v18, %v10539_v25  ;;  %v22428_v29 = vld [vmem:[#allocation85_spill] sm:$0xff] }
 0x5ec   : > { %22415 = vst [vmem:[#allocation76_spill] sm:$0xff] %v21597_v33  ;;  %v10537_v50 = vadd.f32 %v22428_v29, %v21339_v10  ;;  %v21642_v10 = vld [vmem:[%s21901_s5] ss:$0 sm:$0xff] }
 0x5ee   : > { %v21599_v54 = vpop.f32.mrf.mxu1 }
 0x5ef   : > { %22416 = vst [vmem:[#allocation77_spill] sm:$0xff] %v21599_v54  ;;  %v11035_v54 = vadd.f32 %v15255_v26, %v10538_v23  ;;  %v22430_v26 = vld [vmem:[#allocation86_spill] sm:$0xff] }
 0x5f0   : > { %v21603_v61 = vpop.f32.mrf.mxu1  ;;  %v10542_v46 = vadd.f32 %v22430_v26, %v21346_v42  ;;  %v22435_v26 = vld [vmem:[#allocation46_spill] sm:$0xff] }
 0x5f1   : > { %22417 = vst [vmem:[#allocation78_spill] sm:$0xff] %v21603_v61 }
 0x5f2   : > { %v21605_v60 = vpop.f32.mrf.mxu1  ;;  %v11039_v5 = vadd.f32 %v15259_v0, %v10542_v46 }
 0x5f3   : > { %22418 = vst [vmem:[#allocation80_spill] sm:$0xff] %v21605_v60  ;;  %v11033_v60 = vadd.f32 %v10906_v52, %v10536_v38  ;;  %v22431_v52 = vld [vmem:[#allocation37_spill] sm:$0xff] }
 0x5f4   : > { %v21609_v36 = vpop.f32.mrf.mxu1 }
 0x5f5   : > { %22419 = vst [vmem:[#allocation81_spill] sm:$0xff] %v21609_v36  ;;  %v21625_v36 = vpop.f32.mrf.mxu0  ;;  %v11421_v34 = vadd.f32 %v22431_v52, %v11033_v60  ;;  %v22434_v60 = vld [vmem:[#allocation88_spill] sm:$0xff]  ;;  %v22436_v52 = vld [vmem:[#allocation89_spill] sm:$0xff] }
 0x5f6   : > { %22427 = vst [vmem:[#allocation84_spill] sm:$0xff] %v21625_v36  ;;  %v10540_v36 = vadd.f32 %v22432_v55, %v21353_v14 }
 0x5f7   : > { %v21611_v16 = vpop.f32.mrf.mxu1  ;;  %v21637_v40 = vpop.f32.mrf.mxu0 }
 0x5f8   : > { %22420 = vst [vmem:[#allocation94_spill] sm:$0xff] %v21611_v16  ;;  %v11037_v18 = vadd.f32 %v10922_v45, %v10540_v36  ;;  %v22437_v36 = vld [vmem:[#allocation43_spill] sm:$0xff] }
 0x5f9   : > { %v21617_v33 = vpop.f32.mrf.mxu1  ;;  %v11427_v45 = vadd.f32 %v22437_v36, %v11039_v5 }
 0x5fa   : > { %22423 = vst [vmem:[#allocation95_spill] sm:$0xff] %v21617_v33  ;;  %v22429_v33 = vld [vmem:[#allocation48_spill] sm:$0xff] }
 0x5fb   : > { %v21621_v61 = vpop.f32.mrf.mxu1  ;;  %v11423_v23 = vadd.f32 %v22429_v33, %v11035_v54  ;;  %v22433_v33 = vld [vmem:[#allocation21_spill] sm:$0xff] }
 0x5fc   : > { %22425 = vst [vmem:[#allocation83_spill] sm:$0xff] %v21621_v61  ;;  %v11034_v61 = vadd.f32 %v10909_v22, %v10537_v50  ;;  %v11424_v50 = vadd.f32 %v22433_v33, %v11036_v32  ;;  %v10543_v22 = vadd.f32 %v22434_v60, %v21360_v21  ;;  %v22440_v60 = vld [vmem:[#allocation90_spill] sm:$0xff] }
 0x5fd   : > { %v21627_v16 = vpop.f32.mrf.mxu1 }
 0x5fe   : > { %v11422_v46 = vadd.f32 %v22435_v26, %v11034_v61  ;;  %v22438_v61 = vld [vmem:[#allocation56_spill] sm:$0xff] }
 0x5ff   : > { %v15351_v48 = vpop.f32.mrf.mxu1 }
 0x600   : > { %v12176_v38 = vadd.f32 %v15351_v48, %v11423_v23  ;;  %v11040_v48 = vadd.f32 %v21545_v9, %v10543_v22 }
 0x601   : > { %v12047_v25 = vpop.f32.mrf.mxu1 }
 0x602   : > { %v12673_v42 = vadd.f32 %v21541_v43, %v12176_v38  ;;  %v12174_v54 = vadd.f32 %v12047_v25, %v11421_v34  ;;  %v10541_v43 = vadd.f32 %v22436_v52, %v21367_v30  ;;  %v21655_v34 = vpop.f32.mrf.mxu0 }
 0x603   : > { %v15352_v0 = vpop.f32.mrf.mxu1 }
 0x604   : > { %v12711_v14 = vadd.f32 %v21642_v10, %v12673_v42  ;;  %v12671_v29 = vadd.f32 %v21543_v19, %v12174_v54  ;;  %v12177_v23 = vadd.f32 %v15352_v0, %v11424_v50  ;;  %v11038_v19 = vadd.f32 %v21549_v28, %v10541_v43  ;;  %v22439_v54 = vld [vmem:[#allocation49_spill] sm:$0xff]  ;;  %v21672_v22 = vpop.f32.mrf.mxu0  ;;  %v22441_v0 = vld [vmem:[#allocation28_spill] sm:$0xff] }
 0x605   : > { %v12050_v32 = vpop.f32.mrf.mxu1  ;;  %v10546_v42 = vadd.f32 %v22438_v61, %v21374_v8  ;;  %v11425_v33 = vadd.f32 %v22439_v54, %v11037_v18  ;;  %v10544_v8 = vadd.f32 %v22440_v60, %v21381_v41  ;;  %v22443_v41 = vld [vmem:[#allocation19_spill] sm:$0xff] }
 0x606   : > { %v12743_v38 = vmax.f32 %v12711_v14, 0.0  ;;  %v12709_v21 = vadd.f32 %v21642_v10, %v12671_v29  ;;  %v12674_v55 = vadd.f32 %v21547_v7, %v12177_v23  ;;  %v12175_v25 = vadd.f32 %v12050_v32, %v11422_v46 }
 0x607   : > { %v15355_v9 = vpop.f32.mrf.mxu1  ;;  %v11043_v28 = vadd.f32 %v21551_v53, %v10546_v42  ;;  %v11428_v14 = vadd.f32 %v22441_v0, %v11040_v48  ;;  %v11041_v46 = vadd.f32 %v21555_v17, %v10544_v8  ;;  %v22442_v53 = vld [vmem:[#allocation91_spill] sm:$0xff]  ;;  %v11426_v32 = vadd.f32 %v22443_v41, %v11038_v19  ;;  %v21688_v17 = vpop.f32.mrf.mxu0  ;;  %v22448_v8 = vld [vmem:[#allocation62_spill] sm:$0xff] }
 0x608   : > { %12775 = vst [vmem:[%s21664_s2 + $0x10] sm:$0xff] %v12743_v38  ;;  %v12741_v30 = vmax.f32 %v12709_v21, 0.0  ;;  %v12712_v5 = vadd.f32 %v21642_v10, %v12674_v55  ;;  %v12672_v50 = vadd.f32 %v21553_v27, %v12175_v25  ;;  %v12180_v7 = vadd.f32 %v15355_v9, %v11427_v45  ;;  %v22444_v21 = vld [vmem:[#allocation61_spill] sm:$0xff] }
 0x609   : > { %v12063_v18 = vpop.f32.mrf.mxu1  ;;  %v10547_v52 = vadd.f32 %v22442_v53, %v21388_v3  ;;  %v10545_v55 = vadd.f32 %v22444_v21, %v21395_v44  ;;  %v22445_v3 = vld [vmem:[#allocation27_spill] sm:$0xff]  ;;  %v22447_v44 = vld [vmem:[#allocation20_spill] sm:$0xff] }
 0x60a   : > { %12773 = vst [vmem:[%s21664_s2] sm:$0xff] %v12741_v30  ;;  %v12744_v29 = vmax.f32 %v12712_v5, 0.0  ;;  %v12710_v23 = vadd.f32 %v21642_v10, %v12672_v50  ;;  %v12677_v26 = vadd.f32 %v21559_v20, %v12180_v7  ;;  %v12178_v27 = vadd.f32 %v12063_v18, %v11425_v33 }
 0x60b   : > { %v15356_v43 = vpop.f32.mrf.mxu1  ;;  %v11044_v20 = vadd.f32 %v21557_v35, %v10547_v52  ;;  %v11431_v61 = vadd.f32 %v22445_v3, %v11043_v28  ;;  %v11042_v54 = vadd.f32 %v21561_v62, %v10545_v55  ;;  %v22446_v35 = vld [vmem:[#allocation63_spill] sm:$0xff]  ;;  %v11429_v5 = vadd.f32 %v22447_v44, %v11041_v46  ;;  %v21704_v62 = vpop.f32.mrf.mxu0 }
 0x60c   : > { %12776 = vst [vmem:[%s21664_s2 + $0x18] sm:$0xff] %v12744_v29  ;;  %v12742_v36 = vmax.f32 %v12710_v23, 0.0  ;;  %v12715_v48 = vadd.f32 %v21642_v10, %v12677_v26  ;;  %v12675_v45 = vadd.f32 %v21565_v37, %v12178_v27  ;;  %v12181_v38 = vadd.f32 %v15356_v43, %v11428_v14 }
 0x60d   : > { %v12066_v25 = vpop.f32.mrf.mxu1  ;;  %v10550_v33 = vadd.f32 %v22446_v35, %v21402_v4  ;;  %v10548_v18 = vadd.f32 %v22448_v8, %v21409_v1  ;;  %v22449_v4 = vld [vmem:[#allocation33_spill] sm:$0xff]  ;;  %v22451_v1 = vld [vmem:[#allocation44_spill] sm:$0xff] }
 0x60e   : > { %12774 = vst [vmem:[%s21664_s2 + $0x8] sm:$0xff] %v12742_v36  ;;  %v12747_v19 = vmax.f32 %v12715_v48, 0.0  ;;  %v12713_v42 = vadd.f32 %v21642_v10, %v12675_v45  ;;  %v12678_v9 = vadd.f32 %v21571_v2, %v12181_v38  ;;  %v12179_v37 = vadd.f32 %v12066_v25, %v11426_v32  ;;  %v22452_v48 = vld [vmem:[#allocation69_spill] sm:$0xff] }
 0x60f   : > { %v15359_v30 = vpop.f32.mrf.mxu1  ;;  %v11047_v2 = vadd.f32 %v21563_v63, %v10550_v33  ;;  %v11432_v14 = vadd.f32 %v22449_v4, %v11044_v20  ;;  %v11045_v27 = vadd.f32 %v21567_v58, %v10548_v18  ;;  %v22450_v63 = vld [vmem:[#allocation66_spill] sm:$0xff]  ;;  %v11430_v52 = vadd.f32 %v22451_v1, %v11042_v54  ;;  %v21720_v58 = vpop.f32.mrf.mxu0  ;;  %v22456_v33 = vld [vmem:[#allocation92_spill] sm:$0xff] }
 0x610   : > { %12779 = vst [vmem:[%s21664_s2 + $0x30] sm:$0xff] %v12747_v19  ;;  %v12745_v50 = vmax.f32 %v12713_v42, 0.0  ;;  %v12716_v7 = vadd.f32 %v21642_v10, %v12678_v9  ;;  %v12676_v28 = vadd.f32 %v21577_v24, %v12179_v37  ;;  %v12184_v60 = vadd.f32 %v15359_v30, %v11431_v61 }
 0x611   : > { %v12079_v0 = vpop.f32.mrf.mxu1  ;;  %v10551_v46 = vadd.f32 %v22450_v63, %v21416_v12  ;;  %v10549_v45 = vadd.f32 %v22452_v48, %v21423_v51  ;;  %v22453_v12 = vld [vmem:[#allocation22_spill] sm:$0xff]  ;;  %v10552_v30 = vadd.f32 %v22456_v33, %v21437_v57 }
 0x612   : > { %12777 = vst [vmem:[%s21664_s2 + $0x20] sm:$0xff] %v12745_v50  ;;  %v12748_v29 = vmax.f32 %v12716_v7, 0.0  ;;  %v12714_v23 = vadd.f32 %v21642_v10, %v12676_v28  ;;  %v12681_v26 = vadd.f32 %v21583_v31, %v12184_v60  ;;  %v12182_v24 = vadd.f32 %v12079_v0, %v11429_v5  ;;  %v22455_v51 = vld [vmem:[#allocation34_spill] sm:$0xff] }
 0x613   : > { %v15360_v53 = vpop.f32.mrf.mxu1  ;;  %v11048_v31 = vadd.f32 %v21569_v56, %v10551_v46  ;;  %v11435_v20 = vadd.f32 %v22453_v12, %v11047_v2  ;;  %v11046_v3 = vadd.f32 %v21573_v59, %v10549_v45  ;;  %v22454_v56 = vld [vmem:[#allocation71_spill] sm:$0xff]  ;;  %v11433_v42 = vadd.f32 %v22455_v51, %v11045_v27  ;;  %v21736_v59 = vpop.f32.mrf.mxu0  ;;  %v22458_v2 = vld [vmem:[#allocation42_spill] sm:$0xff] }
 0x614   : > { %12780 = vst [vmem:[%s21664_s2 + $0x38] sm:$0xff] %v12748_v29  ;;  %v12746_v43 = vmax.f32 %v12714_v23, 0.0  ;;  %v12719_v41 = vadd.f32 %v21642_v10, %v12681_v26  ;;  %v12679_v32 = vadd.f32 %v21589_v15, %v12182_v24  ;;  %v12185_v36 = vadd.f32 %v15360_v53, %v11432_v14  ;;  %v22460_v57 = vld [vmem:[#allocation38_spill] sm:$0xff]  ;;  %v22462_v24 = vld [vmem:[#allocation68_spill] sm:$0xff]  ;;  %v22467_v45 = vld [vmem:[#allocation35_spill] sm:$0xff] }
 0x615   : > { %v12082_v38 = vpop.f32.mrf.mxu1  ;;  %v10554_v61 = vadd.f32 %v22454_v56, %v21430_v49  ;;  %v22457_v49 = vld [vmem:[#allocation24_spill] sm:$0xff]  ;;  %v11049_v60 = vadd.f32 %v21579_v47, %v10552_v30  ;;  %v11434_v0 = vadd.f32 %v22460_v57, %v11046_v3  ;;  %v22461_v29 = vld [vmem:[#allocation82_spill] sm:$0xff]  ;;  %v22463_v47 = vld [vmem:[#allocation45_spill] sm:$0xff] }
 0x616   : > { %12778 = vst [vmem:[%s21664_s2 + $0x28] sm:$0xff] %v12746_v43  ;;  %v12751_v21 = vmax.f32 %v12719_v41, 0.0  ;;  %v12717_v55 = vadd.f32 %v21642_v10, %v12679_v32  ;;  %v12682_v25 = vadd.f32 %v21595_v11, %v12185_v36  ;;  %v12183_v15 = vadd.f32 %v12082_v38, %v11430_v52  ;;  %v22464_v52 = vld [vmem:[#allocation84_spill] sm:$0xff]  ;;  %v22465_v32 = vld [vmem:[#allocation39_spill] sm:$0xff]  ;;  %v22473_v30 = vld [vmem:[#allocation26_spill] sm:$0xff] }
 0x617   : > { %v15363_v19 = vpop.f32.mrf.mxu1  ;;  %v11051_v11 = vadd.f32 %v21575_v13, %v10554_v61  ;;  %v11436_v5 = vadd.f32 %v22457_v49, %v11048_v31  ;;  %v22459_v13 = vld [vmem:[#allocation93_spill] sm:$0xff]  ;;  %v22466_v36 = vld [vmem:[#allocation79_spill] sm:$0xff]  ;;  %v11437_v38 = vadd.f32 %v22467_v45, %v11049_v60 }
 0x618   : > { %12783 = vst [vmem:[%s21664_s2 + $0x50] sm:$0xff] %v12751_v21  ;;  %v12749_v9 = vmax.f32 %v12717_v55, 0.0  ;;  %v12720_v37 = vadd.f32 %v21642_v10, %v12682_v25  ;;  %v12680_v54 = vadd.f32 %v21601_v6, %v12183_v15  ;;  %v12188_v35 = vadd.f32 %v15363_v19, %v11435_v20  ;;  %v22468_v25 = vld [vmem:[#allocation41_spill] sm:$0xff]  ;;  %v22469_v15 = vld [vmem:[#allocation70_spill] sm:$0xff] }
 0x619   : > { %v12095_v44 = vpop.f32.mrf.mxu1  ;;  %v10555_v8 = vadd.f32 %v22459_v13, %v22458_v2  ;;  %v11439_v46 = vadd.f32 %v22463_v47, %v11051_v11  ;;  %v11050_v31 = vadd.f32 %v22466_v36, %v22465_v32  ;;  %v11055_v3 = vadd.f32 %v22469_v15, %v22468_v25  ;;  %v22470_v19 = vld [vmem:[#allocation29_spill] sm:$0xff] }
 0x61a   : > { %12781 = vst [vmem:[%s21664_s2 + $0x40] sm:$0xff] %v12749_v9  ;;  %v12752_v50 = vmax.f32 %v12720_v37, 0.0  ;;  %v12718_v7 = vadd.f32 %v21642_v10, %v12680_v54  ;;  %v12685_v28 = vadd.f32 %v21607_v39, %v12188_v35  ;;  %v12186_v6 = vadd.f32 %v12095_v44, %v11433_v42  ;;  %v21750_v39 = vpop.f32.mrf.mxu0  ;;  %v22471_v35 = vld [vmem:[#allocation40_spill] sm:$0xff]  ;;  %v22472_v11 = vld [vmem:[#allocation73_spill] sm:$0xff] }
 0x61b   : > { %v15364_v18 = vpop.f32.mrf.mxu1  ;;  %v11052_v27 = vadd.f32 %v22462_v24, %v10555_v8  ;;  %v11438_v44 = vadd.f32 %v22473_v30, %v11050_v31  ;;  %v22476_v13 = vld [vmem:[#allocation25_spill] sm:$0xff]  ;;  %v22489_v30 = vld [vmem:[#allocation50_spill] sm:$0xff] }
 0x61c   : > { %12784 = vst [vmem:[%s21664_s2 + $0x58] sm:$0xff] %v12752_v50  ;;  %v12750_v4 = vmax.f32 %v12718_v7, 0.0  ;;  %v12723_v14 = vadd.f32 %v21642_v10, %v12685_v28  ;;  %v12683_v23 = vadd.f32 %v22461_v29, %v12186_v6  ;;  %v12189_v26 = vadd.f32 %v15364_v18, %v11436_v5  ;;  %v21764_v56 = vpop.f32.mrf.mxu0  ;;  %v22474_v28 = vld [vmem:[#allocation30_spill] sm:$0xff]  ;;  %v22475_v6 = vld [vmem:[#allocation75_spill] sm:$0xff]  ;;  %v22478_v29 = vld [vmem:[#allocation76_spill] sm:$0xff] }
 0x61d   : > { %v12098_v63 = vpop.f32.mrf.mxu1  ;;  %v11440_v51 = vadd.f32 %v22470_v19, %v11052_v27  ;;  %v11056_v60 = vadd.f32 %v22475_v6, %v22474_v28  ;;  %v11443_v8 = vadd.f32 %v22476_v13, %v11055_v3  ;;  %v22492_v13 = vld [vmem:[#allocation52_spill] sm:$0xff] }
 0x61e   : > { %12782 = vst [vmem:[%s21664_s2 + $0x48] sm:$0xff] %v12750_v4  ;;  %v12755_v53 = vmax.f32 %v12723_v14, 0.0  ;;  %v12721_v1 = vadd.f32 %v21642_v10, %v12683_v23  ;;  %v12686_v43 = vadd.f32 %v22464_v52, %v12189_v26  ;;  %v12187_v41 = vadd.f32 %v12098_v63, %v11434_v0  ;;  %v15423_v2 = vpop.f32.mrf.mxu0  ;;  %v22477_v14 = vld [vmem:[#allocation23_spill] sm:$0xff]  ;;  %v22481_v52 = vld [vmem:[#allocation77_spill] sm:$0xff] }
 0x61f   : > { %v15367_v48 = vpop.f32.mrf.mxu1  ;;  %v11054_v23 = vadd.f32 %v22478_v29, %v22477_v14  ;;  %v22479_v26 = vld [vmem:[#allocation47_spill] sm:$0xff] }
 0x620   : > { %12787 = vst [vmem:[%s21664_s2 + $0x70] sm:$0xff] %v12755_v53  ;;  %v12753_v12 = vmax.f32 %v12721_v1, 0.0  ;;  %v12724_v20 = vadd.f32 %v21642_v10, %v12686_v43  ;;  %v12684_v21 = vadd.f32 %v21637_v40, %v12187_v41  ;;  %v12192_v55 = vadd.f32 %v15367_v48, %v11439_v46  ;;  %v12640_v53 = vpop.f32.mrf.mxu0  ;;  %v22480_v1 = vld [vmem:[#allocation31_spill] sm:$0xff] }
 0x621   : > { %v12111_v61 = vpop.f32.mrf.mxu1  ;;  %v11053_v40 = vadd.f32 %v22472_v11, %v22471_v35  ;;  %v11059_v43 = vadd.f32 %v22481_v52, %v22480_v1  ;;  %v22482_v41 = vld [vmem:[#allocation51_spill] sm:$0xff] }
 0x622   : > { %12785 = vst [vmem:[%s21664_s2 + $0x60] sm:$0xff] %v12753_v12  ;;  %v12756_v42 = vmax.f32 %v12724_v20, 0.0  ;;  %v12722_v9 = vadd.f32 %v21642_v10, %v12684_v21  ;;  %v12689_v37 = vadd.f32 %v21655_v34, %v12192_v55  ;;  %v12190_v54 = vadd.f32 %v12111_v61, %v11437_v38  ;;  %v22483_v38 = vld [vmem:[#allocation36_spill] sm:$0xff]  ;;  %v22484_v12 = vld [vmem:[#allocation78_spill] sm:$0xff]  ;;  %v22485_v21 = vld [vmem:[#allocation53_spill] sm:$0xff]  ;;  %v15424_v19 = vpop.f32.mrf.mxu0 }
 0x623   : > { %v15368_v33 = vpop.f32.mrf.mxu1  ;;  %v11441_v24 = vadd.f32 %v22479_v26, %v11053_v40  ;;  %v11444_v32 = vadd.f32 %v22482_v41, %v11056_v60  ;;  %v11057_v20 = vadd.f32 %v22484_v12, %v22483_v38  ;;  %v11442_v55 = vadd.f32 %v22485_v21, %v11054_v23  ;;  %v22496_v26 = vld [vmem:[#allocation95_spill] sm:$0xff] }
 0x624   : > { %12788 = vst [vmem:[%s21664_s2 + $0x78] sm:$0xff] %v12756_v42  ;;  %v12754_v49 = vmax.f32 %v12722_v9, 0.0  ;;  %v12727_v5 = vadd.f32 %v21642_v10, %v12689_v37  ;;  %v12687_v50 = vadd.f32 %v21672_v22, %v12190_v54  ;;  %v12193_v7 = vadd.f32 %v15368_v33, %v11440_v51  ;;  %v22486_v51 = vld [vmem:[#allocation32_spill] sm:$0xff]  ;;  %v22488_v37 = vld [vmem:[#allocation54_spill] sm:$0xff]  ;;  %v22499_v41 = vld [vmem:[#allocation83_spill] sm:$0xff] }
 0x625   : > { %v12114_v34 = vpop.f32.mrf.mxu1  ;;  %v22487_v42 = vld [vmem:[#allocation80_spill] sm:$0xff]  ;;  %v11447_v54 = vadd.f32 %v22488_v37, %v11059_v43 }
 0x626   : > { %12786 = vst [vmem:[%s21664_s2 + $0x68] sm:$0xff] %v12754_v49  ;;  %v12759_v18 = vmax.f32 %v12727_v5, 0.0  ;;  %v12725_v57 = vadd.f32 %v21642_v10, %v12687_v50  ;;  %v12690_v0 = vadd.f32 %v21688_v17, %v12193_v7  ;;  %v12191_v4 = vadd.f32 %v12114_v34, %v11438_v44  ;;  %v22490_v44 = vld [vmem:[#allocation81_spill] sm:$0xff]  ;;  %v22491_v5 = vld [vmem:[#allocation58_spill] sm:$0xff]  ;;  %v12643_v34 = vpop.f32.mrf.mxu0 }
 0x627   : > { %v15371_v22 = vpop.f32.mrf.mxu1  ;;  %v11060_v9 = vadd.f32 %v22487_v42, %v22486_v51  ;;  %v11058_v49 = vadd.f32 %v22490_v44, %v22489_v30  ;;  %v11445_v50 = vadd.f32 %v22491_v5, %v11057_v20  ;;  %v22501_v20 = vld [vmem:[#allocation59_spill] sm:$0xff] }
 0x628   : > { %12791 = vst [vmem:[%s21664_s2 + $0x90] sm:$0xff] %v12759_v18  ;;  %v12757_v27 = vmax.f32 %v12725_v57, 0.0  ;;  %v12728_v63 = vadd.f32 %v21642_v10, %v12690_v0  ;;  %v12688_v47 = vadd.f32 %v21704_v62, %v12191_v4  ;;  %v12196_v46 = vadd.f32 %v15371_v22, %v11443_v8  ;;  %v22493_v8 = vld [vmem:[#allocation94_spill] sm:$0xff]  ;;  %v22494_v57 = vld [vmem:[#allocation60_spill] sm:$0xff]  ;;  %v22495_v22 = vld [vmem:[#allocation55_spill] sm:$0xff] }
 0x629   : > { %v12127_v17 = vpop.f32.mrf.mxu1  ;;  %v11063_v18 = vadd.f32 %v22493_v8, %v22492_v13  ;;  %v11448_v0 = vadd.f32 %v22494_v57, %v11060_v9  ;;  %v22503_v9 = vld [vmem:[#allocation74_spill] sm:$0xff] }
 0x62a   : > { %12789 = vst [vmem:[%s21664_s2 + $0x80] sm:$0xff] %v12757_v27  ;;  %v12760_v36 = vmax.f32 %v12728_v63, 0.0  ;;  %v12726_v31 = vadd.f32 %v21642_v10, %v12688_v47  ;;  %v12693_v48 = vadd.f32 %v21720_v58, %v12196_v46  ;;  %v12194_v45 = vadd.f32 %v12127_v17, %v11441_v24  ;;  %v22497_v63 = vld [vmem:[#allocation65_spill] sm:$0xff] }
 0x62b   : > { %v15372_v62 = vpop.f32.mrf.mxu1  ;;  %v11061_v24 = vadd.f32 %v22496_v26, %v22495_v22  ;;  %v11446_v47 = vadd.f32 %v22497_v63, %v11058_v49  ;;  %v22498_v17 = vld [vmem:[#allocation57_spill] sm:$0xff] }
 0x62c   : > { %12792 = vst [vmem:[%s21664_s2 + $0x98] sm:$0xff] %v12760_v36  ;;  %v12758_v25 = vmax.f32 %v12726_v31, 0.0  ;;  %v12731_v15 = vadd.f32 %v21642_v10, %v12693_v48  ;;  %v12691_v3 = vadd.f32 %v21736_v59, %v12194_v45  ;;  %v12197_v61 = vadd.f32 %v15372_v62, %v11444_v32 }
 0x62d   : > { %v12130_v58 = vpop.f32.mrf.mxu1  ;;  %v11064_v32 = vadd.f32 %v22499_v41, %v22498_v17  ;;  %v11062_v62 = vadd.f32 %v21627_v16, %v22501_v20 }
 0x62e   : > { %12790 = vst [vmem:[%s21664_s2 + $0x88] sm:$0xff] %v12758_v25  ;;  %v12763_v35 = vmax.f32 %v12731_v15, 0.0  ;;  %v12729_v11 = vadd.f32 %v21642_v10, %v12691_v3  ;;  %v12694_v40 = vadd.f32 %v21750_v39, %v12197_v61  ;;  %v12195_v33 = vadd.f32 %v12130_v58, %v11442_v55 }
 0x62f   : > { %v15375_v59 = vpop.f32.mrf.mxu1  ;;  %v11452_v58 = vadd.f32 %v22503_v9, %v11064_v32 }
 0x630   : > { %12795 = vst [vmem:[%s21664_s2 + $0xb0] sm:$0xff] %v12763_v35  ;;  %v12761_v7 = vmax.f32 %v12729_v11, 0.0  ;;  %v12732_v28 = vadd.f32 %v21642_v10, %v12694_v40  ;;  %v12692_v6 = vadd.f32 %v21764_v56, %v12195_v33  ;;  %v12200_v60 = vadd.f32 %v15375_v59, %v11447_v54  ;;  %v15427_v56 = vpop.f32.mrf.mxu0  ;;  %v22504_v40 = vld [vmem:[#allocation64_spill] sm:$0xff] }
 0x631   : > { %v12143_v39 = vpop.f32.mrf.mxu1  ;;  %v11450_v33 = vadd.f32 %v22504_v40, %v11062_v62 }
 0x632   : > { %12793 = vst [vmem:[%s21664_s2 + $0xa0] sm:$0xff] %v12761_v7  ;;  %v12764_v4 = vmax.f32 %v12732_v28, 0.0  ;;  %v12730_v14 = vadd.f32 %v21642_v10, %v12692_v6  ;;  %v12697_v29 = vadd.f32 %v15423_v2, %v12200_v60  ;;  %v12198_v23 = vadd.f32 %v12143_v39, %v11445_v50  ;;  %v22500_v2 = vld [vmem:[#allocation67_spill] sm:$0xff]  ;;  %v12656_v21 = vpop.f32.mrf.mxu0 }
 0x633   : > { %v15376_v27 = vpop.f32.mrf.mxu1  ;;  %v11451_v31 = vadd.f32 %v22500_v2, %v11063_v18 }
 0x634   : > { %12796 = vst [vmem:[%s21664_s2 + $0xb8] sm:$0xff] %v12764_v4  ;;  %v12762_v46 = vmax.f32 %v12730_v14, 0.0  ;;  %v12735_v1 = vadd.f32 %v21642_v10, %v12697_v29  ;;  %v12695_v52 = vadd.f32 %v12640_v53, %v12198_v23  ;;  %v12201_v43 = vadd.f32 %v15376_v27, %v11448_v0  ;;  %v22502_v53 = vld [vmem:[#allocation72_spill] sm:$0xff]  ;;  %v15428_v35 = vpop.f32.mrf.mxu0 }
 0x635   : > { %v12146_v36 = vpop.f32.mrf.mxu1  ;;  %v11449_v25 = vadd.f32 %v22502_v53, %v11061_v24 }
 0x636   : > { %12794 = vst [vmem:[%s21664_s2 + $0xa8] sm:$0xff] %v12762_v46  ;;  %v12767_v48 = vmax.f32 %v12735_v1, 0.0  ;;  %v12733_v45 = vadd.f32 %v21642_v10, %v12695_v52  ;;  %v12698_v38 = vadd.f32 %v15424_v19, %v12201_v43  ;;  %v12199_v12 = vadd.f32 %v12146_v36, %v11446_v47  ;;  %v12659_v60 = vpop.f32.mrf.mxu0 }
 0x637   : > { %v15379_v55 = vpop.f32.mrf.mxu1 }
 0x638   : > { %12799 = vst [vmem:[%s21664_s2 + $0xd0] sm:$0xff] %v12767_v48  ;;  %v12765_v15 = vmax.f32 %v12733_v45, 0.0  ;;  %v12736_v3 = vadd.f32 %v21642_v10, %v12698_v38  ;;  %v12696_v61 = vadd.f32 %v12643_v34, %v12199_v12  ;;  %v12204_v51 = vadd.f32 %v15379_v55, %v11451_v31 }
 0x639   : > { %v12159_v42 = vpop.f32.mrf.mxu1 }
 0x63a   : > { %12797 = vst [vmem:[%s21664_s2 + $0xc0] sm:$0xff] %v12765_v15  ;;  %v12768_v19 = vmax.f32 %v12736_v3, 0.0  ;;  %v12734_v37 = vadd.f32 %v21642_v10, %v12696_v61  ;;  %v12701_v16 = vadd.f32 %v15427_v56, %v12204_v51  ;;  %v12202_v54 = vadd.f32 %v12159_v42, %v11449_v25 }
 0x63b   : > { %v15380_v11 = vpop.f32.mrf.mxu1 }
 0x63c   : > { %12800 = vst [vmem:[%s21664_s2 + $0xd8] sm:$0xff] %v12768_v19  ;;  %v12766_v30 = vmax.f32 %v12734_v37, 0.0  ;;  %v12739_v44 = vadd.f32 %v21642_v10, %v12701_v16  ;;  %v12699_v49 = vadd.f32 %v12656_v21, %v12202_v54  ;;  %v12205_v59 = vadd.f32 %v15380_v11, %v11452_v58 }
 0x63d   : > { %v12162_v5 = vpop.f32.mrf.mxu1 }
 0x63e   : > { %12798 = vst [vmem:[%s21664_s2 + $0xc8] sm:$0xff] %v12766_v30  ;;  %v12771_v50 = vmax.f32 %v12739_v44, 0.0  ;;  %v12737_v7 = vadd.f32 %v21642_v10, %v12699_v49  ;;  %v12702_v28 = vadd.f32 %v15428_v35, %v12205_v59  ;;  %v12203_v6 = vadd.f32 %v12162_v5, %v11450_v33 }
 0x640   : > { %12803 = vst [vmem:[%s21664_s2 + $0xf0] sm:$0xff] %v12771_v50  ;;  %v12769_v34 = vmax.f32 %v12737_v7, 0.0  ;;  %v12740_v13 = vadd.f32 %v21642_v10, %v12702_v28  ;;  %v12700_v8 = vadd.f32 %v12659_v60, %v12203_v6 }
 0x642   : > { %12801 = vst [vmem:[%s21664_s2 + $0xe0] sm:$0xff] %v12769_v34  ;;  %v12772_v18 = vmax.f32 %v12740_v13, 0.0  ;;  %v12738_v39 = vadd.f32 %v21642_v10, %v12700_v8 }
 0x644   : > { %12804 = vst [vmem:[%s21664_s2 + $0xf8] sm:$0xff] %v12772_v18  ;;  %v12770_v57 = vmax.f32 %v12738_v39, 0.0 }
 0x646   : > { %12802 = vst [vmem:[%s21664_s2 + $0xe8] sm:$0xff] %v12770_v57 }
 0x647   : > { %16113 = shalt.err (!%p16110_p4)
}
 0x648   : > { %s16114_s18 = scalar_lea.hbm %s21849_s12, 4096  ;;  %s16118_s11 = scalar_lea.hbm %s21902_s6, 8192 }
 0x649   : > { %p16115_p5 = scmp.ne.s32.totalorder %s21849_s12, %s16114_s18  ;;  %p16119_p2 = scmp.lt.s32.totalorder %s21849_s12, %s21902_s6 }
 0x64a   : > { %p16120_p6 = scmp.lt.s32.totalorder %s16118_s11, %s16114_s18 }
 0x64b   : > { %p16116_p7 = pnand %p16115_p5, %p22505_p10 }
 0x64c   : > { %p16121_p12 = por %p16120_p6, %p16119_p2 }
 0x64d   : > { %p16117_p8 = pneg %p16116_p7 }
 0x64f   : > { %p16122_p0 = pnand %p16121_p12, %p16117_p8 }
 0x651   : > { %16125 = shalt.err (!%p16122_p0)
}
 0x652   : > { %s16186_s8 = smov 128   ;;  %s16187_s14 = smov 8  }
 0x653   : > { %15457 = dma.vmem_to_hbm [thread:$0]  (%p22505_p10), %s21851_s20, 4096, %s21849_s12, %s12806_s15, %s16186_s8, %s16186_s8, %s16187_s14  }
 0x654 PF: > { %s12834_s2 = sand.u32 1, %s16164_s21   ;;  %p22506_p3 = scmp.ne.s32.totalorder %s21954_s28, 0 }
 0x655   : > { %p22507_p11 = scmp.ge.s32.totalorder %s16176_s24, 2  ;;  %s12835_s16 = scalar_lea.sflag [#allocation6], %s12834_s2 }
 0x657   : > { %p15474_p9 = pnand %p22507_p11, %p22506_p3 }
 0x659   : > { %p15475_p13 = pneg %p15474_p9 }
 0x65b   : > { %16159 = dma.done.wait (%p15475_p13), %s12835_s16, 4096  }
 0x65c   : > { %16161 = vsyncadd (%p15475_p13), %s12835_s16, 4294963200  ;;  %s22508_s9 = sld [smem:[#allocation18_spill]]  ;;  %p23_p1 = scmp.ge.s32.totalorder %s16301_s19, 4  }
 0x65d   : > { %s22509_s21 = smov %s16168_s22  ;;  %s22510_s22 = smov %s16172_s23 }
 0x65e   : > { %s22512_s24 = smov %s16301_s19  ;;  %25 = sbr.rel (!%p23_p1) target bundleno = 12 (0xc), region = 119 }
 0x662   : > { %s22511_s23 = smov %s22508_s9 }
 0x663   :  { %12840 = vsyncpa [#allocation5], 1 }
 0x664   :  { %12842 = vsyncpa [#allocation5 + $0x1], 1 }
 0x665   :  { %12843 = vsyncpa [#allocation8], 1 }
 0x666   :  { %12845 = vsyncpa [#allocation8 + $0x1], 1 }
 0x667   :  { %12846 = vsyncpa [#allocation11], 1 }
 0x668   :  { %12847 = vsyncpa [#allocation6], 1 }
 0x669   :  { %12849 = vsyncpa [#allocation6 + $0x1], 1 }

</bundles_post_ra>
